<compile_context>
chip_gen: v7x
topology: tpu7x:2x2x1
jax: 0.10.0
libtpu: 0.0.40
codegen_flags: <defaults>
</compile_context>

<pallas_src>
import functools

import jax
import jax.numpy as jnp
from jax import lax
from jax.experimental import pallas as pl
from jax.experimental.pallas import tpu as pltpu


# ----------------------------------------------------------------------------
# Kernel 1: direct 3x3 ('same') conv, bf16 x bf16 -> f32 accumulate,
#           fused per-channel sum / sum-of-squares for BatchNorm statistics.
# Grid = (cout_tiles, N); stats accumulate across the (last, 'arbitrary') batch axis.
# ----------------------------------------------------------------------------
def _conv_stats_kernel(x_ref, w_ref, y_ref, sum_ref, ssq_ref, *, kh, kw, oh, ow, cin):
    @pl.when(pl.program_id(1) == 0)
    def _():
        sum_ref[...] = jnp.zeros_like(sum_ref)
        ssq_ref[...] = jnp.zeros_like(ssq_ref)

    x = x_ref[0]                                   # (Hp, Wp, Cin) bf16
    acc = None
    for i in range(kh):                            # taps fused into the K loop
        for j in range(kw):
            xs = x[i:i + oh, j:j + ow, :]          # (oh, ow, cin)
            ws = w_ref[(i * kw + j) * cin:(i * kw + j + 1) * cin, :]
            d = lax.dot_general(xs, ws, (((2,), (0,)), ((), ())),
                                preferred_element_type=jnp.float32)
            acc = d if acc is None else acc + d

    y_ref[0] = acc.astype(y_ref.dtype)
    sum_ref[...] += jnp.sum(acc, axis=(0, 1))[None, :]
    ssq_ref[...] += jnp.sum(acc * acc, axis=(0, 1))[None, :]


def conv_same_with_stats(x, w_oihw):
    """x: (N,H,W,Cin) bf16;  w: (Cout,Cin,kh,kw) f32 (PyTorch layout).
    Returns conv output (bf16) and per-channel sum / sumsq (f32)."""
    Cout, Cin, kh, kw = w_oihw.shape
    N, H, W, _ = x.shape
    pad = (kh - 1) // 2
    xp = jnp.pad(x, ((0, 0), (pad, pad), (pad, pad), (0, 0)))
    Hp, Wp = H + 2 * pad, W + 2 * pad
    wmat = jnp.transpose(w_oihw, (2, 3, 1, 0)).reshape(kh * kw * Cin, Cout)
    wmat = wmat.astype(jnp.bfloat16)

    tc = 128 if (Cout % 128 == 0) else Cout
    grid = (Cout // tc, N)

    y, s, q = pl.pallas_call(
        functools.partial(_conv_stats_kernel, kh=kh, kw=kw, oh=H, ow=W, cin=Cin),
        out_shape=(jax.ShapeDtypeStruct((N, H, W, Cout), jnp.bfloat16),
                   jax.ShapeDtypeStruct((1, Cout), jnp.float32),
                   jax.ShapeDtypeStruct((1, Cout), jnp.float32)),
        grid_spec=pltpu.PrefetchScalarGridSpec(
            num_scalar_prefetch=0,
            grid=grid,
            in_specs=[
                pl.BlockSpec((1, Hp, Wp, Cin), lambda co, n: (n, 0, 0, 0)),
                pl.BlockSpec((kh * kw * Cin, tc), lambda co, n: (0, co)),
            ],
            out_specs=[
                pl.BlockSpec((1, H, W, tc), lambda co, n: (n, 0, 0, co)),
                pl.BlockSpec((1, tc), lambda co, n: (0, co)),
                pl.BlockSpec((1, tc), lambda co, n: (0, co)),
            ],
        ),
        compiler_params=pltpu.CompilerParams(
            dimension_semantics=("parallel", "arbitrary")),
    )(xp, wmat)
    return y, s, q


# ----------------------------------------------------------------------------
# Kernel 2: ConvTranspose2d(k=4, s=2, p=1) via sub-pixel phase decomposition.
# All four phases (2x2 stride-1 convs of the un-dilated, pad-1 input) are
# computed in one kernel; output channels are lane-dense (4*Cout).
# ----------------------------------------------------------------------------
def _convtrans_phase_kernel(x_ref, w_ref, b_ref, y_ref, *, oh, ow, cin):
    x = x_ref[0]                                   # (oh+2, ow+2, cin) bf16
    b = b_ref[...].astype(jnp.float32)             # (1, cout)
    groups = []
    t = 0
    for r in range(2):
        for s in range(2):
            acc = None
            for dy in range(2):
                for dx in range(2):
                    xs = x[r + dy:r + dy + oh, s + dx:s + dx + ow, :]
                    ws = w_ref[t * cin:(t + 1) * cin, :]
                    t += 1
                    d = lax.dot_general(xs, ws, (((2,), (0,)), ((), ())),
                                        preferred_element_type=jnp.float32)
                    acc = d if acc is None else acc + d
            groups.append(acc + b)
    y_ref[0] = jnp.concatenate(groups, axis=-1).astype(y_ref.dtype)


def conv_transpose_4x4_s2_p1(x, wt, bt):
    """x: (N,H,W,Cin) bf16; wt: (Cin,Cout,4,4) f32 (PyTorch ConvTranspose layout);
    bt: (Cout,) f32.  Returns (N,2H,2W,Cout) bf16."""
    Cin, Cout, kh, kw = wt.shape
    assert kh == 4 and kw == 4, "phase decomposition derived for k=4, s=2, p=1"
    N, H, W, _ = x.shape
    xp = jnp.pad(x, ((0, 0), (1, 1), (1, 1), (0, 0)))

    # Phase (r,s), window-tap (dy,dx) uses transpose-weight index (3-r-2*dy, 3-s-2*dx).
    blocks = []
    for r in range(2):
        for s in range(2):
            for dy in range(2):
                for dx in range(2):
                    blocks.append(wt[:, :, (3 - r) - 2 * dy, (3 - s) - 2 * dx])
    wmat = jnp.concatenate(blocks, axis=0).astype(jnp.bfloat16)     # (16*Cin, Cout)

    y4 = pl.pallas_call(
        functools.partial(_convtrans_phase_kernel, oh=H, ow=W, cin=Cin),
        out_shape=jax.ShapeDtypeStruct((N, H, W, 4 * Cout), jnp.bfloat16),
        grid_spec=pltpu.PrefetchScalarGridSpec(
            num_scalar_prefetch=0,
            grid=(N,),
            in_specs=[
                pl.BlockSpec((1, H + 2, W + 2, Cin), lambda n: (n, 0, 0, 0)),
                pl.BlockSpec((16 * Cin, Cout), lambda n: (0, 0)),
                pl.BlockSpec((1, Cout), lambda n: (0, 0)),
            ],
            out_specs=pl.BlockSpec((1, H, W, 4 * Cout), lambda n: (n, 0, 0, 0)),
        ),
        compiler_params=pltpu.CompilerParams(dimension_semantics=("parallel",)),
    )(xp, wmat, bt.reshape(1, Cout).astype(jnp.float32))

    # Pixel-shuffle interleave: channel group g = r*2 + s  ->  y[:, 2q+r, 2p+s, :]
    y4 = y4.reshape(N, H, W, 2, 2, Cout)
    y = jnp.transpose(y4, (0, 1, 3, 2, 4, 5)).reshape(N, 2 * H, 2 * W, Cout)
    return y


# ----------------------------------------------------------------------------
# Kernel 3: fused BatchNorm apply (scale/shift) + LeakyReLU, tiled over rows
# with a lane-densified (>=128 lane) layout for narrow channel counts.
# ----------------------------------------------------------------------------
def _scale_shift_act_kernel(x_ref, s_ref, t_ref, o_ref, *, neg_slope):
    y = x_ref[...].astype(jnp.float32) * s_ref[...] + t_ref[...]
    o_ref[...] = jnp.where(y >= 0.0, y, neg_slope * y).astype(o_ref.dtype)


def scale_shift_leaky(x, scale, shift, neg_slope=0.2):
    """x: (N,H,W,C) bf16; scale/shift: (C,) f32."""
    N, H, W, C = x.shape
    R = N * H * W
    x2 = x.reshape(R, C)

    # Lane-densify: fold rows into lanes so the output last dim is >= 128.
    f = 1
    if C < 128 and 128 % C == 0 and R % (128 // C) == 0:
        f = 128 // C
    Rw, Cw = R // f, C * f
    x2 = x2.reshape(Rw, Cw)
    sc = jnp.tile(scale.astype(jnp.float32), f).reshape(1, Cw)
    sh = jnp.tile(shift.astype(jnp.float32), f).reshape(1, Cw)

    tr = Rw
    for cand in (512, 256, 128, 64, 32, 16, 8):
        if Rw % cand == 0:
            tr = cand
            break

    out = pl.pallas_call(
        functools.partial(_scale_shift_act_kernel, neg_slope=neg_slope),
        out_shape=jax.ShapeDtypeStruct((Rw, Cw), jnp.bfloat16),
        grid_spec=pltpu.PrefetchScalarGridSpec(
            num_scalar_prefetch=0,
            grid=(Rw // tr,),
            in_specs=[
                pl.BlockSpec((tr, Cw), lambda i: (i, 0)),
                pl.BlockSpec((1, Cw), lambda i: (0, 0)),
                pl.BlockSpec((1, Cw), lambda i: (0, 0)),
            ],
            out_specs=pl.BlockSpec((tr, Cw), lambda i: (i, 0)),
        ),
        compiler_params=pltpu.CompilerParams(dimension_semantics=("parallel",)),
    )(x2, sc, sh)
    return out.reshape(N, H, W, C)


# ----------------------------------------------------------------------------
# Module forward: ConvBlock and Upsample
# ----------------------------------------------------------------------------
def conv_block_forward(x, w, gamma, beta, eps=1e-5):
    """Conv2d(3x3,'same',bias=False) + BatchNorm2d(train stats) + LeakyReLU(0.2)."""
    y, s, q = conv_same_with_stats(x, w)
    N, H, W, C = y.shape
    cnt = float(N * H * W)
    mean = s[0] / cnt
    var = jnp.maximum(q[0] / cnt - mean * mean, 0.0)     # biased var (PyTorch norm)
    scale = gamma * lax.rsqrt(var + eps)
    shift = beta - mean * scale
    return scale_shift_leaky(y, scale, shift, neg_slope=0.2)


def upsample_forward(params, x_nchw):
    """Forward pass of Upsample(in_f, out_f, kernel_size=4, type='convtrans')."""
    x = jnp.transpose(x_nchw, (0, 2, 3, 1)).astype(jnp.bfloat16)     # NCHW -> NHWC
    y = conv_transpose_4x4_s2_p1(x, params["wt"], params["bt"])
    y = conv_block_forward(y, params["w1"], params["g1"], params["b1"])
    y = conv_block_forward(y, params["w2"], params["g2"], params["b2"])
    return jnp.transpose(y.astype(jnp.float32), (0, 3, 1, 2))        # NHWC -> NCHW


# ----------------------------------------------------------------------------
# Demo
# ----------------------------------------------------------------------------
if __name__ == "__main__":
    N, Cin, H, W = 2, 4, 16, 16
    Cout = 8                       # Upsample(in_features=4, out_features=8, k=4, 'convtrans')

    key = jax.random.PRNGKey(0)
    ks = jax.random.split(key, 6)
    x = jax.random.normal(ks[0], (N, Cin, H, W), dtype=jnp.float32)

    params = {
        "wt": 0.1 * jax.random.normal(ks[1], (Cin, Cout, 4, 4), jnp.float32),
        "bt": 0.1 * jax.random.normal(ks[2], (Cout,), jnp.float32),
        "w1": 0.1 * jax.random.normal(ks[3], (Cout, Cout, 3, 3), jnp.float32),
        "g1": jnp.ones((Cout,), jnp.float32),
        "b1": jnp.zeros((Cout,), jnp.float32),
        "w2": 0.1 * jax.random.normal(ks[4], (Cout, Cout, 3, 3), jnp.float32),
        "g2": jnp.ones((Cout,), jnp.float32),
        "b2": jnp.zeros((Cout,), jnp.float32),
    }

    out = jax.jit(upsample_forward)(params, x)
    out = jax.block_until_ready(out)

    assert out.shape == (N, Cout, 2 * H, 2 * W), out.shape
    assert bool(jnp.all(jnp.isfinite(out)))
    print("KERNEL_OK")
</pallas_src>

<mosaic_0001>
module attributes {stable_mosaic.version = 11 : i64} {
  func.func @_convtrans_phase_kernel(%arg0: i32, %arg1: memref<1x18x18x4xbf16, #tpu.memory_space<vmem>>, %arg2: memref<64x8xbf16, #tpu.memory_space<vmem>>, %arg3: memref<1x8xf32, #tpu.memory_space<vmem>>, %arg4: memref<1x16x16x32xbf16, #tpu.memory_space<vmem>>) attributes {dimension_semantics = [#tpu.dimension_semantics<parallel>], iteration_bounds = array<i64: 2>, scalar_prefetch = 0 : i64, scratch_operands = 0 : i64, tpu.core_type = #tpu.core_type<tc>, window_params = [{transform_indices = @transform_0, window_bounds = array<i64: 1, 18, 18, 4>}, {pipeline_mode = #tpu.pipeline_mode<synchronous>, transform_indices = @transform_1, window_bounds = array<i64: 64, 8>}, {pipeline_mode = #tpu.pipeline_mode<synchronous>, transform_indices = @transform_2, window_bounds = array<i64: 1, 8>}, {transform_indices = @transform_3, window_bounds = array<i64: 1, 16, 16, 32>}]} {
    %c0 = arith.constant 0 : index
    %c0_0 = arith.constant 0 : index
    %c0_1 = arith.constant 0 : index
    %c0_2 = arith.constant 0 : index
    %0 = vector.load %arg1[%c0, %c0_0, %c0_1, %c0_2] : memref<1x18x18x4xbf16, #tpu.memory_space<vmem>>, vector<1x18x18x4xbf16>
    %1 = vector.shape_cast %0 : vector<1x18x18x4xbf16> to vector<18x18x4xbf16>
    %c0_3 = arith.constant 0 : index
    %c0_4 = arith.constant 0 : index
    %2 = vector.load %arg3[%c0_3, %c0_4] : memref<1x8xf32, #tpu.memory_space<vmem>>, vector<1x8xf32>
    %3 = vector.extract_strided_slice %1 {offsets = [0, 0, 0], sizes = [16, 16, 4], strides = [1, 1, 1]} : vector<18x18x4xbf16> to vector<16x16x4xbf16>
    %c0_5 = arith.constant 0 : index
    %c0_6 = arith.constant 0 : index
    %4 = vector.load %arg2[%c0_5, %c0_6] : memref<64x8xbf16, #tpu.memory_space<vmem>>, vector<4x8xbf16>
    %cst = arith.constant dense<0.000000e+00> : vector<16x16x8xf32>
    %5 = tpu.matmul %3, %4, %cst {dimension_numbers = #tpu.dot_dimension_numbers<[2], [0], [0, 1], [1], [0, 0, 0, 1, 1, 1], [], []>} : vector<16x16x4xbf16>, vector<4x8xbf16>, vector<16x16x8xf32> -> vector<16x16x8xf32>
    %6 = vector.extract_strided_slice %1 {offsets = [0, 1, 0], sizes = [16, 16, 4], strides = [1, 1, 1]} : vector<18x18x4xbf16> to vector<16x16x4xbf16>
    %c4 = arith.constant 4 : index
    %c0_7 = arith.constant 0 : index
    %7 = vector.load %arg2[%c4, %c0_7] : memref<64x8xbf16, #tpu.memory_space<vmem>>, vector<4x8xbf16>
    %cst_8 = arith.constant dense<0.000000e+00> : vector<16x16x8xf32>
    %8 = tpu.matmul %6, %7, %cst_8 {dimension_numbers = #tpu.dot_dimension_numbers<[2], [0], [0, 1], [1], [0, 0, 0, 1, 1, 1], [], []>} : vector<16x16x4xbf16>, vector<4x8xbf16>, vector<16x16x8xf32> -> vector<16x16x8xf32>
    %9 = arith.addf %5, %8 : vector<16x16x8xf32>
    %10 = vector.extract_strided_slice %1 {offsets = [1, 0, 0], sizes = [16, 16, 4], strides = [1, 1, 1]} : vector<18x18x4xbf16> to vector<16x16x4xbf16>
    %c8 = arith.constant 8 : index
    %c0_9 = arith.constant 0 : index
    %11 = vector.load %arg2[%c8, %c0_9] : memref<64x8xbf16, #tpu.memory_space<vmem>>, vector<4x8xbf16>
    %cst_10 = arith.constant dense<0.000000e+00> : vector<16x16x8xf32>
    %12 = tpu.matmul %10, %11, %cst_10 {dimension_numbers = #tpu.dot_dimension_numbers<[2], [0], [0, 1], [1], [0, 0, 0, 1, 1, 1], [], []>} : vector<16x16x4xbf16>, vector<4x8xbf16>, vector<16x16x8xf32> -> vector<16x16x8xf32>
    %13 = arith.addf %9, %12 : vector<16x16x8xf32>
    %14 = vector.extract_strided_slice %1 {offsets = [1, 1, 0], sizes = [16, 16, 4], strides = [1, 1, 1]} : vector<18x18x4xbf16> to vector<16x16x4xbf16>
    %c12 = arith.constant 12 : index
    %c0_11 = arith.constant 0 : index
    %15 = vector.load %arg2[%c12, %c0_11] : memref<64x8xbf16, #tpu.memory_space<vmem>>, vector<4x8xbf16>
    %cst_12 = arith.constant dense<0.000000e+00> : vector<16x16x8xf32>
    %16 = tpu.matmul %14, %15, %cst_12 {dimension_numbers = #tpu.dot_dimension_numbers<[2], [0], [0, 1], [1], [0, 0, 0, 1, 1, 1], [], []>} : vector<16x16x4xbf16>, vector<4x8xbf16>, vector<16x16x8xf32> -> vector<16x16x8xf32>
    %17 = arith.addf %13, %16 : vector<16x16x8xf32>
    %18 = vector.shape_cast %2 : vector<1x8xf32> to vector<1x1x8xf32>
    %19 = vector.broadcast %18 : vector<1x1x8xf32> to vector<16x16x8xf32>
    %20 = arith.addf %17, %19 : vector<16x16x8xf32>
    %21 = vector.extract_strided_slice %1 {offsets = [0, 1, 0], sizes = [16, 16, 4], strides = [1, 1, 1]} : vector<18x18x4xbf16> to vector<16x16x4xbf16>
    %c16 = arith.constant 16 : index
    %c0_13 = arith.constant 0 : index
    %22 = vector.load %arg2[%c16, %c0_13] : memref<64x8xbf16, #tpu.memory_space<vmem>>, vector<4x8xbf16>
    %cst_14 = arith.constant dense<0.000000e+00> : vector<16x16x8xf32>
    %23 = tpu.matmul %21, %22, %cst_14 {dimension_numbers = #tpu.dot_dimension_numbers<[2], [0], [0, 1], [1], [0, 0, 0, 1, 1, 1], [], []>} : vector<16x16x4xbf16>, vector<4x8xbf16>, vector<16x16x8xf32> -> vector<16x16x8xf32>
    %24 = vector.extract_strided_slice %1 {offsets = [0, 2, 0], sizes = [16, 16, 4], strides = [1, 1, 1]} : vector<18x18x4xbf16> to vector<16x16x4xbf16>
    %c20 = arith.constant 20 : index
    %c0_15 = arith.constant 0 : index
    %25 = vector.load %arg2[%c20, %c0_15] : memref<64x8xbf16, #tpu.memory_space<vmem>>, vector<4x8xbf16>
    %cst_16 = arith.constant dense<0.000000e+00> : vector<16x16x8xf32>
    %26 = tpu.matmul %24, %25, %cst_16 {dimension_numbers = #tpu.dot_dimension_numbers<[2], [0], [0, 1], [1], [0, 0, 0, 1, 1, 1], [], []>} : vector<16x16x4xbf16>, vector<4x8xbf16>, vector<16x16x8xf32> -> vector<16x16x8xf32>
    %27 = arith.addf %23, %26 : vector<16x16x8xf32>
    %28 = vector.extract_strided_slice %1 {offsets = [1, 1, 0], sizes = [16, 16, 4], strides = [1, 1, 1]} : vector<18x18x4xbf16> to vector<16x16x4xbf16>
    %c24 = arith.constant 24 : index
    %c0_17 = arith.constant 0 : index
    %29 = vector.load %arg2[%c24, %c0_17] : memref<64x8xbf16, #tpu.memory_space<vmem>>, vector<4x8xbf16>
    %cst_18 = arith.constant dense<0.000000e+00> : vector<16x16x8xf32>
    %30 = tpu.matmul %28, %29, %cst_18 {dimension_numbers = #tpu.dot_dimension_numbers<[2], [0], [0, 1], [1], [0, 0, 0, 1, 1, 1], [], []>} : vector<16x16x4xbf16>, vector<4x8xbf16>, vector<16x16x8xf32> -> vector<16x16x8xf32>
    %31 = arith.addf %27, %30 : vector<16x16x8xf32>
    %32 = vector.extract_strided_slice %1 {offsets = [1, 2, 0], sizes = [16, 16, 4], strides = [1, 1, 1]} : vector<18x18x4xbf16> to vector<16x16x4xbf16>
    %c28 = arith.constant 28 : index
    %c0_19 = arith.constant 0 : index
    %33 = vector.load %arg2[%c28, %c0_19] : memref<64x8xbf16, #tpu.memory_space<vmem>>, vector<4x8xbf16>
    %cst_20 = arith.constant dense<0.000000e+00> : vector<16x16x8xf32>
    %34 = tpu.matmul %32, %33, %cst_20 {dimension_numbers = #tpu.dot_dimension_numbers<[2], [0], [0, 1], [1], [0, 0, 0, 1, 1, 1], [], []>} : vector<16x16x4xbf16>, vector<4x8xbf16>, vector<16x16x8xf32> -> vector<16x16x8xf32>
    %35 = arith.addf %31, %34 : vector<16x16x8xf32>
    %36 = vector.shape_cast %2 : vector<1x8xf32> to vector<1x1x8xf32>
    %37 = vector.broadcast %36 : vector<1x1x8xf32> to vector<16x16x8xf32>
    %38 = arith.addf %35, %37 : vector<16x16x8xf32>
    %39 = vector.extract_strided_slice %1 {offsets = [1, 0, 0], sizes = [16, 16, 4], strides = [1, 1, 1]} : vector<18x18x4xbf16> to vector<16x16x4xbf16>
    %c32 = arith.constant 32 : index
    %c0_21 = arith.constant 0 : index
    %40 = vector.load %arg2[%c32, %c0_21] : memref<64x8xbf16, #tpu.memory_space<vmem>>, vector<4x8xbf16>
    %cst_22 = arith.constant dense<0.000000e+00> : vector<16x16x8xf32>
    %41 = tpu.matmul %39, %40, %cst_22 {dimension_numbers = #tpu.dot_dimension_numbers<[2], [0], [0, 1], [1], [0, 0, 0, 1, 1, 1], [], []>} : vector<16x16x4xbf16>, vector<4x8xbf16>, vector<16x16x8xf32> -> vector<16x16x8xf32>
    %42 = vector.extract_strided_slice %1 {offsets = [1, 1, 0], sizes = [16, 16, 4], strides = [1, 1, 1]} : vector<18x18x4xbf16> to vector<16x16x4xbf16>
    %c36 = arith.constant 36 : index
    %c0_23 = arith.constant 0 : index
    %43 = vector.load %arg2[%c36, %c0_23] : memref<64x8xbf16, #tpu.memory_space<vmem>>, vector<4x8xbf16>
    %cst_24 = arith.constant dense<0.000000e+00> : vector<16x16x8xf32>
    %44 = tpu.matmul %42, %43, %cst_24 {dimension_numbers = #tpu.dot_dimension_numbers<[2], [0], [0, 1], [1], [0, 0, 0, 1, 1, 1], [], []>} : vector<16x16x4xbf16>, vector<4x8xbf16>, vector<16x16x8xf32> -> vector<16x16x8xf32>
    %45 = arith.addf %41, %44 : vector<16x16x8xf32>
    %46 = vector.extract_strided_slice %1 {offsets = [2, 0, 0], sizes = [16, 16, 4], strides = [1, 1, 1]} : vector<18x18x4xbf16> to vector<16x16x4xbf16>
    %c40 = arith.constant 40 : index
    %c0_25 = arith.constant 0 : index
    %47 = vector.load %arg2[%c40, %c0_25] : memref<64x8xbf16, #tpu.memory_space<vmem>>, vector<4x8xbf16>
    %cst_26 = arith.constant dense<0.000000e+00> : vector<16x16x8xf32>
    %48 = tpu.matmul %46, %47, %cst_26 {dimension_numbers = #tpu.dot_dimension_numbers<[2], [0], [0, 1], [1], [0, 0, 0, 1, 1, 1], [], []>} : vector<16x16x4xbf16>, vector<4x8xbf16>, vector<16x16x8xf32> -> vector<16x16x8xf32>
    %49 = arith.addf %45, %48 : vector<16x16x8xf32>
    %50 = vector.extract_strided_slice %1 {offsets = [2, 1, 0], sizes = [16, 16, 4], strides = [1, 1, 1]} : vector<18x18x4xbf16> to vector<16x16x4xbf16>
    %c44 = arith.constant 44 : index
    %c0_27 = arith.constant 0 : index
    %51 = vector.load %arg2[%c44, %c0_27] : memref<64x8xbf16, #tpu.memory_space<vmem>>, vector<4x8xbf16>
    %cst_28 = arith.constant dense<0.000000e+00> : vector<16x16x8xf32>
    %52 = tpu.matmul %50, %51, %cst_28 {dimension_numbers = #tpu.dot_dimension_numbers<[2], [0], [0, 1], [1], [0, 0, 0, 1, 1, 1], [], []>} : vector<16x16x4xbf16>, vector<4x8xbf16>, vector<16x16x8xf32> -> vector<16x16x8xf32>
    %53 = arith.addf %49, %52 : vector<16x16x8xf32>
    %54 = vector.shape_cast %2 : vector<1x8xf32> to vector<1x1x8xf32>
    %55 = vector.broadcast %54 : vector<1x1x8xf32> to vector<16x16x8xf32>
    %56 = arith.addf %53, %55 : vector<16x16x8xf32>
    %57 = vector.extract_strided_slice %1 {offsets = [1, 1, 0], sizes = [16, 16, 4], strides = [1, 1, 1]} : vector<18x18x4xbf16> to vector<16x16x4xbf16>
    %c48 = arith.constant 48 : index
    %c0_29 = arith.constant 0 : index
    %58 = vector.load %arg2[%c48, %c0_29] : memref<64x8xbf16, #tpu.memory_space<vmem>>, vector<4x8xbf16>
    %cst_30 = arith.constant dense<0.000000e+00> : vector<16x16x8xf32>
    %59 = tpu.matmul %57, %58, %cst_30 {dimension_numbers = #tpu.dot_dimension_numbers<[2], [0], [0, 1], [1], [0, 0, 0, 1, 1, 1], [], []>} : vector<16x16x4xbf16>, vector<4x8xbf16>, vector<16x16x8xf32> -> vector<16x16x8xf32>
    %60 = vector.extract_strided_slice %1 {offsets = [1, 2, 0], sizes = [16, 16, 4], strides = [1, 1, 1]} : vector<18x18x4xbf16> to vector<16x16x4xbf16>
    %c52 = arith.constant 52 : index
    %c0_31 = arith.constant 0 : index
    %61 = vector.load %arg2[%c52, %c0_31] : memref<64x8xbf16, #tpu.memory_space<vmem>>, vector<4x8xbf16>
    %cst_32 = arith.constant dense<0.000000e+00> : vector<16x16x8xf32>
    %62 = tpu.matmul %60, %61, %cst_32 {dimension_numbers = #tpu.dot_dimension_numbers<[2], [0], [0, 1], [1], [0, 0, 0, 1, 1, 1], [], []>} : vector<16x16x4xbf16>, vector<4x8xbf16>, vector<16x16x8xf32> -> vector<16x16x8xf32>
    %63 = arith.addf %59, %62 : vector<16x16x8xf32>
    %64 = vector.extract_strided_slice %1 {offsets = [2, 1, 0], sizes = [16, 16, 4], strides = [1, 1, 1]} : vector<18x18x4xbf16> to vector<16x16x4xbf16>
    %c56 = arith.constant 56 : index
    %c0_33 = arith.constant 0 : index
    %65 = vector.load %arg2[%c56, %c0_33] : memref<64x8xbf16, #tpu.memory_space<vmem>>, vector<4x8xbf16>
    %cst_34 = arith.constant dense<0.000000e+00> : vector<16x16x8xf32>
    %66 = tpu.matmul %64, %65, %cst_34 {dimension_numbers = #tpu.dot_dimension_numbers<[2], [0], [0, 1], [1], [0, 0, 0, 1, 1, 1], [], []>} : vector<16x16x4xbf16>, vector<4x8xbf16>, vector<16x16x8xf32> -> vector<16x16x8xf32>
    %67 = arith.addf %63, %66 : vector<16x16x8xf32>
    %68 = vector.extract_strided_slice %1 {offsets = [2, 2, 0], sizes = [16, 16, 4], strides = [1, 1, 1]} : vector<18x18x4xbf16> to vector<16x16x4xbf16>
    %c60 = arith.constant 60 : index
    %c0_35 = arith.constant 0 : index
    %69 = vector.load %arg2[%c60, %c0_35] : memref<64x8xbf16, #tpu.memory_space<vmem>>, vector<4x8xbf16>
    %cst_36 = arith.constant dense<0.000000e+00> : vector<16x16x8xf32>
    %70 = tpu.matmul %68, %69, %cst_36 {dimension_numbers = #tpu.dot_dimension_numbers<[2], [0], [0, 1], [1], [0, 0, 0, 1, 1, 1], [], []>} : vector<16x16x4xbf16>, vector<4x8xbf16>, vector<16x16x8xf32> -> vector<16x16x8xf32>
    %71 = arith.addf %67, %70 : vector<16x16x8xf32>
    %72 = vector.shape_cast %2 : vector<1x8xf32> to vector<1x1x8xf32>
    %73 = vector.broadcast %72 : vector<1x1x8xf32> to vector<16x16x8xf32>
    %74 = arith.addf %71, %73 : vector<16x16x8xf32>
    %75 = tpu.concatenate %20, %38, %56, %74 in 2 : vector<16x16x8xf32>, vector<16x16x8xf32>, vector<16x16x8xf32>, vector<16x16x8xf32> -> vector<16x16x32xf32>
    %76 = arith.truncf %75 : vector<16x16x32xf32> to vector<16x16x32xbf16>
    %c0_37 = arith.constant 0 : index
    %c0_38 = arith.constant 0 : index
    %c0_39 = arith.constant 0 : index
    %c0_40 = arith.constant 0 : index
    %77 = vector.load %arg4[%c0_37, %c0_38, %c0_39, %c0_40] : memref<1x16x16x32xbf16, #tpu.memory_space<vmem>>, vector<1x16x16x32xbf16>
    %78 = vector.shape_cast %77 : vector<1x16x16x32xbf16> to vector<16x16x32xbf16>
    %79 = vector.shape_cast %76 : vector<16x16x32xbf16> to vector<1x16x16x32xbf16>
    tpu.vector_store %arg4[%c0_37, %c0_38, %c0_39, %c0_40], %79 {strides = array<i32>} : memref<1x16x16x32xbf16, #tpu.memory_space<vmem>>, vector<1x16x16x32xbf16>,
    return
  }
  func.func @transform_0(%arg0: i32) -> (i32, i32, i32, i32) {
    %c0_i32 = arith.constant 0 : i32
    %c0_i32_0 = arith.constant 0 : i32
    %c0_i32_1 = arith.constant 0 : i32
    %c0_i32_2 = arith.constant 0 : i32
    return %arg0, %c0_i32, %c0_i32_0, %c0_i32_1 : i32, i32, i32, i32
  }
  func.func @transform_1(%arg0: i32) -> (i32, i32) {
    %c0_i32 = arith.constant 0 : i32
    %c0_i32_0 = arith.constant 0 : i32
    %c0_i32_1 = arith.constant 0 : i32
    return %c0_i32, %c0_i32_0 : i32, i32
  }
  func.func @transform_2(%arg0: i32) -> (i32, i32) {
    %c0_i32 = arith.constant 0 : i32
    %c0_i32_0 = arith.constant 0 : i32
    %c0_i32_1 = arith.constant 0 : i32
    return %c0_i32, %c0_i32_0 : i32, i32
  }
  func.func @transform_3(%arg0: i32) -> (i32, i32, i32, i32) {
    %c0_i32 = arith.constant 0 : i32
    %c0_i32_0 = arith.constant 0 : i32
    %c0_i32_1 = arith.constant 0 : i32
    %c0_i32_2 = arith.constant 0 : i32
    return %arg0, %c0_i32, %c0_i32_0, %c0_i32_1 : i32, i32, i32, i32
  }
}

module attributes {stable_mosaic.version = 11 : i64} {
  func.func @_conv_stats_kernel(%arg0: i32, %arg1: i32, %arg2: memref<1x34x34x8xbf16, #tpu.memory_space<vmem>>, %arg3: memref<72x8xbf16, #tpu.memory_space<vmem>>, %arg4: memref<1x32x32x8xbf16, #tpu.memory_space<vmem>>, %arg5: memref<1x8xf32, #tpu.memory_space<vmem>>, %arg6: memref<1x8xf32, #tpu.memory_space<vmem>>) attributes {dimension_semantics = [#tpu.dimension_semantics<parallel>, #tpu.dimension_semantics<arbitrary>], iteration_bounds = array<i64: 1, 2>, scalar_prefetch = 0 : i64, scratch_operands = 0 : i64, tpu.core_type = #tpu.core_type<tc>, window_params = [{transform_indices = @transform_0, window_bounds = array<i64: 1, 34, 34, 8>}, {transform_indices = @transform_1, window_bounds = array<i64: 72, 8>}, {transform_indices = @transform_2, window_bounds = array<i64: 1, 32, 32, 8>}, {transform_indices = @transform_3, window_bounds = array<i64: 1, 8>}, {transform_indices = @transform_4, window_bounds = array<i64: 1, 8>}]} {
    %c0_i32 = arith.constant 0 : i32
    %0 = arith.cmpi eq, %arg1, %c0_i32 : i32
    %1 = arith.extui %0 : i1 to i32
    %c0_i32_0 = arith.constant 0 : i32
    %2 = arith.cmpi ne, %1, %c0_i32_0 : i32
    scf.if %2 {
      %cst_36 = arith.constant 0.000000e+00 : f32
      %55 = vector.broadcast %cst_36 : f32 to vector<1x8xf32>
      %c0_37 = arith.constant 0 : index
      %c0_38 = arith.constant 0 : index
      %56 = vector.load %arg5[%c0_37, %c0_38] : memref<1x8xf32, #tpu.memory_space<vmem>>, vector<1x8xf32>
      tpu.vector_store %arg5[%c0_37, %c0_38], %55 {strides = array<i32>} : memref<1x8xf32, #tpu.memory_space<vmem>>, vector<1x8xf32>,
      %cst_39 = arith.constant 0.000000e+00 : f32
      %57 = vector.broadcast %cst_39 : f32 to vector<1x8xf32>
      %c0_40 = arith.constant 0 : index
      %c0_41 = arith.constant 0 : index
      %58 = vector.load %arg6[%c0_40, %c0_41] : memref<1x8xf32, #tpu.memory_space<vmem>>, vector<1x8xf32>
      tpu.vector_store %arg6[%c0_40, %c0_41], %57 {strides = array<i32>} : memref<1x8xf32, #tpu.memory_space<vmem>>, vector<1x8xf32>,
    } else {
    }
    %c0 = arith.constant 0 : index
    %c0_1 = arith.constant 0 : index
    %c0_2 = arith.constant 0 : index
    %c0_3 = arith.constant 0 : index
    %3 = vector.load %arg2[%c0, %c0_1, %c0_2, %c0_3] : memref<1x34x34x8xbf16, #tpu.memory_space<vmem>>, vector<1x34x34x8xbf16>
    %4 = vector.shape_cast %3 : vector<1x34x34x8xbf16> to vector<34x34x8xbf16>
    %5 = vector.extract_strided_slice %4 {offsets = [0, 0, 0], sizes = [32, 32, 8], strides = [1, 1, 1]} : vector<34x34x8xbf16> to vector<32x32x8xbf16>
    %c0_4 = arith.constant 0 : index
    %c0_5 = arith.constant 0 : index
    %6 = vector.load %arg3[%c0_4, %c0_5] : memref<72x8xbf16, #tpu.memory_space<vmem>>, vector<8x8xbf16>
    %cst = arith.constant dense<0.000000e+00> : vector<32x32x8xf32>
    %7 = tpu.matmul %5, %6, %cst {dimension_numbers = #tpu.dot_dimension_numbers<[2], [0], [0, 1], [1], [0, 0, 0, 1, 1, 1], [], []>} : vector<32x32x8xbf16>, vector<8x8xbf16>, vector<32x32x8xf32> -> vector<32x32x8xf32>
    %8 = vector.extract_strided_slice %4 {offsets = [0, 1, 0], sizes = [32, 32, 8], strides = [1, 1, 1]} : vector<34x34x8xbf16> to vector<32x32x8xbf16>
    %c8 = arith.constant 8 : index
    %c0_6 = arith.constant 0 : index
    %9 = vector.load %arg3[%c8, %c0_6] : memref<72x8xbf16, #tpu.memory_space<vmem>>, vector<8x8xbf16>
    %cst_7 = arith.constant dense<0.000000e+00> : vector<32x32x8xf32>
    %10 = tpu.matmul %8, %9, %cst_7 {dimension_numbers = #tpu.dot_dimension_numbers<[2], [0], [0, 1], [1], [0, 0, 0, 1, 1, 1], [], []>} : vector<32x32x8xbf16>, vector<8x8xbf16>, vector<32x32x8xf32> -> vector<32x32x8xf32>
    %11 = arith.addf %7, %10 : vector<32x32x8xf32>
    %12 = vector.extract_strided_slice %4 {offsets = [0, 2, 0], sizes = [32, 32, 8], strides = [1, 1, 1]} : vector<34x34x8xbf16> to vector<32x32x8xbf16>
    %c16 = arith.constant 16 : index
    %c0_8 = arith.constant 0 : index
    %13 = vector.load %arg3[%c16, %c0_8] : memref<72x8xbf16, #tpu.memory_space<vmem>>, vector<8x8xbf16>
    %cst_9 = arith.constant dense<0.000000e+00> : vector<32x32x8xf32>
    %14 = tpu.matmul %12, %13, %cst_9 {dimension_numbers = #tpu.dot_dimension_numbers<[2], [0], [0, 1], [1], [0, 0, 0, 1, 1, 1], [], []>} : vector<32x32x8xbf16>, vector<8x8xbf16>, vector<32x32x8xf32> -> vector<32x32x8xf32>
    %15 = arith.addf %11, %14 : vector<32x32x8xf32>
    %16 = vector.extract_strided_slice %4 {offsets = [1, 0, 0], sizes = [32, 32, 8], strides = [1, 1, 1]} : vector<34x34x8xbf16> to vector<32x32x8xbf16>
    %c24 = arith.constant 24 : index
    %c0_10 = arith.constant 0 : index
    %17 = vector.load %arg3[%c24, %c0_10] : memref<72x8xbf16, #tpu.memory_space<vmem>>, vector<8x8xbf16>
    %cst_11 = arith.constant dense<0.000000e+00> : vector<32x32x8xf32>
    %18 = tpu.matmul %16, %17, %cst_11 {dimension_numbers = #tpu.dot_dimension_numbers<[2], [0], [0, 1], [1], [0, 0, 0, 1, 1, 1], [], []>} : vector<32x32x8xbf16>, vector<8x8xbf16>, vector<32x32x8xf32> -> vector<32x32x8xf32>
    %19 = arith.addf %15, %18 : vector<32x32x8xf32>
    %20 = vector.extract_strided_slice %4 {offsets = [1, 1, 0], sizes = [32, 32, 8], strides = [1, 1, 1]} : vector<34x34x8xbf16> to vector<32x32x8xbf16>
    %c32 = arith.constant 32 : index
    %c0_12 = arith.constant 0 : index
    %21 = vector.load %arg3[%c32, %c0_12] : memref<72x8xbf16, #tpu.memory_space<vmem>>, vector<8x8xbf16>
    %cst_13 = arith.constant dense<0.000000e+00> : vector<32x32x8xf32>
    %22 = tpu.matmul %20, %21, %cst_13 {dimension_numbers = #tpu.dot_dimension_numbers<[2], [0], [0, 1], [1], [0, 0, 0, 1, 1, 1], [], []>} : vector<32x32x8xbf16>, vector<8x8xbf16>, vector<32x32x8xf32> -> vector<32x32x8xf32>
    %23 = arith.addf %19, %22 : vector<32x32x8xf32>
    %24 = vector.extract_strided_slice %4 {offsets = [1, 2, 0], sizes = [32, 32, 8], strides = [1, 1, 1]} : vector<34x34x8xbf16> to vector<32x32x8xbf16>
    %c40 = arith.constant 40 : index
    %c0_14 = arith.constant 0 : index
    %25 = vector.load %arg3[%c40, %c0_14] : memref<72x8xbf16, #tpu.memory_space<vmem>>, vector<8x8xbf16>
    %cst_15 = arith.constant dense<0.000000e+00> : vector<32x32x8xf32>
    %26 = tpu.matmul %24, %25, %cst_15 {dimension_numbers = #tpu.dot_dimension_numbers<[2], [0], [0, 1], [1], [0, 0, 0, 1, 1, 1], [], []>} : vector<32x32x8xbf16>, vector<8x8xbf16>, vector<32x32x8xf32> -> vector<32x32x8xf32>
    %27 = arith.addf %23, %26 : vector<32x32x8xf32>
    %28 = vector.extract_strided_slice %4 {offsets = [2, 0, 0], sizes = [32, 32, 8], strides = [1, 1, 1]} : vector<34x34x8xbf16> to vector<32x32x8xbf16>
    %c48 = arith.constant 48 : index
    %c0_16 = arith.constant 0 : index
    %29 = vector.load %arg3[%c48, %c0_16] : memref<72x8xbf16, #tpu.memory_space<vmem>>, vector<8x8xbf16>
    %cst_17 = arith.constant dense<0.000000e+00> : vector<32x32x8xf32>
    %30 = tpu.matmul %28, %29, %cst_17 {dimension_numbers = #tpu.dot_dimension_numbers<[2], [0], [0, 1], [1], [0, 0, 0, 1, 1, 1], [], []>} : vector<32x32x8xbf16>, vector<8x8xbf16>, vector<32x32x8xf32> -> vector<32x32x8xf32>
    %31 = arith.addf %27, %30 : vector<32x32x8xf32>
    %32 = vector.extract_strided_slice %4 {offsets = [2, 1, 0], sizes = [32, 32, 8], strides = [1, 1, 1]} : vector<34x34x8xbf16> to vector<32x32x8xbf16>
    %c56 = arith.constant 56 : index
    %c0_18 = arith.constant 0 : index
    %33 = vector.load %arg3[%c56, %c0_18] : memref<72x8xbf16, #tpu.memory_space<vmem>>, vector<8x8xbf16>
    %cst_19 = arith.constant dense<0.000000e+00> : vector<32x32x8xf32>
    %34 = tpu.matmul %32, %33, %cst_19 {dimension_numbers = #tpu.dot_dimension_numbers<[2], [0], [0, 1], [1], [0, 0, 0, 1, 1, 1], [], []>} : vector<32x32x8xbf16>, vector<8x8xbf16>, vector<32x32x8xf32> -> vector<32x32x8xf32>
    %35 = arith.addf %31, %34 : vector<32x32x8xf32>
    %36 = vector.extract_strided_slice %4 {offsets = [2, 2, 0], sizes = [32, 32, 8], strides = [1, 1, 1]} : vector<34x34x8xbf16> to vector<32x32x8xbf16>
    %c64 = arith.constant 64 : index
    %c0_20 = arith.constant 0 : index
    %37 = vector.load %arg3[%c64, %c0_20] : memref<72x8xbf16, #tpu.memory_space<vmem>>, vector<8x8xbf16>
    %cst_21 = arith.constant dense<0.000000e+00> : vector<32x32x8xf32>
    %38 = tpu.matmul %36, %37, %cst_21 {dimension_numbers = #tpu.dot_dimension_numbers<[2], [0], [0, 1], [1], [0, 0, 0, 1, 1, 1], [], []>} : vector<32x32x8xbf16>, vector<8x8xbf16>, vector<32x32x8xf32> -> vector<32x32x8xf32>
    %39 = arith.addf %35, %38 : vector<32x32x8xf32>
    %40 = arith.truncf %39 : vector<32x32x8xf32> to vector<32x32x8xbf16>
    %c0_22 = arith.constant 0 : index
    %c0_23 = arith.constant 0 : index
    %c0_24 = arith.constant 0 : index
    %c0_25 = arith.constant 0 : index
    %41 = vector.load %arg4[%c0_22, %c0_23, %c0_24, %c0_25] : memref<1x32x32x8xbf16, #tpu.memory_space<vmem>>, vector<1x32x32x8xbf16>
    %42 = vector.shape_cast %41 : vector<1x32x32x8xbf16> to vector<32x32x8xbf16>
    %43 = vector.shape_cast %40 : vector<32x32x8xbf16> to vector<1x32x32x8xbf16>
    tpu.vector_store %arg4[%c0_22, %c0_23, %c0_24, %c0_25], %43 {strides = array<i32>} : memref<1x32x32x8xbf16, #tpu.memory_space<vmem>>, vector<1x32x32x8xbf16>,
    %c0_26 = arith.constant 0 : index
    %c0_27 = arith.constant 0 : index
    %44 = vector.load %arg5[%c0_26, %c0_27] : memref<1x8xf32, #tpu.memory_space<vmem>>, vector<1x8xf32>
    %cst_28 = arith.constant dense<0.000000e+00> : vector<8xf32>
    %45 = vector.multi_reduction <add>, %39, %cst_28 [0, 1] : vector<32x32x8xf32> to vector<8xf32>
    %46 = vector.shape_cast %45 : vector<8xf32> to vector<1x8xf32>
    %47 = arith.addf %44, %46 : vector<1x8xf32>
    %c0_29 = arith.constant 0 : index
    %c0_30 = arith.constant 0 : index
    %48 = vector.load %arg5[%c0_29, %c0_30] : memref<1x8xf32, #tpu.memory_space<vmem>>, vector<1x8xf32>
    tpu.vector_store %arg5[%c0_29, %c0_30], %47 {strides = array<i32>} : memref<1x8xf32, #tpu.memory_space<vmem>>, vector<1x8xf32>,
    %c0_31 = arith.constant 0 : index
    %c0_32 = arith.constant 0 : index
    %49 = vector.load %arg6[%c0_31, %c0_32] : memref<1x8xf32, #tpu.memory_space<vmem>>, vector<1x8xf32>
    %50 = arith.mulf %39, %39 : vector<32x32x8xf32>
    %cst_33 = arith.constant dense<0.000000e+00> : vector<8xf32>
    %51 = vector.multi_reduction <add>, %50, %cst_33 [0, 1] : vector<32x32x8xf32> to vector<8xf32>
    %52 = vector.shape_cast %51 : vector<8xf32> to vector<1x8xf32>
    %53 = arith.addf %49, %52 : vector<1x8xf32>
    %c0_34 = arith.constant 0 : index
    %c0_35 = arith.constant 0 : index
    %54 = vector.load %arg6[%c0_34, %c0_35] : memref<1x8xf32, #tpu.memory_space<vmem>>, vector<1x8xf32>
    tpu.vector_store %arg6[%c0_34, %c0_35], %53 {strides = array<i32>} : memref<1x8xf32, #tpu.memory_space<vmem>>, vector<1x8xf32>,
    return
  }
  func.func @transform_0(%arg0: i32, %arg1: i32) -> (i32, i32, i32, i32) {
    %c0_i32 = arith.constant 0 : i32
    %c0_i32_0 = arith.constant 0 : i32
    %c0_i32_1 = arith.constant 0 : i32
    %c0_i32_2 = arith.constant 0 : i32
    return %arg1, %c0_i32, %c0_i32_0, %c0_i32_1 : i32, i32, i32, i32
  }
  func.func @transform_1(%arg0: i32, %arg1: i32) -> (i32, i32) {
    %c0_i32 = arith.constant 0 : i32
    %c0_i32_0 = arith.constant 0 : i32
    return %c0_i32, %arg0 : i32, i32
  }
  func.func @transform_2(%arg0: i32, %arg1: i32) -> (i32, i32, i32, i32) {
    %c0_i32 = arith.constant 0 : i32
    %c0_i32_0 = arith.constant 0 : i32
    %c0_i32_1 = arith.constant 0 : i32
    return %arg1, %c0_i32, %c0_i32_0, %arg0 : i32, i32, i32, i32
  }
  func.func @transform_3(%arg0: i32, %arg1: i32) -> (i32, i32) {
    %c0_i32 = arith.constant 0 : i32
    %c0_i32_0 = arith.constant 0 : i32
    return %c0_i32, %arg0 : i32, i32
  }
  func.func @transform_4(%arg0: i32, %arg1: i32) -> (i32, i32) {
    %c0_i32 = arith.constant 0 : i32
    %c0_i32_0 = arith.constant 0 : i32
    return %c0_i32, %arg0 : i32, i32
  }
}

module attributes {stable_mosaic.version = 11 : i64} {
  func.func @_scale_shift_act_kernel(%arg0: i32, %arg1: memref<128x128xbf16, #tpu.memory_space<vmem>>, %arg2: memref<1x128xf32, #tpu.memory_space<vmem>>, %arg3: memref<1x128xf32, #tpu.memory_space<vmem>>, %arg4: memref<128x128xbf16, #tpu.memory_space<vmem>>) attributes {dimension_semantics = [#tpu.dimension_semantics<parallel>], iteration_bounds = array<i64: 1>, scalar_prefetch = 0 : i64, scratch_operands = 0 : i64, tpu.core_type = #tpu.core_type<tc>, window_params = [{transform_indices = @transform_0, window_bounds = array<i64: 128, 128>}, {pipeline_mode = #tpu.pipeline_mode<synchronous>, transform_indices = @transform_1, window_bounds = array<i64: 1, 128>}, {pipeline_mode = #tpu.pipeline_mode<synchronous>, transform_indices = @transform_2, window_bounds = array<i64: 1, 128>}, {transform_indices = @transform_3, window_bounds = array<i64: 128, 128>}]} {
    %c0 = arith.constant 0 : index
    %c0_0 = arith.constant 0 : index
    %0 = vector.load %arg1[%c0, %c0_0] : memref<128x128xbf16, #tpu.memory_space<vmem>>, vector<128x128xbf16>
    %1 = arith.extf %0 : vector<128x128xbf16> to vector<128x128xf32>
    %c0_1 = arith.constant 0 : index
    %c0_2 = arith.constant 0 : index
    %2 = vector.load %arg2[%c0_1, %c0_2] : memref<1x128xf32, #tpu.memory_space<vmem>>, vector<1x128xf32>
    %3 = vector.broadcast %2 : vector<1x128xf32> to vector<128x128xf32>
    %4 = arith.mulf %1, %3 : vector<128x128xf32>
    %c0_3 = arith.constant 0 : index
    %c0_4 = arith.constant 0 : index
    %5 = vector.load %arg3[%c0_3, %c0_4] : memref<1x128xf32, #tpu.memory_space<vmem>>, vector<1x128xf32>
    %6 = vector.broadcast %5 : vector<1x128xf32> to vector<128x128xf32>
    %7 = arith.addf %4, %6 : vector<128x128xf32>
    %cst = arith.constant 0.000000e+00 : f32
    %8 = vector.broadcast %cst : f32 to vector<128x128xf32>
    %9 = arith.cmpf oge, %7, %8 : vector<128x128xf32>
    %cst_5 = arith.constant 2.000000e-01 : f32
    %10 = vector.broadcast %cst_5 : f32 to vector<128x128xf32>
    %11 = arith.mulf %10, %7 : vector<128x128xf32>
    %12 = arith.select %9, %7, %11 : vector<128x128xi1>, vector<128x128xf32>
    %13 = arith.truncf %12 : vector<128x128xf32> to vector<128x128xbf16>
    %c0_6 = arith.constant 0 : index
    %c0_7 = arith.constant 0 : index
    %14 = vector.load %arg4[%c0_6, %c0_7] : memref<128x128xbf16, #tpu.memory_space<vmem>>, vector<128x128xbf16>
    tpu.vector_store %arg4[%c0_6, %c0_7], %13 {strides = array<i32>} : memref<128x128xbf16, #tpu.memory_space<vmem>>, vector<128x128xbf16>,
    return
  }
  func.func @transform_0(%arg0: i32) -> (i32, i32) {
    %c0_i32 = arith.constant 0 : i32
    %c0_i32_0 = arith.constant 0 : i32
    return %arg0, %c0_i32 : i32, i32
  }
  func.func @transform_1(%arg0: i32) -> (i32, i32) {
    %c0_i32 = arith.constant 0 : i32
    %c0_i32_0 = arith.constant 0 : i32
    %c0_i32_1 = arith.constant 0 : i32
    return %c0_i32, %c0_i32_0 : i32, i32
  }
  func.func @transform_2(%arg0: i32) -> (i32, i32) {
    %c0_i32 = arith.constant 0 : i32
    %c0_i32_0 = arith.constant 0 : i32
    %c0_i32_1 = arith.constant 0 : i32
    return %c0_i32, %c0_i32_0 : i32, i32
  }
  func.func @transform_3(%arg0: i32) -> (i32, i32) {
    %c0_i32 = arith.constant 0 : i32
    %c0_i32_0 = arith.constant 0 : i32
    return %arg0, %c0_i32 : i32, i32
  }
}

</mosaic_0001>

<bundles_post_ra>
// kernel: tile.28
= control target key start
LH: loop header
LB: loop body
LE: loop exit
PB: predicated region body
PF: predicated region fallthrough
CT: control target
= control target key end

     0   :  { %s28_s0 = inlined_call_operand.vmem [shape: f32[8], index: 0, kind: input, shape index: {}]   ;;  %s29_s1 = inlined_call_operand.vmem [shape: f32[16,8], index: 1, kind: output, shape index: {}]  }
   0x1   :  { %v4_v0 = vld [vmem:[%s28_s0] ss:$0 sm:$0xff] }
   0x2   :  { %5 = vst [vmem:[%s29_s1] sm:$0xff] %v4_v0  ;;  %8 = vst [vmem:[%s29_s1 + $0x8] sm:$0xff] %v4_v0 }

// kernel: tile.29
= control target key start
LH: loop header
LB: loop body
LE: loop exit
PB: predicated region body
PF: predicated region fallthrough
CT: control target
= control target key end

     0   :  { %s131_s10 = smov 120   ;;  %s132_s11 = smov 104   ;;  %vm3_vm0 = vcmask 64512   ;;  %vm9_vm1 = vcmask 1048512   ;;  %vm15_vm2 = vcmask 982912   ;;  %vm21_vm3 = vcmask 917312   ;;  %s207_s0 = inlined_call_operand.vmem [shape: f32[16,8], index: 0, kind: input, shape index: {}]   ;;  %s208_s1 = inlined_call_operand.vmem [shape: f32[1,128], index: 1, kind: output, shape index: {}]  }
   0x1   :  { %v101_v0 = vld [vmem:[%s207_s0 + $0xf] sm:$0x1]   ;;  %v103_v1 = vld [vmem:[%s207_s0 + $0xd] sm:$0x1]   ;;  %v102_v2 = vld [vmem:[%s207_s0 + $0xe] sm:$0x1]  }
   0x2   :  { %7 = vrot.lane.b32.xlu0 %v101_v0, %s131_s10  ;;  %19 = vrot.lane.b32.xlu1 %v103_v1, %s132_s11  ;;  %v104_v3 = vld [vmem:[%s207_s0 + $0xc] sm:$0x1]   ;;  %s133_s16 = smov 112   ;;  %s134_s17 = smov 96   ;;  %v105_v4 = vld [vmem:[%s207_s0 + $0xb] sm:$0x1]  }
   0x3   :  { %v106_v5 = vld [vmem:[%s207_s0 + $0xa] sm:$0x1]   ;;  %v2_v6 = vld [vmem:[%s207_s0] sm:$0x1]   ;;  %s135_s24 = smov 88   ;;  %s136_s25 = smov 80  }
   0x4   :  { %4 = vst.msk [vmem:[#allocation0] sm:$0x1] %vm3_vm0, %v2_v6   ;;  %v107_v7 = vld [vmem:[%s207_s0 + $0x9] sm:$0x1]   ;;  %v108_v8 = vld [vmem:[%s207_s0 + $0x8] sm:$0x1]  }
   0x5   :  { %s137_s30 = smov 72   ;;  %s138_s2 = smov 64   ;;  %v109_v9 = vld [vmem:[%s207_s0 + $0x7] sm:$0x1]   ;;  %v110_v10 = vld [vmem:[%s207_s0 + $0x6] sm:$0x1]  }
   0x6   :  { %13 = vrot.lane.b32.xlu0 %v102_v2, %s133_s16  ;;  %25 = vrot.lane.b32.xlu1 %v104_v3, %s134_s17  ;;  %s139_s7 = smov 56   ;;  %s140_s8 = smov 48   ;;  %v111_v11 = vld [vmem:[%s207_s0 + $0x5] sm:$0x1]   ;;  %v112_v12 = vld [vmem:[%s207_s0 + $0x4] sm:$0x1]  }
   0x7   :  { %s141_s13 = smov 40   ;;  %s142_s14 = smov 32   ;;  %v113_v13 = vld [vmem:[%s207_s0 + $0x3] sm:$0x1]   ;;  %v114_v14 = vld [vmem:[%s207_s0 + $0x2] sm:$0x1]  }
   0x8   :  { %s143_s19 = smov 24   ;;  %s144_s20 = smov 16   ;;  %v115_v15 = vld [vmem:[%s207_s0 + $0x1] sm:$0x1]   ;;  %vm27_vm4 = vcmask 851712   ;;  %vm33_vm5 = vcmask 786112  }
   0x9   :  { %s145_s0 = smov 8   ;;  %vm39_vm6 = vcmask 720512   ;;  %vm45_vm7 = vcmask 654912   ;;  %vm51_vm8 = vcmask 589312   ;;  %vm57_vm9 = vcmask 523712  }
   0xa   :  { %31 = vrot.lane.b32.xlu0 %v105_v4, %s135_s24  ;;  %37 = vrot.lane.b32.xlu1 %v106_v5, %s136_s25  ;;  %vm63_vm10 = vcmask 458112   ;;  %vm69_vm11 = vcmask 392512   ;;  %vm75_vm12 = vcmask 326912   ;;  %vm81_vm13 = vcmask 261312  }
   0xb   :  { %vm87_vm14 = vcmask 195712   ;;  %vm93_vm15 = vcmask 130112  }
   0xe   :  { %43 = vrot.lane.b32.xlu0 %v107_v7, %s137_s30  ;;  %49 = vrot.lane.b32.xlu1 %v108_v8, %s138_s2 }
  0x12   :  { %55 = vrot.lane.b32.xlu0 %v109_v9, %s139_s7  ;;  %61 = vrot.lane.b32.xlu1 %v110_v10, %s140_s8 }
  0x16   :  { %67 = vrot.lane.b32.xlu0 %v111_v11, %s141_s13  ;;  %73 = vrot.lane.b32.xlu1 %v112_v12, %s142_s14 }
  0x1a   :  { %79 = vrot.lane.b32.xlu0 %v113_v13, %s143_s19  ;;  %85 = vrot.lane.b32.xlu1 %v114_v14, %s144_s20 }
  0x1e   :  { %91 = vrot.lane.b32.xlu0 %v115_v15, %s145_s0 }
  0x74   :  { %v8_v16 = vpop.permute.xlu0 %7   ;;  %v20_v17 = vpop.permute.xlu1 %19  }
  0x75   :  { %10 = vst.msk [vmem:[#allocation0] sm:$0x1] %vm9_vm1, %v8_v16  }
  0x78   :  { %v14_v18 = vpop.permute.xlu0 %13   ;;  %v26_v19 = vpop.permute.xlu1 %25  }
  0x79   :  { %16 = vst.msk [vmem:[#allocation0] sm:$0x1] %vm15_vm2, %v14_v18  }
  0x7a   :  { %22 = vst.msk [vmem:[#allocation0] sm:$0x1] %vm21_vm3, %v20_v17  }
  0x7b   :  { %28 = vst.msk [vmem:[#allocation0] sm:$0x1] %vm27_vm4, %v26_v19  }
  0x7c   :  { %v32_v20 = vpop.permute.xlu0 %31   ;;  %v38_v21 = vpop.permute.xlu1 %37  }
  0x7d   :  { %34 = vst.msk [vmem:[#allocation0] sm:$0x1] %vm33_vm5, %v32_v20  }
  0x7e   :  { %40 = vst.msk [vmem:[#allocation0] sm:$0x1] %vm39_vm6, %v38_v21  }
  0x80   :  { %v44_v22 = vpop.permute.xlu0 %43   ;;  %v50_v23 = vpop.permute.xlu1 %49  }
  0x81   :  { %46 = vst.msk [vmem:[#allocation0] sm:$0x1] %vm45_vm7, %v44_v22  }
  0x82   :  { %52 = vst.msk [vmem:[#allocation0] sm:$0x1] %vm51_vm8, %v50_v23  }
  0x84   :  { %v56_v24 = vpop.permute.xlu0 %55   ;;  %v62_v25 = vpop.permute.xlu1 %61  }
  0x85   :  { %58 = vst.msk [vmem:[#allocation0] sm:$0x1] %vm57_vm9, %v56_v24  }
  0x86   :  { %64 = vst.msk [vmem:[#allocation0] sm:$0x1] %vm63_vm10, %v62_v25  }
  0x88   :  { %v68_v26 = vpop.permute.xlu0 %67   ;;  %v74_v27 = vpop.permute.xlu1 %73  }
  0x89   :  { %70 = vst.msk [vmem:[#allocation0] sm:$0x1] %vm69_vm11, %v68_v26  }
  0x8a   :  { %76 = vst.msk [vmem:[#allocation0] sm:$0x1] %vm75_vm12, %v74_v27  }
  0x8c   :  { %v80_v28 = vpop.permute.xlu0 %79   ;;  %v86_v29 = vpop.permute.xlu1 %85  }
  0x8d   :  { %82 = vst.msk [vmem:[#allocation0] sm:$0x1] %vm81_vm13, %v80_v28  }
  0x8e   :  { %88 = vst.msk [vmem:[#allocation0] sm:$0x1] %vm87_vm14, %v86_v29  }
  0x90   :  { %v92_v30 = vpop.permute.xlu0 %91  }
  0x91   :  { %94 = vst.msk [vmem:[#allocation0] sm:$0x1] %vm93_vm15, %v92_v30  }
  0x98   :  { %v98_v31 = vld [vmem:[#allocation0] sm:$0x1] }
  0x99   :  { %100 = vst [vmem:[%s208_s1] sm:$0x1] %v98_v31 }

// kernel: upsample_forward.5
= control target key start
LH: loop header
LB: loop body
LE: loop exit
PB: predicated region body
PF: predicated region fallthrough
CT: control target
= control target key end

     0   :  { %s6870_s12 = smov 0   ;;  %s8511_s0 = inlined_call_operand.vmem [shape: bf16[2,18,18,4], index: 0, kind: input, shape index: {}]   ;;  %s8512_s1 = inlined_call_operand.vmem [shape: bf16[64,8], index: 1, kind: input, shape index: {}]   ;;  %s8513_s2 = inlined_call_operand.vmem [shape: f32[1,8], index: 2, kind: input, shape index: {}]   ;;  %s8514_s3 = inlined_call_operand.vmem [shape: bf16[2,16,16,32], index: 3, kind: output, shape index: {}]  }
   0x1 LB: > { %s4932_s13 = sadd.s32 4294967295, %s6845_s12   ;;  %p4936_p0 = scmp.ge.s32.totalorder %s6845_s12, 1  ;;  %s6845_s12 = sphi %s6870_s12, %s13_s12  }
   0x2   : > { %p137_p1 = scmp.lt.s32.totalorder %s6845_s12, 3 }
   0x4   : > { %p138_p2 = pnand %p4936_p0, %p137_p1 }
   0x6   : > { %141 = sbr.rel (%p138_p2) target bundleno = 913 (0x391), region = 32 }
   0xd   : > { %vm717_vm0 = vcmask 1041408   ;;  %v6812_v0 = vld [vmem:[%s8512_s1 + $0x8] ss:$0 sps:$4 sm:$0xcc]   ;;  %p161_p3 = scmp.lt.s32.totalorder %s4932_s13, 1  ;;  %vm1666_vm1 = vcmask 1042432  }
   0xe   : > { %v6813_v1 = vld [vmem:[%s8512_s1] ss:$0 sps:$4 sm:$0xcc]   ;;  %v1832_v2 = vrot.slane %v6812_v0, 2  ;;  %vm1667_vm2 = vcmask 1046532   ;;  %vm668_vm3 = vcmask 31744  }
   0xf   : > { %v667_v3 = vrot.slane %v6813_v1, 2  ;;  %s8624_s13 = smov (!%p161_p3, %s4932_s13), 1  ;;  %v227_v4 = vld [vmem:[%s8512_s1] sm:$0x3]  ;;  %v1648_v6 = vld [vmem:[%s8512_s1 + $0x8] sm:$0x3]  ;;  %vm6897_vm4 = vmor %vm1666_vm1, %vm1667_vm2 }
  0x10   : > { %6548 = vmatprep.subr.msk.bf16.mxu1 %vm717_vm0, %v1832_v2  ;;  %v1882_v5 = vsel %vm717_vm0, %v1832_v2, 0  ;;  %s6560_s22 = smul.u32 216, %s8624_s13  ;;  %vm229_vm5 = vsmask.f32 3328  ;;  %vm230_vm6 = vsmask.f32 7440 }
  0x11   : > { %5753 = vmatpush3.bf16.msra.mxu1 %v1882_v5  ;;  %6544 = vmatprep.subr.msk.bf16.mxu0 %vm717_vm0, %v667_v3  ;;  %v719_v7 = vsel %vm717_vm0, %v667_v3, 0  ;;  %v6903_v9 = vsel %vm717_vm0, %v227_v4, 0  ;;  %v2046_v17 = vsel %vm717_vm0, %v1648_v6, 0  ;;  %vm6954_vm7 = vmor %vm229_vm5, %vm230_vm6  ;;  %v6968_v63 = vld [vmem:[%s8512_s1 + $0xc] sm:$0x3]  ;;  %s6847_s28 = smov 8  }
  0x12   : > { %5617 = vmatpush3.bf16.msra.mxu0 %v719_v7  ;;  %6549 = vmatprep.subr.msk.bf16.mxu1 %vm717_vm0, %v1648_v6  ;;  %s6908_s25 = scalar_lea.vmem %s8511_s0, %s6560_s22  ;;  %s6849_s29 = smov 16   ;;  %vm4617_vm8 = vcmask 64512   ;;  %vm4650_vm9 = vcmask 130048   ;;  %vm4683_vm10 = vcmask 195584   ;;  %vm4844_vm11 = vcmask 257024  }
  0x13   : > { %6545 = vmatprep.subr.msk.bf16.mxu0 %vm717_vm0, %v227_v4  ;;  %v6912_v10 = vld [vmem:[%s6908_s25] sm:$0xf]  ;;  %v6915_v11 = vld [vmem:[%s6908_s25 + $0x4] sm:$0xf]  ;;  %v174_v12 = vld [vmem:[%s6908_s25 + $0x8] sm:$0x1] }
  0x14   : > { %v5041_v13 = vrot.slane %v6912_v10, 9  ;;  %v1671_v14 = vrot.slane %v6915_v11, 5  ;;  %v1674_v15 = vrot.slane %v174_v12, 5  ;;  %v6921_v16 = vld [vmem:[%s6908_s25 + $0xc] sm:$0xf]  ;;  %v233_v21 = vshrl.u32 %v6912_v10, 16 }
  0x15   : > { %v6925_v18 = vld [vmem:[%s6908_s25 + $0x10] sm:$0xf]  ;;  %v257_v19 = vshrl.u32 %v6921_v16, 16  ;;  %v260_v20 = vshll.u32 %v6921_v16, 16  ;;  %v177_v25 = vld [vmem:[%s6908_s25 + $0x14] sm:$0x1] }
  0x16   : > { %v1672_v23 = vsel %vm6897_vm4, %v5041_v13, %v1671_v14  ;;  %v1673_v24 = vrot.slane %v1671_v14, 4  ;;  %v266_v26 = vshll.u32 %v6925_v18, 16  ;;  %v270_v27 = vshrl.u32 %v6925_v18, 16  ;;  %v6942_v40 = vld [vmem:[%s6908_s25 + $0x18] sm:$0xf]  ;;  %s5311_s30 = sshll.u32 %s8624_s13, 7 }
  0x17   : > { %v259_v28 = vrot.slane %v257_v19, 4  ;;  %v262_v29 = vrot.slane %v260_v20, 5  ;;  %v276_v30 = vshll.u32 %v177_v25, 16  ;;  %v5042_v31 = vrot.slane %v6921_v16, 9  ;;  %v6959_v53 = vld [vmem:[%s6908_s25 + $0x1c] sm:$0xf]  ;;  %s8271_s6 = scalar_lea.vmem %s8514_s3, %s5311_s30 }
  0x18   : > { %v1675_v32 = vsel %vm6897_vm4, %v1673_v24, %v1674_v15  ;;  %v268_v33 = vrot.slane %v266_v26, 5  ;;  %v272_v34 = vrot.slane %v270_v27, 4  ;;  %v1678_v35 = vrot.slane %v6925_v18, 5  ;;  %v180_v2 = vld [vmem:[%s6908_s25 + $0x20] sm:$0x1] }
  0x19   : > { %v5057_v36 = vcombine.low %v1672_v23, %v1675_v32  ;;  %v278_v37 = vrot.slane %v276_v30, 5  ;;  %v1681_v38 = vrot.slane %v177_v25, 5  ;;  %v235_v39 = vrot.slane %v233_v21, 4  ;;  %v6982_v20 = vld [vmem:[%s6908_s25 + $0x24] sm:$0xf] }
  0x1a   : > { %v1679_v41 = vsel %vm6897_vm4, %v5042_v31, %v1678_v35  ;;  %v1680_v42 = vrot.slane %v1678_v35, 4  ;;  %v236_v43 = vshll.u32 %v6912_v10, 16  ;;  %v242_v44 = vshll.u32 %v6915_v11, 16 }
  0x1b   : > { %5754 = vmatprep.mubr.msk.bf16.mxu1 %vm668_vm3, %v5057_v36  ;;  %v246_v45 = vshrl.u32 %v6915_v11, 16  ;;  %v252_v46 = vshll.u32 %v174_v12, 16  ;;  %v263_v47 = vor.u32 %v262_v29, %v259_v28  ;;  %v273_v48 = vor.u32 %v272_v34, %v268_v33 }
  0x1c   : > { %v1682_v49 = vsel %vm6897_vm4, %v1680_v42, %v1681_v38  ;;  %v238_v51 = vrot.slane %v236_v43, 5  ;;  %v244_v52 = vrot.slane %v242_v44, 5  ;;  %v281_v54 = vshrl.u32 %v6942_v40, 16  ;;  %v7005_v38 = vld [vmem:[%s8512_s1 + $0x4] sm:$0x3] }
  0x1d   : > { %v6962_v55 = vcombine.low %v1679_v41, %v1682_v49  ;;  %v248_v56 = vrot.slane %v246_v45, 4  ;;  %v254_v57 = vrot.slane %v252_v46, 5  ;;  %v264_v58 = vrot.slane %v263_v47, 4  ;;  %v183_v41 = vld [vmem:[%s6908_s25 + $0x2c] sm:$0x1] }
  0x1e   : > { %v239_v59 = vor.u32 %v238_v51, %v235_v39  ;;  %v274_v60 = vrot.slane %v273_v48, 4  ;;  %v283_v61 = vrot.slane %v281_v54, 4  ;;  %v284_v62 = vshll.u32 %v6942_v40, 16  ;;  %v7020_v49 = vld [vmem:[%s6908_s25 + $0x30] sm:$0xf] }
  0x1f   : > { %8564 = vst [vmem:[#allocation2_spill] sm:$0xff] %v6962_v55  ;;  %5755 = vmatmul.mubr.msk.bf16.vlgmr.msra.gmra.mrb[0].mxu1 %vm668_vm3, %v6962_v55  ;;  %v249_v0 = vor.u32 %v248_v56, %v244_v52  ;;  %v269_v1 = vsel %vm6954_vm7, %v264_v58, %v268_v33  ;;  %v290_v3 = vshll.u32 %v6959_v53, 16  ;;  %v294_v4 = vshrl.u32 %v6959_v53, 16 }
  0x20   : > { %v240_v5 = vrot.slane %v239_v59, 4  ;;  %v279_v6 = vsel %vm6954_vm7, %v274_v60, %v278_v37  ;;  %5787 = vmatpush3.bf16.msra.mxu1 %v2046_v17  ;;  %v286_v7 = vrot.slane %v284_v62, 5  ;;  %v300_v12 = vshll.u32 %v180_v2, 16  ;;  %v6990_v17 = vld [vmem:[%s6908_s25 + $0x28] sm:$0xf] }
  0x21   : > { %v250_v13 = vrot.slane %v249_v0, 4  ;;  %v6979_v14 = vcombine.low %v269_v1, %v279_v6  ;;  %v292_v15 = vrot.slane %v290_v3, 5  ;;  %v296_v19 = vrot.slane %v294_v4, 4  ;;  %6550 = vmatprep.subr.msk.bf16.mxu1 %vm717_vm0, %v6968_v63 }
  0x22   : > { %v245_v21 = vsel %vm6954_vm7, %v240_v5, %v244_v52  ;;  %v287_v23 = vor.u32 %v286_v7, %v283_v61  ;;  %v302_v24 = vrot.slane %v300_v12, 5  ;;  %v5043_v25 = vrot.slane %v6942_v40, 9  ;;  %v186_v12 = vld [vmem:[%s6908_s25 + $0x38] sm:$0x1] }
  0x23   : > { %v255_v26 = vsel %vm6954_vm7, %v250_v13, %v254_v57  ;;  %v297_v27 = vor.u32 %v296_v19, %v292_v15  ;;  %v1685_v28 = vrot.slane %v6959_v53, 5  ;;  %v1688_v29 = vrot.slane %v180_v2, 5  ;;  %v7028_v57 = vld [vmem:[%s6908_s25 + $0x34] sm:$0xf] }
  0x24   : > { %v6995_v30 = vcombine.low %v245_v21, %v255_v26  ;;  %v288_v31 = vrot.slane %v287_v23, 4  ;;  %v305_v32 = vshrl.u32 %v6982_v20, 16  ;;  %v308_v33 = vshll.u32 %v6982_v20, 16 }
  0x25   : > { %v298_v34 = vrot.slane %v297_v27, 4  ;;  %v1686_v35 = vsel %vm6897_vm4, %v5043_v25, %v1685_v28  ;;  %v1687_v36 = vrot.slane %v1685_v28, 4  ;;  %v314_v37 = vshll.u32 %v6990_v17, 16  ;;  %v7050_v25 = vld [vmem:[%s6908_s25 + $0x3c] sm:$0xf] }
  0x26   : > { %5618 = vmatprep.mubr.msk.bf16.mxu0 %vm668_vm3, %v6995_v30  ;;  %v293_v39 = vsel %vm6954_vm7, %v288_v31, %v292_v15  ;;  %v307_v42 = vrot.slane %v305_v32, 4  ;;  %v310_v43 = vrot.slane %v308_v33, 5  ;;  %v318_v44 = vshrl.u32 %v6990_v17, 16  ;;  %8566 = vst [vmem:[#allocation4_spill] sm:$0xff] %v7050_v25  ;;  %v7058_v31 = vld [vmem:[%s6908_s25 + $0x40] sm:$0xf] }
  0x27   : > { %5619 = vmatmul.mubr.msk.bf16.vlgmr.msra.gmra.mrb[0].mxu0 %vm668_vm3, %v6979_v14  ;;  %v303_v45 = vsel %vm6954_vm7, %v298_v34, %v302_v24  ;;  %v1689_v46 = vsel %vm6897_vm4, %v1687_v36, %v1688_v29  ;;  %v316_v47 = vrot.slane %v314_v37, 5  ;;  %v324_v48 = vshll.u32 %v183_v41, 16 }
  0x28   : > { %5651 = vmatpush3.bf16.msra.mxu0 %v6903_v9  ;;  %v7023_v51 = vcombine.low %v293_v39, %v303_v45  ;;  %v7025_v52 = vcombine.low %v1686_v35, %v1689_v46  ;;  %v311_v54 = vor.u32 %v310_v43, %v307_v42  ;;  %v320_v56 = vrot.slane %v318_v44, 4 }
  0x29   : > { %v326_v58 = vrot.slane %v324_v48, 5  ;;  %v5044_v59 = vrot.slane %v6982_v20, 9  ;;  %v1692_v60 = vrot.slane %v6990_v17, 5  ;;  %v1695_v61 = vrot.slane %v183_v41, 5  ;;  %6546 = vmatprep.subr.msk.bf16.mxu0 %vm717_vm0, %v7005_v38 }
  0x2a   : > { %8565 = vst [vmem:[#allocation3_spill] sm:$0xff] %v7025_v52  ;;  %5758 = vmatprep.mubr.msk.bf16.mxu1 %vm668_vm3, %v7025_v52  ;;  %v312_v9 = vrot.slane %v311_v54, 4  ;;  %v321_v62 = vor.u32 %v320_v56, %v316_v47  ;;  %5622 = vmatprep.mubr.msk.bf16.mxu0 %vm668_vm3, %v7023_v51  ;;  %v329_v0 = vshrl.u32 %v7020_v49, 16  ;;  %v332_v1 = vshll.u32 %v7020_v49, 16 }
  0x2b   : > { %v1693_v2 = vsel %vm6897_vm4, %v5044_v59, %v1692_v60  ;;  %v1694_v3 = vrot.slane %v1692_v60, 4  ;;  %v338_v4 = vshll.u32 %v7028_v57, 16  ;;  %v342_v5 = vshrl.u32 %v7028_v57, 16 }
  0x2c   : > { %v317_v6 = vsel %vm6954_vm7, %v312_v9, %v316_v47  ;;  %v322_v7 = vrot.slane %v321_v62, 4  ;;  %v331_v13 = vrot.slane %v329_v0, 4  ;;  %v334_v15 = vrot.slane %v332_v1, 5  ;;  %v189_v47 = vld [vmem:[%s6908_s25 + $0x44] sm:$0x1] }
  0x2d   : > { %v1696_v19 = vsel %vm6897_vm4, %v1694_v3, %v1695_v61  ;;  %v340_v21 = vrot.slane %v338_v4, 5  ;;  %v344_v23 = vrot.slane %v342_v5, 4  ;;  %v348_v24 = vshll.u32 %v186_v12, 16  ;;  %v7081_v9 = vld [vmem:[%s6908_s25 + $0x48] sm:$0xf] }
  0x2e   : > { %v327_v26 = vsel %vm6954_vm7, %v322_v7, %v326_v58  ;;  %v7054_v27 = vcombine.low %v1693_v2, %v1696_v19  ;;  %v335_v28 = vor.u32 %v334_v15, %v331_v13  ;;  %v5045_v29 = vrot.slane %v7020_v49, 9  ;;  %v7088_v3 = vld [vmem:[%s6908_s25 + $0x4c] sm:$0xf] }
  0x2f   : > { %v7060_v32 = vcombine.low %v317_v6, %v327_v26  ;;  %v345_v33 = vor.u32 %v344_v23, %v340_v21  ;;  %v350_v34 = vrot.slane %v348_v24, 5  ;;  %v1699_v35 = vrot.slane %v7028_v57, 5 }
  0x30   : > { %8567 = vst [vmem:[#allocation5_spill] sm:$0xff] %v7054_v27  ;;  %5759 = vmatmul.mubr.msk.bf16.gmra.mrb[4].mxu1 %vm668_vm3, %v7054_v27  ;;  %v336_v36 = vrot.slane %v335_v28, 4  ;;  %v1702_v37 = vrot.slane %v186_v12, 5  ;;  %v353_v39 = vshrl.u32 %v7050_v25, 16  ;;  %v356_v41 = vshll.u32 %v7050_v25, 16 }
  0x31   : > { %5623 = vmatmul.mubr.msk.bf16.gmra.mrb[4].mxu0 %vm668_vm3, %v7060_v32  ;;  %v346_v42 = vrot.slane %v345_v33, 4  ;;  %v1700_v43 = vsel %vm6897_vm4, %v5045_v29, %v1699_v35  ;;  %v1701_v44 = vrot.slane %v1699_v35, 4  ;;  %v362_v45 = vshll.u32 %v7058_v31, 16  ;;  %v192_v33 = vld [vmem:[%s6908_s25 + $0x50] sm:$0x1] }
  0x32   : > { %v341_v46 = vsel %vm6954_vm7, %v336_v36, %v340_v21  ;;  %v355_v48 = vrot.slane %v353_v39, 4  ;;  %v358_v54 = vrot.slane %v356_v41, 5  ;;  %v366_v56 = vshrl.u32 %v7058_v31, 16 }
  0x33   : > { %v351_v58 = vsel %vm6954_vm7, %v346_v42, %v350_v34  ;;  %v1703_v59 = vsel %vm6897_vm4, %v1701_v44, %v1702_v37  ;;  %v364_v60 = vrot.slane %v362_v45, 5  ;;  %v372_v61 = vshll.u32 %v189_v47, 16  ;;  %v7108_v42 = vld [vmem:[%s6908_s25 + $0x54] sm:$0xf] }
  0x34   : > { %v7083_v62 = vcombine.low %v341_v46, %v351_v58  ;;  %v7085_v0 = vcombine.low %v1700_v43, %v1703_v59  ;;  %v359_v1 = vor.u32 %v358_v54, %v355_v48  ;;  %v368_v2 = vrot.slane %v366_v56, 4 }
  0x35   : > { %v374_v4 = vrot.slane %v372_v61, 5  ;;  %v5046_v5 = vrot.slane %v7050_v25, 9  ;;  %v1706_v6 = vrot.slane %v7058_v31, 5  ;;  %v1709_v7 = vrot.slane %v189_v47, 5  ;;  %v7116_v47 = vld [vmem:[%s6908_s25 + $0x58] sm:$0xf] }
  0x36   : > { %8568 = vst [vmem:[#allocation6_spill] sm:$0xff] %v7085_v0  ;;  %5762 = vmatprep.mubr.msk.bf16.mxu1 %vm668_vm3, %v7085_v0  ;;  %v360_v12 = vrot.slane %v359_v1, 4  ;;  %v369_v13 = vor.u32 %v368_v2, %v364_v60  ;;  %5626 = vmatprep.mubr.msk.bf16.mxu0 %vm668_vm3, %v7083_v62  ;;  %v377_v15 = vshrl.u32 %v7081_v9, 16  ;;  %v380_v19 = vshll.u32 %v7081_v9, 16 }
  0x37   : > { %v1707_v21 = vsel %vm6897_vm4, %v5046_v5, %v1706_v6  ;;  %v1708_v23 = vrot.slane %v1706_v6, 4  ;;  %v386_v24 = vshll.u32 %v7088_v3, 16  ;;  %v390_v26 = vshrl.u32 %v7088_v3, 16 }
  0x38   : > { %v365_v28 = vsel %vm6954_vm7, %v360_v12, %v364_v60  ;;  %v370_v29 = vrot.slane %v369_v13, 4  ;;  %v379_v34 = vrot.slane %v377_v15, 4  ;;  %v382_v35 = vrot.slane %v380_v19, 5  ;;  %v195_v12 = vld [vmem:[%s6908_s25 + $0x5c] sm:$0x1] }
  0x39   : > { %v1710_v36 = vsel %vm6897_vm4, %v1708_v23, %v1709_v7  ;;  %v388_v37 = vrot.slane %v386_v24, 5  ;;  %v392_v39 = vrot.slane %v390_v26, 4  ;;  %v396_v41 = vshll.u32 %v192_v33, 16 }
  0x3a   : > { %v375_v43 = vsel %vm6954_vm7, %v370_v29, %v374_v4  ;;  %v7112_v44 = vcombine.low %v1707_v21, %v1710_v36  ;;  %v383_v45 = vor.u32 %v382_v35, %v379_v34  ;;  %v5047_v46 = vrot.slane %v7081_v9, 9  ;;  %v7146_v36 = vld [vmem:[%s6908_s25 + $0x64] sm:$0xf] }
  0x3b   : > { %v7118_v48 = vcombine.low %v365_v28, %v375_v43  ;;  %v393_v54 = vor.u32 %v392_v39, %v388_v37  ;;  %v398_v56 = vrot.slane %v396_v41, 5  ;;  %v1713_v58 = vrot.slane %v7088_v3, 5  ;;  %v7139_v28 = vld [vmem:[%s6908_s25 + $0x60] sm:$0xf] }
  0x3c   : > { %8569 = vst [vmem:[#allocation7_spill] sm:$0xff] %v7112_v44  ;;  %5763 = vmatmul.mubr.msk.bf16.gmra.mrb[8].mxu1 %vm668_vm3, %v7112_v44  ;;  %v384_v59 = vrot.slane %v383_v45, 4  ;;  %v1716_v60 = vrot.slane %v192_v33, 5  ;;  %v401_v61 = vshrl.u32 %v7108_v42, 16  ;;  %v404_v1 = vshll.u32 %v7108_v42, 16 }
  0x3d   : > { %8570 = vst [vmem:[#allocation8_spill] sm:$0xff] %v7118_v48  ;;  %5627 = vmatmul.mubr.msk.bf16.gmra.mrb[8].mxu0 %vm668_vm3, %v7118_v48  ;;  %v394_v2 = vrot.slane %v393_v54, 4  ;;  %v1714_v4 = vsel %vm6897_vm4, %v5047_v46, %v1713_v58  ;;  %v1715_v5 = vrot.slane %v1713_v58, 4  ;;  %v410_v6 = vshll.u32 %v7116_v47, 16 }
  0x3e   : > { %v389_v7 = vsel %vm6954_vm7, %v384_v59, %v388_v37  ;;  %v403_v13 = vrot.slane %v401_v61, 4  ;;  %v406_v15 = vrot.slane %v404_v1, 5  ;;  %v414_v19 = vshrl.u32 %v7116_v47, 16 }
  0x3f   : > { %v399_v21 = vsel %vm6954_vm7, %v394_v2, %v398_v56  ;;  %v1717_v23 = vsel %vm6897_vm4, %v1715_v5, %v1716_v60  ;;  %v412_v24 = vrot.slane %v410_v6, 5  ;;  %v420_v26 = vshll.u32 %v195_v12, 16 }
  0x40   : > { %v7141_v29 = vcombine.low %v389_v7, %v399_v21  ;;  %v7143_v33 = vcombine.low %v1714_v4, %v1717_v23  ;;  %v407_v34 = vor.u32 %v406_v15, %v403_v13  ;;  %v416_v35 = vrot.slane %v414_v19, 4  ;;  %v198_v4 = vld [vmem:[%s6908_s25 + $0x68] sm:$0x1]  ;;  %v7166_v19 = vld [vmem:[%s6908_s25 + $0x6c] sm:$0xf] }
  0x41   : > { %v422_v37 = vrot.slane %v420_v26, 5  ;;  %v5048_v39 = vrot.slane %v7108_v42, 9  ;;  %v1720_v41 = vrot.slane %v7116_v47, 5  ;;  %v1723_v43 = vrot.slane %v195_v12, 5 }
  0x42   : > { %8571 = vst [vmem:[#allocation9_spill] sm:$0xff] %v7141_v29  ;;  %8572 = vst [vmem:[#allocation10_spill] sm:$0xff] %v7143_v33  ;;  %5766 = vmatprep.mubr.msk.bf16.mxu1 %vm668_vm3, %v7143_v33  ;;  %v408_v45 = vrot.slane %v407_v34, 4  ;;  %v417_v46 = vor.u32 %v416_v35, %v412_v24  ;;  %5630 = vmatprep.mubr.msk.bf16.mxu0 %vm668_vm3, %v7141_v29  ;;  %v425_v54 = vshrl.u32 %v7139_v28, 16  ;;  %v428_v56 = vshll.u32 %v7139_v28, 16 }
  0x43   : > { %v1721_v58 = vsel %vm6897_vm4, %v5048_v39, %v1720_v41  ;;  %v1722_v59 = vrot.slane %v1720_v41, 4  ;;  %v434_v60 = vshll.u32 %v7146_v36, 16  ;;  %v438_v61 = vshrl.u32 %v7146_v36, 16  ;;  %v7174_v34 = vld [vmem:[%s6908_s25 + $0x70] sm:$0xf] }
  0x44   : > { %v413_v1 = vsel %vm6954_vm7, %v408_v45, %v412_v24  ;;  %v418_v2 = vrot.slane %v417_v46, 4  ;;  %v427_v5 = vrot.slane %v425_v54, 4  ;;  %v430_v6 = vrot.slane %v428_v56, 5 }
  0x45   : > { %v1724_v7 = vsel %vm6897_vm4, %v1722_v59, %v1723_v43  ;;  %v436_v12 = vrot.slane %v434_v60, 5  ;;  %v440_v13 = vrot.slane %v438_v61, 4  ;;  %v444_v15 = vshll.u32 %v198_v4, 16 }
  0x46   : > { %v423_v21 = vsel %vm6954_vm7, %v418_v2, %v422_v37  ;;  %v7170_v23 = vcombine.low %v1721_v58, %v1724_v7  ;;  %v431_v26 = vor.u32 %v430_v6, %v427_v5  ;;  %v5049_v24 = vrot.slane %v7139_v28, 9 }
  0x47   : > { %v7176_v35 = vcombine.low %v413_v1, %v423_v21  ;;  %v441_v39 = vor.u32 %v440_v13, %v436_v12  ;;  %v446_v41 = vrot.slane %v444_v15, 5  ;;  %v1727_v43 = vrot.slane %v7146_v36, 5  ;;  %v201_v1 = vld [vmem:[%s6908_s25 + $0x74] sm:$0x1]  ;;  %v7197_v21 = vld [vmem:[%s6908_s25 + $0x78] sm:$0xf] }
  0x48   : > { %8573 = vst [vmem:[#allocation11_spill] sm:$0xff] %v7170_v23  ;;  %5767 = vmatmul.mubr.msk.bf16.gmra.mrb[12].mxu1 %vm668_vm3, %v7170_v23  ;;  %v432_v45 = vrot.slane %v431_v26, 4  ;;  %v1730_v46 = vrot.slane %v198_v4, 5  ;;  %v449_v37 = vshrl.u32 %v7166_v19, 16  ;;  %v452_v54 = vshll.u32 %v7166_v19, 16 }
  0x49   : > { %8574 = vst [vmem:[#allocation12_spill] sm:$0xff] %v7176_v35  ;;  %5631 = vmatmul.mubr.msk.bf16.gmra.mrb[12].mxu0 %vm668_vm3, %v7176_v35  ;;  %v442_v56 = vrot.slane %v441_v39, 4  ;;  %v1728_v58 = vsel %vm6897_vm4, %v5049_v24, %v1727_v43  ;;  %v1729_v59 = vrot.slane %v1727_v43, 4  ;;  %v458_v60 = vshll.u32 %v7174_v34, 16  ;;  %v7204_v43 = vld [vmem:[%s6908_s25 + $0x7c] sm:$0xf] }
  0x4a   : > { %v437_v61 = vsel %vm6954_vm7, %v432_v45, %v436_v12  ;;  %v451_v2 = vrot.slane %v449_v37, 4  ;;  %v454_v4 = vrot.slane %v452_v54, 5  ;;  %v462_v5 = vshrl.u32 %v7174_v34, 16 }
  0x4b   : > { %v447_v6 = vsel %vm6954_vm7, %v442_v56, %v446_v41  ;;  %v1731_v7 = vsel %vm6897_vm4, %v1729_v59, %v1730_v46  ;;  %v460_v13 = vrot.slane %v458_v60, 5  ;;  %v468_v15 = vshll.u32 %v201_v1, 16 }
  0x4c   : > { %v7199_v26 = vcombine.low %v437_v61, %v447_v6  ;;  %v7201_v24 = vcombine.low %v1728_v58, %v1731_v7  ;;  %v455_v12 = vor.u32 %v454_v4, %v451_v2  ;;  %v464_v39 = vrot.slane %v462_v5, 4  ;;  %v204_v6 = vld [vmem:[%s6908_s25 + $0x80] sm:$0x1] }
  0x4d   : > { %v470_v45 = vrot.slane %v468_v15, 5  ;;  %v5050_v37 = vrot.slane %v7166_v19, 9  ;;  %v1734_v41 = vrot.slane %v7174_v34, 5  ;;  %v1737_v54 = vrot.slane %v201_v1, 5 }
  0x4e   : > { %8575 = vst [vmem:[#allocation13_spill] sm:$0xff] %v7199_v26  ;;  %8576 = vst [vmem:[#allocation14_spill] sm:$0xff] %v7201_v24  ;;  %5770 = vmatprep.mubr.msk.bf16.mxu1 %vm668_vm3, %v7201_v24  ;;  %v456_v46 = vrot.slane %v455_v12, 4  ;;  %v465_v56 = vor.u32 %v464_v39, %v460_v13  ;;  %5634 = vmatprep.mubr.msk.bf16.mxu0 %vm668_vm3, %v7199_v26  ;;  %v473_v58 = vshrl.u32 %v7197_v21, 16  ;;  %v476_v59 = vshll.u32 %v7197_v21, 16 }
  0x4f   : > { %v1735_v60 = vsel %vm6897_vm4, %v5050_v37, %v1734_v41  ;;  %v1736_v61 = vrot.slane %v1734_v41, 4  ;;  %v482_v2 = vshll.u32 %v7204_v43, 16  ;;  %v486_v1 = vshrl.u32 %v7204_v43, 16  ;;  %v7224_v37 = vld [vmem:[%s6908_s25 + $0x84] sm:$0xf] }
  0x50   : > { %v461_v4 = vsel %vm6954_vm7, %v456_v46, %v460_v13  ;;  %v466_v5 = vrot.slane %v465_v56, 4  ;;  %v475_v7 = vrot.slane %v473_v58, 4  ;;  %v478_v15 = vrot.slane %v476_v59, 5  ;;  %v7232_v46 = vld [vmem:[%s6908_s25 + $0x88] sm:$0xf] }
  0x51   : > { %v1738_v12 = vsel %vm6897_vm4, %v1736_v61, %v1737_v54  ;;  %v484_v39 = vrot.slane %v482_v2, 5  ;;  %v488_v22 = vrot.slane %v486_v1, 4  ;;  %v492_v24 = vshll.u32 %v204_v6, 16 }
  0x52   : > { %v471_v41 = vsel %vm6954_vm7, %v466_v5, %v470_v45  ;;  %v7228_v23 = vcombine.low %v1735_v60, %v1738_v12  ;;  %v479_v33 = vor.u32 %v478_v15, %v475_v7  ;;  %v5051_v13 = vrot.slane %v7197_v21, 9  ;;  %v207_v5 = vld [vmem:[%s6908_s25 + $0x8c] sm:$0x1] }
  0x53   : > { %v7234_v56 = vcombine.low %v461_v4, %v471_v41  ;;  %v489_v58 = vor.u32 %v488_v22, %v484_v39  ;;  %v494_v54 = vrot.slane %v492_v24, 5  ;;  %v1741_v59 = vrot.slane %v7204_v43, 5 }
  0x54   : > { %8577 = vst [vmem:[#allocation15_spill] sm:$0xff] %v7228_v23  ;;  %5771 = vmatmul.mubr.msk.bf16.gmra.mrb[16].mxu1 %vm668_vm3, %v7228_v23  ;;  %v480_v61 = vrot.slane %v479_v33, 4  ;;  %v1744_v2 = vrot.slane %v204_v6, 5  ;;  %v497_v45 = vshrl.u32 %v7224_v37, 16  ;;  %v500_v60 = vshll.u32 %v7224_v37, 16 }
  0x55   : > { %8578 = vst [vmem:[#allocation16_spill] sm:$0xff] %v7234_v56  ;;  %5635 = vmatmul.mubr.msk.bf16.gmra.mrb[16].mxu0 %vm668_vm3, %v7234_v56  ;;  %v490_v1 = vrot.slane %v489_v58, 4  ;;  %v1742_v22 = vsel %vm6897_vm4, %v5051_v13, %v1741_v59  ;;  %v1743_v24 = vrot.slane %v1741_v59, 4  ;;  %v506_v4 = vshll.u32 %v7232_v46, 16  ;;  %v7255_v59 = vld [vmem:[%s6908_s25 + $0x90] sm:$0xf] }
  0x56   : > { %v485_v33 = vsel %vm6954_vm7, %v480_v61, %v484_v39  ;;  %v499_v6 = vrot.slane %v497_v45, 4  ;;  %v502_v7 = vrot.slane %v500_v60, 5  ;;  %v510_v15 = vshrl.u32 %v7232_v46, 16  ;;  %v7262_v45 = vld [vmem:[%s6908_s25 + $0x94] sm:$0xf] }
  0x57   : > { %v495_v12 = vsel %vm6954_vm7, %v490_v1, %v494_v54  ;;  %v1745_v41 = vsel %vm6897_vm4, %v1743_v24, %v1744_v2  ;;  %v508_v58 = vrot.slane %v506_v4, 5  ;;  %v516_v13 = vshll.u32 %v207_v5, 16 }
  0x58   : > { %v7257_v23 = vcombine.low %v485_v33, %v495_v12  ;;  %v7259_v44 = vcombine.low %v1742_v22, %v1745_v41  ;;  %v503_v39 = vor.u32 %v502_v7, %v499_v6  ;;  %v512_v61 = vrot.slane %v510_v15, 4  ;;  %v210_v41 = vld [vmem:[%s6908_s25 + $0x98] sm:$0x1] }
  0x59   : > { %v518_v60 = vrot.slane %v516_v13, 5  ;;  %v5052_v0 = vrot.slane %v7224_v37, 9  ;;  %v1748_v54 = vrot.slane %v7232_v46, 5  ;;  %v1751_v1 = vrot.slane %v207_v5, 5 }
  0x5a   : > { %8579 = vst [vmem:[#allocation17_spill] sm:$0xff] %v7257_v23  ;;  %8580 = vst [vmem:[#allocation18_spill] sm:$0xff] %v7259_v44  ;;  %5774 = vmatprep.mubr.msk.bf16.mxu1 %vm668_vm3, %v7259_v44  ;;  %v504_v2 = vrot.slane %v503_v39, 4  ;;  %v513_v24 = vor.u32 %v512_v61, %v508_v58  ;;  %5638 = vmatprep.mubr.msk.bf16.mxu0 %vm668_vm3, %v7257_v23  ;;  %v521_v22 = vshrl.u32 %v7255_v59, 16  ;;  %v524_v4 = vshll.u32 %v7255_v59, 16 }
  0x5b   : > { %v1749_v33 = vsel %vm6897_vm4, %v5052_v0, %v1748_v54  ;;  %v1750_v6 = vrot.slane %v1748_v54, 4  ;;  %v530_v7 = vshll.u32 %v7262_v45, 16  ;;  %v534_v5 = vshrl.u32 %v7262_v45, 16  ;;  %v7282_v0 = vld [vmem:[%s6908_s25 + $0x9c] sm:$0xf] }
  0x5c   : > { %v509_v15 = vsel %vm6954_vm7, %v504_v2, %v508_v58  ;;  %v514_v12 = vrot.slane %v513_v24, 4  ;;  %v523_v13 = vrot.slane %v521_v22, 4  ;;  %v526_v39 = vrot.slane %v524_v4, 5  ;;  %v7290_v2 = vld [vmem:[%s6908_s25 + $0xa0] sm:$0xf] }
  0x5d   : > { %v1752_v61 = vsel %vm6897_vm4, %v1750_v6, %v1751_v1  ;;  %v532_v44 = vrot.slane %v530_v7, 5  ;;  %v536_v27 = vrot.slane %v534_v5, 4  ;;  %v540_v52 = vshll.u32 %v210_v41, 16 }
  0x5e   : > { %v519_v54 = vsel %vm6954_vm7, %v514_v12, %v518_v60  ;;  %v7286_v55 = vcombine.low %v1749_v33, %v1752_v61  ;;  %v527_v23 = vor.u32 %v526_v39, %v523_v13  ;;  %v5053_v58 = vrot.slane %v7255_v59, 9  ;;  %v213_v12 = vld [vmem:[%s6908_s25 + $0xa4] sm:$0x1] }
  0x5f   : > { %v7292_v24 = vcombine.low %v509_v15, %v519_v54  ;;  %v537_v22 = vor.u32 %v536_v27, %v532_v44  ;;  %v542_v1 = vrot.slane %v540_v52, 5  ;;  %v1755_v4 = vrot.slane %v7262_v45, 5 }
  0x60   : > { %8581 = vst [vmem:[#allocation19_spill] sm:$0xff] %v7286_v55  ;;  %5775 = vmatmul.mubr.msk.bf16.gmra.mrb[20].mxu1 %vm668_vm3, %v7286_v55  ;;  %v528_v6 = vrot.slane %v527_v23, 4  ;;  %v1758_v7 = vrot.slane %v210_v41, 5  ;;  %v545_v60 = vshrl.u32 %v7282_v0, 16  ;;  %v548_v33 = vshll.u32 %v7282_v0, 16 }
  0x61   : > { %8582 = vst [vmem:[#allocation20_spill] sm:$0xff] %v7292_v24  ;;  %5639 = vmatmul.mubr.msk.bf16.gmra.mrb[20].mxu0 %vm668_vm3, %v7292_v24  ;;  %v538_v5 = vrot.slane %v537_v22, 4  ;;  %v1756_v27 = vsel %vm6897_vm4, %v5053_v58, %v1755_v4  ;;  %v1757_v52 = vrot.slane %v1755_v4, 4  ;;  %v554_v15 = vshll.u32 %v7290_v2, 16  ;;  %v7313_v4 = vld [vmem:[%s6908_s25 + $0xa8] sm:$0xf] }
  0x62   : > { %v533_v23 = vsel %vm6954_vm7, %v528_v6, %v532_v44  ;;  %v547_v41 = vrot.slane %v545_v60, 4  ;;  %v550_v13 = vrot.slane %v548_v33, 5  ;;  %v558_v39 = vshrl.u32 %v7290_v2, 16  ;;  %v7320_v60 = vld [vmem:[%s6908_s25 + $0xac] sm:$0xf] }
  0x63   : > { %v543_v61 = vsel %vm6954_vm7, %v538_v5, %v542_v1  ;;  %v1759_v54 = vsel %vm6897_vm4, %v1757_v52, %v1758_v7  ;;  %v556_v22 = vrot.slane %v554_v15, 5  ;;  %v564_v58 = vshll.u32 %v213_v12, 16 }
  0x64   : > { %v7315_v55 = vcombine.low %v533_v23, %v543_v61  ;;  %v7317_v24 = vcombine.low %v1756_v27, %v1759_v54  ;;  %v551_v44 = vor.u32 %v550_v13, %v547_v41  ;;  %v560_v6 = vrot.slane %v558_v39, 4  ;;  %v216_v54 = vld [vmem:[%s6908_s25 + $0xb0] sm:$0x1] }
  0x65   : > { %v566_v33 = vrot.slane %v564_v58, 5  ;;  %v5054_v56 = vrot.slane %v7282_v0, 9  ;;  %v1762_v1 = vrot.slane %v7290_v2, 5  ;;  %v1765_v5 = vrot.slane %v213_v12, 5 }
  0x66   : > { %8583 = vst [vmem:[#allocation21_spill] sm:$0xff] %v7315_v55  ;;  %8584 = vst [vmem:[#allocation22_spill] sm:$0xff] %v7317_v24  ;;  %5778 = vmatprep.mubr.msk.bf16.mxu1 %vm668_vm3, %v7317_v24  ;;  %v552_v7 = vrot.slane %v551_v44, 4  ;;  %v561_v52 = vor.u32 %v560_v6, %v556_v22  ;;  %5642 = vmatprep.mubr.msk.bf16.mxu0 %vm668_vm3, %v7315_v55  ;;  %v569_v27 = vshrl.u32 %v7313_v4, 16  ;;  %v572_v15 = vshll.u32 %v7313_v4, 16 }
  0x67   : > { %v1763_v23 = vsel %vm6897_vm4, %v5054_v56, %v1762_v1  ;;  %v1764_v41 = vrot.slane %v1762_v1, 4  ;;  %v578_v13 = vshll.u32 %v7320_v60, 16  ;;  %v582_v12 = vshrl.u32 %v7320_v60, 16  ;;  %v217_v56 = vld [vmem:[%s6908_s25 + $0xb4] sm:$0xf] }
  0x68   : > { %v557_v39 = vsel %vm6954_vm7, %v552_v7, %v556_v22  ;;  %v562_v61 = vrot.slane %v561_v52, 4  ;;  %v571_v58 = vrot.slane %v569_v27, 4  ;;  %v574_v44 = vrot.slane %v572_v15, 5  ;;  %v218_v22 = vld [vmem:[%s6908_s25 + $0xb8] sm:$0xf] }
  0x69   : > { %v1766_v6 = vsel %vm6897_vm4, %v1764_v41, %v1765_v5  ;;  %v580_v24 = vrot.slane %v578_v13, 5  ;;  %v584_v55 = vrot.slane %v582_v12, 4  ;;  %v588_v26 = vshll.u32 %v216_v54, 16 }
  0x6a   : > { %v567_v1 = vsel %vm6954_vm7, %v562_v61, %v566_v33  ;;  %v7342_v35 = vcombine.low %v1763_v23, %v1766_v6  ;;  %v575_v29 = vor.u32 %v574_v44, %v571_v58  ;;  %v5055_v48 = vrot.slane %v7313_v4, 9 }
  0x6b   : > { %v7346_v7 = vcombine.low %v557_v39, %v567_v1  ;;  %v585_v52 = vor.u32 %v584_v55, %v580_v24  ;;  %v590_v27 = vrot.slane %v588_v26, 5  ;;  %v1769_v5 = vrot.slane %v7320_v60, 5  ;;  %v219_v26 = vld [vmem:[%s6908_s25 + $0xbc] sm:$0x1] }
  0x6c   : > { %8585 = vst [vmem:[#allocation23_spill] sm:$0xff] %v7342_v35  ;;  %5779 = vmatmul.mubr.msk.bf16.gmra.mrb[24].mxu1 %vm668_vm3, %v7342_v35  ;;  %v576_v15 = vrot.slane %v575_v29, 4  ;;  %v1772_v41 = vrot.slane %v216_v54, 5  ;;  %v593_v13 = vshrl.u32 %v217_v56, 16  ;;  %v596_v33 = vshll.u32 %v217_v56, 16 }
  0x6d   : > { %8586 = vst [vmem:[#allocation24_spill] sm:$0xff] %v7346_v7  ;;  %5643 = vmatmul.mubr.msk.bf16.gmra.mrb[24].mxu0 %vm668_vm3, %v7346_v7  ;;  %v586_v23 = vrot.slane %v585_v52, 4  ;;  %v1770_v12 = vsel %vm6897_vm4, %v5055_v48, %v1769_v5  ;;  %v1771_v39 = vrot.slane %v1769_v5, 4  ;;  %v602_v61 = vshll.u32 %v218_v22, 16 }
  0x6e   : > { %v581_v55 = vsel %vm6954_vm7, %v576_v15, %v580_v24  ;;  %v595_v58 = vrot.slane %v593_v13, 4  ;;  %v598_v44 = vrot.slane %v596_v33, 5  ;;  %v606_v6 = vshrl.u32 %v218_v22, 16 }
  0x6f   : > { %v591_v29 = vsel %vm6954_vm7, %v586_v23, %v590_v27  ;;  %v1773_v54 = vsel %vm6897_vm4, %v1771_v39, %v1772_v41  ;;  %v604_v1 = vrot.slane %v602_v61, 5  ;;  %v612_v52 = vshll.u32 %v219_v26, 16 }
  0x70   : > { %v7362_v35 = vcombine.low %v581_v55, %v591_v29  ;;  %v7364_v48 = vcombine.low %v1770_v12, %v1773_v54  ;;  %v599_v5 = vor.u32 %v598_v44, %v595_v58  ;;  %v608_v7 = vrot.slane %v606_v6, 4 }
  0x71   : > { %v5056_v25 = vrot.slane %v217_v56, 9  ;;  %v1776_v24 = vrot.slane %v218_v22, 5  ;;  %v1779_v15 = vrot.slane %v219_v26, 5  ;;  %v614_v27 = vrot.slane %v612_v52, 5 }
  0x72   : > { %5782 = vmatprep.mubr.msk.bf16.mxu1 %vm668_vm3, %v7364_v48  ;;  %v600_v13 = vrot.slane %v599_v5, 4  ;;  %v609_v33 = vor.u32 %v608_v7, %v604_v1  ;;  %5646 = vmatprep.mubr.msk.bf16.mxu0 %vm668_vm3, %v7362_v35  ;;  %v7376_v61 = vcombine.low %v7081_v9, %v7088_v3  ;;  %v7382_v7 = vcombine.low %v7108_v42, %v7116_v47  ;;  %v6833_v5 = vld [vmem:[%s8512_s1 + $0x10] ss:$0 sps:$4 sm:$0xcc]  }
  0x73   : > { %v1777_v41 = vsel %vm6897_vm4, %v5056_v25, %v1776_v24  ;;  %v1778_v23 = vrot.slane %v1776_v24, 4  ;;  %v7386_v26 = vcombine.low %v7139_v28, %v7146_v36  ;;  %v7390_v25 = vcombine.low %v7166_v19, %v7174_v34  ;;  %v6834_v24 = vld [vmem:[%s8512_s1 + $0x18] ss:$0 sps:$4 sm:$0xcc]  }
  0x74   : > { %v605_v12 = vsel %vm6954_vm7, %v600_v13, %v604_v1  ;;  %v610_v39 = vrot.slane %v609_v33, 4  ;;  %v7398_v3 = vcombine.low %v7197_v21, %v7204_v43  ;;  %v7402_v42 = vcombine.low %v7224_v37, %v7232_v46  ;;  %v6830_v43 = vld [vmem:[%s8512_s1 + $0x4] ss:$0 sps:$4 sm:$0xcc]  }
  0x75   : > { %v1780_v55 = vsel %vm6897_vm4, %v1778_v23, %v1779_v15  ;;  %v7408_v28 = vcombine.low %v7255_v59, %v7262_v45  ;;  %v7412_v36 = vcombine.low %v7282_v0, %v7290_v2  ;;  %v7416_v19 = vcombine.low %v7313_v4, %v7320_v60  ;;  %v6831_v37 = vld [vmem:[%s8512_s1 + $0xc] ss:$0 sps:$4 sm:$0xcc]   ;;  %v8596_v0 = vld [vmem:[#allocation21_spill] sm:$0xff]  ;;  %v8597_v2 = vld [vmem:[#allocation24_spill] sm:$0xff] }
  0x76   : > { %v615_v58 = vsel %vm6954_vm7, %v610_v39, %v614_v27  ;;  %v7394_v9 = vcombine.low %v1777_v41, %v1780_v55  ;;  %v7420_v34 = vcombine.low %v217_v56, %v218_v22  ;;  %v8587_v21 = vcombine.low %v6912_v10, %v6915_v11  ;;  %v7513_v4 = vld [vmem:[%s6908_s25 + $0xc0] sm:$0xf]  ;;  %v7516_v60 = vld [vmem:[%s6908_s25 + $0xc4] sm:$0xf]  ;;  %v222_v56 = vld [vmem:[%s6908_s25 + $0xc8] sm:$0x1] }
  0x77   : > { %v7404_v47 = vcombine.low %v605_v12, %v615_v58  ;;  %v7438_v46 = vcombine.low %v6921_v16, %v6925_v18  ;;  %v1184_v10 = vsel %vm717_vm0, %v7005_v38, 0  ;;  %v7446_v11 = vcombine.low %v6942_v40, %v6959_v53  ;;  %v8588_v40 = vld [vmem:[#allocation4_spill] sm:$0xff]  ;;  %v8592_v38 = vld [vmem:[#allocation13_spill] sm:$0xff] }
  0x78   : > { %5783 = vmatmul.mubr.msk.bf16.gmra.mrb[28].mxu1 %vm668_vm3, %v7394_v9  ;;  %v1410_v59 = vrot.slane %v6830_v43, 2  ;;  %v2421_v45 = vrot.slane %v6831_v37, 2  ;;  %v7460_v16 = vcombine.low %v6982_v20, %v6990_v17  ;;  %v7464_v18 = vcombine.low %v7020_v49, %v7028_v57  ;;  %v8590_v20 = vld [vmem:[#allocation9_spill] sm:$0xff]  ;;  %v8591_v17 = vld [vmem:[#allocation12_spill] sm:$0xff] }
  0x79   : > { %5647 = vmatmul.mubr.msk.bf16.gmra.mrb[28].mxu0 %vm668_vm3, %v7404_v47  ;;  %5788 = vmatprep.mubr.msk.bf16.mxu1 %vm668_vm3, %v6995_v30  ;;  %v2211_v30 = vsel %vm717_vm0, %v6968_v63, 0  ;;  %v7476_v53 = vcombine.low %v8588_v40, %v7058_v31  ;;  %v8589_v63 = vld [vmem:[#allocation8_spill] sm:$0xff]  ;;  %v8594_v57 = vld [vmem:[#allocation17_spill] sm:$0xff]  ;;  %v5122_v22 = vrot.slane %v7513_v4, 9  ;;  %v2410_v44 = vrot.slane %v7516_v60, 5 }
  0x7a   : > { %5652 = vmatprep.mubr.msk.bf16.mxu0 %vm668_vm3, %v8587_v21  ;;  %v8593_v49 = vld [vmem:[#allocation16_spill] sm:$0xff]  ;;  %v2413_v6 = vrot.slane %v222_v56, 5  ;;  %v2426_v15 = vsel %vm717_vm0, %v2421_v45, 0  ;;  %v1415_v13 = vsel %vm717_vm0, %v1410_v59, 0  ;;  %v2658_v33 = vrot.slane %v6833_v5, 2  ;;  %v8599_v5 = vld [vmem:[#allocation3_spill] sm:$0xff] }
  0x7b   : > { %v8595_v31 = vld [vmem:[#allocation20_spill] sm:$0xff]  ;;  %v2411_v29 = vsel %vm6897_vm4, %v5122_v22, %v2410_v44  ;;  %v2412_v54 = vrot.slane %v2410_v44, 4  ;;  %v3460_v27 = vrot.slane %v6834_v24, 2  ;;  %v1381_v41 = vshrl.u32 %v7513_v4, 16  ;;  %v8600_v24 = vld [vmem:[#allocation5_spill] sm:$0xff] }
  0x7c   : > { %v1384_v23 = vshll.u32 %v7513_v4, 16  ;;  %v1390_v12 = vshll.u32 %v7516_v60, 16  ;;  %v1394_v39 = vshrl.u32 %v7516_v60, 16 }
  0x7d   : > { %v2414_v1 = vsel %vm6897_vm4, %v2412_v54, %v2413_v6  ;;  %v1383_v55 = vrot.slane %v1381_v41, 4  ;;  %v7619_v6 = vcombine.low %v7513_v4, %v7516_v60  ;;  %v3462_v54 = vsel %vm717_vm0, %v3460_v27, 0  ;;  %v2653_v4 = vld [vmem:[%s8512_s1 + $0x10] sm:$0x3]  ;;  %v3455_v60 = vld [vmem:[%s8512_s1 + $0x18] sm:$0x3] }
  0x7e   : > { %v7531_v52 = vcombine.low %v2411_v29, %v2414_v1  ;;  %v1386_v58 = vrot.slane %v1384_v23, 5  ;;  %v1392_v21 = vrot.slane %v1390_v12, 5  ;;  %v1396_v43 = vrot.slane %v1394_v39, 4  ;;  %v8598_v29 = vld [vmem:[#allocation2_spill] sm:$0xff]  ;;  %v8606_v23 = vld [vmem:[#allocation15_spill] sm:$0xff] }
  0x7f   : > { %v2660_v1 = vsel %vm717_vm0, %v2658_v33, 0  ;;  %v8605_v41 = vld [vmem:[#allocation14_spill] sm:$0xff]  ;;  %v8608_v39 = vld [vmem:[#allocation19_spill] sm:$0xff] }
  0x80   : > { %5789 = vmatmul.mubr.msk.bf16.vlgmr.msra.gmra.mrb[0].mxu1 %vm668_vm3, %v6979_v14  ;;  %v1387_v37 = vor.u32 %v1386_v58, %v1383_v55  ;;  %v8607_v12 = vld [vmem:[#allocation18_spill] sm:$0xff]  ;;  %v8610_v58 = vld [vmem:[#allocation23_spill] sm:$0xff] }
  0x81   : > { %5653 = vmatmul.mubr.msk.bf16.vlgmr.msra.gmra.mrb[0].mxu0 %vm668_vm3, %v7438_v46  ;;  %5821 = vmatpush3.bf16.msra.mxu1 %v2211_v30  ;;  %v1397_v30 = vor.u32 %v1396_v43, %v1392_v21  ;;  %v8609_v55 = vld [vmem:[#allocation22_spill] sm:$0xff]  ;;  %v2824_v43 = vsel %vm717_vm0, %v2653_v4, 0 }
  0x82   : > { %5685 = vmatpush3.bf16.msra.mxu0 %v1184_v10  ;;  %5792 = vmatprep.mubr.msk.bf16.mxu1 %vm668_vm3, %v7023_v51  ;;  %v1400_v10 = vshll.u32 %v222_v56, 16 }
  0x83   : > { %5656 = vmatprep.mubr.msk.bf16.mxu0 %vm668_vm3, %v7446_v11  ;;  %6547 = vmatprep.subr.msk.bf16.mxu0 %vm717_vm0, %v1410_v59  ;;  %v1388_v59 = vrot.slane %v1387_v37, 4  ;;  %v2987_v37 = vld [vmem:[%s8512_s1 + $0x14] sm:$0x3] }
  0x84   : > { %6551 = vmatprep.subr.msk.bf16.mxu1 %vm717_vm0, %v2421_v45  ;;  %v1398_v45 = vrot.slane %v1397_v30, 4  ;;  %v1402_v40 = vrot.slane %v1400_v10, 5  ;;  %v3789_v30 = vld [vmem:[%s8512_s1 + $0x1c] sm:$0x3] }
  0x85   : > { %v1393_v22 = vsel %vm6954_vm7, %v1388_v59, %v1392_v21  ;;  %v3626_v21 = vsel %vm717_vm0, %v3455_v60, 0  ;;  %v6835_v10 = vld [vmem:[%s8512_s1 + $0x14] ss:$0 sps:$4 sm:$0xcc]  }
  0x86   : > { %v1403_v56 = vsel %vm6954_vm7, %v1398_v45, %v1402_v40  ;;  %v6836_v59 = vld [vmem:[%s8512_s1 + $0x1c] ss:$0 sps:$4 sm:$0xcc]   ;;  %v3791_v45 = vsel %vm717_vm0, %v3789_v30, 0  ;;  %v2997_v40 = vsel %vm717_vm0, %v2987_v37, 0 }
  0x87   : > { %v7615_v44 = vcombine.low %v1393_v22, %v1403_v56  ;;  %v3223_v22 = vrot.slane %v6835_v10, 2 }
  0x88   : > { %5793 = vmatmul.mubr.msk.bf16.gmra.mrb[4].mxu1 %vm668_vm3, %v7060_v32 }
  0x89   : > { %5657 = vmatmul.mubr.msk.bf16.gmra.mrb[4].mxu0 %vm668_vm3, %v7460_v16  ;;  %5796 = vmatprep.mubr.msk.bf16.mxu1 %vm668_vm3, %v7083_v62  ;;  %v3228_v56 = vsel %vm717_vm0, %v3223_v22, 0 }
  0x8a   : > { %5660 = vmatprep.mubr.msk.bf16.mxu0 %vm668_vm3, %v7464_v18 }
  0x90   : > { %5797 = vmatmul.mubr.msk.bf16.gmra.mrb[8].mxu1 %vm668_vm3, %v8589_v63 }
  0x91   : > { %5661 = vmatmul.mubr.msk.bf16.gmra.mrb[8].mxu0 %vm668_vm3, %v7476_v53  ;;  %5800 = vmatprep.mubr.msk.bf16.mxu1 %vm668_vm3, %v8590_v20 }
  0x92   : > { %5664 = vmatprep.mubr.msk.bf16.mxu0 %vm668_vm3, %v7376_v61 }
  0x98   : > { %5801 = vmatmul.mubr.msk.bf16.gmra.mrb[12].mxu1 %vm668_vm3, %v8591_v17 }
  0x99   : > { %5665 = vmatmul.mubr.msk.bf16.gmra.mrb[12].mxu0 %vm668_vm3, %v7382_v7  ;;  %5804 = vmatprep.mubr.msk.bf16.mxu1 %vm668_vm3, %v8592_v38 }
  0x9a   : > { %5668 = vmatprep.mubr.msk.bf16.mxu0 %vm668_vm3, %v7386_v26 }
  0xa0   : > { %5805 = vmatmul.mubr.msk.bf16.gmra.mrb[16].mxu1 %vm668_vm3, %v8593_v49 }
  0xa1   : > { %5669 = vmatmul.mubr.msk.bf16.gmra.mrb[16].mxu0 %vm668_vm3, %v7390_v25  ;;  %5808 = vmatprep.mubr.msk.bf16.mxu1 %vm668_vm3, %v8594_v57 }
  0xa2   : > { %5672 = vmatprep.mubr.msk.bf16.mxu0 %vm668_vm3, %v7398_v3 }
  0xa8   : > { %5809 = vmatmul.mubr.msk.bf16.gmra.mrb[20].mxu1 %vm668_vm3, %v8595_v31 }
  0xa9   : > { %5673 = vmatmul.mubr.msk.bf16.gmra.mrb[20].mxu0 %vm668_vm3, %v7402_v42  ;;  %5812 = vmatprep.mubr.msk.bf16.mxu1 %vm668_vm3, %v8596_v0 }
  0xaa   : > { %5676 = vmatprep.mubr.msk.bf16.mxu0 %vm668_vm3, %v7408_v28 }
  0xb0   : > { %5813 = vmatmul.mubr.msk.bf16.gmra.mrb[24].mxu1 %vm668_vm3, %v8597_v2 }
  0xb1   : > { %5677 = vmatmul.mubr.msk.bf16.gmra.mrb[24].mxu0 %vm668_vm3, %v7412_v36  ;;  %5816 = vmatprep.mubr.msk.bf16.mxu1 %vm668_vm3, %v7362_v35 }
  0xb2   : > { %5680 = vmatprep.mubr.msk.bf16.mxu0 %vm668_vm3, %v7416_v19 }
  0xb8   : > { %5817 = vmatmul.mubr.msk.bf16.gmra.mrb[28].mxu1 %vm668_vm3, %v7404_v47 }
  0xb9   : > { %5681 = vmatmul.mubr.msk.bf16.gmra.mrb[28].mxu0 %vm668_vm3, %v7420_v34  ;;  %5822 = vmatprep.mubr.msk.bf16.mxu1 %vm668_vm3, %v6979_v14 }
  0xba   : > { %5686 = vmatprep.mubr.msk.bf16.mxu0 %vm668_vm3, %v7438_v46 }
  0xc0   : > { %5823 = vmatmul.mubr.msk.bf16.vlgmr.msra.gmra.mrb[0].mxu1 %vm668_vm3, %v7023_v51 }
  0xc1   : > { %5687 = vmatmul.mubr.msk.bf16.vlgmr.msra.gmra.mrb[0].mxu0 %vm668_vm3, %v7446_v11  ;;  %5855 = vmatpush3.bf16.msra.mxu1 %v2426_v15  ;;  %v8601_v15 = vld [vmem:[#allocation6_spill] sm:$0xff] }
  0xc2   : > { %5719 = vmatpush3.bf16.msra.mxu0 %v1415_v13  ;;  %5826 = vmatprep.mubr.msk.bf16.mxu1 %vm668_vm3, %v7060_v32  ;;  %v8602_v13 = vld [vmem:[#allocation7_spill] sm:$0xff] }
  0xc3   : > { %5690 = vmatprep.mubr.msk.bf16.mxu0 %vm668_vm3, %v7460_v16  ;;  %6552 = vmatprep.subr.msk.bf16.mxu0 %vm717_vm0, %v2658_v33  ;;  %v8603_v33 = vld [vmem:[#allocation10_spill] sm:$0xff] }
  0xc4   : > { %6556 = vmatprep.subr.msk.bf16.mxu1 %vm717_vm0, %v3460_v27  ;;  %v8604_v27 = vld [vmem:[#allocation11_spill] sm:$0xff] }
  0xc8   : > { %5827 = vmatmul.mubr.msk.bf16.gmra.mrb[4].mxu1 %vm668_vm3, %v7083_v62 }
  0xc9   : > { %5691 = vmatmul.mubr.msk.bf16.gmra.mrb[4].mxu0 %vm668_vm3, %v7464_v18  ;;  %5830 = vmatprep.mubr.msk.bf16.mxu1 %vm668_vm3, %v8589_v63 }
  0xca   : > { %5694 = vmatprep.mubr.msk.bf16.mxu0 %vm668_vm3, %v7476_v53 }
  0xd0   : > { %5831 = vmatmul.mubr.msk.bf16.gmra.mrb[8].mxu1 %vm668_vm3, %v8590_v20 }
  0xd1   : > { %5695 = vmatmul.mubr.msk.bf16.gmra.mrb[8].mxu0 %vm668_vm3, %v7376_v61  ;;  %5834 = vmatprep.mubr.msk.bf16.mxu1 %vm668_vm3, %v8591_v17 }
  0xd2   : > { %5698 = vmatprep.mubr.msk.bf16.mxu0 %vm668_vm3, %v7382_v7 }
  0xd8   : > { %5835 = vmatmul.mubr.msk.bf16.gmra.mrb[12].mxu1 %vm668_vm3, %v8592_v38 }
  0xd9   : > { %5699 = vmatmul.mubr.msk.bf16.gmra.mrb[12].mxu0 %vm668_vm3, %v7386_v26  ;;  %5838 = vmatprep.mubr.msk.bf16.mxu1 %vm668_vm3, %v8593_v49 }
  0xda   : > { %5702 = vmatprep.mubr.msk.bf16.mxu0 %vm668_vm3, %v7390_v25 }
  0xe0   : > { %5839 = vmatmul.mubr.msk.bf16.gmra.mrb[16].mxu1 %vm668_vm3, %v8594_v57 }
  0xe1   : > { %5703 = vmatmul.mubr.msk.bf16.gmra.mrb[16].mxu0 %vm668_vm3, %v7398_v3  ;;  %5842 = vmatprep.mubr.msk.bf16.mxu1 %vm668_vm3, %v8595_v31 }
  0xe2   : > { %5706 = vmatprep.mubr.msk.bf16.mxu0 %vm668_vm3, %v7402_v42 }
  0xe8   : > { %5843 = vmatmul.mubr.msk.bf16.gmra.mrb[20].mxu1 %vm668_vm3, %v8596_v0 }
  0xe9   : > { %5707 = vmatmul.mubr.msk.bf16.gmra.mrb[20].mxu0 %vm668_vm3, %v7408_v28  ;;  %5846 = vmatprep.mubr.msk.bf16.mxu1 %vm668_vm3, %v8597_v2 }
  0xea   : > { %5710 = vmatprep.mubr.msk.bf16.mxu0 %vm668_vm3, %v7412_v36 }
  0xf0   : > { %5847 = vmatmul.mubr.msk.bf16.gmra.mrb[24].mxu1 %vm668_vm3, %v7362_v35 }
  0xf1   : > { %5711 = vmatmul.mubr.msk.bf16.gmra.mrb[24].mxu0 %vm668_vm3, %v7416_v19  ;;  %5850 = vmatprep.mubr.msk.bf16.mxu1 %vm668_vm3, %v7404_v47 }
  0xf2   : > { %5714 = vmatprep.mubr.msk.bf16.mxu0 %vm668_vm3, %v7420_v34 }
  0xf8   : > { %5851 = vmatmul.mubr.msk.bf16.gmra.mrb[28].mxu1 %vm668_vm3, %v7615_v44 }
  0xf9   : > { %5715 = vmatmul.mubr.msk.bf16.gmra.mrb[28].mxu0 %vm668_vm3, %v7619_v6  ;;  %5856 = vmatprep.mubr.msk.bf16.mxu1 %vm668_vm3, %v8598_v29 }
  0xfa   : > { %5720 = vmatprep.mubr.msk.bf16.mxu0 %vm668_vm3, %v6979_v14 }
 0x100   : > { %5857 = vmatmul.mubr.msk.bf16.vlgmr.msra.gmra.mrb[0].mxu1 %vm668_vm3, %v8599_v5 }
 0x101   : > { %5721 = vmatmul.mubr.msk.bf16.vlgmr.msra.gmra.mrb[0].mxu0 %vm668_vm3, %v7023_v51  ;;  %6025 = vmatpush3.bf16.msra.mxu1 %v3462_v54 }
 0x102   : > { %5889 = vmatpush3.bf16.msra.mxu0 %v2660_v1  ;;  %5860 = vmatprep.mubr.msk.bf16.mxu1 %vm668_vm3, %v8600_v24 }
 0x103   : > { %5724 = vmatprep.mubr.msk.bf16.mxu0 %vm668_vm3, %v7060_v32  ;;  %6553 = vmatprep.subr.msk.bf16.mxu0 %vm717_vm0, %v2653_v4 }
 0x104   : > { %6557 = vmatprep.subr.msk.bf16.mxu1 %vm717_vm0, %v3455_v60 }
 0x108   : > { %5861 = vmatmul.mubr.msk.bf16.gmra.mrb[4].mxu1 %vm668_vm3, %v8601_v15 }
 0x109   : > { %5725 = vmatmul.mubr.msk.bf16.gmra.mrb[4].mxu0 %vm668_vm3, %v7083_v62  ;;  %5864 = vmatprep.mubr.msk.bf16.mxu1 %vm668_vm3, %v8602_v13 }
 0x10a   : > { %5728 = vmatprep.mubr.msk.bf16.mxu0 %vm668_vm3, %v8589_v63 }
 0x110   : > { %5865 = vmatmul.mubr.msk.bf16.gmra.mrb[8].mxu1 %vm668_vm3, %v8603_v33 }
 0x111   : > { %5729 = vmatmul.mubr.msk.bf16.gmra.mrb[8].mxu0 %vm668_vm3, %v8590_v20  ;;  %5868 = vmatprep.mubr.msk.bf16.mxu1 %vm668_vm3, %v8604_v27 }
 0x112   : > { %5732 = vmatprep.mubr.msk.bf16.mxu0 %vm668_vm3, %v8591_v17 }
 0x118   : > { %5869 = vmatmul.mubr.msk.bf16.gmra.mrb[12].mxu1 %vm668_vm3, %v8605_v41 }
 0x119   : > { %5733 = vmatmul.mubr.msk.bf16.gmra.mrb[12].mxu0 %vm668_vm3, %v8592_v38  ;;  %5872 = vmatprep.mubr.msk.bf16.mxu1 %vm668_vm3, %v8606_v23 }
 0x11a   : > { %5736 = vmatprep.mubr.msk.bf16.mxu0 %vm668_vm3, %v8593_v49 }
 0x120   : > { %5873 = vmatmul.mubr.msk.bf16.gmra.mrb[16].mxu1 %vm668_vm3, %v8607_v12 }
 0x121   : > { %5737 = vmatmul.mubr.msk.bf16.gmra.mrb[16].mxu0 %vm668_vm3, %v8594_v57  ;;  %5876 = vmatprep.mubr.msk.bf16.mxu1 %vm668_vm3, %v8608_v39 }
 0x122   : > { %5740 = vmatprep.mubr.msk.bf16.mxu0 %vm668_vm3, %v8595_v31 }
 0x128   : > { %5877 = vmatmul.mubr.msk.bf16.gmra.mrb[20].mxu1 %vm668_vm3, %v8609_v55 }
 0x129   : > { %5741 = vmatmul.mubr.msk.bf16.gmra.mrb[20].mxu0 %vm668_vm3, %v8596_v0  ;;  %5880 = vmatprep.mubr.msk.bf16.mxu1 %vm668_vm3, %v8610_v58 }
 0x12a   : > { %5744 = vmatprep.mubr.msk.bf16.mxu0 %vm668_vm3, %v8597_v2 }
 0x130   : > { %5881 = vmatmul.mubr.msk.bf16.gmra.mrb[24].mxu1 %vm668_vm3, %v7364_v48 }
 0x131   : > { %5745 = vmatmul.mubr.msk.bf16.gmra.mrb[24].mxu0 %vm668_vm3, %v7362_v35  ;;  %5884 = vmatprep.mubr.msk.bf16.mxu1 %vm668_vm3, %v7394_v9 }
 0x132   : > { %5748 = vmatprep.mubr.msk.bf16.mxu0 %vm668_vm3, %v7404_v47 }
 0x138   : > { %5885 = vmatmul.mubr.msk.bf16.gmra.mrb[28].mxu1 %vm668_vm3, %v7531_v52 }
 0x139   : > { %5749 = vmatmul.mubr.msk.bf16.gmra.mrb[28].mxu0 %vm668_vm3, %v7615_v44  ;;  %6026 = vmatprep.mubr.msk.bf16.mxu1 %vm668_vm3, %v8598_v29 }
 0x13a   : > { %5890 = vmatprep.mubr.msk.bf16.mxu0 %vm668_vm3, %v6979_v14 }
 0x140   : > { %6027 = vmatmul.mubr.msk.bf16.vlgmr.msra.gmra.mrb[32].mxu1 %vm668_vm3, %v8599_v5 }
 0x141   : > { %5891 = vmatmul.mubr.msk.bf16.vlgmr.msra.gmra.mrb[32].mxu0 %vm668_vm3, %v7023_v51  ;;  %6059 = vmatpush3.bf16.msra.mxu1 %v3626_v21 }
 0x142   : > { %5923 = vmatpush3.bf16.msra.mxu0 %v2824_v43  ;;  %6030 = vmatprep.mubr.msk.bf16.mxu1 %vm668_vm3, %v8600_v24 }
 0x143   : > { %5894 = vmatprep.mubr.msk.bf16.mxu0 %vm668_vm3, %v7060_v32  ;;  %6554 = vmatprep.subr.msk.bf16.mxu0 %vm717_vm0, %v2987_v37 }
 0x144   : > { %6558 = vmatprep.subr.msk.bf16.mxu1 %vm717_vm0, %v3789_v30 }
 0x148   : > { %6031 = vmatmul.mubr.msk.bf16.gmra.mrb[36].mxu1 %vm668_vm3, %v8601_v15 }
 0x149   : > { %5895 = vmatmul.mubr.msk.bf16.gmra.mrb[36].mxu0 %vm668_vm3, %v7083_v62  ;;  %6034 = vmatprep.mubr.msk.bf16.mxu1 %vm668_vm3, %v8602_v13 }
 0x14a   : > { %5898 = vmatprep.mubr.msk.bf16.mxu0 %vm668_vm3, %v8589_v63 }
 0x150   : > { %6035 = vmatmul.mubr.msk.bf16.gmra.mrb[40].mxu1 %vm668_vm3, %v8603_v33 }
 0x151   : > { %5899 = vmatmul.mubr.msk.bf16.gmra.mrb[40].mxu0 %vm668_vm3, %v8590_v20  ;;  %6038 = vmatprep.mubr.msk.bf16.mxu1 %vm668_vm3, %v8604_v27 }
 0x152   : > { %5902 = vmatprep.mubr.msk.bf16.mxu0 %vm668_vm3, %v8591_v17 }
 0x158   : > { %6039 = vmatmul.mubr.msk.bf16.gmra.mrb[44].mxu1 %vm668_vm3, %v8605_v41 }
 0x159   : > { %5903 = vmatmul.mubr.msk.bf16.gmra.mrb[44].mxu0 %vm668_vm3, %v8592_v38  ;;  %6042 = vmatprep.mubr.msk.bf16.mxu1 %vm668_vm3, %v8606_v23 }
 0x15a   : > { %5906 = vmatprep.mubr.msk.bf16.mxu0 %vm668_vm3, %v8593_v49 }
 0x160   : > { %6043 = vmatmul.mubr.msk.bf16.gmra.mrb[48].mxu1 %vm668_vm3, %v8607_v12 }
 0x161   : > { %5907 = vmatmul.mubr.msk.bf16.gmra.mrb[48].mxu0 %vm668_vm3, %v8594_v57  ;;  %6046 = vmatprep.mubr.msk.bf16.mxu1 %vm668_vm3, %v8608_v39 }
 0x162   : > { %5910 = vmatprep.mubr.msk.bf16.mxu0 %vm668_vm3, %v8595_v31 }
 0x168   : > { %6047 = vmatmul.mubr.msk.bf16.gmra.mrb[52].mxu1 %vm668_vm3, %v8609_v55 }
 0x169   : > { %5911 = vmatmul.mubr.msk.bf16.gmra.mrb[52].mxu0 %vm668_vm3, %v8596_v0  ;;  %6050 = vmatprep.mubr.msk.bf16.mxu1 %vm668_vm3, %v8610_v58 }
 0x16a   : > { %5914 = vmatprep.mubr.msk.bf16.mxu0 %vm668_vm3, %v8597_v2 }
 0x170   : > { %6051 = vmatmul.mubr.msk.bf16.gmra.mrb[56].mxu1 %vm668_vm3, %v7364_v48 }
 0x171   : > { %5915 = vmatmul.mubr.msk.bf16.gmra.mrb[56].mxu0 %vm668_vm3, %v7362_v35  ;;  %6054 = vmatprep.mubr.msk.bf16.mxu1 %vm668_vm3, %v7394_v9 }
 0x172   : > { %5918 = vmatprep.mubr.msk.bf16.mxu0 %vm668_vm3, %v7404_v47 }
 0x178   : > { %6055 = vmatmul.mubr.msk.bf16.gmra.mrb[60].mxu1 %vm668_vm3, %v7531_v52 }
 0x179   : > { %5919 = vmatmul.mubr.msk.bf16.gmra.mrb[60].mxu0 %vm668_vm3, %v7615_v44  ;;  %6060 = vmatprep.mubr.msk.bf16.mxu1 %vm668_vm3, %v6979_v14  ;;  %v4001_v14 = vrot.slane %v6836_v59, 2 }
 0x17a   : > { %5924 = vmatprep.mubr.msk.bf16.mxu0 %vm668_vm3, %v7438_v46 }
 0x17b   : > { %v4006_v46 = vsel %vm717_vm0, %v4001_v14, 0 }
 0x180   : > { %6061 = vmatmul.mubr.msk.bf16.vlgmr.msra.gmra.mrb[32].mxu1 %vm668_vm3, %v7023_v51 }
 0x181   : > { %5925 = vmatmul.mubr.msk.bf16.vlgmr.msra.gmra.mrb[32].mxu0 %vm668_vm3, %v7446_v11  ;;  %6093 = vmatpush3.bf16.msra.mxu1 %v3791_v45 }
 0x182   : > { %5957 = vmatpush3.bf16.msra.mxu0 %v2997_v40  ;;  %6064 = vmatprep.mubr.msk.bf16.mxu1 %vm668_vm3, %v7060_v32 }
 0x183   : > { %5928 = vmatprep.mubr.msk.bf16.mxu0 %vm668_vm3, %v7460_v16  ;;  %6555 = vmatprep.subr.msk.bf16.mxu0 %vm717_vm0, %v3223_v22  ;;  %v7908_v22 = vld [vmem:[%s6908_s25 + $0xcc] sm:$0xf] }
 0x184   : > { %6559 = vmatprep.subr.msk.bf16.mxu1 %vm717_vm0, %v4001_v14 }
 0x188   : > { %6065 = vmatmul.mubr.msk.bf16.gmra.mrb[36].mxu1 %vm668_vm3, %v7083_v62 }
 0x189   : > { %5929 = vmatmul.mubr.msk.bf16.gmra.mrb[36].mxu0 %vm668_vm3, %v7464_v18  ;;  %6068 = vmatprep.mubr.msk.bf16.mxu1 %vm668_vm3, %v8589_v63 }
 0x18a   : > { %5932 = vmatprep.mubr.msk.bf16.mxu0 %vm668_vm3, %v7476_v53 }
 0x190   : > { %6069 = vmatmul.mubr.msk.bf16.gmra.mrb[40].mxu1 %vm668_vm3, %v8590_v20 }
 0x191   : > { %5933 = vmatmul.mubr.msk.bf16.gmra.mrb[40].mxu0 %vm668_vm3, %v7376_v61  ;;  %6072 = vmatprep.mubr.msk.bf16.mxu1 %vm668_vm3, %v8591_v17 }
 0x192   : > { %5936 = vmatprep.mubr.msk.bf16.mxu0 %vm668_vm3, %v7382_v7 }
 0x198   : > { %6073 = vmatmul.mubr.msk.bf16.gmra.mrb[44].mxu1 %vm668_vm3, %v8592_v38 }
 0x199   : > { %5937 = vmatmul.mubr.msk.bf16.gmra.mrb[44].mxu0 %vm668_vm3, %v7386_v26  ;;  %6076 = vmatprep.mubr.msk.bf16.mxu1 %vm668_vm3, %v8593_v49 }
 0x19a   : > { %5940 = vmatprep.mubr.msk.bf16.mxu0 %vm668_vm3, %v7390_v25 }
 0x1a0   : > { %6077 = vmatmul.mubr.msk.bf16.gmra.mrb[48].mxu1 %vm668_vm3, %v8594_v57 }
 0x1a1   : > { %5941 = vmatmul.mubr.msk.bf16.gmra.mrb[48].mxu0 %vm668_vm3, %v7398_v3  ;;  %6080 = vmatprep.mubr.msk.bf16.mxu1 %vm668_vm3, %v8595_v31 }
 0x1a2   : > { %5944 = vmatprep.mubr.msk.bf16.mxu0 %vm668_vm3, %v7402_v42 }
 0x1a8   : > { %6081 = vmatmul.mubr.msk.bf16.gmra.mrb[52].mxu1 %vm668_vm3, %v8596_v0 }
 0x1a9   : > { %5945 = vmatmul.mubr.msk.bf16.gmra.mrb[52].mxu0 %vm668_vm3, %v7408_v28  ;;  %6084 = vmatprep.mubr.msk.bf16.mxu1 %vm668_vm3, %v8597_v2 }
 0x1aa   : > { %5948 = vmatprep.mubr.msk.bf16.mxu0 %vm668_vm3, %v7412_v36 }
 0x1b0   : > { %6085 = vmatmul.mubr.msk.bf16.gmra.mrb[56].mxu1 %vm668_vm3, %v7362_v35 }
 0x1b1   : > { %5949 = vmatmul.mubr.msk.bf16.gmra.mrb[56].mxu0 %vm668_vm3, %v7416_v19  ;;  %6088 = vmatprep.mubr.msk.bf16.mxu1 %vm668_vm3, %v7404_v47 }
 0x1b2   : > { %5952 = vmatprep.mubr.msk.bf16.mxu0 %vm668_vm3, %v7420_v34 }
 0x1b8   : > { %6089 = vmatmul.mubr.msk.bf16.gmra.mrb[60].mxu1 %vm668_vm3, %v7615_v44 }
 0x1b9   : > { %5953 = vmatmul.mubr.msk.bf16.gmra.mrb[60].mxu0 %vm668_vm3, %v7619_v6  ;;  %6094 = vmatprep.mubr.msk.bf16.mxu1 %vm668_vm3, %v7023_v51 }
 0x1ba   : > { %5958 = vmatprep.mubr.msk.bf16.mxu0 %vm668_vm3, %v7446_v11  ;;  %v7880_v11 = vld [vmem:[%s8513_s2] ss:$0 sm:$0xff] }
 0x1c0   : > { %6095 = vmatmul.mubr.msk.bf16.vlgmr.msra.gmra.mrb[32].mxu1 %vm668_vm3, %v7060_v32 }
 0x1c1   : > { %5959 = vmatmul.mubr.msk.bf16.vlgmr.msra.gmra.mrb[32].mxu0 %vm668_vm3, %v7460_v16  ;;  %6127 = vmatpush3.bf16.msra.mxu1 %v4006_v46 }
 0x1c2   : > { %5991 = vmatpush3.bf16.msra.mxu0 %v3228_v56  ;;  %6098 = vmatprep.mubr.msk.bf16.mxu1 %vm668_vm3, %v7083_v62 }
 0x1c3   : > { %5962 = vmatprep.mubr.msk.bf16.mxu0 %vm668_vm3, %v7464_v18 }
 0x1c8   : > { %6099 = vmatmul.mubr.msk.bf16.gmra.mrb[36].mxu1 %vm668_vm3, %v8589_v63 }
 0x1c9   : > { %5963 = vmatmul.mubr.msk.bf16.gmra.mrb[36].mxu0 %vm668_vm3, %v7476_v53  ;;  %6102 = vmatprep.mubr.msk.bf16.mxu1 %vm668_vm3, %v8590_v20 }
 0x1ca   : > { %5966 = vmatprep.mubr.msk.bf16.mxu0 %vm668_vm3, %v7376_v61 }
 0x1d0   : > { %6103 = vmatmul.mubr.msk.bf16.gmra.mrb[40].mxu1 %vm668_vm3, %v8591_v17 }
 0x1d1   : > { %5967 = vmatmul.mubr.msk.bf16.gmra.mrb[40].mxu0 %vm668_vm3, %v7382_v7  ;;  %6106 = vmatprep.mubr.msk.bf16.mxu1 %vm668_vm3, %v8592_v38 }
 0x1d2   : > { %5970 = vmatprep.mubr.msk.bf16.mxu0 %vm668_vm3, %v7386_v26 }
 0x1d3   : > { %v5858_v16 = vpop.f32.mrb[0].mxu1 }
 0x1d4   : > { %v2462_v18 = vpop.f32.mrb[1].mxu1  ;;  %v7882_v61 = vpop.f32.mrb[0].mxu0  ;;  %v2623_v7 = vadd.f32 %v5858_v16, %v7880_v11  ;;  %v7916_v16 = vld [vmem:[%s6908_s25 + $0xd0] sm:$0xf] }
 0x1d5   : > { %v5859_v53 = vpop.f32.mrb[2].mxu1  ;;  %v7884_v29 = vpop.f32.mrb[1].mxu0  ;;  %v2621_v26 = vadd.f32 %v7880_v11, %v2462_v18  ;;  %v5174_v50 = vcombine.low %v7908_v22, %v7916_v16 }
 0x1d6   : > { %v2624_v54 = vadd.f32 %v5859_v53, %v7880_v11  ;;  %v2465_v1 = vpop.f32.mrb[3].mxu1  ;;  %v7888_v4 = vpop.f32.mrb[2].mxu0 }
 0x1d7   : > { %v2622_v60 = vadd.f32 %v7880_v11, %v2465_v1  ;;  %v7892_v21 = vpop.f32.mrb[3].mxu0 }
 0x1d8   : > { %6107 = vmatmul.mubr.msk.bf16.gmra.mrb[44].mxu1 %vm668_vm3, %v8593_v49  ;;  %v6572_v43 = vpack.i.bf16 %v2624_v54, %v2623_v7  ;;  %v3194_v54 = vshrl.u32 %v7908_v22, 16 }
 0x1d9   : > { %v6577_v37 = vpack.i.bf16 %v2622_v60, %v2621_v26  ;;  %5971 = vmatmul.mubr.msk.bf16.gmra.mrb[44].mxu0 %vm668_vm3, %v7390_v25  ;;  %6110 = vmatprep.mubr.msk.bf16.mxu1 %vm668_vm3, %v8594_v57  ;;  %v3197_v26 = vshll.u32 %v7908_v22, 16  ;;  %v3203_v60 = vshll.u32 %v7916_v16, 16 }
 0x1da   : > { %6573 = vrot.lane.b32.xlu0 %v6572_v43, %s6847_s28  ;;  %5974 = vmatprep.mubr.msk.bf16.mxu0 %vm668_vm3, %v7398_v3  ;;  %v3207_v43 = vshrl.u32 %v7916_v16, 16 }
 0x1db   : > { %v5862_v30 = vpop.f32.mrb[4].mxu1 }
 0x1dc   : > { %v2478_v10 = vpop.f32.mrb[5].mxu1  ;;  %v7903_v59 = vpop.f32.mrb[4].mxu0  ;;  %v2627_v25 = vadd.f32 %v5862_v30, %v7880_v11 }
 0x1dd   : > { %v5863_v45 = vpop.f32.mrb[6].mxu1  ;;  %v7905_v40 = vpop.f32.mrb[5].mxu0  ;;  %v2625_v3 = vadd.f32 %v7880_v11, %v2478_v10 }
 0x1de   : > { %8611 = vst [vmem:[#allocation4_spill] sm:$0xff] %v7905_v40  ;;  %v2628_v14 = vadd.f32 %v5863_v45, %v7880_v11  ;;  %6578 = vrot.lane.b32.xlu0 %v6577_v37, %s6847_s28  ;;  %v2481_v46 = vpop.f32.mrb[7].mxu1  ;;  %v7913_v56 = vpop.f32.mrb[6].mxu0 }
 0x1df   : > { %8612 = vst [vmem:[#allocation8_spill] sm:$0xff] %v7913_v56  ;;  %v2626_v18 = vadd.f32 %v7880_v11, %v2481_v46  ;;  %v7920_v53 = vpop.f32.mrb[7].mxu0  ;;  %v3205_v46 = vrot.slane %v3203_v60, 5 }
 0x1e0   : > { %8613 = vst [vmem:[#allocation9_spill] sm:$0xff] %v7920_v53  ;;  %6111 = vmatmul.mubr.msk.bf16.gmra.mrb[48].mxu1 %vm668_vm3, %v8595_v31  ;;  %v6582_v7 = vpack.i.bf16 %v2628_v14, %v2627_v25  ;;  %v3196_v25 = vrot.slane %v3194_v54, 4  ;;  %v3199_v14 = vrot.slane %v3197_v26, 5 }
 0x1e1   : > { %v6587_v1 = vpack.i.bf16 %v2626_v18, %v2625_v3  ;;  %5975 = vmatmul.mubr.msk.bf16.gmra.mrb[48].mxu0 %vm668_vm3, %v7402_v42  ;;  %6114 = vmatprep.mubr.msk.bf16.mxu1 %vm668_vm3, %v8596_v0  ;;  %v3209_v3 = vrot.slane %v3207_v43, 4 }
 0x1e2   : > { %6583 = vrot.lane.b32.xlu1 %v6582_v7, %s6847_s28  ;;  %5978 = vmatprep.mubr.msk.bf16.mxu0 %vm668_vm3, %v7408_v28  ;;  %v7945_v28 = vld [vmem:[%s6908_s25 + $0xd4] sm:$0x1]  ;;  %s6848_s25 = smov 24  }
 0x1e3   : > { %v5866_v37 = vpop.f32.mrb[8].mxu1  ;;  %v3210_v60 = vor.u32 %v3209_v3, %v3205_v46  ;;  %v3213_v43 = vshll.u32 %v7945_v28, 16 }
 0x1e4   : > { %v2494_v30 = vpop.f32.mrb[9].mxu1  ;;  %v7935_v10 = vpop.f32.mrb[8].mxu0  ;;  %v2631_v18 = vadd.f32 %v5866_v37, %v7880_v11 }
 0x1e5   : > { %8614 = vst [vmem:[#allocation12_spill] sm:$0xff] %v7935_v10  ;;  %v5867_v42 = vpop.f32.mrb[10].mxu1  ;;  %v7937_v45 = vpop.f32.mrb[9].mxu0  ;;  %v2629_v10 = vadd.f32 %v7880_v11, %v2494_v30 }
 0x1e6   : > { %8615 = vst [vmem:[#allocation13_spill] sm:$0xff] %v7937_v45  ;;  %v2632_v53 = vadd.f32 %v5867_v42, %v7880_v11  ;;  %6588 = vrot.lane.b32.xlu1 %v6587_v1, %s6847_s28  ;;  %v2497_v7 = vpop.f32.mrb[11].mxu1  ;;  %v7942_v40 = vpop.f32.mrb[10].mxu0  ;;  %v3200_v1 = vor.u32 %v3199_v14, %v3196_v25  ;;  %v3211_v42 = vrot.slane %v3210_v60, 4  ;;  %v3215_v25 = vrot.slane %v3213_v43, 5 }
 0x1e7   : > { %v2630_v56 = vadd.f32 %v7880_v11, %v2497_v7  ;;  %v7949_v45 = vpop.f32.mrb[11].mxu0 }
 0x1e8   : > { %v6592_v54 = vpack.i.bf16 %v2632_v53, %v2631_v18  ;;  %6115 = vmatmul.mubr.msk.bf16.gmra.mrb[52].mxu1 %vm668_vm3, %v8597_v2  ;;  %v3216_v43 = vsel %vm6954_vm7, %v3211_v42, %v3215_v25 }
 0x1e9   : > { %v6597_v26 = vpack.i.bf16 %v2630_v56, %v2629_v10  ;;  %5979 = vmatmul.mubr.msk.bf16.gmra.mrb[52].mxu0 %vm668_vm3, %v7412_v36  ;;  %6118 = vmatprep.mubr.msk.bf16.mxu1 %vm668_vm3, %v7362_v35  ;;  %v3201_v10 = vrot.slane %v3200_v1, 4 }
 0x1ea   : > { %6593 = vrot.lane.b32.xlu1 %v6592_v54, %s6847_s28  ;;  %5982 = vmatprep.mubr.msk.bf16.mxu0 %vm668_vm3, %v7416_v19 }
 0x1eb   : > { %6598 = vrot.lane.b32.xlu0 %v6597_v26, %s6847_s28  ;;  %v5870_v53 = vpop.f32.mrb[12].mxu1  ;;  %v3206_v60 = vsel %vm6954_vm7, %v3201_v10, %v3205_v46 }
 0x1ec   : > { %v2510_v37 = vpop.f32.mrb[13].mxu1  ;;  %v7962_v56 = vpop.f32.mrb[12].mxu0  ;;  %v2635_v14 = vadd.f32 %v5870_v53, %v7880_v11 }
 0x1ed   : > { %8616 = vst [vmem:[#allocation16_spill] sm:$0xff] %v7962_v56  ;;  %v5871_v30 = vpop.f32.mrb[14].mxu1  ;;  %v7964_v36 = vpop.f32.mrb[13].mxu0  ;;  %v2633_v19 = vadd.f32 %v7880_v11, %v2510_v37 }
 0x1ee   : > { %v2636_v3 = vadd.f32 %v5871_v30, %v7880_v11  ;;  %v2513_v18 = vpop.f32.mrb[15].mxu1  ;;  %v7968_v7 = vpop.f32.mrb[14].mxu0 }
 0x1ef   : > { %v2634_v54 = vadd.f32 %v7880_v11, %v2513_v18  ;;  %v7972_v26 = vpop.f32.mrb[15].mxu0 }
 0x1f0   : > { %v6602_v56 = vpack.i.bf16 %v2636_v3, %v2635_v14  ;;  %6119 = vmatmul.mubr.msk.bf16.gmra.mrb[56].mxu1 %vm668_vm3, %v7404_v47 }
 0x1f1   : > { %v6607_v1 = vpack.i.bf16 %v2634_v54, %v2633_v19  ;;  %5983 = vmatmul.mubr.msk.bf16.gmra.mrb[56].mxu0 %vm668_vm3, %v7420_v34  ;;  %6122 = vmatprep.mubr.msk.bf16.mxu1 %vm668_vm3, %v7615_v44  ;;  %v7990_v34 = vcombine.low %v3206_v60, %v3216_v43 }
 0x1f2   : > { %6603 = vrot.lane.b32.xlu1 %v6602_v56, %s6847_s28  ;;  %5986 = vmatprep.mubr.msk.bf16.mxu0 %vm668_vm3, %v7619_v6 }
 0x1f3   : > { %6608 = vrot.lane.b32.xlu0 %v6607_v1, %s6847_s28  ;;  %v5874_v53 = vpop.f32.mrb[16].mxu1 }
 0x1f4   : > { %v2526_v37 = vpop.f32.mrb[17].mxu1  ;;  %v7988_v30 = vpop.f32.mrb[16].mxu0  ;;  %v2639_v46 = vadd.f32 %v5874_v53, %v7880_v11 }
 0x1f5   : > { %v5875_v14 = vpop.f32.mrb[18].mxu1  ;;  %v7992_v3 = vpop.f32.mrb[17].mxu0  ;;  %v2637_v42 = vadd.f32 %v7880_v11, %v2526_v37 }
 0x1f6   : > { %v2640_v56 = vadd.f32 %v5875_v14, %v7880_v11  ;;  %v2529_v10 = vpop.f32.mrb[19].mxu1  ;;  %v7998_v6 = vpop.f32.mrb[18].mxu0 }
 0x1f7   : > { %v2638_v25 = vadd.f32 %v7880_v11, %v2529_v10  ;;  %v8002_v18 = vpop.f32.mrb[19].mxu0 }
 0x1f8   : > { %v6612_v19 = vpack.i.bf16 %v2640_v56, %v2639_v46  ;;  %6123 = vmatmul.mubr.msk.bf16.gmra.mrb[60].mxu1 %vm668_vm3, %v7990_v34 }
 0x1f9   : > { %v6617_v54 = vpack.i.bf16 %v2638_v25, %v2637_v42  ;;  %5987 = vmatmul.mubr.msk.bf16.gmra.mrb[60].mxu0 %vm668_vm3, %v5174_v50  ;;  %6128 = vmatprep.mubr.msk.bf16.mxu1 %vm668_vm3, %v8599_v5 }
 0x1fa   : > { %6613 = vrot.lane.b32.xlu1 %v6612_v19, %s6847_s28  ;;  %5992 = vmatprep.mubr.msk.bf16.mxu0 %vm668_vm3, %v7023_v51 }
 0x1fb   : > { %6618 = vrot.lane.b32.xlu0 %v6617_v54, %s6847_s28  ;;  %v5878_v1 = vpop.f32.mrb[20].mxu1 }
 0x1fc   : > { %v2542_v60 = vpop.f32.mrb[21].mxu1  ;;  %v8013_v43 = vpop.f32.mrb[20].mxu0  ;;  %v2643_v14 = vadd.f32 %v5878_v1, %v7880_v11 }
 0x1fd   : > { %v5879_v53 = vpop.f32.mrb[22].mxu1  ;;  %v8015_v37 = vpop.f32.mrb[21].mxu0  ;;  %v2641_v56 = vadd.f32 %v7880_v11, %v2542_v60 }
 0x1fe   : > { %v2644_v50 = vadd.f32 %v5879_v53, %v7880_v11  ;;  %v2545_v46 = vpop.f32.mrb[23].mxu1  ;;  %v8019_v5 = vpop.f32.mrb[22].mxu0 }
 0x1ff   : > { %v2642_v51 = vadd.f32 %v7880_v11, %v2545_v46  ;;  %v8023_v10 = vpop.f32.mrb[23].mxu0 }
 0x200   : > { %v6622_v42 = vpack.i.bf16 %v2644_v50, %v2643_v14  ;;  %6129 = vmatmul.mubr.msk.bf16.vlgmr.msra.gmra.mrb[32].mxu1 %vm668_vm3, %v8600_v24 }
 0x201   : > { %v6627_v25 = vpack.i.bf16 %v2642_v51, %v2641_v56  ;;  %5993 = vmatmul.mubr.msk.bf16.vlgmr.msra.gmra.mrb[32].mxu0 %vm668_vm3, %v7060_v32  ;;  %6132 = vmatprep.mubr.msk.bf16.mxu1 %vm668_vm3, %v8601_v15 }
 0x202   : > { %6623 = vrot.lane.b32.xlu1 %v6622_v42, %s6847_s28  ;;  %5996 = vmatprep.mubr.msk.bf16.mxu0 %vm668_vm3, %v7083_v62 }
 0x203   : > { %6628 = vrot.lane.b32.xlu0 %v6627_v25, %s6847_s28  ;;  %v5882_v19 = vpop.f32.mrb[24].mxu1 }
 0x204   : > { %v2558_v54 = vpop.f32.mrb[25].mxu1  ;;  %v8035_v1 = vpop.f32.mrb[24].mxu0  ;;  %v2647_v53 = vadd.f32 %v5882_v19, %v7880_v11 }
 0x205   : > { %v5883_v60 = vpop.f32.mrb[26].mxu1  ;;  %v8037_v24 = vpop.f32.mrb[25].mxu0  ;;  %v2645_v50 = vadd.f32 %v7880_v11, %v2558_v54 }
 0x206   : > { %v2648_v32 = vadd.f32 %v5883_v60, %v7880_v11  ;;  %v2561_v14 = vpop.f32.mrb[27].mxu1  ;;  %v8041_v15 = vpop.f32.mrb[26].mxu0 }
 0x207   : > { %v2646_v62 = vadd.f32 %v7880_v11, %v2561_v14  ;;  %v8045_v46 = vpop.f32.mrb[27].mxu0 }
 0x208   : > { %v6632_v56 = vpack.i.bf16 %v2648_v32, %v2647_v53  ;;  %6133 = vmatmul.mubr.msk.bf16.gmra.mrb[36].mxu1 %vm668_vm3, %v8602_v13 }
 0x209   : > { %v6637_v51 = vpack.i.bf16 %v2646_v62, %v2645_v50  ;;  %5997 = vmatmul.mubr.msk.bf16.gmra.mrb[36].mxu0 %vm668_vm3, %v8589_v63  ;;  %6136 = vmatprep.mubr.msk.bf16.mxu1 %vm668_vm3, %v8603_v33 }
 0x20a   : > { %6633 = vrot.lane.b32.xlu1 %v6632_v56, %s6847_s28  ;;  %6000 = vmatprep.mubr.msk.bf16.mxu0 %vm668_vm3, %v8590_v20 }
 0x20b   : > { %6638 = vrot.lane.b32.xlu0 %v6637_v51, %s6847_s28  ;;  %v5886_v42 = vpop.f32.mrb[28].mxu1 }
 0x20c   : > { %v2574_v25 = vpop.f32.mrb[29].mxu1  ;;  %v8057_v19 = vpop.f32.mrb[28].mxu0  ;;  %v2651_v60 = vadd.f32 %v5886_v42, %v7880_v11 }
 0x20d   : > { %v5887_v54 = vpop.f32.mrb[30].mxu1  ;;  %v8059_v13 = vpop.f32.mrb[29].mxu0  ;;  %v2649_v32 = vadd.f32 %v7880_v11, %v2574_v25 }
 0x20e   : > { %v2652_v63 = vadd.f32 %v5887_v54, %v7880_v11  ;;  %v2577_v53 = vpop.f32.mrb[31].mxu1  ;;  %v8063_v33 = vpop.f32.mrb[30].mxu0 }
 0x20f   : > { %v2650_v20 = vadd.f32 %v7880_v11, %v2577_v53  ;;  %v8067_v14 = vpop.f32.mrb[31].mxu0 }
 0x210   : > { %v6642_v50 = vpack.i.bf16 %v2652_v63, %v2651_v60  ;;  %6137 = vmatmul.mubr.msk.bf16.gmra.mrb[40].mxu1 %vm668_vm3, %v8604_v27 }
 0x211   : > { %v6647_v62 = vpack.i.bf16 %v2650_v20, %v2649_v32  ;;  %6001 = vmatmul.mubr.msk.bf16.gmra.mrb[40].mxu0 %vm668_vm3, %v8591_v17  ;;  %6140 = vmatprep.mubr.msk.bf16.mxu1 %vm668_vm3, %v8605_v41  ;;  %v3990_v17 = vrot.slane %v7916_v16, 5 }
 0x212   : > { %6643 = vrot.lane.b32.xlu1 %v6642_v50, %s6847_s28  ;;  %6004 = vmatprep.mubr.msk.bf16.mxu0 %vm668_vm3, %v8592_v38  ;;  %v5258_v38 = vrot.slane %v7908_v22, 9 }
 0x213   : > { %6648 = vrot.lane.b32.xlu0 %v6647_v62, %s6847_s28 }
 0x218   : > { %6141 = vmatmul.mubr.msk.bf16.gmra.mrb[44].mxu1 %vm668_vm3, %v8606_v23 }
 0x219   : > { %6005 = vmatmul.mubr.msk.bf16.gmra.mrb[44].mxu0 %vm668_vm3, %v8593_v49  ;;  %6144 = vmatprep.mubr.msk.bf16.mxu1 %vm668_vm3, %v8607_v12  ;;  %v3992_v49 = vrot.slane %v3990_v17, 4 }
 0x21a   : > { %6008 = vmatprep.mubr.msk.bf16.mxu0 %vm668_vm3, %v8594_v57  ;;  %v3993_v57 = vrot.slane %v7945_v28, 5 }
 0x220   : > { %6145 = vmatmul.mubr.msk.bf16.gmra.mrb[48].mxu1 %vm668_vm3, %v8608_v39 }
 0x221   : > { %6009 = vmatmul.mubr.msk.bf16.gmra.mrb[48].mxu0 %vm668_vm3, %v8595_v31  ;;  %6148 = vmatprep.mubr.msk.bf16.mxu1 %vm668_vm3, %v8609_v55 }
 0x222   : > { %6012 = vmatprep.mubr.msk.bf16.mxu0 %vm668_vm3, %v8596_v0 }
 0x228   : > { %6149 = vmatmul.mubr.msk.bf16.gmra.mrb[52].mxu1 %vm668_vm3, %v8610_v58 }
 0x229   : > { %6013 = vmatmul.mubr.msk.bf16.gmra.mrb[52].mxu0 %vm668_vm3, %v8597_v2  ;;  %6152 = vmatprep.mubr.msk.bf16.mxu1 %vm668_vm3, %v7364_v48  ;;  %v3991_v48 = vsel %vm6897_vm4, %v5258_v38, %v3990_v17 }
 0x22a   : > { %6016 = vmatprep.mubr.msk.bf16.mxu0 %vm668_vm3, %v7362_v35  ;;  %v3994_v35 = vsel %vm6897_vm4, %v3992_v49, %v3993_v57 }
 0x22b   : > { %v5259_v31 = vcombine.low %v3991_v48, %v3994_v35 }
 0x230   : > { %6153 = vmatmul.mubr.msk.bf16.gmra.mrb[56].mxu1 %vm668_vm3, %v7394_v9 }
 0x231   : > { %6017 = vmatmul.mubr.msk.bf16.gmra.mrb[56].mxu0 %vm668_vm3, %v7404_v47  ;;  %6156 = vmatprep.mubr.msk.bf16.mxu1 %vm668_vm3, %v7531_v52 }
 0x232   : > { %6020 = vmatprep.mubr.msk.bf16.mxu0 %vm668_vm3, %v7615_v44 }
 0x238   : > { %6157 = vmatmul.mubr.msk.bf16.gmra.mrb[60].mxu1 %vm668_vm3, %v5259_v31 }
 0x239   : > { %6021 = vmatmul.mubr.msk.bf16.gmra.mrb[60].mxu0 %vm668_vm3, %v7990_v34 }
 0x2d3   : > { %v6130_v9 = vpop.f32.mrb[32].mxu1 }
 0x2d4   : > { %v4042_v47 = vpop.f32.mrb[33].mxu1  ;;  %v5994_v0 = vpop.f32.mrb[32].mxu0  ;;  %v4203_v27 = vadd.f32 %v6130_v9, %v7880_v11 }
 0x2d5   : > { %v6131_v2 = vpop.f32.mrb[34].mxu1  ;;  %v3264_v52 = vpop.f32.mrb[33].mxu0  ;;  %v4201_v12 = vadd.f32 %v7880_v11, %v4042_v47  ;;  %v3425_v39 = vadd.f32 %v5994_v0, %v7880_v11 }
 0x2d6   : > { %v4204_v41 = vadd.f32 %v6131_v2, %v7880_v11  ;;  %v4045_v8 = vpop.f32.mrb[35].mxu1  ;;  %v5995_v23 = vpop.f32.mrb[34].mxu0  ;;  %v3423_v16 = vadd.f32 %v7880_v11, %v3264_v52 }
 0x2d7   : > { %v4202_v44 = vadd.f32 %v7880_v11, %v4045_v8  ;;  %v3426_v55 = vadd.f32 %v5995_v23, %v7880_v11  ;;  %v3267_v58 = vpop.f32.mrb[35].mxu0 }
 0x2d8   : > { %v6652_v22 = vpack.i.bf16 %v4204_v41, %v4203_v27  ;;  %v3424_v28 = vadd.f32 %v7880_v11, %v3267_v58 }
 0x2d9   : > { %v6657_v34 = vpack.i.bf16 %v4202_v44, %v4201_v12  ;;  %v6662_v56 = vpack.i.bf16 %v3426_v55, %v3425_v39 }
 0x2da   : > { %6653 = vrot.lane.b32.xlu1 %v6652_v22, %s6848_s25  ;;  %v6667_v51 = vpack.i.bf16 %v3424_v28, %v3423_v16 }
 0x2db   : > { %v6134_v42 = vpop.f32.mrb[36].mxu1  ;;  %6658 = vrot.lane.b32.xlu0 %v6657_v34, %s6848_s25 }
 0x2dc   : > { %v4058_v25 = vpop.f32.mrb[37].mxu1  ;;  %v5998_v54 = vpop.f32.mrb[36].mxu0  ;;  %v4207_v53 = vadd.f32 %v6134_v42, %v7880_v11 }
 0x2dd   : > { %v6135_v60 = vpop.f32.mrb[38].mxu1  ;;  %v3280_v63 = vpop.f32.mrb[37].mxu0  ;;  %v4205_v62 = vadd.f32 %v7880_v11, %v4058_v25  ;;  %v3429_v38 = vadd.f32 %v5998_v54, %v7880_v11 }
 0x2de   : > { %v4208_v32 = vadd.f32 %v6135_v60, %v7880_v11  ;;  %v4061_v20 = vpop.f32.mrb[39].mxu1  ;;  %6663 = vrot.lane.b32.xlu1 %v6662_v56, %s6849_s29  ;;  %v5999_v50 = vpop.f32.mrb[38].mxu0  ;;  %v3427_v35 = vadd.f32 %v7880_v11, %v3280_v63 }
 0x2df   : > { %v4206_v17 = vadd.f32 %v7880_v11, %v4061_v20  ;;  %6668 = vrot.lane.b32.xlu0 %v6667_v51, %s6849_s29  ;;  %v3430_v49 = vadd.f32 %v5999_v50, %v7880_v11  ;;  %v3283_v57 = vpop.f32.mrb[39].mxu0 }
 0x2e0   : > { %v6672_v48 = vpack.i.bf16 %v4208_v32, %v4207_v53  ;;  %v3428_v31 = vadd.f32 %v7880_v11, %v3283_v57 }
 0x2e1   : > { %v6677_v9 = vpack.i.bf16 %v4206_v17, %v4205_v62  ;;  %v6682_v47 = vpack.i.bf16 %v3430_v49, %v3429_v38 }
 0x2e2   : > { %6673 = vrot.lane.b32.xlu1 %v6672_v48, %s6848_s25  ;;  %v6687_v0 = vpack.i.bf16 %v3428_v31, %v3427_v35 }
 0x2e3   : > { %v6138_v2 = vpop.f32.mrb[40].mxu1  ;;  %6678 = vrot.lane.b32.xlu0 %v6677_v9, %s6848_s25 }
 0x2e4   : > { %v4074_v52 = vpop.f32.mrb[41].mxu1  ;;  %v6002_v27 = vpop.f32.mrb[40].mxu0  ;;  %v4211_v23 = vadd.f32 %v6138_v2, %v7880_v11 }
 0x2e5   : > { %v6139_v41 = vpop.f32.mrb[42].mxu1  ;;  %v3296_v8 = vpop.f32.mrb[41].mxu0  ;;  %v4209_v55 = vadd.f32 %v7880_v11, %v4074_v52  ;;  %v3433_v22 = vadd.f32 %v6002_v27, %v7880_v11 }
 0x2e6   : > { %v4212_v12 = vadd.f32 %v6139_v41, %v7880_v11  ;;  %v4077_v44 = vpop.f32.mrb[43].mxu1  ;;  %6683 = vrot.lane.b32.xlu1 %v6682_v47, %s6849_s29  ;;  %v6003_v39 = vpop.f32.mrb[42].mxu0  ;;  %v3431_v56 = vadd.f32 %v7880_v11, %v3296_v8 }
 0x2e7   : > { %v4210_v58 = vadd.f32 %v7880_v11, %v4077_v44  ;;  %6688 = vrot.lane.b32.xlu0 %v6687_v0, %s6849_s29  ;;  %v3434_v16 = vadd.f32 %v6003_v39, %v7880_v11  ;;  %v3299_v28 = vpop.f32.mrb[43].mxu0 }
 0x2e8   : > { %v6692_v34 = vpack.i.bf16 %v4212_v12, %v4211_v23  ;;  %v3432_v51 = vadd.f32 %v7880_v11, %v3299_v28 }
 0x2e9   : > { %v6697_v42 = vpack.i.bf16 %v4210_v58, %v4209_v55  ;;  %v6702_v25 = vpack.i.bf16 %v3434_v16, %v3433_v22 }
 0x2ea   : > { %6693 = vrot.lane.b32.xlu1 %v6692_v34, %s6848_s25  ;;  %v6707_v54 = vpack.i.bf16 %v3432_v51, %v3431_v56 }
 0x2eb   : > { %v6142_v60 = vpop.f32.mrb[44].mxu1  ;;  %6698 = vrot.lane.b32.xlu0 %v6697_v42, %s6848_s25 }
 0x2ec   : > { %v4090_v63 = vpop.f32.mrb[45].mxu1  ;;  %v6006_v53 = vpop.f32.mrb[44].mxu0  ;;  %v4215_v50 = vadd.f32 %v6142_v60, %v7880_v11 }
 0x2ed   : > { %v6143_v32 = vpop.f32.mrb[46].mxu1  ;;  %v3312_v20 = vpop.f32.mrb[45].mxu0  ;;  %v4213_v49 = vadd.f32 %v7880_v11, %v4090_v63  ;;  %v3437_v48 = vadd.f32 %v6006_v53, %v7880_v11 }
 0x2ee   : > { %v4216_v62 = vadd.f32 %v6143_v32, %v7880_v11  ;;  %v4093_v17 = vpop.f32.mrb[47].mxu1  ;;  %6703 = vrot.lane.b32.xlu1 %v6702_v25, %s6849_s29  ;;  %v6007_v38 = vpop.f32.mrb[46].mxu0  ;;  %v3435_v47 = vadd.f32 %v7880_v11, %v3312_v20 }
 0x2ef   : > { %v4214_v57 = vadd.f32 %v7880_v11, %v4093_v17  ;;  %6708 = vrot.lane.b32.xlu0 %v6707_v54, %s6849_s29  ;;  %v3438_v35 = vadd.f32 %v6007_v38, %v7880_v11  ;;  %v3315_v31 = vpop.f32.mrb[47].mxu0 }
 0x2f0   : > { %v6712_v9 = vpack.i.bf16 %v4216_v62, %v4215_v50  ;;  %v3436_v0 = vadd.f32 %v7880_v11, %v3315_v31 }
 0x2f1   : > { %v6717_v2 = vpack.i.bf16 %v4214_v57, %v4213_v49  ;;  %v6722_v52 = vpack.i.bf16 %v3438_v35, %v3437_v48 }
 0x2f2   : > { %6713 = vrot.lane.b32.xlu1 %v6712_v9, %s6848_s25  ;;  %v6727_v27 = vpack.i.bf16 %v3436_v0, %v3435_v47 }
 0x2f3   : > { %v6146_v41 = vpop.f32.mrb[48].mxu1  ;;  %6718 = vrot.lane.b32.xlu0 %v6717_v2, %s6848_s25 }
 0x2f4   : > { %v4106_v8 = vpop.f32.mrb[49].mxu1  ;;  %v6010_v23 = vpop.f32.mrb[48].mxu0  ;;  %v4219_v39 = vadd.f32 %v6146_v41, %v7880_v11 }
 0x2f5   : > { %v6147_v12 = vpop.f32.mrb[50].mxu1  ;;  %v3328_v44 = vpop.f32.mrb[49].mxu0  ;;  %v4217_v16 = vadd.f32 %v7880_v11, %v4106_v8  ;;  %v3441_v34 = vadd.f32 %v6010_v23, %v7880_v11 }
 0x2f6   : > { %v4220_v55 = vadd.f32 %v6147_v12, %v7880_v11  ;;  %v4109_v58 = vpop.f32.mrb[51].mxu1  ;;  %6723 = vrot.lane.b32.xlu1 %v6722_v52, %s6849_s29  ;;  %v6011_v22 = vpop.f32.mrb[50].mxu0  ;;  %v3439_v25 = vadd.f32 %v7880_v11, %v3328_v44 }
 0x2f7   : > { %v4218_v28 = vadd.f32 %v7880_v11, %v4109_v58  ;;  %6728 = vrot.lane.b32.xlu0 %v6727_v27, %s6849_s29  ;;  %v3442_v56 = vadd.f32 %v6011_v22, %v7880_v11  ;;  %v3331_v51 = vpop.f32.mrb[51].mxu0 }
 0x2f8   : > { %v6732_v42 = vpack.i.bf16 %v4220_v55, %v4219_v39  ;;  %v3440_v54 = vadd.f32 %v7880_v11, %v3331_v51 }
 0x2f9   : > { %v6737_v60 = vpack.i.bf16 %v4218_v28, %v4217_v16  ;;  %v6742_v63 = vpack.i.bf16 %v3442_v56, %v3441_v34 }
 0x2fa   : > { %6733 = vrot.lane.b32.xlu1 %v6732_v42, %s6848_s25  ;;  %v6747_v53 = vpack.i.bf16 %v3440_v54, %v3439_v25 }
 0x2fb   : > { %v6150_v32 = vpop.f32.mrb[52].mxu1  ;;  %6738 = vrot.lane.b32.xlu0 %v6737_v60, %s6848_s25 }
 0x2fc   : > { %v4122_v20 = vpop.f32.mrb[53].mxu1  ;;  %v6014_v50 = vpop.f32.mrb[52].mxu0  ;;  %v4223_v38 = vadd.f32 %v6150_v32, %v7880_v11 }
 0x2fd   : > { %v6151_v62 = vpop.f32.mrb[54].mxu1  ;;  %v3344_v17 = vpop.f32.mrb[53].mxu0  ;;  %v4221_v35 = vadd.f32 %v7880_v11, %v4122_v20  ;;  %v3445_v9 = vadd.f32 %v6014_v50, %v7880_v11 }
 0x2fe   : > { %v4224_v49 = vadd.f32 %v6151_v62, %v7880_v11  ;;  %v4125_v57 = vpop.f32.mrb[55].mxu1  ;;  %6743 = vrot.lane.b32.xlu1 %v6742_v63, %s6849_s29  ;;  %v6015_v48 = vpop.f32.mrb[54].mxu0  ;;  %v3443_v52 = vadd.f32 %v7880_v11, %v3344_v17 }
 0x2ff   : > { %v4222_v31 = vadd.f32 %v7880_v11, %v4125_v57  ;;  %6748 = vrot.lane.b32.xlu0 %v6747_v53, %s6849_s29  ;;  %v3446_v47 = vadd.f32 %v6015_v48, %v7880_v11  ;;  %v3347_v0 = vpop.f32.mrb[55].mxu0 }
 0x300   : > { %v6752_v2 = vpack.i.bf16 %v4224_v49, %v4223_v38  ;;  %v3444_v27 = vadd.f32 %v7880_v11, %v3347_v0 }
 0x301   : > { %v6757_v41 = vpack.i.bf16 %v4222_v31, %v4221_v35  ;;  %v6762_v8 = vpack.i.bf16 %v3446_v47, %v3445_v9 }
 0x302   : > { %6753 = vrot.lane.b32.xlu1 %v6752_v2, %s6848_s25  ;;  %v6767_v23 = vpack.i.bf16 %v3444_v27, %v3443_v52 }
 0x303   : > { %v6154_v12 = vpop.f32.mrb[56].mxu1  ;;  %6758 = vrot.lane.b32.xlu0 %v6757_v41, %s6848_s25 }
 0x304   : > { %v4138_v44 = vpop.f32.mrb[57].mxu1  ;;  %v6018_v39 = vpop.f32.mrb[56].mxu0  ;;  %v4227_v22 = vadd.f32 %v6154_v12, %v7880_v11 }
 0x305   : > { %v6155_v55 = vpop.f32.mrb[58].mxu1  ;;  %v3360_v58 = vpop.f32.mrb[57].mxu0  ;;  %v4225_v56 = vadd.f32 %v7880_v11, %v4138_v44  ;;  %v3449_v42 = vadd.f32 %v6018_v39, %v7880_v11 }
 0x306   : > { %v4228_v16 = vadd.f32 %v6155_v55, %v7880_v11  ;;  %v4141_v28 = vpop.f32.mrb[59].mxu1  ;;  %6763 = vrot.lane.b32.xlu1 %v6762_v8, %s6849_s29  ;;  %v6019_v34 = vpop.f32.mrb[58].mxu0  ;;  %v3447_v63 = vadd.f32 %v7880_v11, %v3360_v58 }
 0x307   : > { %v4226_v51 = vadd.f32 %v7880_v11, %v4141_v28  ;;  %6768 = vrot.lane.b32.xlu0 %v6767_v23, %s6849_s29  ;;  %v3450_v25 = vadd.f32 %v6019_v34, %v7880_v11  ;;  %v3363_v54 = vpop.f32.mrb[59].mxu0  ;;  %v8217_v55 = vpop.permute.xlu1 %6583 }
 0x308   : > { %v6772_v60 = vpack.i.bf16 %v4228_v16, %v4227_v22  ;;  %v3448_v53 = vadd.f32 %v7880_v11, %v3363_v54  ;;  %v6574_v58 = vpop.permute.xlu0 %6573 }
 0x309   : > { %v6777_v32 = vpack.i.bf16 %v4226_v51, %v4225_v56  ;;  %v6782_v20 = vpack.i.bf16 %v3450_v25, %v3449_v42 }
 0x30a   : > { %6773 = vrot.lane.b32.xlu1 %v6772_v60, %s6848_s25  ;;  %v6787_v50 = vpack.i.bf16 %v3448_v53, %v3447_v63 }
 0x30b   : > { %v6158_v62 = vpop.f32.mrb[60].mxu1  ;;  %6778 = vrot.lane.b32.xlu0 %v6777_v32, %s6848_s25  ;;  %v8219_v22 = vpop.permute.xlu1 %6588 }
 0x30c   : > { %v4154_v17 = vpop.f32.mrb[61].mxu1  ;;  %v6022_v38 = vpop.f32.mrb[60].mxu0  ;;  %v4231_v48 = vadd.f32 %v6158_v62, %v7880_v11  ;;  %v6576_v62 = vunpack.i.h.bf16 %v6574_v58 }
 0x30d   : > { %v6159_v49 = vpop.f32.mrb[62].mxu1  ;;  %v3376_v57 = vpop.f32.mrb[61].mxu0  ;;  %v4229_v47 = vadd.f32 %v7880_v11, %v4154_v17  ;;  %v3453_v2 = vadd.f32 %v6022_v38, %v7880_v11 }
 0x30e   : > { %v4232_v35 = vadd.f32 %v6159_v49, %v7880_v11  ;;  %v4157_v31 = vpop.f32.mrb[63].mxu1  ;;  %6783 = vrot.lane.b32.xlu1 %v6782_v20, %s6849_s29  ;;  %v6023_v9 = vpop.f32.mrb[62].mxu0  ;;  %v3451_v8 = vadd.f32 %v7880_v11, %v3376_v57  ;;  %v1618_v49 = vadd.f32 %v7882_v61, %v7880_v11 }
 0x30f   : > { %v4230_v0 = vadd.f32 %v7880_v11, %v4157_v31  ;;  %6788 = vrot.lane.b32.xlu0 %v6787_v50, %s6849_s29  ;;  %v3454_v52 = vadd.f32 %v6023_v9, %v7880_v11  ;;  %v3379_v27 = vpop.f32.mrb[63].mxu0  ;;  %v6579_v16 = vpop.permute.xlu0 %6578  ;;  %v6575_v50 = vunpack.i.l.bf16 %v6574_v58  ;;  %v1617_v31 = vadd.f32 %v7880_v11, %v7892_v21 }
 0x310   : > { %v6807_v41 = vpack.i.bf16 %v4232_v35, %v4231_v48  ;;  %v3452_v23 = vadd.f32 %v7880_v11, %v3379_v27  ;;  %v8221_v28 = vpop.permute.xlu1 %6593  ;;  %v6581_v17 = vunpack.i.h.bf16 %v6579_v16  ;;  %v6580_v38 = vunpack.i.l.bf16 %v6579_v16 }
 0x311   : > { %v6802_v12 = vpack.i.bf16 %v4230_v0, %v4229_v47  ;;  %v6792_v44 = vpack.i.bf16 %v3454_v52, %v3453_v2  ;;  %v1616_v48 = vadd.f32 %v7880_v11, %v7884_v29  ;;  %v1619_v35 = vadd.f32 %v7888_v4, %v7880_v11  ;;  %v8617_v0 = vld [vmem:[#allocation8_spill] sm:$0xff] }
 0x312   : > { %v6797_v39 = vpack.i.bf16 %v3452_v23, %v3451_v8  ;;  %v1622_v47 = vadd.f32 %v7903_v59, %v7880_v11  ;;  %v1623_v2 = vadd.f32 %v8617_v0, %v7880_v11  ;;  %v4620_v61 = vsel %vm4617_vm8, %v1618_v49, %v6575_v50 }
 0x313   : > { %6793 = vrot.lane.b32.xlu1 %v6792_v44, %s6849_s29  ;;  %v8223_v34 = vpop.permute.xlu0 %6598  ;;  %v4621_v52 = vsel %vm4617_vm8, %v1619_v35, %v6576_v62  ;;  %v4618_v29 = vsel %vm4617_vm8, %v1616_v48, %v6580_v38  ;;  %v4619_v27 = vsel %vm4617_vm8, %v1617_v31, %v6581_v17  ;;  %v6586_v4 = vunpack.i.h.bf16 %v8217_v55 }
 0x314   : > { %6798 = vrot.lane.b32.xlu0 %v6797_v39, %s6849_s29  ;;  %v8225_v56 = vpop.permute.xlu1 %6603  ;;  %v6591_v21 = vunpack.i.h.bf16 %v8219_v22  ;;  %v6590_v8 = vunpack.i.l.bf16 %v8219_v22 }
 0x317   : > { %6808 = vrot.lane.b32.xlu1 %v6807_v41, %s6848_s25  ;;  %v8227_v51 = vpop.permute.xlu0 %6608  ;;  %v6585_v41 = vunpack.i.l.bf16 %v8217_v55 }
 0x318   : > { %6803 = vrot.lane.b32.xlu0 %v6802_v12, %s6848_s25  ;;  %v8229_v42 = vpop.permute.xlu1 %6613 }
 0x31b   : > { %v8231_v25 = vpop.permute.xlu0 %6618 }
 0x31c   : > { %v8233_v54 = vpop.permute.xlu1 %6623 }
 0x31f   : > { %v8235_v60 = vpop.permute.xlu0 %6628 }
 0x320   : > { %v8237_v63 = vpop.permute.xlu1 %6633 }
 0x323   : > { %v8239_v53 = vpop.permute.xlu0 %6638 }
 0x324   : > { %v8241_v32 = vpop.permute.xlu1 %6643 }
 0x327   : > { %v8243_v20 = vpop.permute.xlu0 %6648 }
 0x34c   : > { %v6654_v57 = vpop.permute.xlu1 %6653 }
 0x34d   : > { %v6659_v9 = vpop.permute.xlu0 %6658  ;;  %v6656_v39 = vunpack.i.h.bf16 %v6654_v57  ;;  %v6655_v58 = vunpack.i.l.bf16 %v6654_v57 }
 0x34e   : > { %v6661_v62 = vunpack.i.h.bf16 %v6659_v9  ;;  %v6660_v17 = vunpack.i.l.bf16 %v6659_v9 }
 0x350   : > { %v6664_v59 = vpop.permute.xlu1 %6663 }
 0x351   : > { %v6666_v23 = vunpack.i.h.bf16 %v6664_v59  ;;  %v6665_v12 = vunpack.i.l.bf16 %v6664_v59  ;;  %v6669_v44 = vpop.permute.xlu0 %6668  ;;  %v8618_v59 = vld [vmem:[#allocation4_spill] sm:$0xff] }
 0x352   : > { %v6671_v16 = vunpack.i.h.bf16 %v6669_v44  ;;  %v6670_v50 = vunpack.i.l.bf16 %v6669_v44 }
 0x353   : > { %v4654_v55 = vsel %vm4650_vm9, %v4621_v52, %v6666_v23  ;;  %v4653_v38 = vsel %vm4650_vm9, %v4620_v61, %v6665_v12  ;;  %v1620_v23 = vadd.f32 %v7880_v11, %v8618_v59  ;;  %v8619_v12 = vld [vmem:[#allocation9_spill] sm:$0xff] }
 0x354   : > { %v4687_v22 = vsel %vm4683_vm10, %v4654_v55, %v6656_v39  ;;  %v4686_v49 = vsel %vm4683_vm10, %v4653_v38, %v6655_v58  ;;  %v4652_v48 = vsel %vm4650_vm9, %v4619_v27, %v6671_v16  ;;  %v4651_v57 = vsel %vm4650_vm9, %v4618_v29, %v6670_v50  ;;  %v6674_v35 = vpop.permute.xlu1 %6673  ;;  %v8620_v29 = vld [vmem:[#allocation12_spill] sm:$0xff] }
 0x355   : > { %v5315_v31 = vpack.c.bf16 %v4687_v22, %v4687_v22  ;;  %v5314_v9 = vpack.c.bf16 %v4686_v49, %v4686_v49  ;;  %v4685_v0 = vsel %vm4683_vm10, %v4652_v48, %v6661_v62  ;;  %v4684_v61 = vsel %vm4683_vm10, %v4651_v57, %v6660_v17  ;;  %v6679_v52 = vpop.permute.xlu0 %6678 }
 0x356   : > { %v1621_v27 = vadd.f32 %v7880_v11, %v8619_v12  ;;  %v5313_v44 = vpack.c.bf16 %v4685_v0, %v4685_v0  ;;  %v5312_v39 = vpack.c.bf16 %v4684_v61, %v4684_v61  ;;  %v1626_v58 = vadd.f32 %v8620_v29, %v7880_v11  ;;  %v8621_v29 = vld [vmem:[#allocation13_spill] sm:$0xff] }
 0x357   : > { %v1627_v16 = vadd.f32 %v7942_v40, %v7880_v11  ;;  %v4624_v50 = vsel %vm4617_vm8, %v1622_v47, %v6585_v41  ;;  %v4625_v62 = vsel %vm4617_vm8, %v1623_v2, %v6586_v4  ;;  %4848 = vst.msk [vmem:[%s8271_s6 + $0xc] sm:$0xf] %vm4844_vm11, %v5315_v31  ;;  %4847 = vst.msk [vmem:[%s8271_s6 + $0x8] sm:$0xf] %vm4844_vm11, %v5314_v9  ;;  %v6596_v38 = vunpack.i.h.bf16 %v8221_v28 }
 0x358   : > { %v4622_v17 = vsel %vm4617_vm8, %v1620_v23, %v6590_v8  ;;  %v4623_v55 = vsel %vm4617_vm8, %v1621_v27, %v6591_v21  ;;  %v6595_v22 = vunpack.i.l.bf16 %v8221_v28  ;;  %4846 = vst.msk [vmem:[%s8271_s6 + $0x4] sm:$0xf] %vm4844_vm11, %v5313_v44  ;;  %4845 = vst.msk [vmem:[%s8271_s6] sm:$0xf] %vm4844_vm11, %v5312_v39  ;;  %v6684_v40 = vpop.permute.xlu1 %6683  ;;  %v6601_v47 = vunpack.i.h.bf16 %v8223_v34 }
 0x359   : > { %v6600_v2 = vunpack.i.l.bf16 %v8223_v34  ;;  %v6686_v4 = vunpack.i.h.bf16 %v6684_v40  ;;  %v6685_v41 = vunpack.i.l.bf16 %v6684_v40  ;;  %v6689_v49 = vpop.permute.xlu0 %6688  ;;  %v6676_v48 = vunpack.i.h.bf16 %v6674_v35 }
 0x35a   : > { %v6675_v8 = vunpack.i.l.bf16 %v6674_v35  ;;  %v6691_v57 = vunpack.i.h.bf16 %v6689_v49  ;;  %v6690_v21 = vunpack.i.l.bf16 %v6689_v49  ;;  %v6681_v31 = vunpack.i.h.bf16 %v6679_v52 }
 0x35b   : > { %v6680_v9 = vunpack.i.l.bf16 %v6679_v52  ;;  %v4658_v28 = vsel %vm4650_vm9, %v4625_v62, %v6686_v4  ;;  %v4657_v0 = vsel %vm4650_vm9, %v4624_v50, %v6685_v41  ;;  %v1624_v50 = vadd.f32 %v7880_v11, %v8621_v29  ;;  %v8346_v29 = vld [vmem:[%s8513_s2] ss:$0 sm:$0xff] }
 0x35c   : > { %v4691_v61 = vsel %vm4683_vm10, %v4658_v28, %v6676_v48  ;;  %v4690_v59 = vsel %vm4683_vm10, %v4657_v0, %v6675_v8  ;;  %v4656_v23 = vsel %vm4650_vm9, %v4623_v55, %v6691_v57  ;;  %v4655_v34 = vsel %vm4650_vm9, %v4622_v17, %v6690_v21  ;;  %v6694_v12 = vpop.permute.xlu1 %6693  ;;  %v8622_v17 = vld [vmem:[#allocation16_spill] sm:$0xff] }
 0x35d   : > { %v5319_v35 = vpack.c.bf16 %v4691_v61, %v4691_v61  ;;  %v5318_v27 = vpack.c.bf16 %v4690_v59, %v4690_v59  ;;  %v4689_v44 = vsel %vm4683_vm10, %v4656_v23, %v6681_v31  ;;  %v4688_v52 = vsel %vm4683_vm10, %v4655_v34, %v6680_v9  ;;  %v6699_v39 = vpop.permute.xlu0 %6698 }
 0x35e   : > { %v1625_v62 = vadd.f32 %v7880_v11, %v7949_v45  ;;  %v5317_v55 = vpack.c.bf16 %v4689_v44, %v4689_v44  ;;  %v5316_v40 = vpack.c.bf16 %v4688_v52, %v4688_v52  ;;  %v1630_v4 = vadd.f32 %v8622_v17, %v7880_v11 }
 0x35f   : > { %v1631_v41 = vadd.f32 %v7968_v7, %v7880_v11  ;;  %v4628_v49 = vsel %vm4617_vm8, %v1626_v58, %v6595_v22  ;;  %v4629_v48 = vsel %vm4617_vm8, %v1627_v16, %v6596_v38  ;;  %4852 = vst.msk [vmem:[%s8271_s6 + $0x1c] sm:$0xf] %vm4844_vm11, %v5319_v35  ;;  %4851 = vst.msk [vmem:[%s8271_s6 + $0x18] sm:$0xf] %vm4844_vm11, %v5318_v27  ;;  %v6606_v57 = vunpack.i.h.bf16 %v8225_v56 }
 0x360   : > { %v4626_v8 = vsel %vm4617_vm8, %v1624_v50, %v6600_v2  ;;  %v4627_v45 = vsel %vm4617_vm8, %v1625_v62, %v6601_v47  ;;  %v6605_v21 = vunpack.i.l.bf16 %v8225_v56  ;;  %4850 = vst.msk [vmem:[%s8271_s6 + $0x14] sm:$0xf] %vm4844_vm11, %v5317_v55  ;;  %4849 = vst.msk [vmem:[%s8271_s6 + $0x10] sm:$0xf] %vm4844_vm11, %v5316_v40  ;;  %v6704_v11 = vpop.permute.xlu1 %6703  ;;  %v6611_v7 = vunpack.i.h.bf16 %v8227_v51 }
 0x361   : > { %v6610_v58 = vunpack.i.l.bf16 %v8227_v51  ;;  %v6706_v16 = vunpack.i.h.bf16 %v6704_v11  ;;  %v6705_v38 = vunpack.i.l.bf16 %v6704_v11  ;;  %v6709_v22 = vpop.permute.xlu0 %6708  ;;  %v6696_v31 = vunpack.i.h.bf16 %v6694_v12 }
 0x362   : > { %v6695_v2 = vunpack.i.l.bf16 %v6694_v12  ;;  %v6711_v9 = vunpack.i.h.bf16 %v6709_v22  ;;  %v6710_v47 = vunpack.i.l.bf16 %v6709_v22  ;;  %v6701_v28 = vunpack.i.h.bf16 %v6699_v39 }
 0x363   : > { %v6700_v0 = vunpack.i.l.bf16 %v6699_v39  ;;  %v4662_v56 = vsel %vm4650_vm9, %v4629_v48, %v6706_v16  ;;  %v4661_v61 = vsel %vm4650_vm9, %v4628_v49, %v6705_v38  ;;  %v1628_v50 = vadd.f32 %v8346_v29, %v7964_v36 }
 0x364   : > { %v4695_v59 = vsel %vm4683_vm10, %v4662_v56, %v6696_v31  ;;  %v4694_v23 = vsel %vm4683_vm10, %v4661_v61, %v6695_v2  ;;  %v4660_v34 = vsel %vm4650_vm9, %v4627_v45, %v6711_v9  ;;  %v4659_v51 = vsel %vm4650_vm9, %v4626_v8, %v6710_v47  ;;  %v6714_v35 = vpop.permute.xlu1 %6713 }
 0x365   : > { %v5323_v12 = vpack.c.bf16 %v4695_v59, %v4695_v59  ;;  %v5322_v27 = vpack.c.bf16 %v4694_v23, %v4694_v23  ;;  %v4693_v44 = vsel %vm4683_vm10, %v4660_v34, %v6701_v28  ;;  %v4692_v52 = vsel %vm4683_vm10, %v4659_v51, %v6700_v0  ;;  %v6719_v39 = vpop.permute.xlu0 %6718 }
 0x366   : > { %v1629_v62 = vadd.f32 %v8346_v29, %v7972_v26  ;;  %v5321_v55 = vpack.c.bf16 %v4693_v44, %v4693_v44  ;;  %v5320_v40 = vpack.c.bf16 %v4692_v52, %v4692_v52  ;;  %v1634_v17 = vadd.f32 %v8346_v29, %v7988_v30 }
 0x367   : > { %v1635_v49 = vadd.f32 %v8346_v29, %v7998_v6  ;;  %v4632_v48 = vsel %vm4617_vm8, %v1630_v4, %v6605_v21  ;;  %v4633_v8 = vsel %vm4617_vm8, %v1631_v41, %v6606_v57  ;;  %4856 = vst.msk [vmem:[%s8271_s6 + $0x2c] sm:$0xf] %vm4844_vm11, %v5323_v12  ;;  %4855 = vst.msk [vmem:[%s8271_s6 + $0x28] sm:$0xf] %vm4844_vm11, %v5322_v27  ;;  %v6616_v45 = vunpack.i.h.bf16 %v8229_v42 }
 0x368   : > { %v4630_v36 = vsel %vm4617_vm8, %v1628_v50, %v6610_v58  ;;  %v4631_v26 = vsel %vm4617_vm8, %v1629_v62, %v6611_v7  ;;  %v6615_v11 = vunpack.i.l.bf16 %v8229_v42  ;;  %4854 = vst.msk [vmem:[%s8271_s6 + $0x24] sm:$0xf] %vm4844_vm11, %v5321_v55  ;;  %4853 = vst.msk [vmem:[%s8271_s6 + $0x20] sm:$0xf] %vm4844_vm11, %v5320_v40  ;;  %v6724_v30 = vpop.permute.xlu1 %6723  ;;  %v6621_v6 = vunpack.i.h.bf16 %v8231_v25 }
 0x369   : > { %v6620_v4 = vunpack.i.l.bf16 %v8231_v25  ;;  %v6726_v41 = vunpack.i.h.bf16 %v6724_v30  ;;  %v6725_v57 = vunpack.i.l.bf16 %v6724_v30  ;;  %v6729_v21 = vpop.permute.xlu0 %6728  ;;  %v6716_v16 = vunpack.i.h.bf16 %v6714_v35 }
 0x36a   : > { %v6715_v58 = vunpack.i.l.bf16 %v6714_v35  ;;  %v6731_v38 = vunpack.i.h.bf16 %v6729_v21  ;;  %v6730_v7 = vunpack.i.l.bf16 %v6729_v21  ;;  %v6721_v22 = vunpack.i.h.bf16 %v6719_v39 }
 0x36b   : > { %v6720_v31 = vunpack.i.l.bf16 %v6719_v39  ;;  %v4666_v42 = vsel %vm4650_vm9, %v4633_v8, %v6726_v41  ;;  %v4665_v2 = vsel %vm4650_vm9, %v4632_v48, %v6725_v57  ;;  %v1632_v51 = vadd.f32 %v8346_v29, %v7992_v3 }
 0x36c   : > { %v4699_v9 = vsel %vm4683_vm10, %v4666_v42, %v6716_v16  ;;  %v4698_v47 = vsel %vm4683_vm10, %v4665_v2, %v6715_v58  ;;  %v4664_v28 = vsel %vm4650_vm9, %v4631_v26, %v6731_v38  ;;  %v4663_v25 = vsel %vm4650_vm9, %v4630_v36, %v6730_v7  ;;  %v6734_v0 = vpop.permute.xlu1 %6733 }
 0x36d   : > { %v5327_v56 = vpack.c.bf16 %v4699_v9, %v4699_v9  ;;  %v5326_v61 = vpack.c.bf16 %v4698_v47, %v4698_v47  ;;  %v4697_v59 = vsel %vm4683_vm10, %v4664_v28, %v6721_v22  ;;  %v4696_v23 = vsel %vm4683_vm10, %v4663_v25, %v6720_v31  ;;  %v6739_v34 = vpop.permute.xlu0 %6738 }
 0x36e   : > { %v1633_v35 = vadd.f32 %v8346_v29, %v8002_v18  ;;  %v5325_v12 = vpack.c.bf16 %v4697_v59, %v4697_v59  ;;  %v5324_v27 = vpack.c.bf16 %v4696_v23, %v4696_v23  ;;  %v1638_v44 = vadd.f32 %v8346_v29, %v8013_v43 }
 0x36f   : > { %v1639_v52 = vadd.f32 %v8346_v29, %v8019_v5  ;;  %v4636_v39 = vsel %vm4617_vm8, %v1634_v17, %v6615_v11  ;;  %v4637_v50 = vsel %vm4617_vm8, %v1635_v49, %v6616_v45  ;;  %4860 = vst.msk [vmem:[%s8271_s6 + $0x3c] sm:$0xf] %vm4844_vm11, %v5327_v56  ;;  %4859 = vst.msk [vmem:[%s8271_s6 + $0x38] sm:$0xf] %vm4844_vm11, %v5326_v61  ;;  %v6626_v62 = vunpack.i.h.bf16 %v8233_v54 }
 0x370   : > { %v4634_v3 = vsel %vm4617_vm8, %v1632_v51, %v6620_v4  ;;  %v4635_v18 = vsel %vm4617_vm8, %v1633_v35, %v6621_v6  ;;  %v6625_v55 = vunpack.i.l.bf16 %v8233_v54  ;;  %4858 = vst.msk [vmem:[%s8271_s6 + $0x34] sm:$0xf] %vm4844_vm11, %v5325_v12  ;;  %4857 = vst.msk [vmem:[%s8271_s6 + $0x30] sm:$0xf] %vm4844_vm11, %v5324_v27  ;;  %v6744_v43 = vpop.permute.xlu1 %6743  ;;  %v6631_v5 = vunpack.i.h.bf16 %v8235_v60 }
 0x371   : > { %v6630_v40 = vunpack.i.l.bf16 %v8235_v60  ;;  %v6746_v17 = vunpack.i.h.bf16 %v6744_v43  ;;  %v6745_v49 = vunpack.i.l.bf16 %v6744_v43  ;;  %v6749_v48 = vpop.permute.xlu0 %6748  ;;  %v6736_v8 = vunpack.i.h.bf16 %v6734_v0 }
 0x372   : > { %v6735_v36 = vunpack.i.l.bf16 %v6734_v0  ;;  %v6751_v26 = vunpack.i.h.bf16 %v6749_v48  ;;  %v6750_v45 = vunpack.i.l.bf16 %v6749_v48  ;;  %v6741_v11 = vunpack.i.h.bf16 %v6739_v34 }
 0x373   : > { %v6740_v30 = vunpack.i.l.bf16 %v6739_v34  ;;  %v4670_v54 = vsel %vm4650_vm9, %v4637_v50, %v6746_v17  ;;  %v4669_v6 = vsel %vm4650_vm9, %v4636_v39, %v6745_v49  ;;  %v1636_v31 = vadd.f32 %v8346_v29, %v8015_v37 }
 0x374   : > { %v4703_v4 = vsel %vm4683_vm10, %v4670_v54, %v6736_v8  ;;  %v4702_v41 = vsel %vm4683_vm10, %v4669_v6, %v6735_v36  ;;  %v4668_v57 = vsel %vm4650_vm9, %v4635_v18, %v6751_v26  ;;  %v4667_v60 = vsel %vm4650_vm9, %v4634_v3, %v6750_v45  ;;  %v6754_v21 = vpop.permute.xlu1 %6753 }
 0x375   : > { %v5331_v16 = vpack.c.bf16 %v4703_v4, %v4703_v4  ;;  %v5330_v58 = vpack.c.bf16 %v4702_v41, %v4702_v41  ;;  %v4701_v38 = vsel %vm4683_vm10, %v4668_v57, %v6741_v11  ;;  %v4700_v7 = vsel %vm4683_vm10, %v4667_v60, %v6740_v30  ;;  %v6759_v22 = vpop.permute.xlu0 %6758 }
 0x376   : > { %v1637_v42 = vadd.f32 %v8346_v29, %v8023_v10  ;;  %v5329_v2 = vpack.c.bf16 %v4701_v38, %v4701_v38  ;;  %v5328_v9 = vpack.c.bf16 %v4700_v7, %v4700_v7  ;;  %v1642_v47 = vadd.f32 %v8346_v29, %v8035_v1 }
 0x377   : > { %v1640_v28 = vadd.f32 %v8346_v29, %v8037_v24  ;;  %v4640_v25 = vsel %vm4617_vm8, %v1638_v44, %v6625_v55  ;;  %v4641_v0 = vsel %vm4617_vm8, %v1639_v52, %v6626_v62  ;;  %4864 = vst.msk [vmem:[%s8271_s6 + $0x4c] sm:$0xf] %vm4844_vm11, %v5331_v16  ;;  %4863 = vst.msk [vmem:[%s8271_s6 + $0x48] sm:$0xf] %vm4844_vm11, %v5330_v58  ;;  %v6636_v56 = vunpack.i.h.bf16 %v8237_v63 }
 0x378   : > { %v4638_v37 = vsel %vm4617_vm8, %v1636_v31, %v6630_v40  ;;  %v4639_v10 = vsel %vm4617_vm8, %v1637_v42, %v6631_v5  ;;  %v6635_v61 = vunpack.i.l.bf16 %v8237_v63  ;;  %4862 = vst.msk [vmem:[%s8271_s6 + $0x44] sm:$0xf] %vm4844_vm11, %v5329_v2  ;;  %4861 = vst.msk [vmem:[%s8271_s6 + $0x40] sm:$0xf] %vm4844_vm11, %v5328_v9  ;;  %v6764_v1 = vpop.permute.xlu1 %6763  ;;  %v6641_v24 = vunpack.i.h.bf16 %v8239_v53 }
 0x379   : > { %v6640_v59 = vunpack.i.l.bf16 %v8239_v53  ;;  %v6766_v23 = vunpack.i.h.bf16 %v6764_v1  ;;  %v6765_v34 = vunpack.i.l.bf16 %v6764_v1  ;;  %v6769_v51 = vpop.permute.xlu0 %6768  ;;  %v6756_v35 = vunpack.i.h.bf16 %v6754_v21 }
 0x37a   : > { %v6755_v12 = vunpack.i.l.bf16 %v6754_v21  ;;  %v6771_v27 = vunpack.i.h.bf16 %v6769_v51  ;;  %v6770_v44 = vunpack.i.l.bf16 %v6769_v51  ;;  %v6761_v52 = vunpack.i.h.bf16 %v6759_v22 }
 0x37b   : > { %v6760_v39 = vunpack.i.l.bf16 %v6759_v22  ;;  %v4674_v63 = vsel %vm4650_vm9, %v4641_v0, %v6766_v23  ;;  %v4673_v50 = vsel %vm4650_vm9, %v4640_v25, %v6765_v34  ;;  %v1643_v48 = vadd.f32 %v8346_v29, %v8041_v15 }
 0x37c   : > { %v4707_v3 = vsel %vm4683_vm10, %v4674_v63, %v6756_v35  ;;  %v4706_v18 = vsel %vm4683_vm10, %v4673_v50, %v6755_v12  ;;  %v4672_v53 = vsel %vm4650_vm9, %v4639_v10, %v6771_v27  ;;  %v4671_v62 = vsel %vm4650_vm9, %v4638_v37, %v6770_v44  ;;  %v6774_v55 = vpop.permute.xlu1 %6773 }
 0x37d   : > { %v5335_v43 = vpack.c.bf16 %v4707_v3, %v4707_v3  ;;  %v5334_v5 = vpack.c.bf16 %v4706_v18, %v4706_v18  ;;  %v4705_v40 = vsel %vm4683_vm10, %v4672_v53, %v6761_v52  ;;  %v4704_v17 = vsel %vm4683_vm10, %v4671_v62, %v6760_v39  ;;  %v6779_v49 = vpop.permute.xlu0 %6778 }
 0x37e   : > { %v1641_v8 = vadd.f32 %v8346_v29, %v8045_v46  ;;  %v5333_v36 = vpack.c.bf16 %v4705_v40, %v4705_v40  ;;  %v5332_v26 = vpack.c.bf16 %v4704_v17, %v4704_v17  ;;  %v4644_v45 = vsel %vm4617_vm8, %v1642_v47, %v6635_v61 }
 0x37f   : > { %4868 = vst.msk [vmem:[%s8271_s6 + $0x5c] sm:$0xf] %vm4844_vm11, %v5335_v43  ;;  %4867 = vst.msk [vmem:[%s8271_s6 + $0x58] sm:$0xf] %vm4844_vm11, %v5334_v5  ;;  %v4645_v11 = vsel %vm4617_vm8, %v1643_v48, %v6636_v56  ;;  %v4642_v30 = vsel %vm4617_vm8, %v1640_v28, %v6640_v59  ;;  %v6646_v46 = vunpack.i.h.bf16 %v8241_v32  ;;  %v6645_v6 = vunpack.i.l.bf16 %v8241_v32 }
 0x380   : > { %v4643_v54 = vsel %vm4617_vm8, %v1641_v8, %v6641_v24  ;;  %4866 = vst.msk [vmem:[%s8271_s6 + $0x54] sm:$0xf] %vm4844_vm11, %v5333_v36  ;;  %4865 = vst.msk [vmem:[%s8271_s6 + $0x50] sm:$0xf] %vm4844_vm11, %v5332_v26  ;;  %v6784_v15 = vpop.permute.xlu1 %6783  ;;  %v6776_v60 = vunpack.i.h.bf16 %v6774_v55  ;;  %v6775_v21 = vunpack.i.l.bf16 %v6774_v55  ;;  %v6781_v38 = vunpack.i.h.bf16 %v6779_v49 }
 0x381   : > { %v6786_v4 = vunpack.i.h.bf16 %v6784_v15  ;;  %v6785_v41 = vunpack.i.l.bf16 %v6784_v15  ;;  %v6789_v57 = vpop.permute.xlu0 %6788  ;;  %v6780_v7 = vunpack.i.l.bf16 %v6779_v49  ;;  %v6651_v10 = vunpack.i.h.bf16 %v8243_v20 }
 0x382   : > { %v6791_v16 = vunpack.i.h.bf16 %v6789_v57  ;;  %v6790_v58 = vunpack.i.l.bf16 %v6789_v57  ;;  %v6650_v56 = vunpack.i.l.bf16 %v8243_v20  ;;  %v1646_v59 = vadd.f32 %v8346_v29, %v8057_v19 }
 0x383   : > { %v4678_v22 = vsel %vm4650_vm9, %v4645_v11, %v6786_v4  ;;  %v4677_v31 = vsel %vm4650_vm9, %v4644_v45, %v6785_v41  ;;  %v1647_v23 = vadd.f32 %v8346_v29, %v8063_v33  ;;  %v1644_v35 = vadd.f32 %v8346_v29, %v8059_v13 }
 0x384   : > { %v4711_v42 = vsel %vm4683_vm10, %v4678_v22, %v6776_v60  ;;  %v4710_v2 = vsel %vm4683_vm10, %v4677_v31, %v6775_v21  ;;  %v4676_v32 = vsel %vm4650_vm9, %v4643_v54, %v6791_v16  ;;  %v4675_v9 = vsel %vm4650_vm9, %v4642_v30, %v6790_v58 }
 0x385   : > { %v5339_v47 = vpack.c.bf16 %v4711_v42, %v4711_v42  ;;  %v5338_v28 = vpack.c.bf16 %v4710_v2, %v4710_v2  ;;  %v4709_v25 = vsel %vm4683_vm10, %v4676_v32, %v6781_v38  ;;  %v4708_v0 = vsel %vm4683_vm10, %v4675_v9, %v6780_v7  ;;  %v6794_v37 = vpop.permute.xlu1 %6793 }
 0x386   : > { %v5337_v61 = vpack.c.bf16 %v4709_v25, %v4709_v25  ;;  %v5336_v1 = vpack.c.bf16 %v4708_v0, %v4708_v0  ;;  %v6799_v24 = vpop.permute.xlu0 %6798  ;;  %v6796_v34 = vunpack.i.h.bf16 %v6794_v37  ;;  %v6795_v51 = vunpack.i.l.bf16 %v6794_v37 }
 0x387   : > { %4872 = vst.msk [vmem:[%s8271_s6 + $0x6c] sm:$0xf] %vm4844_vm11, %v5339_v47  ;;  %4871 = vst.msk [vmem:[%s8271_s6 + $0x68] sm:$0xf] %vm4844_vm11, %v5338_v28  ;;  %v1645_v20 = vadd.f32 %v8346_v29, %v8067_v14  ;;  %v6801_v19 = vunpack.i.h.bf16 %v6799_v24  ;;  %v6800_v12 = vunpack.i.l.bf16 %v6799_v24  ;;  %v4648_v33 = vsel %vm4617_vm8, %v1646_v59, %v6645_v6 }
 0x388   : > { %4870 = vst.msk [vmem:[%s8271_s6 + $0x64] sm:$0xf] %vm4844_vm11, %v5337_v61  ;;  %4869 = vst.msk [vmem:[%s8271_s6 + $0x60] sm:$0xf] %vm4844_vm11, %v5336_v1  ;;  %v4649_v27 = vsel %vm4617_vm8, %v1647_v23, %v6646_v46  ;;  %v4646_v52 = vsel %vm4617_vm8, %v1644_v35, %v6650_v56  ;;  %v4681_v29 = vsel %vm4650_vm9, %v4648_v33, %v6795_v51 }
 0x389   : > { %v6809_v44 = vpop.permute.xlu1 %6808  ;;  %v4647_v39 = vsel %vm4617_vm8, %v1645_v20, %v6651_v10  ;;  %v4682_v14 = vsel %vm4650_vm9, %v4649_v27, %v6796_v34  ;;  %v4679_v53 = vsel %vm4650_vm9, %v4646_v52, %v6800_v12 }
 0x38a   : > { %v6811_v63 = vunpack.i.h.bf16 %v6809_v44  ;;  %v6810_v13 = vunpack.i.l.bf16 %v6809_v44  ;;  %v6804_v50 = vpop.permute.xlu0 %6803  ;;  %v4680_v62 = vsel %vm4650_vm9, %v4647_v39, %v6801_v19 }
 0x38b   : > { %v6806_v3 = vunpack.i.h.bf16 %v6804_v50  ;;  %v6805_v18 = vunpack.i.l.bf16 %v6804_v50 }
 0x38c   : > { %v4714_v55 = vsel %vm4683_vm10, %v4681_v29, %v6810_v13  ;;  %v4715_v43 = vsel %vm4683_vm10, %v4682_v14, %v6811_v63 }
 0x38d   : > { %v5342_v5 = vpack.c.bf16 %v4714_v55, %v4714_v55  ;;  %v5343_v40 = vpack.c.bf16 %v4715_v43, %v4715_v43  ;;  %v4712_v17 = vsel %vm4683_vm10, %v4679_v53, %v6805_v18  ;;  %v4713_v49 = vsel %vm4683_vm10, %v4680_v62, %v6806_v3 }
 0x38e   : > { %v5340_v48 = vpack.c.bf16 %v4712_v17, %v4712_v17  ;;  %v5341_v8 = vpack.c.bf16 %v4713_v49, %v4713_v49 }
 0x38f   : > { %4875 = vst.msk [vmem:[%s8271_s6 + $0x78] sm:$0xf] %vm4844_vm11, %v5342_v5  ;;  %4876 = vst.msk [vmem:[%s8271_s6 + $0x7c] sm:$0xf] %vm4844_vm11, %v5343_v40 }
 0x390   : > { %4873 = vst.msk [vmem:[%s8271_s6 + $0x70] sm:$0xf] %vm4844_vm11, %v5340_v48  ;;  %4874 = vst.msk [vmem:[%s8271_s6 + $0x74] sm:$0xf] %vm4844_vm11, %v5341_v8 }
 0x391 PF: > { %s13_s12 = sadd.s32 1, %s6845_s12  }
 0x392   : > { %p10_p4 = scmp.ge.s32.totalorder %s13_s12, 4  }
 0x394   :  { %12 = sbr.rel (!%p10_p4) target bundleno = 1 (0x1), region = 62 }

// kernel: upsample_forward.7
= control target key start
LH: loop header
LB: loop body
LE: loop exit
PB: predicated region body
PF: predicated region fallthrough
CT: control target
= control target key end

     0   :  { %s455_s0 = inlined_call_operand.vmem [shape: bf16[128,128], index: 0, kind: input, shape index: {}]   ;;  %s456_s1 = inlined_call_operand.vmem [shape: f32[1,128], index: 1, kind: input, shape index: {}]   ;;  %s457_s2 = inlined_call_operand.vmem [shape: f32[1,128], index: 2, kind: input, shape index: {}]   ;;  %s458_s3 = inlined_call_operand.vmem [shape: bf16[128,128], index: 3, kind: output, shape index: {}]  }
   0x1   :  { %v259_v0 = vld [vmem:[%s455_s0] sm:$0xff]   ;;  %v330_v4 = vld [vmem:[%s455_s0 + $0x8] sm:$0xff]   ;;  %v331_v5 = vld [vmem:[%s455_s0 + $0x10] sm:$0xff]  }
   0x2   :  { %v370_v1 = vld [vmem:[%s456_s1] ss:$0 sm:$0xff]  ;;  %v260_v2 = vunpack.c.l.bf16 %v259_v0  ;;  %v261_v3 = vunpack.c.h.bf16 %v259_v0  ;;  %v332_v6 = vld [vmem:[%s455_s0 + $0x18] sm:$0xff]   ;;  %v264_v8 = vunpack.c.l.bf16 %v330_v4  ;;  %v265_v9 = vunpack.c.h.bf16 %v330_v4  ;;  %v334_v35 = vld [vmem:[%s455_s0 + $0x28] sm:$0xff]  }
   0x3   :  { %v384_v7 = vld [vmem:[%s457_s2] ss:$0 sm:$0xff]  ;;  %v268_v10 = vunpack.c.l.bf16 %v331_v5  ;;  %v269_v11 = vunpack.c.h.bf16 %v331_v5  ;;  %v272_v14 = vunpack.c.l.bf16 %v332_v6  ;;  %v273_v15 = vunpack.c.h.bf16 %v332_v6  ;;  %v335_v48 = vld [vmem:[%s455_s0 + $0x30] sm:$0xff]   ;;  %v336_v4 = vld [vmem:[%s455_s0 + $0x38] sm:$0xff]  }
   0x4   :  { %v53_v12 = vmul.f32 %v260_v2, %v370_v1  ;;  %v54_v13 = vmul.f32 %v261_v3, %v370_v1  ;;  %v55_v16 = vmul.f32 %v264_v8, %v370_v1  ;;  %v56_v17 = vmul.f32 %v265_v9, %v370_v1  ;;  %v333_v34 = vld [vmem:[%s455_s0 + $0x20] sm:$0xff]  }
   0x5   :  { %v57_v18 = vmul.f32 %v268_v10, %v370_v1  ;;  %v58_v19 = vmul.f32 %v269_v11, %v370_v1  ;;  %v59_v22 = vmul.f32 %v272_v14, %v370_v1  ;;  %v60_v23 = vmul.f32 %v273_v15, %v370_v1 }
   0x6   :  { %v76_v20 = vadd.f32 %v384_v7, %v53_v12  ;;  %v77_v21 = vadd.f32 %v384_v7, %v54_v13  ;;  %v78_v24 = vadd.f32 %v384_v7, %v55_v16  ;;  %v79_v25 = vadd.f32 %v384_v7, %v56_v17 }
   0x7   :  { %v80_v26 = vadd.f32 %v384_v7, %v57_v18  ;;  %v81_v27 = vadd.f32 %v384_v7, %v58_v19  ;;  %v82_v42 = vadd.f32 %v384_v7, %v59_v22  ;;  %v83_v43 = vadd.f32 %v384_v7, %v60_v23 }
   0x8   :  { %vm92_vm0 = vcmp.ge.f32.partialorder %v76_v20, 0.0  ;;  %vm93_vm1 = vcmp.ge.f32.partialorder %v77_v21, 0.0  ;;  %v108_v28 = vmul.f32 0.2, %v76_v20  ;;  %v109_v29 = vmul.f32 0.2, %v77_v21 }
   0x9   :  { %vm94_vm2 = vcmp.ge.f32.partialorder %v78_v24, 0.0  ;;  %vm95_vm3 = vcmp.ge.f32.partialorder %v79_v25, 0.0  ;;  %v110_v30 = vmul.f32 0.2, %v78_v24  ;;  %v111_v31 = vmul.f32 0.2, %v79_v25 }
   0xa   :  { %v124_v32 = vsel %vm92_vm0, %v76_v20, %v108_v28  ;;  %v125_v33 = vsel %vm93_vm1, %v77_v21, %v109_v29  ;;  %vm96_vm4 = vcmp.ge.f32.partialorder %v80_v26, 0.0  ;;  %vm97_vm5 = vcmp.ge.f32.partialorder %v81_v27, 0.0 }
   0xb   :  { %v293_v36 = vpack.c.bf16 %v125_v33, %v124_v32  ;;  %v126_v37 = vsel %vm94_vm2, %v78_v24, %v110_v30  ;;  %v127_v38 = vsel %vm95_vm3, %v79_v25, %v111_v31  ;;  %v112_v39 = vmul.f32 0.2, %v80_v26 }
   0xc   :  { %v298_v40 = vpack.c.bf16 %v127_v38, %v126_v37  ;;  %v113_v41 = vmul.f32 0.2, %v81_v27  ;;  %v276_v45 = vunpack.c.l.bf16 %v333_v34  ;;  %v277_v46 = vunpack.c.h.bf16 %v333_v34 }
   0xd   :  { %294 = vst [vmem:[%s458_s3] sm:$0xff] %v293_v36   ;;  %v128_v44 = vsel %vm96_vm4, %v80_v26, %v112_v39  ;;  %v280_v47 = vunpack.c.l.bf16 %v334_v35  ;;  %vm98_vm6 = vcmp.ge.f32.partialorder %v82_v42, 0.0  ;;  %vm99_vm7 = vcmp.ge.f32.partialorder %v83_v43, 0.0 }
   0xe   :  { %337 = vst [vmem:[%s458_s3 + $0x8] sm:$0xff] %v298_v40   ;;  %v129_v49 = vsel %vm97_vm5, %v81_v27, %v113_v41  ;;  %v114_v50 = vmul.f32 0.2, %v82_v42  ;;  %v115_v52 = vmul.f32 0.2, %v83_v43  ;;  %v61_v53 = vmul.f32 %v276_v45, %v370_v1 }
   0xf   :  { %v303_v51 = vpack.c.bf16 %v129_v49, %v128_v44  ;;  %v62_v54 = vmul.f32 %v277_v46, %v370_v1  ;;  %v281_v56 = vunpack.c.h.bf16 %v334_v35  ;;  %v63_v57 = vmul.f32 %v280_v47, %v370_v1 }
  0x10   :  { %v130_v55 = vsel %vm98_vm6, %v82_v42, %v114_v50  ;;  %v284_v58 = vunpack.c.l.bf16 %v335_v48  ;;  %v131_v59 = vsel %vm99_vm7, %v83_v43, %v115_v52  ;;  %v84_v60 = vadd.f32 %v384_v7, %v61_v53 }
  0x11   :  { %338 = vst [vmem:[%s458_s3 + $0x10] sm:$0xff] %v303_v51   ;;  %v85_v61 = vadd.f32 %v384_v7, %v62_v54  ;;  %v285_v62 = vunpack.c.h.bf16 %v335_v48  ;;  %v308_v63 = vpack.c.bf16 %v131_v59, %v130_v55  ;;  %v64_v0 = vmul.f32 %v281_v56, %v370_v1 }
  0x12   :  { %v86_v2 = vadd.f32 %v384_v7, %v63_v57  ;;  %v65_v3 = vmul.f32 %v284_v58, %v370_v1  ;;  %vm100_vm8 = vcmp.ge.f32.partialorder %v84_v60, 0.0  ;;  %v116_v5 = vmul.f32 0.2, %v84_v60 }
  0x13   :  { %vm101_vm9 = vcmp.ge.f32.partialorder %v85_v61, 0.0  ;;  %v117_v6 = vmul.f32 0.2, %v85_v61  ;;  %339 = vst [vmem:[%s458_s3 + $0x18] sm:$0xff] %v308_v63   ;;  %v87_v8 = vadd.f32 %v384_v7, %v64_v0  ;;  %v66_v10 = vmul.f32 %v285_v62, %v370_v1 }
  0x14   :  { %vm102_vm10 = vcmp.ge.f32.partialorder %v86_v2, 0.0  ;;  %v118_v9 = vmul.f32 0.2, %v86_v2  ;;  %v132_v11 = vsel %vm100_vm8, %v84_v60, %v116_v5  ;;  %v88_v13 = vadd.f32 %v384_v7, %v65_v3 }
  0x15   :  { %v133_v12 = vsel %vm101_vm9, %v85_v61, %v117_v6  ;;  %v288_v14 = vunpack.c.l.bf16 %v336_v4  ;;  %vm103_vm11 = vcmp.ge.f32.partialorder %v87_v8, 0.0  ;;  %v119_v16 = vmul.f32 0.2, %v87_v8 }
  0x16   :  { %v313_v15 = vpack.c.bf16 %v133_v12, %v132_v11  ;;  %v134_v17 = vsel %vm102_vm10, %v86_v2, %v118_v9  ;;  %v89_v18 = vadd.f32 %v384_v7, %v66_v10  ;;  %vm104_vm12 = vcmp.ge.f32.partialorder %v88_v13, 0.0 }
  0x17   :  { %v120_v19 = vmul.f32 0.2, %v88_v13  ;;  %v289_v20 = vunpack.c.h.bf16 %v336_v4  ;;  %v135_v21 = vsel %vm103_vm11, %v87_v8, %v119_v16  ;;  %v67_v22 = vmul.f32 %v288_v14, %v370_v1 }
  0x18   :  { %340 = vst [vmem:[%s458_s3 + $0x20] sm:$0xff] %v313_v15   ;;  %v318_v23 = vpack.c.bf16 %v135_v21, %v134_v17  ;;  %vm105_vm13 = vcmp.ge.f32.partialorder %v89_v18, 0.0  ;;  %v121_v24 = vmul.f32 0.2, %v89_v18 }
  0x19   :  { %v136_v25 = vsel %vm104_vm12, %v88_v13, %v120_v19  ;;  %v68_v26 = vmul.f32 %v289_v20, %v370_v1  ;;  %v90_v27 = vadd.f32 %v384_v7, %v67_v22 }
  0x1a   :  { %341 = vst [vmem:[%s458_s3 + $0x28] sm:$0xff] %v318_v23   ;;  %v137_v28 = vsel %vm105_vm13, %v89_v18, %v121_v24 }
  0x1b   :  { %v323_v29 = vpack.c.bf16 %v137_v28, %v136_v25  ;;  %v91_v30 = vadd.f32 %v384_v7, %v68_v26  ;;  %vm106_vm14 = vcmp.ge.f32.partialorder %v90_v27, 0.0  ;;  %v122_v31 = vmul.f32 0.2, %v90_v27 }
  0x1d   :  { %342 = vst [vmem:[%s458_s3 + $0x30] sm:$0xff] %v323_v29   ;;  %vm107_vm15 = vcmp.ge.f32.partialorder %v91_v30, 0.0  ;;  %v123_v32 = vmul.f32 0.2, %v91_v30  ;;  %v138_v33 = vsel %vm106_vm14, %v90_v27, %v122_v31 }
  0x1f   :  { %v139_v1 = vsel %vm107_vm15, %v91_v30, %v123_v32 }
  0x20   :  { %v328_v34 = vpack.c.bf16 %v139_v1, %v138_v33 }
  0x22   :  { %343 = vst [vmem:[%s458_s3 + $0x38] sm:$0xff] %v328_v34  }

// kernel: upsample_forward.6
= control target key start
LH: loop header
LB: loop body
LE: loop exit
PB: predicated region body
PF: predicated region fallthrough
CT: control target
= control target key end

     0   :  { %s15260_s15 = smov 0   ;;  %s15262_s16 = smov 0   ;;  %s18988_s0 = inlined_call_operand.vmem [shape: bf16[2,34,34,8], index: 0, kind: input, shape index: {}]   ;;  %s18989_s1 = inlined_call_operand.vmem [shape: bf16[72,8], index: 1, kind: input, shape index: {}]   ;;  %s18990_s2 = inlined_call_operand.vmem [shape: bf16[2,32,32,8], index: 2, kind: output, shape index: {0}]   ;;  %s18991_s3 = inlined_call_operand.vmem [shape: f32[1,8], index: 3, kind: output, shape index: {1}]   ;;  %s18992_s4 = inlined_call_operand.vmem [shape: f32[1,8], index: 4, kind: output, shape index: {2}]  }
   0x1   :  { %s15264_s17 = smov 0  }
   0x2 LB: > { %s24_s18 = sadd.s32 1, %s15228_s16  ;;  %p11047_p0 = scmp.ge.s32.totalorder %s15232_s17, 1  ;;  %s15232_s17 = sphi %s15264_s17, %s15_s17   ;;  %s15228_s16 = sphi %s15262_s16, %s19886_s16   ;;  %s15224_s15 = sphi %s15260_s15, %s19885_s15  }
   0x3   : > { %p25_p1 = scmp.ge.s32.totalorder %s24_s18, 2  ;;  %p190_p2 = scmp.lt.s32.totalorder %s15232_s17, 3 }
   0x5   : > { %s19888_s18 = smov (%p25_p1, %s24_s18), 0  ;;  %p191_p3 = pnand %p11047_p0, %p190_p2 }
   0x7   : > { %194 = sbr.rel (%p191_p3) target bundleno = 1484 (0x5cc), region = 28 }
   0xe   : > { %p229_p4 = scmp.lt.s32.totalorder %s15224_s15, 1  ;;  %p11051_p5 = scmp.ne.s32.totalorder %s15224_s15, 0 }
   0xf   : > { %vm257_vm0 = vcmask (!%p11051_p5), 57344   ;;  %v15234_v0 = vmov (!%p11051_p5), 0.0  }
  0x10   : > { %s230_s19 = scalar_select %p229_p4, %s15224_s15, 1 }
  0x11   : > { %256 = sbr.rel (%p11051_p5) target bundleno = 24 (0x18), region = 32  ;;  %258 = vst.msk [vmem:[%s18991_s3] sm:$0x1] (!%p11051_p5), %vm257_vm0, %v15234_v0  ;;  %259 = vst.msk [vmem:[%s18992_s4] sm:$0x1] (!%p11051_p5), %vm257_vm0, %v15234_v0 }
  0x12   : > { %s14918_s20 = smul.u32 680, %s230_s19  ;;  %s11998_s21 = sshll.u32 %s230_s19, 9 }
  0x13   : > { %s15281_s24 = scalar_lea.vmem %s18990_s2, %s11998_s21 }
  0x14   : > { %s15286_s27 = scalar_lea.vmem %s18988_s0, %s14918_s20 }
  0x18 PF: > { %v431_v1 = vld [vmem:[%s18989_s1 + $0x4] sm:$0xf]  ;;  %vm2228_vm1 = vcmask 1043456   ;;  %v6042_v2 = vld [vmem:[%s18989_s1 + $0x10] sm:$0xf]  ;;  %vm2035_vm4 = vcmask 64512  }
  0x19   : > { %14908 = vmatprep.subr.msk.bf16.mxu1 %vm2228_vm1, %v431_v1  ;;  %14912 = vmatprep.subr.msk.bf16.mxu0 %vm2228_vm1, %v6042_v2  ;;  %v2230_v3 = vsel %vm2228_vm1, %v431_v1, 0  ;;  %v15304_v4 = vsel %vm2228_vm1, %v6042_v2, 0  ;;  %v260_v5 = vld [vmem:[%s15286_s27] sm:$0xf]  ;;  %v261_v6 = vld [vmem:[%s15286_s27 + $0x4] sm:$0xf] }
  0x1a   : > { %19310 = vst [vmem:[#allocation2_spill] sm:$0xff] %v15304_v4  ;;  %12713 = vmatpush3.bf16.msra.mxu1 %v2230_v3  ;;  %13233 = vmatpush3.bf16.msra.mxu0 %v15304_v4  ;;  %v262_v7 = vld [vmem:[%s15286_s27 + $0x8] sm:$0xf]  ;;  %v263_v8 = vld [vmem:[%s15286_s27 + $0xc] sm:$0xf]  ;;  %v436_v9 = vshrl.u32 %v260_v5, 16 }
  0x1b   : > { %vm432_vm2 = vsmask.f32 3328  ;;  %vm433_vm3 = vsmask.f32 7440  ;;  %v439_v10 = vshll.u32 %v260_v5, 16  ;;  %v445_v11 = vshll.u32 %v261_v6, 16 }
  0x1c   : > { %v449_v12 = vshrl.u32 %v261_v6, 16  ;;  %v455_v13 = vshll.u32 %v262_v7, 16  ;;  %v459_v14 = vshrl.u32 %v262_v7, 16  ;;  %v430_v15 = vld [vmem:[%s18989_s1] sm:$0xf]  ;;  %v438_v16 = vrot.slane %v436_v9, 4  ;;  %vm15320_vm5 = vmor %vm432_vm2, %vm433_vm3 }
  0x1d   : > { %v441_v17 = vrot.slane %v439_v10, 5  ;;  %v447_v18 = vrot.slane %v445_v11, 5  ;;  %14909 = vmatprep.subr.msk.bf16.mxu1 %vm2228_vm1, %v430_v15  ;;  %v265_v19 = vld [vmem:[%s15286_s27 + $0x14] sm:$0xf]  ;;  %v465_v20 = vshll.u32 %v263_v8, 16  ;;  %v19311_v31 = vmov 0 }
  0x1e   : > { %v451_v21 = vrot.slane %v449_v12, 4  ;;  %v457_v22 = vrot.slane %v455_v13, 5  ;;  %v461_v23 = vrot.slane %v459_v14, 4  ;;  %v266_v24 = vld [vmem:[%s15286_s27 + $0x18] sm:$0xf]  ;;  %v480_v25 = vshrl.u32 %v265_v19, 16 }
  0x1f   : > { %v442_v26 = vor.u32 %v441_v17, %v438_v16  ;;  %v267_v27 = vld [vmem:[%s15286_s27 + $0x1c] sm:$0xf]  ;;  %v483_v28 = vshll.u32 %v265_v19, 16  ;;  %v489_v29 = vshll.u32 %v266_v24, 16  ;;  %v493_v30 = vshrl.u32 %v266_v24, 16 }
  0x20   : > { %v19312_v31 = vsel %vm15320_vm5, 4294967295, %v19311_v31  ;;  %v452_v32 = vor.u32 %v451_v21, %v447_v18  ;;  %v462_v33 = vor.u32 %v461_v23, %v457_v22  ;;  %v482_v34 = vrot.slane %v480_v25, 4  ;;  %v6775_v36 = vld [vmem:[%s18989_s1 + $0x14] sm:$0xf]  ;;  %v264_v41 = vld [vmem:[%s15286_s27 + $0x10] sm:$0x1] }
  0x21   : > { %19313 = vst [vmem:[#allocation3_spill] sm:$0xff] %v19312_v31  ;;  %v499_v35 = vshll.u32 %v267_v27, 16  ;;  %v443_v37 = vrot.slane %v442_v26, 4  ;;  %v485_v38 = vrot.slane %v483_v28, 5  ;;  %v491_v39 = vrot.slane %v489_v29, 5  ;;  %14914 = vmatprep.subr.msk.bf16.mxu0 %vm2228_vm1, %v6775_v36 }
  0x22   : > { %v495_v40 = vrot.slane %v493_v30, 4  ;;  %v453_v42 = vrot.slane %v452_v32, 4  ;;  %v463_v43 = vrot.slane %v462_v33, 4  ;;  %v503_v45 = vshrl.u32 %v267_v27, 16  ;;  %v15334_v54 = vld [vmem:[%s15286_s27 + $0x20] sm:$0xf] }
  0x23   : > { %v501_v44 = vrot.slane %v499_v35, 5  ;;  %v448_v46 = vsel %vm15320_vm5, %v443_v37, %v447_v18  ;;  %v486_v47 = vor.u32 %v485_v38, %v482_v34  ;;  %v467_v49 = vrot.slane %v465_v20, 5  ;;  %v15339_v62 = vld [vmem:[%s15286_s27 + $0x24] sm:$0x1]  ;;  %v270_v3 = vld [vmem:[%s15286_s27 + $0x28] sm:$0xf] }
  0x24   : > { %v496_v48 = vor.u32 %v495_v40, %v491_v39  ;;  %v458_v50 = vsel %vm15320_vm5, %v453_v42, %v457_v22  ;;  %v505_v51 = vrot.slane %v503_v45, 4  ;;  %v469_v52 = vshrl.u32 %v263_v8, 16  ;;  %v271_v9 = vld [vmem:[%s15286_s27 + $0x2c] sm:$0xf]  ;;  %v272_v17 = vld [vmem:[%s15286_s27 + $0x30] sm:$0xf] }
  0x25   : > { %v475_v53 = vshll.u32 %v264_v41, 16  ;;  %v11052_v55 = vcombine.low %v448_v46, %v458_v50  ;;  %v487_v56 = vrot.slane %v486_v47, 4  ;;  %v468_v59 = vsel %vm15320_vm5, %v463_v43, %v467_v49  ;;  %v273_v23 = vld [vmem:[%s15286_s27 + $0x34] sm:$0xf]  ;;  %v274_v28 = vld [vmem:[%s15286_s27 + $0x38] sm:$0x1] }
  0x26   : > { %v497_v57 = vrot.slane %v496_v48, 4  ;;  %v506_v58 = vor.u32 %v505_v51, %v501_v44  ;;  %v471_v60 = vrot.slane %v469_v52, 4  ;;  %v3290_v1 = vsel %vm2228_vm1, %v430_v15, 0  ;;  %v275_v42 = vld [vmem:[%s15286_s27 + $0x3c] sm:$0xf] }
  0x27   : > { %v477_v61 = vrot.slane %v475_v53, 5  ;;  %12714 = vmatprep.mubr.msk.bf16.mxu1 %vm2035_vm4, %v11052_v55  ;;  %v492_v63 = vsel %vm15320_vm5, %v487_v56, %v491_v39  ;;  %v509_v2 = vshll.u32 %v15334_v54, 16  ;;  %v513_v8 = vshrl.u32 %v15334_v54, 16  ;;  %v276_v47 = vld [vmem:[%s15286_s27 + $0x40] sm:$0xf] }
  0x28   : > { %v502_v0 = vsel %vm15320_vm5, %v497_v57, %v501_v44  ;;  %v507_v5 = vrot.slane %v506_v58, 4  ;;  %v472_v7 = vor.u32 %v471_v60, %v467_v49  ;;  %v519_v11 = vshll.u32 %v15339_v62, 16 }
  0x29   : > { %v11054_v6 = vcombine.low %v492_v63, %v502_v0  ;;  %v511_v10 = vrot.slane %v509_v2, 5  ;;  %v3894_v12 = vrot.slane %v15334_v54, 5  ;;  %v3897_v13 = vrot.slane %v15339_v62, 5 }
  0x2a   : > { %v473_v14 = vrot.slane %v472_v7, 4  ;;  %v515_v15 = vrot.slane %v513_v8, 4  ;;  %v6803_v16 = vsel %vm2228_vm1, %v6775_v36, 0  ;;  %v524_v18 = vshrl.u32 %v270_v3, 16 }
  0x2b   : > { %13234 = vmatprep.mubr.msk.bf16.mxu0 %vm2035_vm4, %v11054_v6  ;;  %v512_v19 = vsel %vm15320_vm5, %v507_v5, %v511_v10  ;;  %v521_v20 = vrot.slane %v519_v11, 5  ;;  %v527_v21 = vshll.u32 %v270_v3, 16  ;;  %v533_v22 = vshll.u32 %v271_v9, 16  ;;  %v278_v3 = vld [vmem:[%s15286_s27 + $0x48] sm:$0xf] }
  0x2c   : > { %v478_v24 = vsel %vm15320_vm5, %v473_v14, %v477_v61  ;;  %v516_v25 = vor.u32 %v515_v15, %v511_v10  ;;  %v526_v26 = vrot.slane %v524_v18, 4  ;;  %v537_v27 = vshrl.u32 %v271_v9, 16  ;;  %v279_v14 = vld [vmem:[%s15286_s27 + $0x4c] sm:$0x1] }
  0x2d   : > { %v11053_v29 = vcombine.low %v468_v59, %v478_v24  ;;  %v529_v30 = vrot.slane %v527_v21, 5  ;;  %v535_v32 = vrot.slane %v533_v22, 5  ;;  %v543_v33 = vshll.u32 %v272_v17, 16  ;;  %v277_v59 = vld [vmem:[%s15286_s27 + $0x44] sm:$0xf] }
  0x2e   : > { %v517_v34 = vrot.slane %v516_v25, 4  ;;  %v539_v35 = vrot.slane %v537_v27, 4  ;;  %v547_v36 = vshrl.u32 %v272_v17, 16  ;;  %v553_v37 = vshll.u32 %v273_v23, 16  ;;  %v281_v25 = vld [vmem:[%s15286_s27 + $0x54] sm:$0xf] }
  0x2f   : > { %12715 = vmatmul.mubr.msk.bf16.vlgmr.msra.gmra.mrb[0].mxu1 %vm2035_vm4, %v11053_v29  ;;  %v530_v38 = vor.u32 %v529_v30, %v526_v26  ;;  %v545_v39 = vrot.slane %v543_v33, 5  ;;  %v557_v40 = vshrl.u32 %v273_v23, 16  ;;  %v563_v41 = vshll.u32 %v274_v28, 16  ;;  %v282_v33 = vld [vmem:[%s15286_s27 + $0x58] sm:$0xf] }
  0x30   : > { %12843 = vmatpush3.bf16.msra.mxu1 %v3290_v1  ;;  %v522_v43 = vsel %vm15320_vm5, %v517_v34, %v521_v20  ;;  %12718 = vmatprep.mubr.msk.bf16.mxu1 %vm2035_vm4, %v11054_v6  ;;  %v540_v44 = vor.u32 %v539_v35, %v535_v32  ;;  %v549_v45 = vrot.slane %v547_v36, 4  ;;  %v555_v46 = vrot.slane %v553_v37, 5  ;;  %v280_v20 = vld [vmem:[%s15286_s27 + $0x50] sm:$0xf] }
  0x31   : > { %v11055_v48 = vcombine.low %v512_v19, %v522_v43  ;;  %v531_v49 = vrot.slane %v530_v38, 4  ;;  %v559_v50 = vrot.slane %v557_v40, 4  ;;  %v565_v51 = vrot.slane %v563_v41, 5  ;;  %v283_v40 = vld [vmem:[%s15286_s27 + $0x5c] sm:$0xf] }
  0x32   : > { %v541_v52 = vrot.slane %v540_v44, 4  ;;  %v550_v53 = vor.u32 %v549_v45, %v545_v39  ;;  %v568_v55 = vshrl.u32 %v275_v42, 16  ;;  %v571_v56 = vshll.u32 %v275_v42, 16 }
  0x33   : > { %13235 = vmatmul.mubr.msk.bf16.vlgmr.msra.gmra.mrb[0].mxu0 %vm2035_vm4, %v11055_v48  ;;  %v536_v57 = vsel %vm15320_vm5, %v531_v49, %v535_v32  ;;  %v560_v58 = vor.u32 %v559_v50, %v555_v46  ;;  %v577_v60 = vshll.u32 %v276_v47, 16  ;;  %v581_v61 = vshrl.u32 %v276_v47, 16 }
  0x34   : > { %13363 = vmatpush3.bf16.msra.mxu0 %v6803_v16  ;;  %v546_v63 = vsel %vm15320_vm5, %v541_v52, %v545_v39  ;;  %v551_v0 = vrot.slane %v550_v53, 4  ;;  %v570_v1 = vrot.slane %v568_v55, 4  ;;  %v573_v2 = vrot.slane %v571_v56, 5  ;;  %v285_v55 = vld [vmem:[%s15286_s27 + $0x64] sm:$0xf] }
  0x35   : > { %v15376_v5 = vcombine.low %v536_v57, %v546_v63  ;;  %v561_v6 = vrot.slane %v560_v58, 4  ;;  %v579_v7 = vrot.slane %v577_v60, 5  ;;  %v583_v8 = vrot.slane %v581_v61, 4  ;;  %v286_v60 = vld [vmem:[%s15286_s27 + $0x68] sm:$0xf] }
  0x36   : > { %v556_v9 = vsel %vm15320_vm5, %v551_v0, %v555_v46  ;;  %v574_v10 = vor.u32 %v573_v2, %v570_v1  ;;  %v587_v11 = vshll.u32 %v277_v59, 16  ;;  %v591_v15 = vshrl.u32 %v277_v59, 16 }
  0x37   : > { %19314 = vst [vmem:[#allocation4_spill] sm:$0xff] %v15376_v5  ;;  %13238 = vmatprep.mubr.msk.bf16.mxu0 %vm2035_vm4, %v15376_v5  ;;  %12719 = vmatmul.mubr.msk.bf16.gmra.mrb[4].mxu1 %vm2035_vm4, %v11055_v48  ;;  %v566_v16 = vsel %vm15320_vm5, %v561_v6, %v565_v51  ;;  %v584_v17 = vor.u32 %v583_v8, %v579_v7  ;;  %v597_v18 = vshll.u32 %v278_v3, 16  ;;  %v601_v19 = vshrl.u32 %v278_v3, 16  ;;  %v284_v51 = vld [vmem:[%s15286_s27 + $0x60] sm:$0x1] }
  0x38   : > { %v15387_v21 = vcombine.low %v556_v9, %v566_v16  ;;  %12722 = vmatprep.mubr.msk.bf16.mxu1 %vm2035_vm4, %v15376_v5  ;;  %v575_v22 = vrot.slane %v574_v10, 4  ;;  %v589_v23 = vrot.slane %v587_v11, 5  ;;  %v593_v24 = vrot.slane %v591_v15, 4  ;;  %v287_v10 = vld [vmem:[%s15286_s27 + $0x6c] sm:$0xf] }
  0x39   : > { %v585_v26 = vrot.slane %v584_v17, 4  ;;  %v599_v27 = vrot.slane %v597_v18, 5  ;;  %v603_v28 = vrot.slane %v601_v19, 4  ;;  %v607_v29 = vshll.u32 %v279_v14, 16  ;;  %v15074_v5 = vld [vmem:[%s15286_s27 + $0x114] sm:$0x1] }
  0x3a   : > { %19315 = vst [vmem:[#allocation5_spill] sm:$0xff] %v15387_v21  ;;  %v580_v30 = vsel %vm15320_vm5, %v575_v22, %v579_v7  ;;  %v594_v32 = vor.u32 %v593_v24, %v589_v23  ;;  %v612_v34 = vshrl.u32 %v280_v20, 16  ;;  %v615_v35 = vshll.u32 %v280_v20, 16  ;;  %v288_v24 = vld [vmem:[%s15286_s27 + $0x70] sm:$0xf] }
  0x3b   : > { %13239 = vmatmul.mubr.msk.bf16.gmra.mrb[4].mxu0 %vm2035_vm4, %v15387_v21  ;;  %v590_v36 = vsel %vm15320_vm5, %v585_v26, %v589_v23  ;;  %v604_v37 = vor.u32 %v603_v28, %v599_v27  ;;  %v609_v38 = vrot.slane %v607_v29, 5  ;;  %v621_v39 = vshll.u32 %v281_v25, 16 }
  0x3c   : > { %v15400_v41 = vcombine.low %v580_v30, %v590_v36  ;;  %v595_v42 = vrot.slane %v594_v32, 4  ;;  %v614_v43 = vrot.slane %v612_v34, 4  ;;  %v617_v44 = vrot.slane %v615_v35, 5  ;;  %v289_v34 = vld [vmem:[%s15286_s27 + $0x74] sm:$0x1] }
  0x3d   : > { %v605_v45 = vrot.slane %v604_v37, 4  ;;  %v623_v46 = vrot.slane %v621_v39, 5  ;;  %v625_v47 = vshrl.u32 %v281_v25, 16  ;;  %v631_v48 = vshll.u32 %v282_v33, 16  ;;  %v290_v35 = vld [vmem:[%s15286_s27 + $0x78] sm:$0xf] }
  0x3e   : > { %19316 = vst [vmem:[#allocation6_spill] sm:$0xff] %v15400_v41  ;;  %13242 = vmatprep.mubr.msk.bf16.mxu0 %vm2035_vm4, %v15400_v41  ;;  %v600_v49 = vsel %vm15320_vm5, %v595_v42, %v599_v27  ;;  %v618_v50 = vor.u32 %v617_v44, %v614_v43  ;;  %v635_v52 = vshrl.u32 %v282_v33, 16  ;;  %v641_v53 = vshll.u32 %v283_v40, 16 }
  0x3f   : > { %12723 = vmatmul.mubr.msk.bf16.gmra.mrb[8].mxu1 %vm2035_vm4, %v15387_v21  ;;  %v610_v56 = vsel %vm15320_vm5, %v605_v45, %v609_v38  ;;  %v627_v57 = vrot.slane %v625_v47, 4  ;;  %v633_v58 = vrot.slane %v631_v48, 5  ;;  %v645_v59 = vshrl.u32 %v283_v40, 16  ;;  %v291_v45 = vld [vmem:[%s15286_s27 + $0x7c] sm:$0xf] }
  0x40   : > { %v15413_v61 = vcombine.low %v600_v49, %v610_v56  ;;  %12726 = vmatprep.mubr.msk.bf16.mxu1 %vm2035_vm4, %v15400_v41  ;;  %v619_v63 = vrot.slane %v618_v50, 4  ;;  %v637_v0 = vrot.slane %v635_v52, 4  ;;  %v643_v1 = vrot.slane %v641_v53, 5  ;;  %v292_v53 = vld [vmem:[%s15286_s27 + $0x80] sm:$0xf] }
  0x41   : > { %v628_v2 = vor.u32 %v627_v57, %v623_v46  ;;  %v647_v3 = vrot.slane %v645_v59, 4  ;;  %v651_v6 = vshll.u32 %v284_v51, 16  ;;  %v656_v7 = vshrl.u32 %v285_v55, 16 }
  0x42   : > { %19317 = vst [vmem:[#allocation7_spill] sm:$0xff] %v15413_v61  ;;  %v624_v8 = vsel %vm15320_vm5, %v619_v63, %v623_v46  ;;  %v638_v9 = vor.u32 %v637_v0, %v633_v58  ;;  %v659_v11 = vshll.u32 %v285_v55, 16  ;;  %v665_v14 = vshll.u32 %v286_v60, 16 }
  0x43   : > { %13243 = vmatmul.mubr.msk.bf16.gmra.mrb[8].mxu0 %vm2035_vm4, %v15413_v61  ;;  %v629_v15 = vrot.slane %v628_v2, 4  ;;  %v648_v16 = vor.u32 %v647_v3, %v643_v1  ;;  %v653_v17 = vrot.slane %v651_v6, 5  ;;  %v658_v18 = vrot.slane %v656_v7, 4  ;;  %v293_v2 = vld [vmem:[%s15286_s27 + $0x84] sm:$0xf] }
  0x44   : > { %v639_v19 = vrot.slane %v638_v9, 4  ;;  %v661_v20 = vrot.slane %v659_v11, 5  ;;  %v667_v22 = vrot.slane %v665_v14, 5  ;;  %v669_v23 = vshrl.u32 %v286_v60, 16  ;;  %v294_v3 = vld [vmem:[%s15286_s27 + $0x88] sm:$0x1] }
  0x45   : > { %v634_v25 = vsel %vm15320_vm5, %v629_v15, %v633_v58  ;;  %v649_v26 = vrot.slane %v648_v16, 4  ;;  %v675_v27 = vshll.u32 %v287_v10, 16  ;;  %v679_v28 = vshrl.u32 %v287_v10, 16 }
  0x46   : > { %v15425_v29 = vcombine.low %v624_v8, %v634_v25  ;;  %v644_v30 = vsel %vm15320_vm5, %v639_v19, %v643_v1  ;;  %v662_v32 = vor.u32 %v661_v20, %v658_v18  ;;  %v671_v33 = vrot.slane %v669_v23, 4  ;;  %v295_v20 = vld [vmem:[%s15286_s27 + $0x8c] sm:$0xf] }
  0x47   : > { %12727 = vmatmul.mubr.msk.bf16.gmra.mrb[12].mxu1 %vm2035_vm4, %v15413_v61  ;;  %v654_v36 = vsel %vm15320_vm5, %v649_v26, %v653_v17  ;;  %v677_v37 = vrot.slane %v675_v27, 5  ;;  %v681_v38 = vrot.slane %v679_v28, 4  ;;  %v685_v39 = vshll.u32 %v288_v24, 16  ;;  %v296_v26 = vld [vmem:[%s15286_s27 + $0x90] sm:$0xf] }
  0x48   : > { %19318 = vst [vmem:[#allocation8_spill] sm:$0xff] %v15425_v29  ;;  %13246 = vmatprep.mubr.msk.bf16.mxu0 %vm2035_vm4, %v15425_v29  ;;  %v15437_v40 = vcombine.low %v644_v30, %v654_v36  ;;  %12730 = vmatprep.mubr.msk.bf16.mxu1 %vm2035_vm4, %v15425_v29  ;;  %v663_v42 = vrot.slane %v662_v32, 4  ;;  %v672_v43 = vor.u32 %v671_v33, %v667_v22  ;;  %v689_v44 = vshrl.u32 %v288_v24, 16  ;;  %v297_v33 = vld [vmem:[%s15286_s27 + $0x94] sm:$0xf] }
  0x49   : > { %v682_v46 = vor.u32 %v681_v38, %v677_v37  ;;  %v687_v47 = vrot.slane %v685_v39, 5  ;;  %v695_v48 = vshll.u32 %v289_v34, 16  ;;  %v700_v49 = vshrl.u32 %v290_v35, 16  ;;  %v16313_v61 = vld [vmem:[%s15286_s27 + $0x244] sm:$0xf] }
  0x4a   : > { %19319 = vst [vmem:[#allocation9_spill] sm:$0xff] %v15437_v40  ;;  %v668_v50 = vsel %vm15320_vm5, %v663_v42, %v667_v22  ;;  %v673_v51 = vrot.slane %v672_v43, 4  ;;  %v691_v52 = vrot.slane %v689_v44, 4  ;;  %v703_v55 = vshll.u32 %v290_v35, 16 }
  0x4b   : > { %13247 = vmatmul.mubr.msk.bf16.gmra.mrb[12].mxu0 %vm2035_vm4, %v15437_v40  ;;  %v683_v56 = vrot.slane %v682_v46, 4  ;;  %v697_v57 = vrot.slane %v695_v48, 5  ;;  %v702_v58 = vrot.slane %v700_v49, 4  ;;  %v709_v59 = vshll.u32 %v291_v45, 16  ;;  %v298_v48 = vld [vmem:[%s15286_s27 + $0x98] sm:$0xf] }
  0x4c   : > { %v678_v60 = vsel %vm15320_vm5, %v673_v51, %v677_v37  ;;  %v692_v63 = vor.u32 %v691_v52, %v687_v47  ;;  %v705_v0 = vrot.slane %v703_v55, 5  ;;  %v713_v1 = vshrl.u32 %v291_v45, 16 }
  0x4d   : > { %v15451_v6 = vcombine.low %v668_v50, %v678_v60  ;;  %v688_v7 = vsel %vm15320_vm5, %v683_v56, %v687_v47  ;;  %v711_v8 = vrot.slane %v709_v59, 5  ;;  %v719_v9 = vshll.u32 %v292_v53, 16  ;;  %v300_v59 = vld [vmem:[%s15286_s27 + $0xa0] sm:$0xf] }
  0x4e   : > { %v693_v10 = vrot.slane %v692_v63, 4  ;;  %v706_v11 = vor.u32 %v705_v0, %v702_v58  ;;  %v715_v14 = vrot.slane %v713_v1, 4  ;;  %v723_v15 = vshrl.u32 %v292_v53, 16  ;;  %v299_v53 = vld [vmem:[%s15286_s27 + $0x9c] sm:$0x1] }
  0x4f   : > { %19320 = vst [vmem:[#allocation10_spill] sm:$0xff] %v15451_v6  ;;  %13250 = vmatprep.mubr.msk.bf16.mxu0 %vm2035_vm4, %v15451_v6  ;;  %12731 = vmatmul.mubr.msk.bf16.gmra.mrb[16].mxu1 %vm2035_vm4, %v15437_v40  ;;  %v721_v16 = vrot.slane %v719_v9, 5  ;;  %v729_v17 = vshll.u32 %v293_v2, 16  ;;  %v733_v18 = vshrl.u32 %v293_v2, 16  ;;  %v739_v19 = vshll.u32 %v294_v3, 16 }
  0x50   : > { %v698_v22 = vsel %vm15320_vm5, %v693_v10, %v697_v57  ;;  %12734 = vmatprep.mubr.msk.bf16.mxu1 %vm2035_vm4, %v15451_v6  ;;  %v707_v23 = vrot.slane %v706_v11, 4  ;;  %v716_v24 = vor.u32 %v715_v14, %v711_v8  ;;  %v725_v25 = vrot.slane %v723_v15, 4  ;;  %v301_v9 = vld [vmem:[%s15286_s27 + $0xa4] sm:$0xf] }
  0x51   : > { %v15465_v27 = vcombine.low %v688_v7, %v698_v22  ;;  %v731_v28 = vrot.slane %v729_v17, 5  ;;  %v735_v30 = vrot.slane %v733_v18, 4  ;;  %v741_v32 = vrot.slane %v739_v19, 5 }
  0x52   : > { %v712_v34 = vsel %vm15320_vm5, %v707_v23, %v711_v8  ;;  %v717_v35 = vrot.slane %v716_v24, 4  ;;  %v726_v36 = vor.u32 %v725_v25, %v721_v16  ;;  %v744_v37 = vshrl.u32 %v295_v20, 16 }
  0x53   : > { %19321 = vst [vmem:[#allocation11_spill] sm:$0xff] %v15465_v27  ;;  %13251 = vmatmul.mubr.msk.bf16.gmra.mrb[16].mxu0 %vm2035_vm4, %v15465_v27  ;;  %v736_v38 = vor.u32 %v735_v30, %v731_v28  ;;  %v747_v39 = vshll.u32 %v295_v20, 16  ;;  %v753_v42 = vshll.u32 %v296_v26, 16  ;;  %v757_v43 = vshrl.u32 %v296_v26, 16  ;;  %v302_v20 = vld [vmem:[%s15286_s27 + $0xa8] sm:$0xf] }
  0x54   : > { %v722_v44 = vsel %vm15320_vm5, %v717_v35, %v721_v16  ;;  %v727_v45 = vrot.slane %v726_v36, 4  ;;  %v746_v46 = vrot.slane %v744_v37, 4  ;;  %v763_v47 = vshll.u32 %v297_v33, 16  ;;  %v15495_v16 = vld [vmem:[%s18989_s1 + $0x18] sm:$0xf] }
  0x55   : > { %v15475_v49 = vcombine.low %v712_v34, %v722_v44  ;;  %v737_v50 = vrot.slane %v736_v38, 4  ;;  %v749_v51 = vrot.slane %v747_v39, 5  ;;  %v755_v52 = vrot.slane %v753_v42, 5  ;;  %14915 = vmatprep.subr.msk.bf16.mxu0 %vm2228_vm1, %v15495_v16  ;;  %v303_v34 = vld [vmem:[%s15286_s27 + $0xac] sm:$0xf] }
  0x56   : > { %v732_v55 = vsel %vm15320_vm5, %v727_v45, %v731_v28  ;;  %v759_v56 = vrot.slane %v757_v43, 4  ;;  %v765_v57 = vrot.slane %v763_v47, 5  ;;  %v767_v58 = vshrl.u32 %v297_v33, 16  ;;  %v304_v44 = vld [vmem:[%s15286_s27 + $0xb0] sm:$0x1] }
  0x57   : > { %19322 = vst [vmem:[#allocation12_spill] sm:$0xff] %v15475_v49  ;;  %13254 = vmatprep.mubr.msk.bf16.mxu0 %vm2035_vm4, %v15475_v49  ;;  %12735 = vmatmul.mubr.msk.bf16.gmra.mrb[20].mxu1 %vm2035_vm4, %v15465_v27  ;;  %v742_v60 = vsel %vm15320_vm5, %v737_v50, %v741_v32  ;;  %v750_v63 = vor.u32 %v749_v51, %v746_v46  ;;  %v773_v0 = vshll.u32 %v298_v48, 16  ;;  %v777_v1 = vshrl.u32 %v298_v48, 16  ;;  %v305_v46 = vld [vmem:[%s15286_s27 + $0xb4] sm:$0xf] }
  0x58   : > { %v15487_v2 = vcombine.low %v732_v55, %v742_v60  ;;  %12738 = vmatprep.mubr.msk.bf16.mxu1 %vm2035_vm4, %v15475_v49  ;;  %v760_v3 = vor.u32 %v759_v56, %v755_v52  ;;  %v769_v7 = vrot.slane %v767_v58, 4  ;;  %v783_v8 = vshll.u32 %v299_v53, 16  ;;  %v16284_v49 = vld [vmem:[%s15286_s27 + $0x240] sm:$0x1] }
  0x59   : > { %v751_v10 = vrot.slane %v750_v63, 4  ;;  %v775_v11 = vrot.slane %v773_v0, 5  ;;  %v779_v14 = vrot.slane %v777_v1, 4  ;;  %v788_v15 = vshrl.u32 %v300_v59, 16 }
  0x5a   : > { %19323 = vst [vmem:[#allocation13_spill] sm:$0xff] %v15487_v2  ;;  %v761_v17 = vrot.slane %v760_v3, 4  ;;  %v770_v18 = vor.u32 %v769_v7, %v765_v57  ;;  %v785_v19 = vrot.slane %v783_v8, 5  ;;  %v791_v22 = vshll.u32 %v300_v59, 16  ;;  %v307_v7 = vld [vmem:[%s15286_s27 + $0xbc] sm:$0xf] }
  0x5b   : > { %13255 = vmatmul.mubr.msk.bf16.gmra.mrb[20].mxu0 %vm2035_vm4, %v15487_v2  ;;  %v756_v23 = vsel %vm15320_vm5, %v751_v10, %v755_v52  ;;  %v780_v24 = vor.u32 %v779_v14, %v775_v11  ;;  %v790_v25 = vrot.slane %v788_v15, 4  ;;  %v797_v26 = vshll.u32 %v301_v9, 16 }
  0x5c   : > { %v766_v28 = vsel %vm15320_vm5, %v761_v17, %v765_v57  ;;  %v771_v30 = vrot.slane %v770_v18, 4  ;;  %v793_v32 = vrot.slane %v791_v22, 5  ;;  %v801_v33 = vshrl.u32 %v301_v9, 16  ;;  %v306_v57 = vld [vmem:[%s15286_s27 + $0xb8] sm:$0xf] }
  0x5d   : > { %v15507_v35 = vcombine.low %v756_v23, %v766_v28  ;;  %v781_v36 = vrot.slane %v780_v24, 4  ;;  %v799_v37 = vrot.slane %v797_v26, 5  ;;  %v807_v38 = vshll.u32 %v302_v20, 16 }
  0x5e   : > { %v776_v39 = vsel %vm15320_vm5, %v771_v30, %v775_v11  ;;  %v794_v42 = vor.u32 %v793_v32, %v790_v25  ;;  %v803_v43 = vrot.slane %v801_v33, 4  ;;  %v811_v45 = vshrl.u32 %v302_v20, 16  ;;  %v308_v20 = vld [vmem:[%s15286_s27 + $0xc0] sm:$0xf]  ;;  %v309_v32 = vld [vmem:[%s15286_s27 + $0xc4] sm:$0x1] }
  0x5f   : > { %19324 = vst [vmem:[#allocation14_spill] sm:$0xff] %v15507_v35  ;;  %13258 = vmatprep.mubr.msk.bf16.mxu0 %vm2035_vm4, %v15507_v35  ;;  %12739 = vmatmul.mubr.msk.bf16.gmra.mrb[24].mxu1 %vm2035_vm4, %v15487_v2  ;;  %v786_v47 = vsel %vm15320_vm5, %v781_v36, %v785_v19  ;;  %v809_v48 = vrot.slane %v807_v38, 5  ;;  %v817_v50 = vshll.u32 %v303_v34, 16  ;;  %v821_v51 = vshrl.u32 %v303_v34, 16  ;;  %v310_v34 = vld [vmem:[%s15286_s27 + $0xc8] sm:$0xf] }
  0x60   : > { %v15519_v52 = vcombine.low %v776_v39, %v786_v47  ;;  %12742 = vmatprep.mubr.msk.bf16.mxu1 %vm2035_vm4, %v15507_v35  ;;  %v795_v53 = vrot.slane %v794_v42, 4  ;;  %v804_v55 = vor.u32 %v803_v43, %v799_v37  ;;  %v813_v56 = vrot.slane %v811_v45, 4  ;;  %v15069_v35 = vld [vmem:[%s15286_s27 + $0x100] sm:$0x1]  ;;  %v16281_v2 = vld [vmem:[%s15286_s27 + $0x23c] sm:$0xf] }
  0x61   : > { %v819_v58 = vrot.slane %v817_v50, 5  ;;  %v823_v59 = vrot.slane %v821_v51, 4  ;;  %v827_v60 = vshll.u32 %v304_v44, 16  ;;  %v832_v63 = vshrl.u32 %v305_v46, 16 }
  0x62   : > { %19325 = vst [vmem:[#allocation15_spill] sm:$0xff] %v15519_v52  ;;  %v800_v0 = vsel %vm15320_vm5, %v795_v53, %v799_v37  ;;  %v805_v1 = vrot.slane %v804_v55, 4  ;;  %v814_v3 = vor.u32 %v813_v56, %v809_v48  ;;  %v835_v8 = vshll.u32 %v305_v46, 16  ;;  %v311_v46 = vld [vmem:[%s15286_s27 + $0xcc] sm:$0xf] }
  0x63   : > { %13259 = vmatmul.mubr.msk.bf16.gmra.mrb[24].mxu0 %vm2035_vm4, %v15519_v52  ;;  %v824_v9 = vor.u32 %v823_v59, %v819_v58  ;;  %v829_v10 = vrot.slane %v827_v60, 5  ;;  %v834_v11 = vrot.slane %v832_v63, 4  ;;  %v841_v14 = vshll.u32 %v306_v57, 16 }
  0x64   : > { %v810_v15 = vsel %vm15320_vm5, %v805_v1, %v809_v48  ;;  %v815_v17 = vrot.slane %v814_v3, 4  ;;  %v837_v18 = vrot.slane %v835_v8, 5  ;;  %v845_v19 = vshrl.u32 %v306_v57, 16  ;;  %v312_v57 = vld [vmem:[%s15286_s27 + $0xd0] sm:$0xf] }
  0x65   : > { %v15532_v22 = vcombine.low %v800_v0, %v810_v15  ;;  %v825_v23 = vrot.slane %v824_v9, 4  ;;  %v843_v24 = vrot.slane %v841_v14, 5  ;;  %v851_v25 = vshll.u32 %v307_v7, 16  ;;  %v313_v9 = vld [vmem:[%s15286_s27 + $0xd4] sm:$0xf] }
  0x66   : > { %v820_v26 = vsel %vm15320_vm5, %v815_v17, %v819_v58  ;;  %v838_v28 = vor.u32 %v837_v18, %v834_v11  ;;  %v847_v30 = vrot.slane %v845_v19, 4  ;;  %v855_v33 = vshrl.u32 %v307_v7, 16 }
  0x67   : > { %19326 = vst [vmem:[#allocation16_spill] sm:$0xff] %v15532_v22  ;;  %13262 = vmatprep.mubr.msk.bf16.mxu0 %vm2035_vm4, %v15532_v22  ;;  %12743 = vmatmul.mubr.msk.bf16.gmra.mrb[28].mxu1 %vm2035_vm4, %v15519_v52  ;;  %v830_v36 = vsel %vm15320_vm5, %v825_v23, %v829_v10  ;;  %v853_v37 = vrot.slane %v851_v25, 5  ;;  %v861_v38 = vshll.u32 %v308_v20, 16  ;;  %v865_v39 = vshrl.u32 %v308_v20, 16  ;;  %v314_v20 = vld [vmem:[%s15286_s27 + $0xd8] sm:$0x1] }
  0x68   : > { %v15544_v42 = vcombine.low %v820_v26, %v830_v36  ;;  %12746 = vmatprep.mubr.msk.bf16.mxu1 %vm2035_vm4, %v15532_v22  ;;  %v839_v43 = vrot.slane %v838_v28, 4  ;;  %v848_v44 = vor.u32 %v847_v30, %v843_v24  ;;  %v857_v45 = vrot.slane %v855_v33, 4 }
  0x69   : > { %v863_v47 = vrot.slane %v861_v38, 5  ;;  %v867_v48 = vrot.slane %v865_v39, 4  ;;  %v871_v50 = vshll.u32 %v309_v32, 16  ;;  %v876_v51 = vshrl.u32 %v310_v34, 16 }
  0x6a   : > { %19327 = vst [vmem:[#allocation17_spill] sm:$0xff] %v15544_v42  ;;  %v844_v53 = vsel %vm15320_vm5, %v839_v43, %v843_v24  ;;  %v849_v55 = vrot.slane %v848_v44, 4  ;;  %v858_v56 = vor.u32 %v857_v45, %v853_v37  ;;  %v879_v58 = vshll.u32 %v310_v34, 16  ;;  %v315_v24 = vld [vmem:[%s15286_s27 + $0xdc] sm:$0xf] }
  0x6b   : > { %13263 = vmatmul.mubr.msk.bf16.gmra.mrb[28].mxu0 %vm2035_vm4, %v15544_v42  ;;  %v868_v59 = vor.u32 %v867_v48, %v863_v47  ;;  %v873_v60 = vrot.slane %v871_v50, 5  ;;  %v878_v63 = vrot.slane %v876_v51, 4  ;;  %v885_v0 = vshll.u32 %v311_v46, 16  ;;  %v317_v48 = vld [vmem:[%s15286_s27 + $0xe4] sm:$0xf] }
  0x6c   : > { %v854_v1 = vsel %vm15320_vm5, %v849_v55, %v853_v37  ;;  %v859_v3 = vrot.slane %v858_v56, 4  ;;  %v881_v7 = vrot.slane %v879_v58, 5  ;;  %v889_v8 = vshrl.u32 %v311_v46, 16  ;;  %v316_v37 = vld [vmem:[%s15286_s27 + $0xe0] sm:$0xf] }
  0x6d   : > { %v15557_v10 = vcombine.low %v844_v53, %v854_v1  ;;  %v869_v11 = vrot.slane %v868_v59, 4  ;;  %v887_v14 = vrot.slane %v885_v0, 5  ;;  %v895_v15 = vshll.u32 %v312_v57, 16 }
  0x6e   : > { %v864_v17 = vsel %vm15320_vm5, %v859_v3, %v863_v47  ;;  %v882_v18 = vor.u32 %v881_v7, %v878_v63  ;;  %v891_v19 = vrot.slane %v889_v8, 4  ;;  %v899_v23 = vshrl.u32 %v312_v57, 16  ;;  %v318_v63 = vld [vmem:[%s15286_s27 + $0xe8] sm:$0xf] }
  0x6f   : > { %19328 = vst [vmem:[#allocation18_spill] sm:$0xff] %v15557_v10  ;;  %13266 = vmatprep.mubr.msk.bf16.mxu0 %vm2035_vm4, %v15557_v10  ;;  %12747 = vmatmul.mubr.msk.bf16.gmra.mrb[32].mxu1 %vm2035_vm4, %v15544_v42  ;;  %v874_v25 = vsel %vm15320_vm5, %v869_v11, %v873_v60  ;;  %v897_v26 = vrot.slane %v895_v15, 5  ;;  %v905_v28 = vshll.u32 %v313_v9, 16  ;;  %v909_v30 = vshrl.u32 %v313_v9, 16  ;;  %v15067_v42 = vld [vmem:[%s15286_s27 + $0xf8] sm:$0xf] }
  0x70   : > { %v15569_v32 = vcombine.low %v864_v17, %v874_v25  ;;  %12750 = vmatprep.mubr.msk.bf16.mxu1 %vm2035_vm4, %v15557_v10  ;;  %v883_v33 = vrot.slane %v882_v18, 4  ;;  %v892_v34 = vor.u32 %v891_v19, %v887_v14  ;;  %v901_v36 = vrot.slane %v899_v23, 4  ;;  %v320_v17 = vld [vmem:[%s15286_s27 + $0xf0] sm:$0xf] }
  0x71   : > { %v907_v38 = vrot.slane %v905_v28, 5  ;;  %v911_v39 = vrot.slane %v909_v30, 4  ;;  %v915_v43 = vshll.u32 %v314_v20, 16  ;;  %v920_v44 = vshrl.u32 %v315_v24, 16  ;;  %v321_v30 = vld [vmem:[%s15286_s27 + $0xf4] sm:$0xf] }
  0x72   : > { %19329 = vst [vmem:[#allocation19_spill] sm:$0xff] %v15569_v32  ;;  %v888_v45 = vsel %vm15320_vm5, %v883_v33, %v887_v14  ;;  %v893_v46 = vrot.slane %v892_v34, 4  ;;  %v902_v47 = vor.u32 %v901_v36, %v897_v26  ;;  %v923_v50 = vshll.u32 %v315_v24, 16  ;;  %v319_v14 = vld [vmem:[%s15286_s27 + $0xec] sm:$0x1] }
  0x73   : > { %13267 = vmatmul.mubr.msk.bf16.gmra.mrb[32].mxu0 %vm2035_vm4, %v15569_v32  ;;  %v912_v51 = vor.u32 %v911_v39, %v907_v38  ;;  %v917_v53 = vrot.slane %v915_v43, 5  ;;  %v922_v55 = vrot.slane %v920_v44, 4  ;;  %v929_v56 = vshll.u32 %v316_v37, 16  ;;  %v322_v44 = vld [vmem:[%s15286_s27 + $0xf8] sm:$0xf] }
  0x74   : > { %v898_v57 = vsel %vm15320_vm5, %v893_v46, %v897_v26  ;;  %v903_v58 = vrot.slane %v902_v47, 4  ;;  %v925_v59 = vrot.slane %v923_v50, 5  ;;  %v933_v60 = vshrl.u32 %v316_v37, 16 }
  0x75   : > { %v15582_v0 = vcombine.low %v888_v45, %v898_v57  ;;  %v913_v1 = vrot.slane %v912_v51, 4  ;;  %v931_v3 = vrot.slane %v929_v56, 5  ;;  %v939_v7 = vshll.u32 %v317_v48, 16  ;;  %v323_v57 = vld [vmem:[%s15286_s27 + $0xfc] sm:$0xf] }
  0x76   : > { %v908_v8 = vsel %vm15320_vm5, %v903_v58, %v907_v38  ;;  %v926_v9 = vor.u32 %v925_v59, %v922_v55  ;;  %v935_v11 = vrot.slane %v933_v60, 4  ;;  %v943_v15 = vshrl.u32 %v317_v48, 16 }
  0x77   : > { %19330 = vst [vmem:[#allocation20_spill] sm:$0xff] %v15582_v0  ;;  %13270 = vmatprep.mubr.msk.bf16.mxu0 %vm2035_vm4, %v15582_v0  ;;  %12751 = vmatmul.mubr.msk.bf16.gmra.mrb[36].mxu1 %vm2035_vm4, %v15569_v32  ;;  %v918_v18 = vsel %vm15320_vm5, %v913_v1, %v917_v53  ;;  %v941_v19 = vrot.slane %v939_v7, 5  ;;  %v949_v20 = vshll.u32 %v318_v63, 16  ;;  %v953_v23 = vshrl.u32 %v318_v63, 16  ;;  %v15065_v32 = vld [vmem:[%s15286_s27 + $0xf0] sm:$0xf] }
  0x78   : > { %v15594_v24 = vcombine.low %v908_v8, %v918_v18  ;;  %12754 = vmatprep.mubr.msk.bf16.mxu1 %vm2035_vm4, %v15582_v0  ;;  %v927_v25 = vrot.slane %v926_v9, 4  ;;  %v936_v26 = vor.u32 %v935_v11, %v931_v3  ;;  %v945_v28 = vrot.slane %v943_v15, 4  ;;  %v324_v8 = vld [vmem:[%s15286_s27 + $0x100] sm:$0x1]  ;;  %v325_v11 = vld [vmem:[%s15286_s27 + $0x104] sm:$0xf] }
  0x79   : > { %v951_v33 = vrot.slane %v949_v20, 5  ;;  %v955_v34 = vrot.slane %v953_v23, 4  ;;  %v959_v36 = vshll.u32 %v319_v14, 16  ;;  %v964_v37 = vshrl.u32 %v320_v17, 16  ;;  %v16195_v0 = vld [vmem:[%s15286_s27 + $0x224] sm:$0xf] }
  0x7a   : > { %19331 = vst [vmem:[#allocation21_spill] sm:$0xff] %v15594_v24  ;;  %v932_v38 = vsel %vm15320_vm5, %v927_v25, %v931_v3  ;;  %v937_v39 = vrot.slane %v936_v26, 4  ;;  %v946_v43 = vor.u32 %v945_v28, %v941_v19  ;;  %v967_v45 = vshll.u32 %v320_v17, 16  ;;  %v326_v26 = vld [vmem:[%s15286_s27 + $0x108] sm:$0xf] }
  0x7b   : > { %13271 = vmatmul.mubr.msk.bf16.gmra.mrb[36].mxu0 %vm2035_vm4, %v15594_v24  ;;  %v956_v46 = vor.u32 %v955_v34, %v951_v33  ;;  %v961_v47 = vrot.slane %v959_v36, 5  ;;  %v966_v48 = vrot.slane %v964_v37, 4  ;;  %v973_v50 = vshll.u32 %v321_v30, 16 }
  0x7c   : > { %v942_v51 = vsel %vm15320_vm5, %v937_v39, %v941_v19  ;;  %v947_v53 = vrot.slane %v946_v43, 4  ;;  %v969_v55 = vrot.slane %v967_v45, 5  ;;  %v977_v56 = vshrl.u32 %v321_v30, 16  ;;  %v327_v39 = vld [vmem:[%s15286_s27 + $0x10c] sm:$0xf] }
  0x7d   : > { %v15607_v58 = vcombine.low %v932_v38, %v942_v51  ;;  %v957_v59 = vrot.slane %v956_v46, 4  ;;  %v975_v60 = vrot.slane %v973_v50, 5  ;;  %v983_v63 = vshll.u32 %v322_v44, 16 }
  0x7e   : > { %v952_v1 = vsel %vm15320_vm5, %v947_v53, %v951_v33  ;;  %v970_v3 = vor.u32 %v969_v55, %v966_v48  ;;  %v979_v7 = vrot.slane %v977_v56, 4  ;;  %v987_v9 = vshrl.u32 %v322_v44, 16  ;;  %v328_v55 = vld [vmem:[%s15286_s27 + $0x110] sm:$0xf] }
  0x7f   : > { %19332 = vst [vmem:[#allocation22_spill] sm:$0xff] %v15607_v58  ;;  %13274 = vmatprep.mubr.msk.bf16.mxu0 %vm2035_vm4, %v15607_v58  ;;  %12755 = vmatmul.mubr.msk.bf16.gmra.mrb[40].mxu1 %vm2035_vm4, %v15594_v24  ;;  %v962_v14 = vsel %vm15320_vm5, %v957_v59, %v961_v47  ;;  %v985_v15 = vrot.slane %v983_v63, 5  ;;  %v993_v17 = vshll.u32 %v323_v57, 16  ;;  %v997_v18 = vshrl.u32 %v323_v57, 16 }
  0x80   : > { %v15619_v19 = vcombine.low %v952_v1, %v962_v14  ;;  %12758 = vmatprep.mubr.msk.bf16.mxu1 %vm2035_vm4, %v15607_v58  ;;  %v971_v20 = vrot.slane %v970_v3, 4  ;;  %v980_v23 = vor.u32 %v979_v7, %v975_v60  ;;  %v989_v25 = vrot.slane %v987_v9, 4  ;;  %v329_v7 = vld [vmem:[%s15286_s27 + $0x114] sm:$0x1]  ;;  %v330_v9 = vld [vmem:[%s15286_s27 + $0x118] sm:$0xf] }
  0x81   : > { %v995_v28 = vrot.slane %v993_v17, 5  ;;  %v999_v30 = vrot.slane %v997_v18, 4  ;;  %v1003_v33 = vshll.u32 %v324_v8, 16  ;;  %v1008_v34 = vshrl.u32 %v325_v11, 16  ;;  %v15057_v58 = vld [vmem:[%s15286_s27 + $0xd0] sm:$0xf] }
  0x82   : > { %19333 = vst [vmem:[#allocation23_spill] sm:$0xff] %v15619_v19  ;;  %v976_v36 = vsel %vm15320_vm5, %v971_v20, %v975_v60  ;;  %v981_v37 = vrot.slane %v980_v23, 4  ;;  %v990_v38 = vor.u32 %v989_v25, %v985_v15  ;;  %v1011_v43 = vshll.u32 %v325_v11, 16 }
  0x83   : > { %13275 = vmatmul.mubr.msk.bf16.gmra.mrb[40].mxu0 %vm2035_vm4, %v15619_v19  ;;  %v1000_v44 = vor.u32 %v999_v30, %v995_v28  ;;  %v1005_v45 = vrot.slane %v1003_v33, 5  ;;  %v1010_v46 = vrot.slane %v1008_v34, 4  ;;  %v1017_v47 = vshll.u32 %v326_v26, 16 }
  0x84   : > { %v986_v48 = vsel %vm15320_vm5, %v981_v37, %v985_v15  ;;  %v991_v50 = vrot.slane %v990_v38, 4  ;;  %v1013_v51 = vrot.slane %v1011_v43, 5  ;;  %v1021_v53 = vshrl.u32 %v326_v26, 16  ;;  %v331_v26 = vld [vmem:[%s15286_s27 + $0x11c] sm:$0xf] }
  0x85   : > { %v15632_v56 = vcombine.low %v976_v36, %v986_v48  ;;  %v1001_v57 = vrot.slane %v1000_v44, 4  ;;  %v1019_v59 = vrot.slane %v1017_v47, 5  ;;  %v1027_v60 = vshll.u32 %v327_v39, 16 }
  0x86   : > { %v996_v63 = vsel %vm15320_vm5, %v991_v50, %v995_v28  ;;  %v1014_v1 = vor.u32 %v1013_v51, %v1010_v46  ;;  %v1023_v3 = vrot.slane %v1021_v53, 4  ;;  %v1031_v8 = vshrl.u32 %v327_v39, 16  ;;  %v332_v39 = vld [vmem:[%s15286_s27 + $0x120] sm:$0xf] }
  0x87   : > { %19334 = vst [vmem:[#allocation24_spill] sm:$0xff] %v15632_v56  ;;  %13278 = vmatprep.mubr.msk.bf16.mxu0 %vm2035_vm4, %v15632_v56  ;;  %12759 = vmatmul.mubr.msk.bf16.gmra.mrb[44].mxu1 %vm2035_vm4, %v15619_v19  ;;  %v1006_v11 = vsel %vm15320_vm5, %v1001_v57, %v1005_v45  ;;  %v1029_v14 = vrot.slane %v1027_v60, 5  ;;  %v1037_v15 = vshll.u32 %v328_v55, 16  ;;  %v1041_v17 = vshrl.u32 %v328_v55, 16  ;;  %v333_v55 = vld [vmem:[%s15286_s27 + $0x124] sm:$0xf] }
  0x88   : > { %v15644_v18 = vcombine.low %v996_v63, %v1006_v11  ;;  %12762 = vmatprep.mubr.msk.bf16.mxu1 %vm2035_vm4, %v15632_v56  ;;  %v1015_v20 = vrot.slane %v1014_v1, 4  ;;  %v1024_v23 = vor.u32 %v1023_v3, %v1019_v59  ;;  %v1033_v25 = vrot.slane %v1031_v8, 4  ;;  %v334_v8 = vld [vmem:[%s15286_s27 + $0x128] sm:$0x1]  ;;  %v335_v11 = vld [vmem:[%s15286_s27 + $0x12c] sm:$0xf] }
  0x89   : > { %v1039_v28 = vrot.slane %v1037_v15, 5  ;;  %v1043_v30 = vrot.slane %v1041_v17, 4  ;;  %v1047_v33 = vshll.u32 %v329_v7, 16  ;;  %v1052_v34 = vshrl.u32 %v330_v9, 16 }
  0x8a   : > { %19335 = vst [vmem:[#allocation25_spill] sm:$0xff] %v15644_v18  ;;  %v1020_v36 = vsel %vm15320_vm5, %v1015_v20, %v1019_v59  ;;  %v1025_v37 = vrot.slane %v1024_v23, 4  ;;  %v1034_v38 = vor.u32 %v1033_v25, %v1029_v14  ;;  %v1055_v43 = vshll.u32 %v330_v9, 16 }
  0x8b   : > { %13279 = vmatmul.mubr.msk.bf16.gmra.mrb[44].mxu0 %vm2035_vm4, %v15644_v18  ;;  %v1044_v44 = vor.u32 %v1043_v30, %v1039_v28  ;;  %v1049_v45 = vrot.slane %v1047_v33, 5  ;;  %v1054_v46 = vrot.slane %v1052_v34, 4  ;;  %v1061_v47 = vshll.u32 %v331_v26, 16  ;;  %v336_v30 = vld [vmem:[%s15286_s27 + $0x130] sm:$0xf] }
  0x8c   : > { %v1030_v48 = vsel %vm15320_vm5, %v1025_v37, %v1029_v14  ;;  %v1035_v50 = vrot.slane %v1034_v38, 4  ;;  %v1057_v51 = vrot.slane %v1055_v43, 5  ;;  %v1065_v53 = vshrl.u32 %v331_v26, 16 }
  0x8d   : > { %v15657_v57 = vcombine.low %v1020_v36, %v1030_v48  ;;  %v1045_v59 = vrot.slane %v1044_v44, 4  ;;  %v1063_v60 = vrot.slane %v1061_v47, 5  ;;  %v1071_v63 = vshll.u32 %v332_v39, 16  ;;  %v337_v44 = vld [vmem:[%s15286_s27 + $0x134] sm:$0xf] }
  0x8e   : > { %v1040_v1 = vsel %vm15320_vm5, %v1035_v50, %v1039_v28  ;;  %v1058_v3 = vor.u32 %v1057_v51, %v1054_v46  ;;  %v1067_v7 = vrot.slane %v1065_v53, 4  ;;  %v1075_v9 = vshrl.u32 %v332_v39, 16 }
  0x8f   : > { %19336 = vst [vmem:[#allocation26_spill] sm:$0xff] %v15657_v57  ;;  %13282 = vmatprep.mubr.msk.bf16.mxu0 %vm2035_vm4, %v15657_v57  ;;  %12763 = vmatmul.mubr.msk.bf16.gmra.mrb[48].mxu1 %vm2035_vm4, %v15644_v18  ;;  %v1050_v14 = vsel %vm15320_vm5, %v1045_v59, %v1049_v45  ;;  %v1073_v15 = vrot.slane %v1071_v63, 5  ;;  %v1081_v17 = vshll.u32 %v333_v55, 16  ;;  %v1085_v20 = vshrl.u32 %v333_v55, 16 }
  0x90   : > { %v15669_v23 = vcombine.low %v1040_v1, %v1050_v14  ;;  %12766 = vmatprep.mubr.msk.bf16.mxu1 %vm2035_vm4, %v15657_v57  ;;  %v1059_v25 = vrot.slane %v1058_v3, 4  ;;  %v1068_v26 = vor.u32 %v1067_v7, %v1063_v60  ;;  %v1077_v28 = vrot.slane %v1075_v9, 4  ;;  %v339_v14 = vld [vmem:[%s15286_s27 + $0x13c] sm:$0x1]  ;;  %v15047_v57 = vld [vmem:[%s15286_s27 + $0xa8] sm:$0xf] }
  0x91   : > { %v1083_v33 = vrot.slane %v1081_v17, 5  ;;  %v1087_v34 = vrot.slane %v1085_v20, 4  ;;  %v1091_v36 = vshll.u32 %v334_v8, 16  ;;  %v1096_v37 = vshrl.u32 %v335_v11, 16  ;;  %v340_v20 = vld [vmem:[%s15286_s27 + $0x140] sm:$0xf] }
  0x92   : > { %19337 = vst [vmem:[#allocation27_spill] sm:$0xff] %v15669_v23  ;;  %v1064_v38 = vsel %vm15320_vm5, %v1059_v25, %v1063_v60  ;;  %v1069_v39 = vrot.slane %v1068_v26, 4  ;;  %v1078_v43 = vor.u32 %v1077_v28, %v1073_v15  ;;  %v1099_v45 = vshll.u32 %v335_v11, 16  ;;  %v338_v60 = vld [vmem:[%s15286_s27 + $0x138] sm:$0xf] }
  0x93   : > { %13283 = vmatmul.mubr.msk.bf16.gmra.mrb[48].mxu0 %vm2035_vm4, %v15669_v23  ;;  %v1088_v46 = vor.u32 %v1087_v34, %v1083_v33  ;;  %v1093_v47 = vrot.slane %v1091_v36, 5  ;;  %v1098_v48 = vrot.slane %v1096_v37, 4  ;;  %v1105_v50 = vshll.u32 %v336_v30, 16  ;;  %v341_v37 = vld [vmem:[%s15286_s27 + $0x144] sm:$0xf] }
  0x94   : > { %v1074_v51 = vsel %vm15320_vm5, %v1069_v39, %v1073_v15  ;;  %v1079_v53 = vrot.slane %v1078_v43, 4  ;;  %v1101_v55 = vrot.slane %v1099_v45, 5  ;;  %v1109_v59 = vshrl.u32 %v336_v30, 16 }
  0x95   : > { %v15682_v63 = vcombine.low %v1064_v38, %v1074_v51  ;;  %v1089_v1 = vrot.slane %v1088_v46, 4  ;;  %v1107_v3 = vrot.slane %v1105_v50, 5  ;;  %v1115_v7 = vshll.u32 %v337_v44, 16 }
  0x96   : > { %v1084_v8 = vsel %vm15320_vm5, %v1079_v53, %v1083_v33  ;;  %v1102_v9 = vor.u32 %v1101_v55, %v1098_v48  ;;  %v1111_v11 = vrot.slane %v1109_v59, 4  ;;  %v1119_v17 = vshrl.u32 %v337_v44, 16  ;;  %v342_v48 = vld [vmem:[%s15286_s27 + $0x148] sm:$0xf] }
  0x97   : > { %19338 = vst [vmem:[#allocation28_spill] sm:$0xff] %v15682_v63  ;;  %13286 = vmatprep.mubr.msk.bf16.mxu0 %vm2035_vm4, %v15682_v63  ;;  %12767 = vmatmul.mubr.msk.bf16.gmra.mrb[52].mxu1 %vm2035_vm4, %v15669_v23  ;;  %v1094_v15 = vsel %vm15320_vm5, %v1089_v1, %v1093_v47  ;;  %v1117_v25 = vrot.slane %v1115_v7, 5  ;;  %v1125_v26 = vshll.u32 %v338_v60, 16  ;;  %v1129_v28 = vshrl.u32 %v338_v60, 16 }
  0x98   : > { %v15694_v30 = vcombine.low %v1084_v8, %v1094_v15  ;;  %12770 = vmatprep.mubr.msk.bf16.mxu1 %vm2035_vm4, %v15682_v63  ;;  %v1103_v33 = vrot.slane %v1102_v9, 4  ;;  %v1112_v34 = vor.u32 %v1111_v11, %v1107_v3  ;;  %v1121_v36 = vrot.slane %v1119_v17, 4  ;;  %v343_v9 = vld [vmem:[%s15286_s27 + $0x14c] sm:$0xf] }
  0x99   : > { %v1127_v38 = vrot.slane %v1125_v26, 5  ;;  %v1131_v39 = vrot.slane %v1129_v28, 4  ;;  %v1135_v43 = vshll.u32 %v339_v14, 16  ;;  %v1140_v44 = vshrl.u32 %v340_v20, 16  ;;  %v344_v28 = vld [vmem:[%s15286_s27 + $0x150] sm:$0x1] }
  0x9a   : > { %19339 = vst [vmem:[#allocation29_spill] sm:$0xff] %v15694_v30  ;;  %v1108_v45 = vsel %vm15320_vm5, %v1103_v33, %v1107_v3  ;;  %v1113_v46 = vrot.slane %v1112_v34, 4  ;;  %v1122_v47 = vor.u32 %v1121_v36, %v1117_v25  ;;  %v1143_v50 = vshll.u32 %v340_v20, 16 }
  0x9b   : > { %13287 = vmatmul.mubr.msk.bf16.gmra.mrb[52].mxu0 %vm2035_vm4, %v15694_v30  ;;  %v1132_v51 = vor.u32 %v1131_v39, %v1127_v38  ;;  %v1137_v53 = vrot.slane %v1135_v43, 5  ;;  %v1142_v55 = vrot.slane %v1140_v44, 4  ;;  %v1149_v59 = vshll.u32 %v341_v37, 16 }
  0x9c   : > { %v1118_v60 = vsel %vm15320_vm5, %v1113_v46, %v1117_v25  ;;  %v1123_v1 = vrot.slane %v1122_v47, 4  ;;  %v1145_v7 = vrot.slane %v1143_v50, 5  ;;  %v1153_v8 = vshrl.u32 %v341_v37, 16 }
  0x9d   : > { %v15707_v3 = vcombine.low %v1108_v45, %v1118_v60  ;;  %v1133_v11 = vrot.slane %v1132_v51, 4  ;;  %v1151_v14 = vrot.slane %v1149_v59, 5  ;;  %v1159_v17 = vshll.u32 %v342_v48, 16  ;;  %v15012_v60 = vld [vmem:[%s15286_s27 + $0x14] sm:$0xf] }
  0x9e   : > { %v1128_v20 = vsel %vm15320_vm5, %v1123_v1, %v1127_v38  ;;  %v1146_v15 = vor.u32 %v1145_v7, %v1142_v55  ;;  %v1155_v26 = vrot.slane %v1153_v8, 4  ;;  %v1163_v33 = vshrl.u32 %v342_v48, 16  ;;  %v15013_v7 = vld [vmem:[%s15286_s27 + $0x18] sm:$0xf] }
  0x9f   : > { %19340 = vst [vmem:[#allocation30_spill] sm:$0xff] %v15707_v3  ;;  %13290 = vmatprep.mubr.msk.bf16.mxu0 %vm2035_vm4, %v15707_v3  ;;  %12771 = vmatmul.mubr.msk.bf16.gmra.mrb[56].mxu1 %vm2035_vm4, %v15694_v30  ;;  %v1138_v25 = vsel %vm15320_vm5, %v1133_v11, %v1137_v53  ;;  %v1161_v34 = vrot.slane %v1159_v17, 5  ;;  %v1169_v36 = vshll.u32 %v343_v9, 16  ;;  %v1173_v37 = vshrl.u32 %v343_v9, 16 }
  0xa0   : > { %v15718_v39 = vcombine.low %v1128_v20, %v1138_v25  ;;  %12774 = vmatprep.mubr.msk.bf16.mxu1 %vm2035_vm4, %v15707_v3  ;;  %v1147_v38 = vrot.slane %v1146_v15, 4  ;;  %v1156_v43 = vor.u32 %v1155_v26, %v1151_v14  ;;  %v1165_v44 = vrot.slane %v1163_v33, 4  ;;  %v345_v15 = vld [vmem:[%s15286_s27 + $0x154] sm:$0xf]  ;;  %v15037_v3 = vld [vmem:[%s15286_s27 + $0x80] sm:$0xf] }
  0xa1   : > { %v1171_v45 = vrot.slane %v1169_v36, 5  ;;  %v1175_v46 = vrot.slane %v1173_v37, 4  ;;  %v1179_v47 = vshll.u32 %v344_v28, 16  ;;  %vm3870_vm6 = vcmask 1042432   ;;  %v346_v36 = vld [vmem:[%s15286_s27 + $0x158] sm:$0xf] }
  0xa2   : > { %19341 = vst [vmem:[#allocation31_spill] sm:$0xff] %v15718_v39  ;;  %v1152_v48 = vsel %vm15320_vm5, %v1147_v38, %v1151_v14  ;;  %v1157_v50 = vrot.slane %v1156_v43, 4  ;;  %v1166_v51 = vor.u32 %v1165_v44, %v1161_v34  ;;  %vm3871_vm7 = vcmask 1046532   ;;  %v15014_v14 = vld [vmem:[%s15286_s27 + $0x1c] sm:$0xf] }
  0xa3   : > { %13291 = vmatmul.mubr.msk.bf16.gmra.mrb[56].mxu0 %vm2035_vm4, %v15718_v39  ;;  %v1176_v53 = vor.u32 %v1175_v46, %v1171_v45  ;;  %v1181_v55 = vrot.slane %v1179_v47, 5  ;;  %vm15726_vm8 = vmor %vm3870_vm6, %vm3871_vm7  ;;  %v19342_v59 = vmov 0  ;;  %v11309_v1 = vrot.slane %v15012_v60, 9 }
  0xa4   : > { %v19343_v59 = vsel %vm15726_vm8, 4294967295, %v19342_v59  ;;  %v3888_v8 = vrot.slane %v15013_v7, 5  ;;  %v1162_v9 = vsel %vm15320_vm5, %v1157_v50, %v1161_v34  ;;  %v1167_v11 = vrot.slane %v1166_v51, 4 }
  0xa5   : > { %19344 = vst [vmem:[#allocation32_spill] sm:$0xff] %v19343_v59  ;;  %v3891_v17 = vrot.slane %v15014_v14, 5  ;;  %v3896_v20 = vrot.slane %v3894_v12, 4  ;;  %v15738_v26 = vcombine.low %v1152_v48, %v1162_v9  ;;  %v1177_v28 = vrot.slane %v1176_v53, 4  ;;  %v15015_v9 = vld [vmem:[%s15286_s27 + $0x28] sm:$0xf] }
  0xa6   : > { %v3889_v33 = vsel %vm15726_vm8, %v11309_v1, %v3888_v8  ;;  %v3890_v25 = vrot.slane %v3888_v8, 4  ;;  %v1172_v37 = vsel %vm15320_vm5, %v1167_v11, %v1171_v45  ;;  %v15751_v43 = vsel %vm2228_vm1, %v15495_v16, 0  ;;  %v347_v45 = vld [vmem:[%s15286_s27 + $0x15c] sm:$0xf]  ;;  %v348_v1 = vld [vmem:[%s15286_s27 + $0x160] sm:$0xf] }
  0xa7   : > { %19345 = vst [vmem:[#allocation33_spill] sm:$0xff] %v15738_v26  ;;  %v3893_v34 = vrot.slane %v3891_v17, 4  ;;  %v3898_v38 = vsel %vm15726_vm8, %v3896_v20, %v3897_v13  ;;  %13294 = vmatprep.mubr.msk.bf16.mxu0 %vm2035_vm4, %v15738_v26  ;;  %12775 = vmatmul.mubr.msk.bf16.gmra.mrb[60].mxu1 %vm2035_vm4, %v15718_v39  ;;  %v1182_v44 = vsel %vm15320_vm5, %v1177_v28, %v1181_v55  ;;  %v1184_v13 = vshrl.u32 %v345_v15, 16  ;;  %v15016_v14 = vld [vmem:[%s15286_s27 + $0x2c] sm:$0xf] }
  0xa8   : > { %v3892_v62 = vsel %vm15726_vm8, %v3890_v25, %v3891_v17  ;;  %v1187_v46 = vshll.u32 %v345_v15, 16  ;;  %v15762_v16 = vcombine.low %v1172_v37, %v1182_v44  ;;  %12778 = vmatprep.mubr.msk.bf16.mxu1 %vm2035_vm4, %v15738_v26  ;;  %v1193_v50 = vshll.u32 %v346_v36, 16  ;;  %v15017_v20 = vld [vmem:[%s15286_s27 + $0x30] sm:$0xf]  ;;  %v349_v28 = vld [vmem:[%s15286_s27 + $0x164] sm:$0x1] }
  0xa9   : > { %v15766_v47 = vcombine.low %v3889_v33, %v3892_v62  ;;  %v3895_v48 = vsel %vm15726_vm8, %v3893_v34, %v3894_v12  ;;  %v1186_v53 = vrot.slane %v1184_v13, 4  ;;  %v1197_v60 = vshrl.u32 %v346_v36, 16 }
  0xaa   : > { %19346 = vst [vmem:[#allocation34_spill] sm:$0xff] %v15762_v16  ;;  %v15772_v51 = vcombine.low %v3895_v48, %v3898_v38  ;;  %v1189_v55 = vrot.slane %v1187_v46, 5  ;;  %v1195_v7 = vrot.slane %v1193_v50, 5  ;;  %v1203_v8 = vshll.u32 %v347_v45, 16 }
  0xab   : > { %19347 = vst [vmem:[#allocation35_spill] sm:$0xff] %v15766_v47  ;;  %v11310_v11 = vrot.slane %v15015_v9, 9  ;;  %v3901_v17 = vrot.slane %v15016_v14, 5  ;;  %13295 = vmatmul.mubr.msk.bf16.gmra.mrb[60].mxu0 %vm2035_vm4, %v15762_v16  ;;  %v1199_v12 = vrot.slane %v1197_v60, 4  ;;  %v3904_v15 = vrot.slane %v15017_v20, 5 }
  0xac   : > { %19348 = vst [vmem:[#allocation36_spill] sm:$0xff] %v15772_v51  ;;  %v1190_v54 = vor.u32 %v1189_v55, %v1186_v53  ;;  %v1207_v33 = vshrl.u32 %v347_v45, 16  ;;  %13364 = vmatprep.mubr.msk.bf16.mxu0 %vm2035_vm4, %v15766_v47  ;;  %v1205_v25 = vrot.slane %v1203_v8, 5  ;;  %v1213_v34 = vshll.u32 %v348_v1, 16  ;;  %v350_v53 = vld [vmem:[%s15286_s27 + $0x168] sm:$0xf] }
  0xad   : > { %v3902_v36 = vsel %vm15726_vm8, %v11310_v11, %v3901_v17  ;;  %v3903_v37 = vrot.slane %v3901_v17, 4  ;;  %v1200_v44 = vor.u32 %v1199_v12, %v1195_v7  ;;  %v1217_v13 = vshrl.u32 %v348_v1, 16  ;;  %v15018_v14 = vld [vmem:[%s15286_s27 + $0x34] sm:$0xf]  ;;  %v351_v20 = vld [vmem:[%s15286_s27 + $0x16c] sm:$0xf] }
  0xae   : > { %v1191_v38 = vrot.slane %v1190_v54, 4  ;;  %v1209_v62 = vrot.slane %v1207_v33, 4  ;;  %v1215_v45 = vrot.slane %v1213_v34, 5  ;;  %v1223_v48 = vshll.u32 %v349_v28, 16  ;;  %v15019_v54 = vld [vmem:[%s15286_s27 + $0x38] sm:$0x1] }
  0xaf   : > { %v3905_v46 = vsel %vm15726_vm8, %v3903_v37, %v3904_v15  ;;  %v3906_v50 = vrot.slane %v3904_v15, 4  ;;  %12779 = vmatmul.mubr.msk.bf16.gmra.mrb[64].mxu1 %vm2035_vm4, %v15762_v16  ;;  %v1201_v60 = vrot.slane %v1200_v44, 4  ;;  %v1219_v1 = vrot.slane %v1217_v13, 4  ;;  %v352_v33 = vld [vmem:[%s15286_s27 + $0x170] sm:$0xf] }
  0xb0   : > { %v1196_v55 = vsel %vm15320_vm5, %v1191_v38, %v1195_v7  ;;  %v15792_v8 = vcombine.low %v3902_v36, %v3905_v46  ;;  %v1210_v9 = vor.u32 %v1209_v62, %v1205_v25  ;;  %v1225_v11 = vrot.slane %v1223_v48, 5 }
  0xb1   : > { %v3907_v17 = vrot.slane %v15018_v14, 5  ;;  %v3910_v12 = vrot.slane %v15019_v54, 5  ;;  %v1206_v15 = vsel %vm15320_vm5, %v1201_v60, %v1205_v25  ;;  %v1228_v37 = vshrl.u32 %v350_v53, 16 }
  0xb2   : > { %19349 = vst [vmem:[#allocation37_spill] sm:$0xff] %v15792_v8  ;;  %v1211_v28 = vrot.slane %v1210_v9, 4  ;;  %v1231_v34 = vshll.u32 %v350_v53, 16  ;;  %v15800_v4 = vcombine.low %v1196_v55, %v1206_v15  ;;  %v1220_v7 = vor.u32 %v1219_v1, %v1215_v45  ;;  %v353_v1 = vld [vmem:[%s15286_s27 + $0x174] sm:$0xf] }
  0xb3   : > { %v3908_v36 = vsel %vm15726_vm8, %v3906_v50, %v3907_v17  ;;  %v3909_v38 = vrot.slane %v3907_v17, 4  ;;  %13365 = vmatmul.mubr.msk.bf16.vlgmr.msra.gmra.mrb[0].mxu0 %vm2035_vm4, %v15772_v51  ;;  %v1230_v25 = vrot.slane %v1228_v37, 4  ;;  %v1237_v13 = vshll.u32 %v351_v20, 16  ;;  %v15021_v15 = vld [vmem:[%s15286_s27 + $0x40] sm:$0xf] }
  0xb4   : > { %19350 = vst [vmem:[#allocation38_spill] sm:$0xff] %v15800_v4  ;;  %v1216_v44 = vsel %vm15320_vm5, %v1211_v28, %v1215_v45  ;;  %v1233_v62 = vrot.slane %v1231_v34, 5  ;;  %13493 = vmatpush3.bf16.msra.mxu0 %v15751_v43  ;;  %12782 = vmatprep.mubr.msk.bf16.mxu1 %vm2035_vm4, %v15800_v4  ;;  %v1221_v46 = vrot.slane %v1220_v7, 4  ;;  %v1241_v50 = vshrl.u32 %v351_v20, 16  ;;  %v15020_v43 = vld [vmem:[%s15286_s27 + $0x3c] sm:$0xf] }
  0xb5   : > { %v3911_v48 = vsel %vm15726_vm8, %v3909_v38, %v3910_v12  ;;  %v1247_v53 = vshll.u32 %v352_v33, 16  ;;  %13368 = vmatprep.mubr.msk.bf16.mxu0 %vm2035_vm4, %v15792_v8  ;;  %v1239_v60 = vrot.slane %v1237_v13, 5  ;;  %v11311_v9 = vrot.slane %v15020_v43, 9  ;;  %v354_v20 = vld [vmem:[%s15286_s27 + $0x178] sm:$0x1] }
  0xb6   : > { %v15815_v45 = vcombine.low %v3908_v36, %v3911_v48  ;;  %v1234_v55 = vor.u32 %v1233_v62, %v1230_v25  ;;  %v1226_v14 = vsel %vm15320_vm5, %v1221_v46, %v1225_v11  ;;  %v1243_v17 = vrot.slane %v1241_v50, 4  ;;  %v15022_v34 = vld [vmem:[%s15286_s27 + $0x44] sm:$0xf]  ;;  %v355_v50 = vld [vmem:[%s15286_s27 + $0x17c] sm:$0xf] }
  0xb7   : > { %v1249_v54 = vrot.slane %v1247_v53, 5  ;;  %v3914_v12 = vrot.slane %v15021_v15, 5  ;;  %v15823_v28 = vcombine.low %v1216_v44, %v1226_v14  ;;  %v3917_v7 = vrot.slane %v15022_v34, 5  ;;  %v356_v15 = vld [vmem:[%s15286_s27 + $0x180] sm:$0xf] }
  0xb8   : > { %19351 = vst [vmem:[#allocation39_spill] sm:$0xff] %v15815_v45  ;;  %v1235_v37 = vrot.slane %v1234_v55, 4  ;;  %v1251_v36 = vshrl.u32 %v352_v33, 16  ;;  %v1244_v38 = vor.u32 %v1243_v17, %v1239_v60  ;;  %v1257_v13 = vshll.u32 %v353_v1, 16  ;;  %v15027_v4 = vld [vmem:[%s15286_s27 + $0x58] sm:$0xf] }
  0xb9   : > { %19352 = vst [vmem:[#allocation40_spill] sm:$0xff] %v15823_v28  ;;  %v3915_v25 = vsel %vm15726_vm8, %v11311_v9, %v3914_v12  ;;  %v3916_v62 = vrot.slane %v3914_v12, 4  ;;  %12783 = vmatmul.mubr.msk.bf16.gmra.mrb[68].mxu1 %vm2035_vm4, %v15823_v28  ;;  %v1261_v46 = vshrl.u32 %v353_v1, 16  ;;  %v1267_v48 = vshll.u32 %v354_v20, 16  ;;  %v15023_v12 = vld [vmem:[%s15286_s27 + $0x48] sm:$0xf] }
  0xba   : > { %v1240_v11 = vsel %vm15320_vm5, %v1235_v37, %v1239_v60  ;;  %v1253_v44 = vrot.slane %v1251_v36, 4  ;;  %v1245_v33 = vrot.slane %v1244_v38, 4  ;;  %v1259_v55 = vrot.slane %v1257_v13, 5  ;;  %v15024_v37 = vld [vmem:[%s15286_s27 + $0x4c] sm:$0x1] }
  0xbb   : > { %v3918_v53 = vsel %vm15726_vm8, %v3916_v62, %v3917_v7  ;;  %v3919_v43 = vrot.slane %v3917_v7, 4  ;;  %13369 = vmatmul.mubr.msk.bf16.gmra.mrb[4].mxu0 %vm2035_vm4, %v15815_v45  ;;  %v1263_v60 = vrot.slane %v1261_v46, 4  ;;  %v1269_v17 = vrot.slane %v1267_v48, 5  ;;  %v357_v62 = vld [vmem:[%s15286_s27 + $0x184] sm:$0xf] }
  0xbc   : > { %v15837_v9 = vcombine.low %v3915_v25, %v3918_v53  ;;  %v1254_v14 = vor.u32 %v1253_v44, %v1249_v54  ;;  %v1250_v1 = vsel %vm15320_vm5, %v1245_v33, %v1249_v54  ;;  %v3920_v20 = vrot.slane %v15023_v12, 5  ;;  %v16508_v45 = vld [vmem:[%s15286_s27 + $0x140] sm:$0xf] }
  0xbd   : > { %v3923_v34 = vrot.slane %v15024_v37, 5  ;;  %v1272_v36 = vshrl.u32 %v355_v50, 16  ;;  %v15844_v38 = vcombine.low %v1240_v11, %v1250_v1  ;;  %v1264_v25 = vor.u32 %v1263_v60, %v1259_v55  ;;  %v15025_v1 = vld [vmem:[%s15286_s27 + $0x50] sm:$0xf]  ;;  %19405 = vst [vmem:[#allocation93_spill] sm:$0xff] %v16508_v45 }
  0xbe   : > { %19353 = vst [vmem:[#allocation41_spill] sm:$0xff] %v15837_v9  ;;  %13372 = vmatprep.mubr.msk.bf16.mxu0 %vm2035_vm4, %v15837_v9  ;;  %v1255_v7 = vrot.slane %v1254_v14, 4  ;;  %v1275_v13 = vshll.u32 %v355_v50, 16  ;;  %v3921_v44 = vsel %vm15726_vm8, %v3919_v43, %v3920_v20  ;;  %v3922_v54 = vrot.slane %v3920_v20, 4  ;;  %v358_v20 = vld [vmem:[%s15286_s27 + $0x188] sm:$0xf] }
  0xbf   : > { %19354 = vst [vmem:[#allocation42_spill] sm:$0xff] %v15844_v38  ;;  %v1274_v46 = vrot.slane %v1272_v36, 4  ;;  %v1281_v48 = vshll.u32 %v356_v15, 16  ;;  %12786 = vmatprep.mubr.msk.bf16.mxu1 %vm2035_vm4, %v15844_v38  ;;  %v1265_v33 = vrot.slane %v1264_v25, 4  ;;  %v1285_v14 = vshrl.u32 %v356_v15, 16 }
  0xc0   : > { %v1260_v11 = vsel %vm15320_vm5, %v1255_v7, %v1259_v55  ;;  %v1277_v53 = vrot.slane %v1275_v13, 5  ;;  %v3924_v50 = vsel %vm15726_vm8, %v3922_v54, %v3923_v34  ;;  %v1291_v43 = vshll.u32 %v357_v62, 16  ;;  %v359_v7 = vld [vmem:[%s15286_s27 + $0x18c] sm:$0x1]  ;;  %v15026_v13 = vld [vmem:[%s15286_s27 + $0x54] sm:$0xf] }
  0xc1   : > { %v1283_v60 = vrot.slane %v1281_v48, 5  ;;  %v11312_v12 = vrot.slane %v15025_v1, 9  ;;  %v1270_v37 = vsel %vm15320_vm5, %v1265_v33, %v1269_v17  ;;  %v15861_v36 = vcombine.low %v3921_v44, %v3924_v50 }
  0xc2   : > { %v1278_v38 = vor.u32 %v1277_v53, %v1274_v46  ;;  %v1287_v55 = vrot.slane %v1285_v14, 4  ;;  %v15864_v25 = vcombine.low %v1260_v11, %v1270_v37  ;;  %v1293_v15 = vrot.slane %v1291_v43, 5 }
  0xc3   : > { %19355 = vst [vmem:[#allocation43_spill] sm:$0xff] %v15861_v36  ;;  %v3927_v28 = vrot.slane %v15026_v13, 5  ;;  %v3930_v34 = vrot.slane %v15027_v4, 5  ;;  %13373 = vmatmul.mubr.msk.bf16.gmra.mrb[8].mxu0 %vm2035_vm4, %v15861_v36  ;;  %v1295_v1 = vshrl.u32 %v357_v62, 16  ;;  %v1301_v17 = vshll.u32 %v358_v20, 16 }
  0xc4   : > { %19356 = vst [vmem:[#allocation44_spill] sm:$0xff] %v15864_v25  ;;  %v1279_v54 = vrot.slane %v1278_v38, 4  ;;  %v1288_v48 = vor.u32 %v1287_v55, %v1283_v60  ;;  %12787 = vmatmul.mubr.msk.bf16.gmra.mrb[72].mxu1 %vm2035_vm4, %v15864_v25  ;;  %v1305_v11 = vshrl.u32 %v358_v20, 16  ;;  %v1311_v33 = vshll.u32 %v359_v7, 16  ;;  %v360_v62 = vld [vmem:[%s15286_s27 + $0x190] sm:$0xf] }
  0xc5   : > { %v3928_v44 = vsel %vm15726_vm8, %v11312_v12, %v3927_v28  ;;  %v3929_v46 = vrot.slane %v3927_v28, 4  ;;  %v1297_v38 = vrot.slane %v1295_v1, 4  ;;  %v1303_v14 = vrot.slane %v1301_v17, 5  ;;  %v15028_v7 = vld [vmem:[%s15286_s27 + $0x5c] sm:$0xf] }
  0xc6   : > { %v1284_v4 = vsel %vm15320_vm5, %v1279_v54, %v1283_v60  ;;  %v1289_v53 = vrot.slane %v1288_v48, 4  ;;  %v1307_v43 = vrot.slane %v1305_v11, 4  ;;  %v1313_v37 = vrot.slane %v1311_v33, 5  ;;  %v361_v13 = vld [vmem:[%s15286_s27 + $0x194] sm:$0xf] }
  0xc7   : > { %v3931_v50 = vsel %vm15726_vm8, %v3929_v46, %v3930_v34  ;;  %v3932_v12 = vrot.slane %v3930_v34, 4  ;;  %v1298_v55 = vor.u32 %v1297_v38, %v1293_v15  ;;  %v3933_v60 = vrot.slane %v15028_v7, 5  ;;  %v15029_v1 = vld [vmem:[%s15286_s27 + $0x60] sm:$0x1]  ;;  %v362_v25 = vld [vmem:[%s15286_s27 + $0x198] sm:$0xf] }
  0xc8   : > { %v1294_v28 = vsel %vm15320_vm5, %v1289_v53, %v1293_v15  ;;  %v15881_v20 = vcombine.low %v3928_v44, %v3931_v50  ;;  %v1308_v48 = vor.u32 %v1307_v43, %v1303_v14  ;;  %v3936_v17 = vrot.slane %v15029_v1, 5  ;;  %v363_v7 = vld [vmem:[%s15286_s27 + $0x19c] sm:$0xf]  ;;  %v15030_v1 = vld [vmem:[%s15286_s27 + $0x64] sm:$0xf] }
  0xc9   : > { %v15885_v54 = vcombine.low %v1284_v4, %v1294_v28  ;;  %v1316_v16 = vshrl.u32 %v360_v62, 16  ;;  %v1299_v34 = vrot.slane %v1298_v55, 4  ;;  %v3934_v46 = vsel %vm15726_vm8, %v3932_v12, %v3933_v60 }
  0xca   : > { %19357 = vst [vmem:[#allocation45_spill] sm:$0xff] %v15881_v20  ;;  %13376 = vmatprep.mubr.msk.bf16.mxu0 %vm2035_vm4, %v15881_v20  ;;  %v3935_v44 = vrot.slane %v3933_v60, 4  ;;  %v1319_v15 = vshll.u32 %v360_v62, 16  ;;  %v1309_v11 = vrot.slane %v1308_v48, 4  ;;  %v1325_v4 = vshll.u32 %v361_v13, 16 }
  0xcb   : > { %19358 = vst [vmem:[#allocation46_spill] sm:$0xff] %v15885_v54  ;;  %12790 = vmatprep.mubr.msk.bf16.mxu1 %vm2035_vm4, %v15885_v54  ;;  %v1318_v33 = vrot.slane %v1316_v16, 4  ;;  %v1329_v53 = vshrl.u32 %v361_v13, 16  ;;  %v1304_v38 = vsel %vm15320_vm5, %v1299_v34, %v1303_v14  ;;  %v1335_v12 = vshll.u32 %v362_v25, 16  ;;  %v364_v60 = vld [vmem:[%s15286_s27 + $0x1a0] sm:$0x1] }
  0xcc   : > { %v3937_v50 = vsel %vm15726_vm8, %v3935_v44, %v3936_v17  ;;  %v1321_v43 = vrot.slane %v1319_v15, 5  ;;  %v1314_v62 = vsel %vm15320_vm5, %v1309_v11, %v1313_v37  ;;  %v1327_v55 = vrot.slane %v1325_v4, 5  ;;  %v15031_v44 = vld [vmem:[%s15286_s27 + $0x68] sm:$0xf]  ;;  %v15032_v54 = vld [vmem:[%s15286_s27 + $0x6c] sm:$0xf] }
  0xcd   : > { %v15901_v28 = vcombine.low %v3934_v46, %v3937_v50  ;;  %v1331_v16 = vrot.slane %v1329_v53, 4  ;;  %v15905_v13 = vcombine.low %v1304_v38, %v1314_v62  ;;  %v1337_v14 = vrot.slane %v1335_v12, 5  ;;  %v15084_v20 = vld [vmem:[%s15286_s27 + $0x13c] sm:$0x1] }
  0xce   : > { %v1322_v48 = vor.u32 %v1321_v43, %v1318_v33  ;;  %v11313_v34 = vrot.slane %v15030_v1, 9  ;;  %v3940_v15 = vrot.slane %v15031_v44, 5  ;;  %v3943_v37 = vrot.slane %v15032_v54, 5 }
  0xcf   : > { %19359 = vst [vmem:[#allocation47_spill] sm:$0xff] %v15901_v28  ;;  %19360 = vst [vmem:[#allocation48_spill] sm:$0xff] %v15905_v13  ;;  %13377 = vmatmul.mubr.msk.bf16.gmra.mrb[12].mxu0 %vm2035_vm4, %v15901_v28  ;;  %v1332_v17 = vor.u32 %v1331_v16, %v1327_v55  ;;  %v1339_v46 = vshrl.u32 %v362_v25, 16  ;;  %12791 = vmatmul.mubr.msk.bf16.gmra.mrb[76].mxu1 %vm2035_vm4, %v15905_v13  ;;  %v1345_v4 = vshll.u32 %v363_v7, 16  ;;  %v1349_v33 = vshrl.u32 %v363_v7, 16 }
  0xd0   : > { %v1323_v11 = vrot.slane %v1322_v48, 4  ;;  %v1355_v53 = vshll.u32 %v364_v60, 16  ;;  %v3941_v50 = vsel %vm15726_vm8, %v11313_v34, %v3940_v15  ;;  %v3942_v43 = vrot.slane %v3940_v15, 4  ;;  %v365_v48 = vld [vmem:[%s15286_s27 + $0x1a4] sm:$0xf] }
  0xd1   : > { %v1333_v38 = vrot.slane %v1332_v17, 4  ;;  %v1341_v12 = vrot.slane %v1339_v46, 4  ;;  %v1347_v25 = vrot.slane %v1345_v4, 5  ;;  %v1351_v54 = vrot.slane %v1349_v33, 4  ;;  %v366_v17 = vld [vmem:[%s15286_s27 + $0x1a8] sm:$0xf] }
  0xd2   : > { %v1328_v62 = vsel %vm15320_vm5, %v1323_v11, %v1327_v55  ;;  %v1357_v16 = vrot.slane %v1355_v53, 5  ;;  %v3944_v60 = vsel %vm15726_vm8, %v3942_v43, %v3943_v37  ;;  %v3945_v34 = vrot.slane %v3943_v37, 4  ;;  %v15033_v46 = vld [vmem:[%s15286_s27 + $0x70] sm:$0xf]  ;;  %v15034_v33 = vld [vmem:[%s15286_s27 + $0x74] sm:$0x1] }
  0xd3   : > { %v1338_v7 = vsel %vm15320_vm5, %v1333_v38, %v1337_v14  ;;  %v1342_v1 = vor.u32 %v1341_v12, %v1337_v14  ;;  %v15926_v15 = vcombine.low %v3941_v50, %v3944_v60  ;;  %v1352_v55 = vor.u32 %v1351_v54, %v1347_v25  ;;  %v367_v13 = vld [vmem:[%s15286_s27 + $0x1ac] sm:$0xf] }
  0xd4   : > { %v15924_v44 = vcombine.low %v1328_v62, %v1338_v7  ;;  %v3946_v11 = vrot.slane %v15033_v46, 5  ;;  %v3949_v53 = vrot.slane %v15034_v33, 5  ;;  %v1360_v26 = vshrl.u32 %v365_v48, 16 }
  0xd5   : > { %19362 = vst [vmem:[#allocation50_spill] sm:$0xff] %v15926_v15  ;;  %v1343_v4 = vrot.slane %v1342_v1, 4  ;;  %v1363_v38 = vshll.u32 %v365_v48, 16  ;;  %13380 = vmatprep.mubr.msk.bf16.mxu0 %vm2035_vm4, %v15926_v15  ;;  %v1353_v14 = vrot.slane %v1352_v55, 4  ;;  %v1369_v43 = vshll.u32 %v366_v17, 16 }
  0xd6   : > { %19361 = vst [vmem:[#allocation49_spill] sm:$0xff] %v15924_v44  ;;  %12794 = vmatprep.mubr.msk.bf16.mxu1 %vm2035_vm4, %v15924_v44  ;;  %v3947_v37 = vsel %vm15726_vm8, %v3945_v34, %v3946_v11  ;;  %v3948_v50 = vrot.slane %v3946_v11, 4  ;;  %v1362_v62 = vrot.slane %v1360_v26, 4  ;;  %v1373_v48 = vshrl.u32 %v366_v17, 16  ;;  %v368_v55 = vld [vmem:[%s15286_s27 + $0x1b0] sm:$0xf] }
  0xd7   : > { %v1348_v12 = vsel %vm15320_vm5, %v1343_v4, %v1347_v25  ;;  %v1365_v54 = vrot.slane %v1363_v38, 5  ;;  %v1358_v7 = vsel %vm15320_vm5, %v1353_v14, %v1357_v16  ;;  %v1371_v1 = vrot.slane %v1369_v43, 5  ;;  %v369_v26 = vld [vmem:[%s15286_s27 + $0x1b4] sm:$0x1]  ;;  %v15035_v38 = vld [vmem:[%s15286_s27 + $0x78] sm:$0xf] }
  0xd8   : > { %v3950_v60 = vsel %vm15726_vm8, %v3948_v50, %v3949_v53  ;;  %v1379_v34 = vshll.u32 %v367_v13, 16  ;;  %v15944_v46 = vcombine.low %v1348_v12, %v1358_v7  ;;  %v1375_v25 = vrot.slane %v1373_v48, 4  ;;  %v15036_v44 = vld [vmem:[%s15286_s27 + $0x7c] sm:$0xf]  ;;  %v3837_v43 = vld [vmem:[%s18989_s1 + $0x8] sm:$0xf] }
  0xd9   : > { %v15946_v11 = vcombine.low %v3947_v37, %v3950_v60  ;;  %v1366_v33 = vor.u32 %v1365_v54, %v1362_v62  ;;  %v11314_v17 = vrot.slane %v15035_v38, 9  ;;  %v3953_v39 = vrot.slane %v15036_v44, 5  ;;  %14910 = vmatprep.subr.msk.bf16.mxu1 %vm2228_vm1, %v3837_v43  ;;  %v370_v60 = vld [vmem:[%s15286_s27 + $0x1b8] sm:$0xf] }
  0xda   : > { %19363 = vst [vmem:[#allocation51_spill] sm:$0xff] %v15944_v46  ;;  %v1381_v4 = vrot.slane %v1379_v34, 5  ;;  %v3956_v16 = vrot.slane %v15037_v3, 5  ;;  %12795 = vmatmul.mubr.msk.bf16.gmra.mrb[80].mxu1 %vm2035_vm4, %v15944_v46  ;;  %v1376_v14 = vor.u32 %v1375_v25, %v1371_v1  ;;  %v1383_v37 = vshrl.u32 %v367_v13, 16  ;;  %v372_v46 = vld [vmem:[%s15286_s27 + $0x1c0] sm:$0xf] }
  0xdb   : > { %19364 = vst [vmem:[#allocation52_spill] sm:$0xff] %v15946_v11  ;;  %13381 = vmatmul.mubr.msk.bf16.gmra.mrb[16].mxu0 %vm2035_vm4, %v15946_v11  ;;  %v1367_v53 = vrot.slane %v1366_v33, 4  ;;  %v1389_v50 = vshll.u32 %v368_v55, 16  ;;  %v3954_v44 = vsel %vm15726_vm8, %v11314_v17, %v3953_v39  ;;  %v3955_v12 = vrot.slane %v3953_v39, 4  ;;  %v15038_v17 = vld [vmem:[%s15286_s27 + $0x84] sm:$0xf] }
  0xdc   : > { %v1393_v3 = vshrl.u32 %v368_v55, 16  ;;  %v1399_v62 = vshll.u32 %v369_v26, 16  ;;  %v1377_v48 = vrot.slane %v1376_v14, 4  ;;  %v1385_v13 = vrot.slane %v1383_v37, 4  ;;  %v16459_v11 = vld [vmem:[%s15286_s27 + $0x26c] sm:$0xf] }
  0xdd   : > { %v1372_v54 = vsel %vm15320_vm5, %v1367_v53, %v1371_v1  ;;  %v1391_v7 = vrot.slane %v1389_v50, 5  ;;  %v3957_v34 = vsel %vm15726_vm8, %v3955_v12, %v3956_v16  ;;  %v3958_v25 = vrot.slane %v3956_v16, 4  ;;  %v371_v53 = vld [vmem:[%s15286_s27 + $0x1bc] sm:$0xf]  ;;  %v15039_v50 = vld [vmem:[%s15286_s27 + $0x88] sm:$0x1] }
  0xde   : > { %v1395_v33 = vrot.slane %v1393_v3, 4  ;;  %v1401_v39 = vrot.slane %v1399_v62, 5  ;;  %v1382_v55 = vsel %vm15320_vm5, %v1377_v48, %v1381_v4  ;;  %v15969_v26 = vcombine.low %v3954_v44, %v3957_v34 }
  0xdf   : > { %v1386_v38 = vor.u32 %v1385_v13, %v1381_v4  ;;  %v3959_v1 = vrot.slane %v15038_v17, 5  ;;  %v15973_v14 = vcombine.low %v1372_v54, %v1382_v55  ;;  %v3962_v43 = vrot.slane %v15039_v50, 5  ;;  %v373_v17 = vld [vmem:[%s15286_s27 + $0x1c4] sm:$0xf]  ;;  %v15040_v50 = vld [vmem:[%s15286_s27 + $0x8c] sm:$0xf] }
  0xe0   : > { %19365 = vst [vmem:[#allocation53_spill] sm:$0xff] %v15969_v26  ;;  %v1396_v37 = vor.u32 %v1395_v33, %v1391_v7  ;;  %v1404_v30 = vshrl.u32 %v370_v60, 16  ;;  %13384 = vmatprep.mubr.msk.bf16.mxu0 %vm2035_vm4, %v15969_v26  ;;  %v1407_v4 = vshll.u32 %v370_v60, 16  ;;  %v1413_v54 = vshll.u32 %v371_v53, 16 }
  0xe1   : > { %19366 = vst [vmem:[#allocation54_spill] sm:$0xff] %v15973_v14  ;;  %v1387_v16 = vrot.slane %v1386_v38, 4  ;;  %v3960_v12 = vsel %vm15726_vm8, %v3958_v25, %v3959_v1  ;;  %v3961_v44 = vrot.slane %v3959_v1, 4  ;;  %12798 = vmatprep.mubr.msk.bf16.mxu1 %vm2035_vm4, %v15973_v14  ;;  %v1417_v48 = vshrl.u32 %v371_v53, 16  ;;  %v374_v1 = vld [vmem:[%s15286_s27 + $0x1c8] sm:$0x1] }
  0xe2   : > { %v1397_v3 = vrot.slane %v1396_v37, 4  ;;  %v1406_v62 = vrot.slane %v1404_v30, 4  ;;  %v1409_v33 = vrot.slane %v1407_v4, 5  ;;  %v1423_v25 = vshll.u32 %v372_v46, 16  ;;  %v15042_v14 = vld [vmem:[%s15286_s27 + $0x94] sm:$0xf] }
  0xe3   : > { %v1392_v13 = vsel %vm15320_vm5, %v1387_v16, %v1391_v7  ;;  %v3963_v34 = vsel %vm15726_vm8, %v3961_v44, %v3962_v43  ;;  %v1415_v38 = vrot.slane %v1413_v54, 5  ;;  %v1419_v30 = vrot.slane %v1417_v48, 4  ;;  %v15041_v44 = vld [vmem:[%s15286_s27 + $0x90] sm:$0xf] }
  0xe4   : > { %v1402_v60 = vsel %vm15320_vm5, %v1397_v3, %v1401_v39  ;;  %v15989_v55 = vcombine.low %v3960_v12, %v3963_v34  ;;  %v1410_v37 = vor.u32 %v1409_v33, %v1406_v62  ;;  %v1425_v7 = vrot.slane %v1423_v25, 5 }
  0xe5   : > { %v15993_v53 = vcombine.low %v1392_v13, %v1402_v60  ;;  %v11315_v16 = vrot.slane %v15040_v50, 9  ;;  %v1420_v43 = vor.u32 %v1419_v30, %v1415_v38  ;;  %v3966_v4 = vrot.slane %v15041_v44, 5 }
  0xe6   : > { %19367 = vst [vmem:[#allocation55_spill] sm:$0xff] %v15989_v55  ;;  %13385 = vmatmul.mubr.msk.bf16.gmra.mrb[20].mxu0 %vm2035_vm4, %v15989_v55  ;;  %v3969_v39 = vrot.slane %v15042_v14, 5  ;;  %v1427_v12 = vshrl.u32 %v372_v46, 16  ;;  %v1411_v3 = vrot.slane %v1410_v37, 4  ;;  %v1433_v54 = vshll.u32 %v373_v17, 16 }
  0xe7   : > { %19368 = vst [vmem:[#allocation56_spill] sm:$0xff] %v15993_v53  ;;  %12799 = vmatmul.mubr.msk.bf16.gmra.mrb[84].mxu1 %vm2035_vm4, %v15993_v53  ;;  %v1437_v62 = vshrl.u32 %v373_v17, 16  ;;  %v1443_v48 = vshll.u32 %v374_v1, 16  ;;  %v1421_v13 = vrot.slane %v1420_v43, 4  ;;  %v3967_v34 = vsel %vm15726_vm8, %v11315_v16, %v3966_v4  ;;  %v375_v37 = vld [vmem:[%s15286_s27 + $0x1cc] sm:$0xf] }
  0xe8   : > { %v3968_v33 = vrot.slane %v3966_v4, 4  ;;  %v1429_v25 = vrot.slane %v1427_v12, 4  ;;  %v1416_v60 = vsel %vm15320_vm5, %v1411_v3, %v1415_v38  ;;  %v1435_v46 = vrot.slane %v1433_v54, 5  ;;  %v376_v43 = vld [vmem:[%s15286_s27 + $0x1d0] sm:$0xf] }
  0xe9   : > { %v1439_v14 = vrot.slane %v1437_v62, 4  ;;  %v1445_v30 = vrot.slane %v1443_v48, 5  ;;  %v1426_v17 = vsel %vm15320_vm5, %v1421_v13, %v1425_v7  ;;  %v3971_v16 = vrot.slane %v3969_v39, 4  ;;  %v15043_v12 = vld [vmem:[%s15286_s27 + $0x98] sm:$0xf] }
  0xea   : > { %v3970_v1 = vsel %vm15726_vm8, %v3968_v33, %v3969_v39  ;;  %v1430_v50 = vor.u32 %v1429_v25, %v1425_v7  ;;  %v16012_v44 = vcombine.low %v1416_v60, %v1426_v17  ;;  %v3972_v3 = vrot.slane %v15043_v12, 5  ;;  %v15044_v62 = vld [vmem:[%s15286_s27 + $0x9c] sm:$0x1]  ;;  %v377_v53 = vld [vmem:[%s15286_s27 + $0x1d4] sm:$0xf] }
  0xeb   : > { %v16014_v4 = vcombine.low %v3967_v34, %v3970_v1  ;;  %v1440_v38 = vor.u32 %v1439_v14, %v1435_v46  ;;  %v3975_v48 = vrot.slane %v15044_v62, 5  ;;  %v1448_v63 = vshrl.u32 %v375_v37, 16 }
  0xec   : > { %19369 = vst [vmem:[#allocation57_spill] sm:$0xff] %v16012_v44  ;;  %v1431_v54 = vrot.slane %v1430_v50, 4  ;;  %v1451_v13 = vshll.u32 %v375_v37, 16  ;;  %12802 = vmatprep.mubr.msk.bf16.mxu1 %vm2035_vm4, %v16012_v44  ;;  %v3973_v39 = vsel %vm15726_vm8, %v3971_v16, %v3972_v3  ;;  %v3974_v34 = vrot.slane %v3972_v3, 4  ;;  %v15046_v44 = vld [vmem:[%s15286_s27 + $0xa4] sm:$0xf] }
  0xed   : > { %19370 = vst [vmem:[#allocation58_spill] sm:$0xff] %v16014_v4  ;;  %13388 = vmatprep.mubr.msk.bf16.mxu0 %vm2035_vm4, %v16014_v4  ;;  %v1441_v7 = vrot.slane %v1440_v38, 4  ;;  %v1457_v33 = vshll.u32 %v376_v43, 16  ;;  %v1450_v60 = vrot.slane %v1448_v63, 4  ;;  %v1461_v37 = vshrl.u32 %v376_v43, 16 }
  0xee   : > { %v1436_v25 = vsel %vm15320_vm5, %v1431_v54, %v1435_v46  ;;  %v1453_v14 = vrot.slane %v1451_v13, 5  ;;  %v3976_v1 = vsel %vm15726_vm8, %v3974_v34, %v3975_v48  ;;  %v1467_v16 = vshll.u32 %v377_v53, 16  ;;  %v378_v38 = vld [vmem:[%s15286_s27 + $0x1d8] sm:$0xf]  ;;  %v379_v63 = vld [vmem:[%s15286_s27 + $0x1dc] sm:$0x1] }
  0xef   : > { %v1446_v17 = vsel %vm15320_vm5, %v1441_v7, %v1445_v30  ;;  %v1459_v50 = vrot.slane %v1457_v33, 5  ;;  %v16034_v3 = vcombine.low %v3973_v39, %v3976_v1  ;;  %v1463_v46 = vrot.slane %v1461_v37, 4  ;;  %v15045_v13 = vld [vmem:[%s15286_s27 + $0xa0] sm:$0xf] }
  0xf0   : > { %v16032_v12 = vcombine.low %v1436_v25, %v1446_v17  ;;  %v1454_v62 = vor.u32 %v1453_v14, %v1450_v60  ;;  %v1469_v54 = vrot.slane %v1467_v16, 5  ;;  %v11316_v43 = vrot.slane %v15045_v13, 9  ;;  %v380_v1 = vld [vmem:[%s15286_s27 + $0x1e0] sm:$0xf]  ;;  %v15048_v13 = vld [vmem:[%s15286_s27 + $0xac] sm:$0xf] }
  0xf1   : > { %19372 = vst [vmem:[#allocation60_spill] sm:$0xff] %v16034_v3  ;;  %v3979_v23 = vrot.slane %v15046_v44, 5  ;;  %v3982_v30 = vrot.slane %v15047_v57, 5  ;;  %13389 = vmatmul.mubr.msk.bf16.gmra.mrb[24].mxu0 %vm2035_vm4, %v16034_v3  ;;  %v1464_v7 = vor.u32 %v1463_v46, %v1459_v50  ;;  %v1471_v39 = vshrl.u32 %v377_v53, 16  ;;  %v16430_v3 = vld [vmem:[%s15286_s27 + $0x268] sm:$0x1] }
  0xf2   : > { %19371 = vst [vmem:[#allocation59_spill] sm:$0xff] %v16032_v12  ;;  %12803 = vmatmul.mubr.msk.bf16.gmra.mrb[88].mxu1 %vm2035_vm4, %v16032_v12  ;;  %v1455_v48 = vrot.slane %v1454_v62, 4  ;;  %v1477_v34 = vshll.u32 %v378_v38, 16  ;;  %v1481_v60 = vshrl.u32 %v378_v38, 16  ;;  %v1487_v44 = vshll.u32 %v379_v63, 16 }
  0xf3   : > { %v3980_v33 = vsel %vm15726_vm8, %v11316_v43, %v3979_v23  ;;  %v3981_v25 = vrot.slane %v3979_v23, 4  ;;  %v1465_v14 = vrot.slane %v1464_v7, 4  ;;  %v1473_v37 = vrot.slane %v1471_v39, 4  ;;  %v381_v43 = vld [vmem:[%s15286_s27 + $0x1e4] sm:$0xf] }
  0xf4   : > { %v1460_v57 = vsel %vm15320_vm5, %v1455_v48, %v1459_v50  ;;  %v1479_v17 = vrot.slane %v1477_v34, 5  ;;  %v1483_v16 = vrot.slane %v1481_v60, 4  ;;  %v1489_v62 = vrot.slane %v1487_v44, 5  ;;  %v15049_v39 = vld [vmem:[%s15286_s27 + $0xb0] sm:$0x1] }
  0xf5   : > { %v3983_v53 = vsel %vm15726_vm8, %v3981_v25, %v3982_v30  ;;  %v3984_v46 = vrot.slane %v3982_v30, 4  ;;  %v1470_v23 = vsel %vm15320_vm5, %v1465_v14, %v1469_v54  ;;  %v1474_v63 = vor.u32 %v1473_v37, %v1469_v54  ;;  %v382_v12 = vld [vmem:[%s15286_s27 + $0x1e8] sm:$0xf] }
  0xf6   : > { %v16053_v38 = vcombine.low %v3980_v33, %v3983_v53  ;;  %v3985_v50 = vrot.slane %v15048_v13, 5  ;;  %v16057_v48 = vcombine.low %v1460_v57, %v1470_v23  ;;  %v1484_v7 = vor.u32 %v1483_v16, %v1479_v17  ;;  %v383_v13 = vld [vmem:[%s15286_s27 + $0x1ec] sm:$0xf] }
  0xf7   : > { %v3988_v34 = vrot.slane %v15049_v39, 5  ;;  %v1492_v18 = vshrl.u32 %v380_v1, 16  ;;  %v1475_v30 = vrot.slane %v1474_v63, 4  ;;  %v1495_v54 = vshll.u32 %v380_v1, 16  ;;  %v15050_v39 = vld [vmem:[%s15286_s27 + $0xb4] sm:$0xf] }
  0xf8   : > { %19373 = vst [vmem:[#allocation61_spill] sm:$0xff] %v16053_v38  ;;  %19374 = vst [vmem:[#allocation62_spill] sm:$0xff] %v16057_v48  ;;  %13392 = vmatprep.mubr.msk.bf16.mxu0 %vm2035_vm4, %v16053_v38  ;;  %v3986_v25 = vsel %vm15726_vm8, %v3984_v46, %v3985_v50  ;;  %v3987_v33 = vrot.slane %v3985_v50, 4  ;;  %12806 = vmatprep.mubr.msk.bf16.mxu1 %vm2035_vm4, %v16057_v48  ;;  %v1485_v60 = vrot.slane %v1484_v7, 4  ;;  %v1501_v57 = vshll.u32 %v381_v43, 16 }
  0xf9   : > { %v1494_v44 = vrot.slane %v1492_v18, 4  ;;  %v1505_v14 = vshrl.u32 %v381_v43, 16  ;;  %v1480_v37 = vsel %vm15320_vm5, %v1475_v30, %v1479_v17  ;;  %v1497_v16 = vrot.slane %v1495_v54, 5  ;;  %v384_v50 = vld [vmem:[%s15286_s27 + $0x1f0] sm:$0x1] }
  0xfa   : > { %v3989_v53 = vsel %vm15726_vm8, %v3987_v33, %v3988_v34  ;;  %v1511_v46 = vshll.u32 %v382_v12, 16  ;;  %v1490_v1 = vsel %vm15320_vm5, %v1485_v60, %v1489_v62  ;;  %v1503_v63 = vrot.slane %v1501_v57, 5  ;;  %v15051_v33 = vld [vmem:[%s15286_s27 + $0xb8] sm:$0xf]  ;;  %v15052_v48 = vld [vmem:[%s15286_s27 + $0xbc] sm:$0xf] }
  0xfb   : > { %v16073_v23 = vcombine.low %v3986_v25, %v3989_v53  ;;  %v1507_v18 = vrot.slane %v1505_v14, 4  ;;  %v16077_v43 = vcombine.low %v1480_v37, %v1490_v1  ;;  %v1498_v7 = vor.u32 %v1497_v16, %v1494_v44  ;;  %v15079_v38 = vld [vmem:[%s15286_s27 + $0x128] sm:$0x1] }
  0xfc   : > { %v1513_v17 = vrot.slane %v1511_v46, 5  ;;  %v11317_v30 = vrot.slane %v15050_v39, 9  ;;  %v3992_v54 = vrot.slane %v15051_v33, 5  ;;  %v3995_v62 = vrot.slane %v15052_v48, 5 }
  0xfd   : > { %19375 = vst [vmem:[#allocation63_spill] sm:$0xff] %v16073_v23  ;;  %19376 = vst [vmem:[#allocation64_spill] sm:$0xff] %v16077_v43  ;;  %13393 = vmatmul.mubr.msk.bf16.gmra.mrb[28].mxu0 %vm2035_vm4, %v16073_v23  ;;  %v1508_v34 = vor.u32 %v1507_v18, %v1503_v63  ;;  %v1515_v25 = vshrl.u32 %v382_v12, 16  ;;  %12807 = vmatmul.mubr.msk.bf16.gmra.mrb[92].mxu1 %vm2035_vm4, %v16077_v43  ;;  %v1499_v60 = vrot.slane %v1498_v7, 4  ;;  %v1521_v57 = vshll.u32 %v383_v13, 16 }
  0xfe   : > { %v1525_v44 = vshrl.u32 %v383_v13, 16  ;;  %v1531_v14 = vshll.u32 %v384_v50, 16  ;;  %v3993_v53 = vsel %vm15726_vm8, %v11317_v30, %v3992_v54  ;;  %v3994_v16 = vrot.slane %v3992_v54, 4  ;;  %v385_v7 = vld [vmem:[%s15286_s27 + $0x1f4] sm:$0xf] }
  0xff   : > { %v1509_v37 = vrot.slane %v1508_v34, 4  ;;  %v1517_v46 = vrot.slane %v1515_v25, 4  ;;  %v1504_v1 = vsel %vm15320_vm5, %v1499_v60, %v1503_v63  ;;  %v1523_v12 = vrot.slane %v1521_v57, 5  ;;  %v386_v34 = vld [vmem:[%s15286_s27 + $0x1f8] sm:$0xf] }
 0x100   : > { %v1527_v48 = vrot.slane %v1525_v44, 4  ;;  %v1533_v18 = vrot.slane %v1531_v14, 5  ;;  %v3996_v50 = vsel %vm15726_vm8, %v3994_v16, %v3995_v62  ;;  %v3997_v30 = vrot.slane %v3995_v62, 4  ;;  %v15053_v25 = vld [vmem:[%s15286_s27 + $0xc0] sm:$0xf] }
 0x101   : > { %v1514_v13 = vsel %vm15320_vm5, %v1509_v37, %v1513_v17  ;;  %v1518_v39 = vor.u32 %v1517_v46, %v1513_v17  ;;  %v16098_v54 = vcombine.low %v3993_v53, %v3996_v50  ;;  %v3998_v60 = vrot.slane %v15053_v25, 5  ;;  %v15054_v44 = vld [vmem:[%s15286_s27 + $0xc4] sm:$0x1]  ;;  %v387_v43 = vld [vmem:[%s15286_s27 + $0x1fc] sm:$0xf] }
 0x102   : > { %v16096_v33 = vcombine.low %v1504_v1, %v1514_v13  ;;  %v1528_v63 = vor.u32 %v1527_v48, %v1523_v12  ;;  %v4001_v14 = vrot.slane %v15054_v44, 5  ;;  %v1536_v56 = vshrl.u32 %v385_v7, 16 }
 0x103   : > { %19378 = vst [vmem:[#allocation66_spill] sm:$0xff] %v16098_v54  ;;  %v1519_v57 = vrot.slane %v1518_v39, 4  ;;  %v1539_v37 = vshll.u32 %v385_v7, 16  ;;  %13396 = vmatprep.mubr.msk.bf16.mxu0 %vm2035_vm4, %v16098_v54  ;;  %v3999_v62 = vsel %vm15726_vm8, %v3997_v30, %v3998_v60  ;;  %v4000_v53 = vrot.slane %v3998_v60, 4 }
 0x104   : > { %19377 = vst [vmem:[#allocation65_spill] sm:$0xff] %v16096_v33  ;;  %12810 = vmatprep.mubr.msk.bf16.mxu1 %vm2035_vm4, %v16096_v33  ;;  %v1529_v17 = vrot.slane %v1528_v63, 4  ;;  %v1545_v16 = vshll.u32 %v386_v34, 16  ;;  %v1538_v1 = vrot.slane %v1536_v56, 4  ;;  %v1549_v7 = vshrl.u32 %v386_v34, 16 }
 0x105   : > { %v1524_v46 = vsel %vm15320_vm5, %v1519_v57, %v1523_v12  ;;  %v1541_v48 = vrot.slane %v1539_v37, 5  ;;  %v4002_v50 = vsel %vm15726_vm8, %v4000_v53, %v4001_v14  ;;  %v1555_v30 = vshll.u32 %v387_v43, 16  ;;  %v388_v63 = vld [vmem:[%s15286_s27 + $0x200] sm:$0xf]  ;;  %v389_v56 = vld [vmem:[%s15286_s27 + $0x204] sm:$0x1] }
 0x106   : > { %v1534_v13 = vsel %vm15320_vm5, %v1529_v17, %v1533_v18  ;;  %v1547_v39 = vrot.slane %v1545_v16, 5  ;;  %v16118_v60 = vcombine.low %v3999_v62, %v4002_v50  ;;  %v1551_v12 = vrot.slane %v1549_v7, 4  ;;  %v15055_v37 = vld [vmem:[%s15286_s27 + $0xc8] sm:$0xf]  ;;  %v15056_v33 = vld [vmem:[%s15286_s27 + $0xcc] sm:$0xf] }
 0x107   : > { %v16116_v25 = vcombine.low %v1524_v46, %v1534_v13  ;;  %v1542_v44 = vor.u32 %v1541_v48, %v1538_v1  ;;  %v1557_v57 = vrot.slane %v1555_v30, 5  ;;  %v11318_v34 = vrot.slane %v15055_v37, 9  ;;  %v390_v50 = vld [vmem:[%s15286_s27 + $0x208] sm:$0xf]  ;;  %v15058_v37 = vld [vmem:[%s15286_s27 + $0xd4] sm:$0xf] }
 0x108   : > { %19380 = vst [vmem:[#allocation68_spill] sm:$0xff] %v16118_v60  ;;  %v4005_v19 = vrot.slane %v15056_v33, 5  ;;  %v4008_v18 = vrot.slane %v15057_v58, 5  ;;  %13397 = vmatmul.mubr.msk.bf16.gmra.mrb[32].mxu0 %vm2035_vm4, %v16118_v60  ;;  %v1552_v17 = vor.u32 %v1551_v12, %v1547_v39  ;;  %v1559_v62 = vshrl.u32 %v387_v43, 16 }
 0x109   : > { %19379 = vst [vmem:[#allocation67_spill] sm:$0xff] %v16116_v25  ;;  %12811 = vmatmul.mubr.msk.bf16.gmra.mrb[96].mxu1 %vm2035_vm4, %v16116_v25  ;;  %v1543_v14 = vrot.slane %v1542_v44, 4  ;;  %v1565_v53 = vshll.u32 %v388_v63, 16  ;;  %v1569_v1 = vshrl.u32 %v388_v63, 16  ;;  %v1575_v33 = vshll.u32 %v389_v56, 16 }
 0x10a   : > { %v4006_v16 = vsel %vm15726_vm8, %v11318_v34, %v4005_v19  ;;  %v4007_v46 = vrot.slane %v4005_v19, 4  ;;  %v1553_v48 = vrot.slane %v1552_v17, 4  ;;  %v1561_v7 = vrot.slane %v1559_v62, 4  ;;  %v391_v34 = vld [vmem:[%s15286_s27 + $0x20c] sm:$0xf] }
 0x10b   : > { %v1548_v58 = vsel %vm15320_vm5, %v1543_v14, %v1547_v39  ;;  %v1567_v13 = vrot.slane %v1565_v53, 5  ;;  %v1571_v30 = vrot.slane %v1569_v1, 4  ;;  %v1577_v44 = vrot.slane %v1575_v33, 5  ;;  %v15059_v62 = vld [vmem:[%s15286_s27 + $0xd8] sm:$0x1] }
 0x10c   : > { %v4009_v43 = vsel %vm15726_vm8, %v4007_v46, %v4008_v18  ;;  %v4010_v12 = vrot.slane %v4008_v18, 4  ;;  %v1558_v19 = vsel %vm15320_vm5, %v1553_v48, %v1557_v57  ;;  %v1562_v56 = vor.u32 %v1561_v7, %v1557_v57  ;;  %v392_v25 = vld [vmem:[%s15286_s27 + $0x210] sm:$0xf] }
 0x10d   : > { %v16137_v63 = vcombine.low %v4006_v16, %v4009_v43  ;;  %v4011_v39 = vrot.slane %v15058_v37, 5  ;;  %v16141_v14 = vcombine.low %v1548_v58, %v1558_v19  ;;  %v1572_v17 = vor.u32 %v1571_v30, %v1567_v13  ;;  %v16160_v37 = vld [vmem:[%s15286_s27 + $0x214] sm:$0xf] }
 0x10e   : > { %v4014_v53 = vrot.slane %v15059_v62, 5  ;;  %v1580_v24 = vshrl.u32 %v390_v50, 16  ;;  %v1563_v18 = vrot.slane %v1562_v56, 4  ;;  %v1583_v57 = vshll.u32 %v390_v50, 16  ;;  %v15060_v62 = vld [vmem:[%s15286_s27 + $0xdc] sm:$0xf] }
 0x10f   : > { %19381 = vst [vmem:[#allocation69_spill] sm:$0xff] %v16137_v63  ;;  %19382 = vst [vmem:[#allocation70_spill] sm:$0xff] %v16141_v14  ;;  %13400 = vmatprep.mubr.msk.bf16.mxu0 %vm2035_vm4, %v16137_v63  ;;  %v4012_v46 = vsel %vm15726_vm8, %v4010_v12, %v4011_v39  ;;  %v4013_v16 = vrot.slane %v4011_v39, 4  ;;  %12814 = vmatprep.mubr.msk.bf16.mxu1 %vm2035_vm4, %v16141_v14  ;;  %v1573_v1 = vrot.slane %v1572_v17, 4  ;;  %v1589_v58 = vshll.u32 %v391_v34, 16  ;;  %v19606_v59 = vld [vmem:[#allocation68_spill] sm:$0xff] }
 0x110   : > { %v1582_v33 = vrot.slane %v1580_v24, 4  ;;  %v1593_v48 = vshrl.u32 %v391_v34, 16  ;;  %v1568_v7 = vsel %vm15320_vm5, %v1563_v18, %v1567_v13  ;;  %v1585_v30 = vrot.slane %v1583_v57, 5  ;;  %v394_v39 = vld [vmem:[%s15286_s27 + $0x218] sm:$0x1] }
 0x111   : > { %v4015_v43 = vsel %vm15726_vm8, %v4013_v16, %v4014_v53  ;;  %v1599_v12 = vshll.u32 %v392_v25, 16  ;;  %v1578_v50 = vsel %vm15320_vm5, %v1573_v1, %v1577_v44  ;;  %v1591_v56 = vrot.slane %v1589_v58, 5  ;;  %v15061_v16 = vld [vmem:[%s15286_s27 + $0xe0] sm:$0xf]  ;;  %v15062_v44 = vld [vmem:[%s15286_s27 + $0xe4] sm:$0xf] }
 0x112   : > { %v16157_v19 = vcombine.low %v4012_v46, %v4015_v43  ;;  %v1595_v24 = vrot.slane %v1593_v48, 4  ;;  %v16163_v34 = vcombine.low %v1568_v7, %v1578_v50  ;;  %v1586_v13 = vor.u32 %v1585_v30, %v1582_v33 }
 0x113   : > { %v1601_v17 = vrot.slane %v1599_v12, 5  ;;  %v11319_v53 = vrot.slane %v15060_v62, 9  ;;  %v4018_v57 = vrot.slane %v15061_v16, 5  ;;  %v4021_v46 = vrot.slane %v15062_v44, 5  ;;  %v16179_v16 = vld [vmem:[%s15286_s27 + $0x21c] sm:$0xf] }
 0x114   : > { %19383 = vst [vmem:[#allocation71_spill] sm:$0xff] %v16157_v19  ;;  %19384 = vst [vmem:[#allocation72_spill] sm:$0xff] %v16163_v34  ;;  %13401 = vmatmul.mubr.msk.bf16.gmra.mrb[36].mxu0 %vm2035_vm4, %v16157_v19  ;;  %v1596_v18 = vor.u32 %v1595_v24, %v1591_v56  ;;  %v1603_v1 = vshrl.u32 %v392_v25, 16  ;;  %12815 = vmatmul.mubr.msk.bf16.gmra.mrb[100].mxu1 %vm2035_vm4, %v16163_v34  ;;  %v1587_v58 = vrot.slane %v1586_v13, 4  ;;  %v1609_v48 = vshll.u32 %v16160_v37, 16 }
 0x115   : > { %v1613_v33 = vshrl.u32 %v16160_v37, 16  ;;  %v1619_v7 = vshll.u32 %v394_v39, 16  ;;  %v4019_v30 = vsel %vm15726_vm8, %v11319_v53, %v4018_v57  ;;  %v4020_v12 = vrot.slane %v4018_v57, 4  ;;  %v16186_v57 = vld [vmem:[%s15286_s27 + $0x220] sm:$0xf] }
 0x116   : > { %v1597_v43 = vrot.slane %v1596_v18, 4  ;;  %v1605_v50 = vrot.slane %v1603_v1, 4  ;;  %v1592_v25 = vsel %vm15320_vm5, %v1587_v58, %v1591_v56  ;;  %v1611_v24 = vrot.slane %v1609_v48, 5  ;;  %v15063_v48 = vld [vmem:[%s15286_s27 + $0xe8] sm:$0xf] }
 0x117   : > { %v1615_v62 = vrot.slane %v1613_v33, 4  ;;  %v1621_v13 = vrot.slane %v1619_v7, 5  ;;  %v4022_v18 = vsel %vm15726_vm8, %v4020_v12, %v4021_v46  ;;  %v4023_v44 = vrot.slane %v4021_v46, 4  ;;  %v15064_v34 = vld [vmem:[%s15286_s27 + $0xec] sm:$0x1] }
 0x118   : > { %v1602_v39 = vsel %vm15320_vm5, %v1597_v43, %v1601_v17  ;;  %v1606_v53 = vor.u32 %v1605_v50, %v1601_v17  ;;  %v16190_v56 = vcombine.low %v4019_v30, %v4022_v18  ;;  %v4024_v33 = vrot.slane %v15063_v48, 5  ;;  %v16215_v48 = vld [vmem:[%s15286_s27 + $0x228] sm:$0xf] }
 0x119   : > { %v16188_v1 = vcombine.low %v1592_v25, %v1602_v39  ;;  %v1616_v58 = vor.u32 %v1615_v62, %v1611_v24  ;;  %v4027_v14 = vrot.slane %v15064_v34, 5  ;;  %v1624_v43 = vshrl.u32 %v16179_v16, 16 }
 0x11a   : > { %19386 = vst [vmem:[#allocation74_spill] sm:$0xff] %v16190_v56  ;;  %v1607_v7 = vrot.slane %v1606_v53, 4  ;;  %v1627_v17 = vshll.u32 %v16179_v16, 16  ;;  %13404 = vmatprep.mubr.msk.bf16.mxu0 %vm2035_vm4, %v16190_v56  ;;  %v4025_v30 = vsel %vm15726_vm8, %v4023_v44, %v4024_v33  ;;  %v4026_v12 = vrot.slane %v4024_v33, 4  ;;  %v16386_v56 = vld [vmem:[%s15286_s27 + $0x258] sm:$0xf] }
 0x11b   : > { %19385 = vst [vmem:[#allocation73_spill] sm:$0xff] %v16188_v1  ;;  %12818 = vmatprep.mubr.msk.bf16.mxu1 %vm2035_vm4, %v16188_v1  ;;  %v1617_v46 = vrot.slane %v1616_v58, 4  ;;  %v1633_v34 = vshll.u32 %v16186_v57, 16  ;;  %v1626_v25 = vrot.slane %v1624_v43, 4  ;;  %v1637_v39 = vshrl.u32 %v16186_v57, 16 }
 0x11c   : > { %v1612_v50 = vsel %vm15320_vm5, %v1607_v7, %v1611_v24  ;;  %v1629_v62 = vrot.slane %v1627_v17, 5  ;;  %v4028_v53 = vsel %vm15726_vm8, %v4026_v12, %v4027_v14  ;;  %v1643_v58 = vshll.u32 %v16195_v0, 16  ;;  %v16222_v17 = vld [vmem:[%s15286_s27 + $0x22c] sm:$0x1] }
 0x11d   : > { %v1622_v18 = vsel %vm15320_vm5, %v1617_v46, %v1621_v13  ;;  %v1635_v44 = vrot.slane %v1633_v34, 5  ;;  %v16219_v24 = vcombine.low %v4025_v30, %v4028_v53  ;;  %v1639_v43 = vrot.slane %v1637_v39, 4  ;;  %v15066_v13 = vld [vmem:[%s15286_s27 + $0xf4] sm:$0xf] }
 0x11e   : > { %v16217_v33 = vcombine.low %v1612_v50, %v1622_v18  ;;  %v1630_v7 = vor.u32 %v1629_v62, %v1626_v25  ;;  %v1645_v1 = vrot.slane %v1643_v58, 5  ;;  %v11320_v10 = vrot.slane %v15065_v32, 9 }
 0x11f   : > { %19388 = vst [vmem:[#allocation76_spill] sm:$0xff] %v16219_v24  ;;  %v4031_v46 = vrot.slane %v15066_v13, 5  ;;  %v4034_v14 = vrot.slane %v15067_v42, 5  ;;  %13405 = vmatmul.mubr.msk.bf16.gmra.mrb[40].mxu0 %vm2035_vm4, %v16219_v24  ;;  %v1640_v12 = vor.u32 %v1639_v43, %v1635_v44  ;;  %v1647_v34 = vshrl.u32 %v16195_v0, 16  ;;  %v16362_v24 = vld [vmem:[%s15286_s27 + $0x118] sm:$0xf] }
 0x120   : > { %19387 = vst [vmem:[#allocation75_spill] sm:$0xff] %v16217_v33  ;;  %12819 = vmatmul.mubr.msk.bf16.gmra.mrb[104].mxu1 %vm2035_vm4, %v16217_v33  ;;  %v1631_v30 = vrot.slane %v1630_v7, 4  ;;  %v1653_v50 = vshll.u32 %v16215_v48, 16  ;;  %v1657_v62 = vshrl.u32 %v16215_v48, 16  ;;  %v1663_v42 = vshll.u32 %v16222_v17, 16 }
 0x121   : > { %v4032_v32 = vsel %vm15726_vm8, %v11320_v10, %v4031_v46  ;;  %v4033_v25 = vrot.slane %v4031_v46, 4  ;;  %v1641_v18 = vrot.slane %v1640_v12, 4  ;;  %v1649_v53 = vrot.slane %v1647_v34, 4  ;;  %v16240_v7 = vld [vmem:[%s15286_s27 + $0x230] sm:$0xf] }
 0x122   : > { %v1636_v39 = vsel %vm15320_vm5, %v1631_v30, %v1635_v44  ;;  %v1655_v58 = vrot.slane %v1653_v50, 5  ;;  %v1659_v43 = vrot.slane %v1657_v62, 4  ;;  %v1665_v13 = vrot.slane %v1663_v42, 5  ;;  %v16249_v44 = vld [vmem:[%s15286_s27 + $0xfc] sm:$0xf] }
 0x123   : > { %v4035_v10 = vsel %vm15726_vm8, %v4033_v25, %v4034_v14  ;;  %v4036_v46 = vrot.slane %v4034_v14, 4  ;;  %v1646_v33 = vsel %vm15320_vm5, %v1641_v18, %v1645_v1  ;;  %v1650_v52 = vor.u32 %v1649_v53, %v1645_v1  ;;  %v16253_v12 = vld [vmem:[%s15286_s27 + $0x234] sm:$0xf]  ;;  %v16259_v62 = vld [vmem:[%s15286_s27 + $0x238] sm:$0xf] }
 0x124   : > { %v16246_v22 = vcombine.low %v4032_v32, %v4035_v10  ;;  %v4037_v30 = vrot.slane %v16249_v44, 5  ;;  %v16255_v34 = vcombine.low %v1636_v39, %v1646_v33  ;;  %v1660_v50 = vor.u32 %v1659_v43, %v1655_v58 }
 0x125   : > { %v4040_v25 = vrot.slane %v15069_v35, 5  ;;  %v1668_v14 = vshrl.u32 %v16240_v7, 16  ;;  %v1651_v32 = vrot.slane %v1650_v52, 4  ;;  %v1671_v33 = vshll.u32 %v16240_v7, 16 }
 0x126   : > { %19389 = vst [vmem:[#allocation77_spill] sm:$0xff] %v16246_v22  ;;  %19390 = vst [vmem:[#allocation78_spill] sm:$0xff] %v16255_v34  ;;  %13408 = vmatprep.mubr.msk.bf16.mxu0 %vm2035_vm4, %v16246_v22  ;;  %v4038_v1 = vsel %vm15726_vm8, %v4036_v46, %v4037_v30  ;;  %v4039_v42 = vrot.slane %v4037_v30, 4  ;;  %12822 = vmatprep.mubr.msk.bf16.mxu1 %vm2035_vm4, %v16255_v34  ;;  %v1661_v35 = vrot.slane %v1660_v50, 4  ;;  %v1677_v18 = vshll.u32 %v16253_v12, 16 }
 0x127   : > { %v1670_v39 = vrot.slane %v1668_v14, 4  ;;  %v1681_v53 = vshrl.u32 %v16253_v12, 16  ;;  %v1656_v52 = vsel %vm15320_vm5, %v1651_v32, %v1655_v58  ;;  %v1673_v43 = vrot.slane %v1671_v33, 5 }
 0x128   : > { %v4041_v10 = vsel %vm15726_vm8, %v4039_v42, %v4040_v25  ;;  %v1687_v46 = vshll.u32 %v16259_v62, 16  ;;  %v1666_v30 = vsel %vm15320_vm5, %v1661_v35, %v1665_v13  ;;  %v1679_v14 = vrot.slane %v1677_v18, 5  ;;  %v16289_v42 = vld [vmem:[%s15286_s27 + $0x104] sm:$0xf]  ;;  %v16299_v18 = vld [vmem:[%s15286_s27 + $0x10c] sm:$0xf] }
 0x129   : > { %v16278_v50 = vcombine.low %v4038_v1, %v4041_v10  ;;  %v1683_v34 = vrot.slane %v1681_v53, 4  ;;  %v16286_v58 = vcombine.low %v1656_v52, %v1666_v30  ;;  %v1674_v32 = vor.u32 %v1673_v43, %v1670_v39  ;;  %v16295_v1 = vld [vmem:[%s15286_s27 + $0x108] sm:$0xf] }
 0x12a   : > { %v1689_v25 = vrot.slane %v1687_v46, 5  ;;  %v11321_v33 = vrot.slane %v16289_v42, 9  ;;  %v4044_v35 = vrot.slane %v16295_v1, 5  ;;  %v4047_v53 = vrot.slane %v16299_v18, 5 }
 0x12b   : > { %19391 = vst [vmem:[#allocation79_spill] sm:$0xff] %v16278_v50  ;;  %19392 = vst [vmem:[#allocation80_spill] sm:$0xff] %v16286_v58  ;;  %13409 = vmatmul.mubr.msk.bf16.gmra.mrb[44].mxu0 %vm2035_vm4, %v16278_v50  ;;  %v1684_v13 = vor.u32 %v1683_v34, %v1679_v14  ;;  %v1691_v39 = vshrl.u32 %v16259_v62, 16  ;;  %12823 = vmatmul.mubr.msk.bf16.gmra.mrb[108].mxu1 %vm2035_vm4, %v16286_v58  ;;  %v1675_v52 = vrot.slane %v1674_v32, 4  ;;  %v1697_v10 = vshll.u32 %v16281_v2, 16 }
 0x12c   : > { %v1701_v34 = vshrl.u32 %v16281_v2, 16  ;;  %v1707_v43 = vshll.u32 %v16284_v49, 16  ;;  %v4045_v30 = vsel %vm15726_vm8, %v11321_v33, %v4044_v35  ;;  %v4046_v27 = vrot.slane %v4044_v35, 4  ;;  %v16320_v35 = vld [vmem:[%s15286_s27 + $0x248] sm:$0xf] }
 0x12d   : > { %v1685_v46 = vrot.slane %v1684_v13, 4  ;;  %v1693_v6 = vrot.slane %v1691_v39, 4  ;;  %v1680_v40 = vsel %vm15320_vm5, %v1675_v52, %v1679_v14  ;;  %v1699_v58 = vrot.slane %v1697_v10, 5  ;;  %v16327_v10 = vld [vmem:[%s15286_s27 + $0x110] sm:$0xf] }
 0x12e   : > { %v1703_v32 = vrot.slane %v1701_v34, 4  ;;  %v1709_v29 = vrot.slane %v1707_v43, 5  ;;  %v4048_v13 = vsel %vm15726_vm8, %v4046_v27, %v4047_v53  ;;  %v4049_v21 = vrot.slane %v4047_v53, 4 }
 0x12f   : > { %v1690_v41 = vsel %vm15320_vm5, %v1685_v46, %v1689_v25  ;;  %v1694_v33 = vor.u32 %v1693_v6, %v1689_v25  ;;  %v16324_v14 = vcombine.low %v4045_v30, %v4048_v13  ;;  %v4050_v34 = vrot.slane %v16327_v10, 5  ;;  %v16332_v46 = vld [vmem:[%s15286_s27 + $0x24c] sm:$0xf] }
 0x130   : > { %v16322_v39 = vcombine.low %v1680_v40, %v1690_v41  ;;  %v1704_v52 = vor.u32 %v1703_v32, %v1699_v58  ;;  %v4053_v50 = vrot.slane %v15074_v5, 5  ;;  %v1712_v27 = vshrl.u32 %v16313_v61, 16 }
 0x131   : > { %19394 = vst [vmem:[#allocation82_spill] sm:$0xff] %v16324_v14  ;;  %v1695_v43 = vrot.slane %v1694_v33, 4  ;;  %v1715_v6 = vshll.u32 %v16313_v61, 16  ;;  %13412 = vmatprep.mubr.msk.bf16.mxu0 %vm2035_vm4, %v16324_v14  ;;  %v4051_v40 = vsel %vm15726_vm8, %v4049_v21, %v4050_v34  ;;  %v4052_v25 = vrot.slane %v4050_v34, 4 }
 0x132   : > { %19393 = vst [vmem:[#allocation81_spill] sm:$0xff] %v16322_v39  ;;  %12826 = vmatprep.mubr.msk.bf16.mxu1 %vm2035_vm4, %v16322_v39  ;;  %v1705_v41 = vrot.slane %v1704_v52, 4  ;;  %v1721_v5 = vshll.u32 %v16320_v35, 16  ;;  %v1714_v30 = vrot.slane %v1712_v27, 4  ;;  %v1725_v13 = vshrl.u32 %v16320_v35, 16 }
 0x133   : > { %v1700_v53 = vsel %vm15320_vm5, %v1695_v43, %v1699_v58  ;;  %v1717_v32 = vrot.slane %v1715_v6, 5  ;;  %v4054_v21 = vsel %vm15726_vm8, %v4052_v25, %v4053_v50  ;;  %v1731_v34 = vshll.u32 %v16332_v46, 16  ;;  %v16352_v39 = vld [vmem:[%s15286_s27 + $0x250] sm:$0xf]  ;;  %v16359_v6 = vld [vmem:[%s15286_s27 + $0x254] sm:$0x1] }
 0x134   : > { %v1710_v33 = vsel %vm15320_vm5, %v1705_v41, %v1709_v29  ;;  %v1723_v52 = vrot.slane %v1721_v5, 5  ;;  %v16356_v58 = vcombine.low %v4051_v40, %v4054_v21  ;;  %v1727_v27 = vrot.slane %v1725_v13, 4  ;;  %v16366_v41 = vld [vmem:[%s15286_s27 + $0x11c] sm:$0xf]  ;;  %v16370_v25 = vld [vmem:[%s15286_s27 + $0x120] sm:$0xf] }
 0x135   : > { %v16354_v14 = vcombine.low %v1700_v53, %v1710_v33  ;;  %v1718_v43 = vor.u32 %v1717_v32, %v1714_v30  ;;  %v1733_v22 = vrot.slane %v1731_v34, 5  ;;  %v11322_v29 = vrot.slane %v16362_v24, 9 }
 0x136   : > { %19396 = vst [vmem:[#allocation84_spill] sm:$0xff] %v16356_v58  ;;  %v4057_v50 = vrot.slane %v16366_v41, 5  ;;  %v4060_v5 = vrot.slane %v16370_v25, 5  ;;  %13413 = vmatmul.mubr.msk.bf16.gmra.mrb[48].mxu0 %vm2035_vm4, %v16356_v58  ;;  %v1728_v53 = vor.u32 %v1727_v27, %v1723_v52  ;;  %v1735_v30 = vshrl.u32 %v16332_v46, 16 }
 0x137   : > { %19395 = vst [vmem:[#allocation83_spill] sm:$0xff] %v16354_v14  ;;  %12827 = vmatmul.mubr.msk.bf16.gmra.mrb[112].mxu1 %vm2035_vm4, %v16354_v14  ;;  %v1719_v40 = vrot.slane %v1718_v43, 4  ;;  %v1741_v32 = vshll.u32 %v16352_v39, 16  ;;  %v1745_v21 = vshrl.u32 %v16352_v39, 16  ;;  %v1751_v34 = vshll.u32 %v16359_v6, 16 }
 0x138   : > { %v4058_v13 = vsel %vm15726_vm8, %v11322_v29, %v4057_v50  ;;  %v4059_v33 = vrot.slane %v4057_v50, 4  ;;  %v1729_v58 = vrot.slane %v1728_v53, 4  ;;  %v1737_v43 = vrot.slane %v1735_v30, 4  ;;  %v16399_v53 = vld [vmem:[%s15286_s27 + $0x25c] sm:$0xf] }
 0x139   : > { %v1724_v14 = vsel %vm15320_vm5, %v1719_v40, %v1723_v52  ;;  %v1743_v27 = vrot.slane %v1741_v32, 5  ;;  %v1747_v19 = vrot.slane %v1745_v21, 4  ;;  %v1753_v50 = vrot.slane %v1751_v34, 5  ;;  %v16395_v52 = vld [vmem:[%s15286_s27 + $0x124] sm:$0xf] }
 0x13a   : > { %v4061_v29 = vsel %vm15726_vm8, %v4059_v33, %v4060_v5  ;;  %v4062_v63 = vrot.slane %v4060_v5, 4  ;;  %v1734_v60 = vsel %vm15320_vm5, %v1729_v58, %v1733_v22  ;;  %v1738_v23 = vor.u32 %v1737_v43, %v1733_v22  ;;  %v16405_v21 = vld [vmem:[%s15286_s27 + $0x260] sm:$0xf] }
 0x13b   : > { %v16392_v54 = vcombine.low %v4058_v13, %v4061_v29  ;;  %v4063_v40 = vrot.slane %v16395_v52, 5  ;;  %v16401_v30 = vcombine.low %v1724_v14, %v1734_v60  ;;  %v1748_v32 = vor.u32 %v1747_v19, %v1743_v27 }
 0x13c   : > { %v4066_v33 = vrot.slane %v15079_v38, 5  ;;  %v1756_v5 = vshrl.u32 %v16386_v56, 16  ;;  %v1739_v58 = vrot.slane %v1738_v23, 4  ;;  %v1759_v60 = vshll.u32 %v16386_v56, 16 }
 0x13d   : > { %19397 = vst [vmem:[#allocation85_spill] sm:$0xff] %v16392_v54  ;;  %19398 = vst [vmem:[#allocation86_spill] sm:$0xff] %v16401_v30  ;;  %13416 = vmatprep.mubr.msk.bf16.mxu0 %vm2035_vm4, %v16392_v54  ;;  %v4064_v22 = vsel %vm15726_vm8, %v4062_v63, %v4063_v40  ;;  %v4065_v13 = vrot.slane %v4063_v40, 4  ;;  %12830 = vmatprep.mubr.msk.bf16.mxu1 %vm2035_vm4, %v16401_v30  ;;  %v1749_v38 = vrot.slane %v1748_v32, 4  ;;  %v1765_v14 = vshll.u32 %v16399_v53, 16 }
 0x13e   : > { %v1758_v19 = vrot.slane %v1756_v5, 4  ;;  %v1769_v34 = vshrl.u32 %v16399_v53, 16  ;;  %v1744_v23 = vsel %vm15320_vm5, %v1739_v58, %v1743_v27  ;;  %v1761_v43 = vrot.slane %v1759_v60, 5  ;;  %v16427_v54 = vld [vmem:[%s15286_s27 + $0x264] sm:$0xf] }
 0x13f   : > { %v4067_v63 = vsel %vm15726_vm8, %v4065_v13, %v4066_v33  ;;  %v1775_v29 = vshll.u32 %v16405_v21, 16  ;;  %v1754_v40 = vsel %vm15320_vm5, %v1749_v38, %v1753_v50  ;;  %v1767_v5 = vrot.slane %v1765_v14, 5  ;;  %v16435_v13 = vld [vmem:[%s15286_s27 + $0x12c] sm:$0xf]  ;;  %v16445_v14 = vld [vmem:[%s15286_s27 + $0x134] sm:$0xf] }
 0x140   : > { %v16424_v32 = vcombine.low %v4064_v22, %v4067_v63  ;;  %v1771_v30 = vrot.slane %v1769_v34, 4  ;;  %v16432_v27 = vcombine.low %v1744_v23, %v1754_v40  ;;  %v1762_v58 = vor.u32 %v1761_v43, %v1758_v19  ;;  %v16441_v22 = vld [vmem:[%s15286_s27 + $0x130] sm:$0xf] }
 0x141   : > { %v1777_v33 = vrot.slane %v1775_v29, 5  ;;  %v11323_v60 = vrot.slane %v16435_v13, 9  ;;  %v4070_v38 = vrot.slane %v16441_v22, 5  ;;  %v4073_v34 = vrot.slane %v16445_v14, 5 }
 0x142   : > { %19399 = vst [vmem:[#allocation87_spill] sm:$0xff] %v16424_v32  ;;  %19400 = vst [vmem:[#allocation88_spill] sm:$0xff] %v16432_v27  ;;  %13417 = vmatmul.mubr.msk.bf16.gmra.mrb[52].mxu0 %vm2035_vm4, %v16424_v32  ;;  %v1772_v50 = vor.u32 %v1771_v30, %v1767_v5  ;;  %v1779_v19 = vshrl.u32 %v16405_v21, 16  ;;  %12831 = vmatmul.mubr.msk.bf16.gmra.mrb[116].mxu1 %vm2035_vm4, %v16432_v27  ;;  %v1763_v23 = vrot.slane %v1762_v58, 4  ;;  %v1785_v63 = vshll.u32 %v16427_v54, 16 }
 0x143   : > { %v1789_v30 = vshrl.u32 %v16427_v54, 16  ;;  %v1795_v43 = vshll.u32 %v16430_v3, 16  ;;  %v4071_v40 = vsel %vm15726_vm8, %v11323_v60, %v4070_v38  ;;  %v4072_v32 = vrot.slane %v4070_v38, 4  ;;  %v16466_v38 = vld [vmem:[%s15286_s27 + $0x270] sm:$0xf] }
 0x144   : > { %v1773_v29 = vrot.slane %v1772_v50, 4  ;;  %v1781_v4 = vrot.slane %v1779_v19, 4  ;;  %v1768_v55 = vsel %vm15320_vm5, %v1763_v23, %v1767_v5  ;;  %v1787_v27 = vrot.slane %v1785_v63, 5  ;;  %v16473_v63 = vld [vmem:[%s15286_s27 + $0x138] sm:$0xf] }
 0x145   : > { %v1791_v58 = vrot.slane %v1789_v30, 4  ;;  %v1797_v26 = vrot.slane %v1795_v43, 5  ;;  %v4074_v50 = vsel %vm15726_vm8, %v4072_v32, %v4073_v34  ;;  %v4075_v28 = vrot.slane %v4073_v34, 4 }
 0x146   : > { %v1778_v15 = vsel %vm15320_vm5, %v1773_v29, %v1777_v33  ;;  %v1782_v60 = vor.u32 %v1781_v4, %v1777_v33  ;;  %v16470_v5 = vcombine.low %v4071_v40, %v4074_v50  ;;  %v4076_v30 = vrot.slane %v16473_v63, 5  ;;  %v16478_v29 = vld [vmem:[%s15286_s27 + $0x274] sm:$0xf] }
 0x147   : > { %v16468_v19 = vcombine.low %v1768_v55, %v1778_v15  ;;  %v1792_v23 = vor.u32 %v1791_v58, %v1787_v27  ;;  %v4079_v36 = vrot.slane %v15084_v20, 5  ;;  %v1800_v32 = vshrl.u32 %v16459_v11, 16 }
 0x148   : > { %19402 = vst [vmem:[#allocation90_spill] sm:$0xff] %v16470_v5  ;;  %v1783_v43 = vrot.slane %v1782_v60, 4  ;;  %v1803_v4 = vshll.u32 %v16459_v11, 16  ;;  %13420 = vmatprep.mubr.msk.bf16.mxu0 %vm2035_vm4, %v16470_v5  ;;  %v4077_v55 = vsel %vm15726_vm8, %v4075_v28, %v4076_v30  ;;  %v4078_v33 = vrot.slane %v4076_v30, 4 }
 0x149   : > { %19401 = vst [vmem:[#allocation89_spill] sm:$0xff] %v16468_v19  ;;  %12834 = vmatprep.mubr.msk.bf16.mxu1 %vm2035_vm4, %v16468_v19  ;;  %v1793_v15 = vrot.slane %v1792_v23, 4  ;;  %v1809_v20 = vshll.u32 %v16466_v38, 16  ;;  %v1802_v40 = vrot.slane %v1800_v32, 4  ;;  %v1813_v50 = vshrl.u32 %v16466_v38, 16 }
 0x14a   : > { %v1788_v34 = vsel %vm15320_vm5, %v1783_v43, %v1787_v27  ;;  %v1805_v58 = vrot.slane %v1803_v4, 5  ;;  %v4080_v28 = vsel %vm15726_vm8, %v4078_v33, %v4079_v36  ;;  %v1819_v30 = vshll.u32 %v16478_v29, 16  ;;  %v16498_v19 = vld [vmem:[%s15286_s27 + $0x278] sm:$0xf]  ;;  %v16505_v4 = vld [vmem:[%s15286_s27 + $0x27c] sm:$0x1] }
 0x14b   : > { %v1798_v60 = vsel %vm15320_vm5, %v1793_v15, %v1797_v26  ;;  %v1811_v23 = vrot.slane %v1809_v20, 5  ;;  %v16502_v27 = vcombine.low %v4077_v55, %v4080_v28  ;;  %v1815_v32 = vrot.slane %v1813_v50, 4  ;;  %v16512_v15 = vld [vmem:[%s15286_s27 + $0x144] sm:$0xf]  ;;  %v16516_v33 = vld [vmem:[%s15286_s27 + $0x148] sm:$0xf] }
 0x14c   : > { %v16500_v5 = vcombine.low %v1788_v34, %v1798_v60  ;;  %v1806_v43 = vor.u32 %v1805_v58, %v1802_v40  ;;  %v1821_v9 = vrot.slane %v1819_v30, 5  ;;  %v11324_v26 = vrot.slane %v16508_v45, 9  ;;  %19406 = vst [vmem:[#allocation94_spill] sm:$0xff] %v16516_v33  ;;  %v16538_v45 = vld [vmem:[%s15286_s27 + $0x14c] sm:$0xf] }
 0x14d   : > { %19404 = vst [vmem:[#allocation92_spill] sm:$0xff] %v16502_v27  ;;  %v4083_v36 = vrot.slane %v16512_v15, 5  ;;  %v4086_v20 = vrot.slane %v16516_v33, 5  ;;  %13421 = vmatmul.mubr.msk.bf16.gmra.mrb[56].mxu0 %vm2035_vm4, %v16502_v27  ;;  %v1816_v34 = vor.u32 %v1815_v32, %v1811_v23  ;;  %v1823_v40 = vshrl.u32 %v16478_v29, 16 }
 0x14e   : > { %19403 = vst [vmem:[#allocation91_spill] sm:$0xff] %v16500_v5  ;;  %12835 = vmatmul.mubr.msk.bf16.gmra.mrb[120].mxu1 %vm2035_vm4, %v16500_v5  ;;  %v1807_v55 = vrot.slane %v1806_v43, 4  ;;  %v1829_v58 = vshll.u32 %v16498_v19, 16  ;;  %v1833_v28 = vshrl.u32 %v16498_v19, 16  ;;  %v1839_v30 = vshll.u32 %v16505_v4, 16 }
 0x14f   : > { %v4084_v50 = vsel %vm15726_vm8, %v11324_v26, %v4083_v36  ;;  %v4085_v60 = vrot.slane %v4083_v36, 4  ;;  %v1817_v27 = vrot.slane %v1816_v34, 4  ;;  %v1825_v43 = vrot.slane %v1823_v40, 4 }
 0x150   : > { %v1812_v5 = vsel %vm15320_vm5, %v1807_v55, %v1811_v23  ;;  %v1831_v32 = vrot.slane %v1829_v58, 5  ;;  %v1835_v51 = vrot.slane %v1833_v28, 4  ;;  %v4088_v47 = vrot.slane %v4086_v20, 4  ;;  %v15089_v58 = vld [vmem:[%s15286_s27 + $0x150] sm:$0x1] }
 0x151   : > { %v4087_v8 = vsel %vm15726_vm8, %v4085_v60, %v4086_v20  ;;  %v1822_v26 = vsel %vm15320_vm5, %v1817_v27, %v1821_v9  ;;  %v1826_v33 = vor.u32 %v1825_v43, %v1821_v9  ;;  %v4089_v23 = vrot.slane %v16538_v45, 5  ;;  %v16555_v60 = vld [vmem:[%s15286_s27] sm:$0xf]  ;;  %v16558_v28 = vld [vmem:[%s15286_s27 + $0x4] sm:$0xf] }
 0x152   : > { %v16535_v36 = vcombine.low %v4084_v50, %v4087_v8  ;;  %v16541_v55 = vcombine.low %v1812_v5, %v1822_v26  ;;  %v1836_v34 = vor.u32 %v1835_v51, %v1831_v32  ;;  %v1841_v40 = vrot.slane %v1839_v30, 5  ;;  %v16549_v50 = vld [vmem:[%s15286_s27 + $0x154] sm:$0xf]  ;;  %19410 = vst [vmem:[#allocation98_spill] sm:$0xff] %v16555_v60  ;;  %19411 = vst [vmem:[#allocation99_spill] sm:$0xff] %v16558_v28 }
 0x153   : > { %v4092_v20 = vrot.slane %v15089_v58, 5  ;;  %v1827_v8 = vrot.slane %v1826_v33, 4  ;;  %v4090_v9 = vsel %vm15726_vm8, %v4088_v47, %v4089_v23  ;;  %v4091_v27 = vrot.slane %v4089_v23, 4  ;;  %19409 = vst [vmem:[#allocation97_spill] sm:$0xff] %v16549_v50  ;;  %v16563_v30 = vld [vmem:[%s15286_s27 + $0x158] sm:$0xf] }
 0x154   : > { %19407 = vst [vmem:[#allocation95_spill] sm:$0xff] %v16535_v36  ;;  %19408 = vst [vmem:[#allocation96_spill] sm:$0xff] %v16541_v55  ;;  %13424 = vmatprep.mubr.msk.bf16.mxu0 %vm2035_vm4, %v16535_v36  ;;  %v11325_v5 = vrot.slane %v16549_v50, 9  ;;  %12838 = vmatprep.mubr.msk.bf16.mxu1 %vm2035_vm4, %v16541_v55  ;;  %v1837_v51 = vrot.slane %v1836_v34, 4  ;;  %v11180_v33 = vcombine.low %v16555_v60, %v16558_v28  ;;  %v4096_v47 = vrot.slane %v16563_v30, 5 }
 0x155   : > { %19412 = vst [vmem:[#allocation100_spill] sm:$0xff] %v16563_v30  ;;  %v16567_v43 = vld [vmem:[%s15286_s27 + $0x15c] sm:$0xf]  ;;  %v1832_v23 = vsel %vm15320_vm5, %v1827_v8, %v1831_v32  ;;  %v4093_v34 = vsel %vm15726_vm8, %v4091_v27, %v4092_v20  ;;  %v16575_v58 = vld [vmem:[%s15286_s27 + $0x160] sm:$0xf]  ;;  %vm10119_vm9 = vcmask 60416  }
 0x156   : > { %19413 = vst [vmem:[#allocation101_spill] sm:$0xff] %v16567_v43  ;;  %v4099_v26 = vrot.slane %v16567_v43, 5  ;;  %19414 = vst [vmem:[#allocation102_spill] sm:$0xff] %v16575_v58  ;;  %v4102_v55 = vrot.slane %v16575_v58, 5  ;;  %v15096_v36 = vld [vmem:[%s15286_s27 + $0x164] sm:$0x1]  ;;  %v1842_v28 = vsel %vm15320_vm5, %v1837_v51, %v1841_v40  ;;  %v16581_v50 = vcombine.low %v4090_v9, %v4093_v34 }
 0x157   : > { %v4105_v60 = vrot.slane %v15096_v36, 5  ;;  %v4097_v43 = vsel %vm15726_vm8, %v11325_v5, %v4096_v47  ;;  %v4098_v32 = vrot.slane %v4096_v47, 4  ;;  %v16585_v8 = vcombine.low %v1832_v23, %v1842_v28  ;;  %v16592_v36 = vld [vmem:[%s15286_s27 + $0x168] sm:$0xf]  ;;  %v16596_v9 = vld [vmem:[%s15286_s27 + $0x16c] sm:$0xf] }
 0x158   : > { %19415 = vst [vmem:[#allocation103_spill] sm:$0xff] %v16581_v50  ;;  %v4101_v20 = vrot.slane %v4099_v26, 4  ;;  %v4104_v27 = vrot.slane %v4102_v55, 4  ;;  %13425 = vmatmul.mubr.msk.bf16.gmra.mrb[60].mxu0 %vm2035_vm4, %v16581_v50  ;;  %19417 = vst [vmem:[#allocation105_spill] sm:$0xff] %v16592_v36  ;;  %v11326_v40 = vrot.slane %v16592_v36, 9  ;;  %v4109_v5 = vrot.slane %v16596_v9, 5 }
 0x159   : > { %19416 = vst [vmem:[#allocation104_spill] sm:$0xff] %v16585_v8  ;;  %v4100_v58 = vsel %vm15726_vm8, %v4098_v32, %v4099_v26  ;;  %19418 = vst [vmem:[#allocation106_spill] sm:$0xff] %v16596_v9  ;;  %v16600_v51 = vld [vmem:[%s15286_s27 + $0x170] sm:$0xf]  ;;  %12839 = vmatmul.mubr.msk.bf16.gmra.mrb[124].mxu1 %vm2035_vm4, %v16585_v8  ;;  %v16617_v8 = vld [vmem:[%s18989_s1 + $0x1c] sm:$0xf] }
 0x15a   : > { %19419 = vst [vmem:[#allocation107_spill] sm:$0xff] %v16600_v51  ;;  %v4112_v28 = vrot.slane %v16600_v51, 5  ;;  %v16605_v47 = vcombine.low %v4097_v43, %v4100_v58  ;;  %v4103_v26 = vsel %vm15726_vm8, %v4101_v20, %v4102_v55  ;;  %v4106_v23 = vsel %vm15726_vm8, %v4104_v27, %v4105_v60  ;;  %12844 = vmatprep.mubr.msk.bf16.mxu1 %vm2035_vm4, %v11180_v33  ;;  %v16622_v55 = vld [vmem:[%s15286_s27 + $0x174] sm:$0xf]  ;;  %v16628_v33 = vld [vmem:[%s15286_s27 + $0x8] sm:$0xf] }
 0x15b   : > { %v4110_v34 = vsel %vm15726_vm8, %v11326_v40, %v4109_v5  ;;  %v4111_v32 = vrot.slane %v4109_v5, 4  ;;  %19421 = vst [vmem:[#allocation109_spill] sm:$0xff] %v16617_v8  ;;  %19422 = vst [vmem:[#allocation110_spill] sm:$0xff] %v16622_v55  ;;  %v4115_v60 = vrot.slane %v16622_v55, 5  ;;  %14916 = vmatprep.subr.msk.bf16.mxu0 %vm2228_vm1, %v16617_v8  ;;  %v16631_v43 = vld [vmem:[%s15286_s27 + $0xc] sm:$0xf]  ;;  %v16635_v20 = vcombine.low %v4103_v26, %v4106_v23 }
 0x15c   : > { %19420 = vst [vmem:[#allocation108_spill] sm:$0xff] %v16605_v47  ;;  %13428 = vmatprep.mubr.msk.bf16.mxu0 %vm2035_vm4, %v16605_v47  ;;  %19423 = vst [vmem:[#allocation111_spill] sm:$0xff] %v16628_v33  ;;  %v11181_v58 = vcombine.low %v16628_v33, %v16631_v43  ;;  %v16640_v40 = vld [vmem:[%s15286_s27 + $0x180] sm:$0xf]  ;;  %v4114_v47 = vrot.slane %v4112_v28, 4  ;;  %vm10511_vm10 = vcmask 57344  }
 0x15d   : > { %19424 = vst [vmem:[#allocation112_spill] sm:$0xff] %v16631_v43  ;;  %19425 = vst [vmem:[#allocation113_spill] sm:$0xff] %v16635_v20  ;;  %v4113_v27 = vsel %vm15726_vm8, %v4111_v32, %v4112_v28  ;;  %v4122_v5 = vrot.slane %v16640_v40, 5  ;;  %v4117_v50 = vrot.slane %v4115_v60, 4  ;;  %v15104_v51 = vld [vmem:[%s15286_s27 + $0x178] sm:$0x1] }
 0x15e   : > { %19426 = vst [vmem:[#allocation114_spill] sm:$0xff] %v16640_v40  ;;  %v16643_v31 = vcombine.low %v4110_v34, %v4113_v27  ;;  %v4118_v55 = vrot.slane %v15104_v51, 5  ;;  %v15105_v36 = vld [vmem:[%s15286_s27 + $0x14] sm:$0xf]  ;;  %v15106_v9 = vld [vmem:[%s15286_s27 + $0x18] sm:$0xf] }
 0x15f   : > { %v16648_v43 = vcombine.low %v15105_v36, %v15106_v9  ;;  %v16651_v26 = vld [vmem:[%s15286_s27 + $0x17c] sm:$0xf]  ;;  %v4124_v32 = vrot.slane %v4122_v5, 4  ;;  %v16655_v33 = vld [vmem:[%s15286_s27 + $0x184] sm:$0xf]  ;;  %v4116_v36 = vsel %vm15726_vm8, %v4114_v47, %v4115_v60 }
 0x160   : > { %19427 = vst [vmem:[#allocation115_spill] sm:$0xff] %v16643_v31  ;;  %19429 = vst [vmem:[#allocation117_spill] sm:$0xff] %v16651_v26  ;;  %v11327_v23 = vrot.slane %v16651_v26, 9  ;;  %v4125_v34 = vrot.slane %v16655_v33, 5  ;;  %v15109_v51 = vld [vmem:[%s18989_s1 + $0x8] sm:$0xf]  ;;  %13429 = vmatmul.mubr.msk.bf16.gmra.mrb[64].mxu0 %vm2035_vm4, %v16635_v20  ;;  %v4119_v9 = vsel %vm15726_vm8, %v4117_v50, %v4118_v55 }
 0x161   : > { %19428 = vst [vmem:[#allocation116_spill] sm:$0xff] %v16648_v43  ;;  %19430 = vst [vmem:[#allocation118_spill] sm:$0xff] %v16655_v33  ;;  %v4674_v28 = vsel %vm2228_vm1, %v15109_v51, 0  ;;  %12845 = vmatmul.mubr.msk.bf16.vlgmr.msra.gmra.mrb[0].mxu1 %vm2035_vm4, %v11181_v58  ;;  %13432 = vmatprep.mubr.msk.bf16.mxu0 %vm2035_vm4, %v16643_v31  ;;  %v16672_v27 = vld [vmem:[%s15286_s27 + $0x188] sm:$0xf] }
 0x162   : > { %19431 = vst [vmem:[#allocation119_spill] sm:$0xff] %v16672_v27  ;;  %v4128_v33 = vrot.slane %v16672_v27, 5  ;;  %12973 = vmatpush3.bf16.msra.mxu1 %v4674_v28  ;;  %12848 = vmatprep.mubr.msk.bf16.mxu1 %vm2035_vm4, %v16648_v43  ;;  %v4123_v58 = vsel %vm15726_vm8, %v11327_v23, %v4122_v5  ;;  %v4126_v47 = vsel %vm15726_vm8, %v4124_v32, %v4125_v34  ;;  %v16682_v60 = vld [vmem:[%s15286_s27 + $0x194] sm:$0xf]  ;;  %v15112_v55 = vld [vmem:[%s15286_s27 + $0x1c] sm:$0xf] }
 0x163   : > { %19432 = vst [vmem:[#allocation120_spill] sm:$0xff] %v16682_v60  ;;  %v4135_v50 = vrot.slane %v16682_v60, 5  ;;  %v15113_v51 = vld [vmem:[%s15286_s27 + $0x20] sm:$0xf]  ;;  %v16689_v28 = vcombine.low %v4116_v36, %v4119_v9  ;;  %v16691_v20 = vcombine.low %v4123_v58, %v4126_v47  ;;  %v4127_v43 = vrot.slane %v4125_v34, 4 }
 0x164   : > { %v16687_v31 = vcombine.low %v15112_v55, %v15113_v51  ;;  %v4130_v27 = vrot.slane %v4128_v33, 4  ;;  %v15114_v5 = vld [vmem:[%s15286_s27 + $0x18c] sm:$0x1]  ;;  %v15115_v26 = vld [vmem:[%s15286_s27 + $0x28] sm:$0xf] }
 0x165   : > { %19434 = vst [vmem:[#allocation122_spill] sm:$0xff] %v16689_v28  ;;  %19435 = vst [vmem:[#allocation123_spill] sm:$0xff] %v16691_v20  ;;  %v4131_v23 = vrot.slane %v15114_v5, 5  ;;  %v15116_v32 = vld [vmem:[%s15286_s27 + $0x2c] sm:$0xf]  ;;  %v4137_v55 = vrot.slane %v4135_v50, 4 }
 0x166   : > { %19433 = vst [vmem:[#allocation121_spill] sm:$0xff] %v16687_v31  ;;  %v16696_v40 = vcombine.low %v15115_v26, %v15116_v32  ;;  %v16699_v60 = vld [vmem:[%s15286_s27 + $0x190] sm:$0xf]  ;;  %v16703_v36 = vld [vmem:[%s15286_s27 + $0x198] sm:$0xf]  ;;  %v4129_v26 = vsel %vm15726_vm8, %v4127_v43, %v4128_v33 }
 0x167   : > { %19436 = vst [vmem:[#allocation124_spill] sm:$0xff] %v16699_v60  ;;  %v11328_v30 = vrot.slane %v16699_v60, 9  ;;  %19437 = vst [vmem:[#allocation125_spill] sm:$0xff] %v16703_v36  ;;  %v4138_v34 = vrot.slane %v16703_v36, 5  ;;  %v4132_v9 = vsel %vm15726_vm8, %v4130_v27, %v4131_v23  ;;  %v16717_v58 = vld [vmem:[%s15286_s27 + $0x19c] sm:$0xf] }
 0x168   : > { %13433 = vmatmul.mubr.msk.bf16.gmra.mrb[68].mxu0 %vm2035_vm4, %v16689_v28  ;;  %19438 = vst [vmem:[#allocation126_spill] sm:$0xff] %v16717_v58  ;;  %v4141_v47 = vrot.slane %v16717_v58, 5  ;;  %v16727_v43 = vld [vmem:[%s15286_s27 + $0x1a8] sm:$0xf]  ;;  %v15121_v5 = vld [vmem:[%s15286_s27 + $0x30] sm:$0xf] }
 0x169   : > { %12849 = vmatmul.mubr.msk.bf16.gmra.mrb[4].mxu1 %vm2035_vm4, %v16687_v31  ;;  %13436 = vmatprep.mubr.msk.bf16.mxu0 %vm2035_vm4, %v16691_v20  ;;  %v4136_v51 = vsel %vm15726_vm8, %v11328_v30, %v4135_v50  ;;  %v4139_v33 = vsel %vm15726_vm8, %v4137_v55, %v4138_v34  ;;  %19439 = vst [vmem:[#allocation127_spill] sm:$0xff] %v16727_v43  ;;  %v4148_v27 = vrot.slane %v16727_v43, 5  ;;  %v15122_v23 = vld [vmem:[%s15286_s27 + $0x34] sm:$0xf]  ;;  %v4140_v28 = vrot.slane %v4138_v34, 4 }
 0x16a   : > { %12852 = vmatprep.mubr.msk.bf16.mxu1 %vm2035_vm4, %v16696_v40  ;;  %v16732_v32 = vcombine.low %v15121_v5, %v15122_v23  ;;  %v16734_v31 = vcombine.low %v4129_v26, %v4132_v9  ;;  %v16736_v20 = vcombine.low %v4136_v51, %v4139_v33  ;;  %v4143_v36 = vrot.slane %v4141_v47, 4  ;;  %v15123_v30 = vld [vmem:[%s15286_s27 + $0x1a0] sm:$0x1]  ;;  %v15124_v58 = vld [vmem:[%s15286_s27 + $0x3c] sm:$0xf] }
 0x16b   : > { %v4144_v50 = vrot.slane %v15123_v30, 5  ;;  %v15125_v55 = vld [vmem:[%s15286_s27 + $0x40] sm:$0xf]  ;;  %v16744_v43 = vld [vmem:[%s15286_s27 + $0x1a4] sm:$0xf]  ;;  %v4150_v5 = vrot.slane %v4148_v27, 4  ;;  %v4142_v9 = vsel %vm15726_vm8, %v4140_v28, %v4141_v47 }
 0x16c   : > { %19440 = vst [vmem:[#allocation128_spill] sm:$0xff] %v16732_v32  ;;  %19441 = vst [vmem:[#allocation129_spill] sm:$0xff] %v16734_v31  ;;  %v16741_v60 = vcombine.low %v15124_v58, %v15125_v55  ;;  %v11329_v8 = vrot.slane %v16744_v43, 9  ;;  %v16748_v26 = vld [vmem:[%s15286_s27 + $0x1ac] sm:$0xf] }
 0x16d   : > { %19442 = vst [vmem:[#allocation130_spill] sm:$0xff] %v16736_v20  ;;  %19444 = vst [vmem:[#allocation132_spill] sm:$0xff] %v16744_v43  ;;  %v4151_v34 = vrot.slane %v16748_v26, 5  ;;  %v4145_v58 = vsel %vm15726_vm8, %v4143_v36, %v4144_v50  ;;  %v16762_v51 = vld [vmem:[%s15286_s27 + $0x1b0] sm:$0xf] }
 0x16e   : > { %19443 = vst [vmem:[#allocation131_spill] sm:$0xff] %v16741_v60  ;;  %19445 = vst [vmem:[#allocation133_spill] sm:$0xff] %v16748_v26  ;;  %v4154_v33 = vrot.slane %v16762_v51, 5  ;;  %v4149_v23 = vsel %vm15726_vm8, %v11329_v8, %v4148_v27  ;;  %v16772_v47 = vld [vmem:[%s15286_s27 + $0x1bc] sm:$0xf] }
 0x16f   : > { %19446 = vst [vmem:[#allocation134_spill] sm:$0xff] %v16762_v51  ;;  %v4152_v28 = vsel %vm15726_vm8, %v4150_v5, %v4151_v34  ;;  %19447 = vst [vmem:[#allocation135_spill] sm:$0xff] %v16772_v47  ;;  %v4161_v36 = vrot.slane %v16772_v47, 5  ;;  %v15130_v30 = vld [vmem:[%s15286_s27 + $0x44] sm:$0xf]  ;;  %v4153_v26 = vrot.slane %v4151_v34, 4 }
 0x170   : > { %13437 = vmatmul.mubr.msk.bf16.gmra.mrb[72].mxu0 %vm2035_vm4, %v16734_v31  ;;  %v15131_v50 = vld [vmem:[%s15286_s27 + $0x48] sm:$0xf]  ;;  %v16781_v31 = vcombine.low %v4149_v23, %v4152_v28  ;;  %v4156_v51 = vrot.slane %v4154_v33, 4  ;;  %v15132_v8 = vld [vmem:[%s15286_s27 + $0x1b4] sm:$0x1] }
 0x171   : > { %12853 = vmatmul.mubr.msk.bf16.gmra.mrb[8].mxu1 %vm2035_vm4, %v16732_v32  ;;  %13440 = vmatprep.mubr.msk.bf16.mxu0 %vm2035_vm4, %v16736_v20  ;;  %v16777_v55 = vcombine.low %v15130_v30, %v15131_v50  ;;  %v16779_v20 = vcombine.low %v4142_v9, %v4145_v58  ;;  %v4157_v27 = vrot.slane %v15132_v8, 5  ;;  %v15133_v43 = vld [vmem:[%s15286_s27 + $0x50] sm:$0xf]  ;;  %v15134_v5 = vld [vmem:[%s15286_s27 + $0x54] sm:$0xf]  ;;  %v4163_v30 = vrot.slane %v4161_v36, 4 }
 0x172   : > { %12856 = vmatprep.mubr.msk.bf16.mxu1 %vm2035_vm4, %v16741_v60  ;;  %19450 = vst [vmem:[#allocation138_spill] sm:$0xff] %v16781_v31  ;;  %v16786_v60 = vcombine.low %v15133_v43, %v15134_v5  ;;  %v16789_v47 = vld [vmem:[%s15286_s27 + $0x1b8] sm:$0xf]  ;;  %v16793_v9 = vld [vmem:[%s15286_s27 + $0x1c0] sm:$0xf]  ;;  %v4155_v43 = vsel %vm15726_vm8, %v4153_v26, %v4154_v33 }
 0x173   : > { %19448 = vst [vmem:[#allocation136_spill] sm:$0xff] %v16777_v55  ;;  %19449 = vst [vmem:[#allocation137_spill] sm:$0xff] %v16779_v20  ;;  %v11330_v32 = vrot.slane %v16789_v47, 9  ;;  %v4164_v34 = vrot.slane %v16793_v9, 5  ;;  %v4158_v58 = vsel %vm15726_vm8, %v4156_v51, %v4157_v27  ;;  %v16807_v23 = vld [vmem:[%s15286_s27 + $0x1c4] sm:$0xf] }
 0x174   : > { %19451 = vst [vmem:[#allocation139_spill] sm:$0xff] %v16786_v60  ;;  %19452 = vst [vmem:[#allocation140_spill] sm:$0xff] %v16789_v47  ;;  %v4167_v28 = vrot.slane %v16807_v23, 5  ;;  %v16817_v33 = vld [vmem:[%s15286_s27 + $0x1d0] sm:$0xf] }
 0x175   : > { %19453 = vst [vmem:[#allocation141_spill] sm:$0xff] %v16793_v9  ;;  %19454 = vst [vmem:[#allocation142_spill] sm:$0xff] %v16807_v23  ;;  %v4162_v50 = vsel %vm15726_vm8, %v11330_v32, %v4161_v36  ;;  %v4165_v26 = vsel %vm15726_vm8, %v4163_v30, %v4164_v34  ;;  %v4174_v51 = vrot.slane %v16817_v33, 5  ;;  %v15139_v8 = vld [vmem:[%s15286_s27 + $0x58] sm:$0xf]  ;;  %v4166_v9 = vrot.slane %v4164_v34, 4 }
 0x176   : > { %19455 = vst [vmem:[#allocation143_spill] sm:$0xff] %v16817_v33  ;;  %v15140_v27 = vld [vmem:[%s15286_s27 + $0x5c] sm:$0xf]  ;;  %v4169_v23 = vrot.slane %v4167_v28, 4  ;;  %v15141_v32 = vld [vmem:[%s15286_s27 + $0x1c8] sm:$0x1] }
 0x177   : > { %v16822_v5 = vcombine.low %v15139_v8, %v15140_v27  ;;  %v4170_v36 = vrot.slane %v15141_v32, 5  ;;  %v15142_v47 = vld [vmem:[%s15286_s27 + $0x64] sm:$0xf]  ;;  %v15143_v30 = vld [vmem:[%s15286_s27 + $0x68] sm:$0xf]  ;;  %v4176_v8 = vrot.slane %v4174_v51, 4 }
 0x178   : > { %13441 = vmatmul.mubr.msk.bf16.gmra.mrb[76].mxu0 %vm2035_vm4, %v16779_v20  ;;  %v16826_v20 = vcombine.low %v4162_v50, %v4165_v26  ;;  %v16834_v33 = vld [vmem:[%s15286_s27 + $0x1cc] sm:$0xf]  ;;  %v16852_v50 = vld [vmem:[%s15286_s27 + $0x1d8] sm:$0xf] }
 0x179   : > { %12857 = vmatmul.mubr.msk.bf16.gmra.mrb[12].mxu1 %vm2035_vm4, %v16777_v55  ;;  %13444 = vmatprep.mubr.msk.bf16.mxu0 %vm2035_vm4, %v16781_v31  ;;  %19456 = vst [vmem:[#allocation144_spill] sm:$0xff] %v16822_v5  ;;  %v16824_v31 = vcombine.low %v4155_v43, %v4158_v58  ;;  %19460 = vst [vmem:[#allocation148_spill] sm:$0xff] %v16834_v33  ;;  %v11331_v55 = vrot.slane %v16834_v33, 9  ;;  %v16838_v43 = vld [vmem:[%s15286_s27 + $0x1d4] sm:$0xf]  ;;  %v4171_v58 = vsel %vm15726_vm8, %v4169_v23, %v4170_v36 }
 0x17a   : > { %12860 = vmatprep.mubr.msk.bf16.mxu1 %vm2035_vm4, %v16786_v60  ;;  %19458 = vst [vmem:[#allocation146_spill] sm:$0xff] %v16826_v20  ;;  %v16831_v60 = vcombine.low %v15142_v47, %v15143_v30  ;;  %19461 = vst [vmem:[#allocation149_spill] sm:$0xff] %v16838_v43  ;;  %v4177_v34 = vrot.slane %v16838_v43, 5  ;;  %v4168_v47 = vsel %vm15726_vm8, %v4166_v9, %v4167_v28  ;;  %v4180_v26 = vrot.slane %v16852_v50, 5  ;;  %v16862_v28 = vld [vmem:[%s15286_s27 + $0x1e4] sm:$0xf] }
 0x17b   : > { %19457 = vst [vmem:[#allocation145_spill] sm:$0xff] %v16824_v31  ;;  %19462 = vst [vmem:[#allocation150_spill] sm:$0xff] %v16852_v50  ;;  %v4175_v27 = vsel %vm15726_vm8, %v11331_v55, %v4174_v51  ;;  %v4187_v23 = vrot.slane %v16862_v28, 5  ;;  %v15148_v32 = vld [vmem:[%s15286_s27 + $0x6c] sm:$0xf] }
 0x17c   : > { %19459 = vst [vmem:[#allocation147_spill] sm:$0xff] %v16831_v60  ;;  %v4178_v9 = vsel %vm15726_vm8, %v4176_v8, %v4177_v34  ;;  %19463 = vst [vmem:[#allocation151_spill] sm:$0xff] %v16862_v28  ;;  %v15149_v36 = vld [vmem:[%s15286_s27 + $0x70] sm:$0xf]  ;;  %v4179_v43 = vrot.slane %v4177_v34, 4  ;;  %v4182_v50 = vrot.slane %v4180_v26, 4 }
 0x17d   : > { %v16867_v30 = vcombine.low %v15148_v32, %v15149_v36  ;;  %v15150_v55 = vld [vmem:[%s15286_s27 + $0x1dc] sm:$0x1]  ;;  %v15151_v33 = vld [vmem:[%s15286_s27 + $0x78] sm:$0xf]  ;;  %v16879_v28 = vld [vmem:[%s15286_s27 + $0x1e0] sm:$0xf] }
 0x17e   : > { %v4183_v51 = vrot.slane %v15150_v55, 5  ;;  %v15152_v8 = vld [vmem:[%s15286_s27 + $0x7c] sm:$0xf]  ;;  %19468 = vst [vmem:[#allocation156_spill] sm:$0xff] %v16879_v28  ;;  %v4189_v32 = vrot.slane %v4187_v23, 4 }
 0x17f   : > { %19464 = vst [vmem:[#allocation152_spill] sm:$0xff] %v16867_v30  ;;  %v15157_v55 = vld [vmem:[%s15286_s27 + $0x80] sm:$0xf] }
 0x180   : > { %13445 = vmatmul.mubr.msk.bf16.gmra.mrb[80].mxu0 %vm2035_vm4, %v16824_v31  ;;  %v16871_v31 = vcombine.low %v4175_v27, %v4178_v9  ;;  %v16897_v27 = vld [vmem:[%s15286_s27 + $0x1ec] sm:$0xf] }
 0x181   : > { %12861 = vmatmul.mubr.msk.bf16.gmra.mrb[16].mxu1 %vm2035_vm4, %v16822_v5  ;;  %13448 = vmatprep.mubr.msk.bf16.mxu0 %vm2035_vm4, %v16826_v20  ;;  %v16869_v20 = vcombine.low %v4168_v47, %v4171_v58  ;;  %v11332_v5 = vrot.slane %v16879_v28, 9  ;;  %v16883_v47 = vld [vmem:[%s15286_s27 + $0x1e8] sm:$0xf]  ;;  %v4184_v58 = vsel %vm15726_vm8, %v4182_v50, %v4183_v51  ;;  %19470 = vst [vmem:[#allocation158_spill] sm:$0xff] %v16897_v27  ;;  %v4193_v9 = vrot.slane %v16897_v27, 5 }
 0x182   : > { %12864 = vmatprep.mubr.msk.bf16.mxu1 %vm2035_vm4, %v16831_v60  ;;  %19466 = vst [vmem:[#allocation154_spill] sm:$0xff] %v16871_v31  ;;  %v16876_v60 = vcombine.low %v15151_v33, %v15152_v8  ;;  %19469 = vst [vmem:[#allocation157_spill] sm:$0xff] %v16883_v47  ;;  %v4190_v34 = vrot.slane %v16883_v47, 5  ;;  %v4181_v33 = vsel %vm15726_vm8, %v4179_v43, %v4180_v26  ;;  %v16907_v26 = vld [vmem:[%s15286_s27 + $0x1f8] sm:$0xf] }
 0x183   : > { %19465 = vst [vmem:[#allocation153_spill] sm:$0xff] %v16869_v20  ;;  %v4188_v36 = vsel %vm15726_vm8, %v11332_v5, %v4187_v23  ;;  %19471 = vst [vmem:[#allocation159_spill] sm:$0xff] %v16907_v26  ;;  %v4200_v50 = vrot.slane %v16907_v26, 5  ;;  %v15158_v51 = vld [vmem:[%s15286_s27 + $0x84] sm:$0xf]  ;;  %v4195_v27 = vrot.slane %v4193_v9, 4 }
 0x184   : > { %19467 = vst [vmem:[#allocation155_spill] sm:$0xff] %v16876_v60  ;;  %v4191_v43 = vsel %vm15726_vm8, %v4189_v32, %v4190_v34  ;;  %v16912_v8 = vcombine.low %v15157_v55, %v15158_v51  ;;  %v4192_v47 = vrot.slane %v4190_v34, 4  ;;  %v15159_v5 = vld [vmem:[%s15286_s27 + $0x1f0] sm:$0x1]  ;;  %v15160_v28 = vld [vmem:[%s15286_s27 + $0x8c] sm:$0xf] }
 0x185   : > { %v4196_v23 = vrot.slane %v15159_v5, 5  ;;  %v15161_v32 = vld [vmem:[%s15286_s27 + $0x90] sm:$0xf]  ;;  %v16924_v26 = vld [vmem:[%s15286_s27 + $0x1f4] sm:$0xf]  ;;  %v4202_v55 = vrot.slane %v4200_v50, 4 }
 0x186   : > { %19472 = vst [vmem:[#allocation160_spill] sm:$0xff] %v16912_v8  ;;  %19476 = vst [vmem:[#allocation164_spill] sm:$0xff] %v16924_v26  ;;  %v15166_v5 = vld [vmem:[%s15286_s27 + $0x94] sm:$0xf] }
 0x188   : > { %13449 = vmatmul.mubr.msk.bf16.gmra.mrb[84].mxu0 %vm2035_vm4, %v16869_v20  ;;  %v16916_v20 = vcombine.low %v4188_v36, %v4191_v43  ;;  %v16942_v36 = vld [vmem:[%s15286_s27 + $0x200] sm:$0xf] }
 0x189   : > { %12865 = vmatmul.mubr.msk.bf16.gmra.mrb[20].mxu1 %vm2035_vm4, %v16867_v30  ;;  %13452 = vmatprep.mubr.msk.bf16.mxu0 %vm2035_vm4, %v16871_v31  ;;  %v16914_v31 = vcombine.low %v4181_v33, %v4184_v58  ;;  %v11333_v30 = vrot.slane %v16924_v26, 9  ;;  %v16928_v33 = vld [vmem:[%s15286_s27 + $0x1fc] sm:$0xf]  ;;  %v4197_v58 = vsel %vm15726_vm8, %v4195_v27, %v4196_v23  ;;  %19478 = vst [vmem:[#allocation166_spill] sm:$0xff] %v16942_v36  ;;  %v4206_v43 = vrot.slane %v16942_v36, 5 }
 0x18a   : > { %12868 = vmatprep.mubr.msk.bf16.mxu1 %vm2035_vm4, %v16876_v60  ;;  %19474 = vst [vmem:[#allocation162_spill] sm:$0xff] %v16916_v20  ;;  %v16921_v60 = vcombine.low %v15160_v28, %v15161_v32  ;;  %19477 = vst [vmem:[#allocation165_spill] sm:$0xff] %v16928_v33  ;;  %v4203_v34 = vrot.slane %v16928_v33, 5  ;;  %v4194_v28 = vsel %vm15726_vm8, %v4192_v47, %v4193_v9  ;;  %v16952_v9 = vld [vmem:[%s15286_s27 + $0x20c] sm:$0xf] }
 0x18b   : > { %19473 = vst [vmem:[#allocation161_spill] sm:$0xff] %v16914_v31  ;;  %v4201_v51 = vsel %vm15726_vm8, %v11333_v30, %v4200_v50  ;;  %19479 = vst [vmem:[#allocation167_spill] sm:$0xff] %v16952_v9  ;;  %v4213_v27 = vrot.slane %v16952_v9, 5  ;;  %v15167_v23 = vld [vmem:[%s15286_s27 + $0x98] sm:$0xf]  ;;  %v4208_v36 = vrot.slane %v4206_v43, 4 }
 0x18c   : > { %19475 = vst [vmem:[#allocation163_spill] sm:$0xff] %v16921_v60  ;;  %v4204_v47 = vsel %vm15726_vm8, %v4202_v55, %v4203_v34  ;;  %v16957_v32 = vcombine.low %v15166_v5, %v15167_v23  ;;  %v4205_v33 = vrot.slane %v4203_v34, 4  ;;  %v15168_v30 = vld [vmem:[%s15286_s27 + $0x204] sm:$0x1]  ;;  %v15169_v26 = vld [vmem:[%s15286_s27 + $0xa0] sm:$0xf] }
 0x18d   : > { %v4209_v50 = vrot.slane %v15168_v30, 5  ;;  %v4215_v5 = vrot.slane %v4213_v27, 4  ;;  %v16973_v23 = vld [vmem:[%s15286_s27 + $0x210] sm:$0xf]  ;;  %v4219_v34 = vrot.slane %v16160_v37, 5 }
 0x18e   : > { %19480 = vst [vmem:[#allocation168_spill] sm:$0xff] %v16957_v32  ;;  %19485 = vst [vmem:[#allocation173_spill] sm:$0xff] %v16973_v23  ;;  %v15173_v30 = vld [vmem:[%s15286_s27 + $0xa8] sm:$0xf] }
 0x190   : > { %13453 = vmatmul.mubr.msk.bf16.gmra.mrb[88].mxu0 %vm2035_vm4, %v16914_v31  ;;  %v16961_v31 = vcombine.low %v4201_v51, %v4204_v47  ;;  %v4226_v47 = vrot.slane %v16186_v57, 5  ;;  %v11335_v57 = vrot.slane %v16179_v16, 9 }
 0x191   : > { %12869 = vmatmul.mubr.msk.bf16.gmra.mrb[24].mxu1 %vm2035_vm4, %v16912_v8  ;;  %13456 = vmatprep.mubr.msk.bf16.mxu0 %vm2035_vm4, %v16916_v20  ;;  %v16959_v20 = vcombine.low %v4194_v28, %v4197_v58  ;;  %v16969_v8 = vld [vmem:[%s15286_s27 + $0x208] sm:$0xf]  ;;  %v4216_v28 = vrot.slane %v16973_v23, 5 }
 0x192   : > { %12872 = vmatprep.mubr.msk.bf16.mxu1 %vm2035_vm4, %v16921_v60  ;;  %19482 = vst [vmem:[#allocation170_spill] sm:$0xff] %v16961_v31  ;;  %v15170_v60 = vld [vmem:[%s15286_s27 + $0xa4] sm:$0xf]  ;;  %19484 = vst [vmem:[#allocation172_spill] sm:$0xff] %v16969_v8  ;;  %v11334_v9 = vrot.slane %v16969_v8, 9 }
 0x193   : > { %19481 = vst [vmem:[#allocation169_spill] sm:$0xff] %v16959_v20  ;;  %v16966_v55 = vcombine.low %v15169_v26, %v15170_v60  ;;  %v4207_v60 = vsel %vm15726_vm8, %v4205_v33, %v4206_v43  ;;  %v4210_v26 = vsel %vm15726_vm8, %v4208_v36, %v4209_v50  ;;  %v4217_v51 = vsel %vm15726_vm8, %v4215_v5, %v4216_v28  ;;  %v15174_v33 = vld [vmem:[%s15286_s27 + $0xac] sm:$0xf]  ;;  %v15176_v8 = vld [vmem:[%s15286_s27 + $0xb4] sm:$0xf] }
 0x194   : > { %v4214_v58 = vsel %vm15726_vm8, %v11334_v9, %v4213_v27  ;;  %v16996_v43 = vcombine.low %v15173_v30, %v15174_v33  ;;  %v4218_v37 = vrot.slane %v4216_v28, 4  ;;  %v4221_v50 = vrot.slane %v4219_v34, 4  ;;  %v15177_v9 = vld [vmem:[%s15286_s27 + $0xb8] sm:$0xf] }
 0x195   : > { %19483 = vst [vmem:[#allocation171_spill] sm:$0xff] %v16966_v55  ;;  %v17000_v36 = vcombine.low %v4214_v58, %v4217_v51  ;;  %v17005_v27 = vcombine.low %v15176_v8, %v15177_v9  ;;  %v4228_v5 = vrot.slane %v4226_v47, 4  ;;  %v4229_v30 = vrot.slane %v16195_v0, 5  ;;  %v15179_v58 = vld [vmem:[%s15286_s27 + $0xc0] sm:$0xf] }
 0x196   : > { %19486 = vst [vmem:[#allocation174_spill] sm:$0xff] %v16996_v43  ;;  %v4232_v8 = vrot.slane %v16215_v48, 5  ;;  %v4227_v0 = vsel %vm15726_vm8, %v11335_v57, %v4226_v47  ;;  %v15181_v47 = vld [vmem:[%s15286_s27 + $0xcc] sm:$0xf] }
 0x197   : > { %19488 = vst [vmem:[#allocation176_spill] sm:$0xff] %v17000_v36  ;;  %19489 = vst [vmem:[#allocation177_spill] sm:$0xff] %v17005_v27  ;;  %v4230_v28 = vsel %vm15726_vm8, %v4228_v5, %v4229_v30  ;;  %v4231_v48 = vrot.slane %v4229_v30, 4  ;;  %v4242_v5 = vrot.slane %v16259_v62, 5  ;;  %v4245_v30 = vrot.slane %v16281_v2, 5 }
 0x198   : > { %13457 = vmatmul.mubr.msk.bf16.gmra.mrb[92].mxu0 %vm2035_vm4, %v16959_v20  ;;  %v15175_v20 = vld [vmem:[%s15286_s27 + $0x218] sm:$0x1]  ;;  %v4234_v33 = vrot.slane %v4232_v8, 4 }
 0x199   : > { %12873 = vmatmul.mubr.msk.bf16.gmra.mrb[28].mxu1 %vm2035_vm4, %v16957_v32  ;;  %13460 = vmatprep.mubr.msk.bf16.mxu0 %vm2035_vm4, %v16961_v31  ;;  %v16998_v31 = vcombine.low %v4207_v60, %v4210_v26  ;;  %v4222_v23 = vrot.slane %v15175_v20, 5  ;;  %v4220_v20 = vsel %vm15726_vm8, %v4218_v37, %v4219_v34  ;;  %v4239_v60 = vrot.slane %v16253_v12, 5  ;;  %v15178_v26 = vld [vmem:[%s15286_s27 + $0xbc] sm:$0xf] }
 0x19a   : > { %12876 = vmatprep.mubr.msk.bf16.mxu1 %vm2035_vm4, %v16966_v55  ;;  %v17029_v34 = vcombine.low %v15178_v26, %v15179_v58  ;;  %v4235_v37 = vrot.slane %v16222_v17, 5  ;;  %v11336_v12 = vrot.slane %v16240_v7, 9  ;;  %v4233_v17 = vsel %vm15726_vm8, %v4231_v48, %v4232_v8 }
 0x19b   : > { %19487 = vst [vmem:[#allocation175_spill] sm:$0xff] %v16998_v31  ;;  %v4223_v16 = vsel %vm15726_vm8, %v4221_v50, %v4222_v23  ;;  %v17033_v23 = vcombine.low %v4227_v0, %v4230_v28  ;;  %v15180_v50 = vld [vmem:[%s15286_s27 + $0xc8] sm:$0xf]  ;;  %v4241_v57 = vrot.slane %v4239_v60, 4  ;;  %v15182_v0 = vld [vmem:[%s15286_s27 + $0xd0] sm:$0xf] }
 0x19c   : > { %19490 = vst [vmem:[#allocation178_spill] sm:$0xff] %v17029_v34  ;;  %v17031_v51 = vcombine.low %v4220_v20, %v4223_v16  ;;  %v17038_v9 = vcombine.low %v15180_v50, %v15181_v47  ;;  %v4236_v7 = vsel %vm15726_vm8, %v4234_v33, %v4235_v37  ;;  %v4240_v62 = vsel %vm15726_vm8, %v11336_v12, %v4239_v60  ;;  %v15183_v28 = vld [vmem:[%s15286_s27 + $0xd4] sm:$0xf]  ;;  %v15184_v37 = vld [vmem:[%s15286_s27 + $0xdc] sm:$0xf] }
 0x19d   : > { %19492 = vst [vmem:[#allocation180_spill] sm:$0xff] %v17033_v23  ;;  %v4243_v20 = vsel %vm15726_vm8, %v4241_v57, %v4242_v5  ;;  %v4252_v16 = vrot.slane %v16320_v35, 5  ;;  %v17062_v8 = vcombine.low %v15182_v0, %v15183_v28  ;;  %v17064_v26 = vcombine.low %v4233_v17, %v4236_v7  ;;  %v15185_v60 = vld [vmem:[%s15286_s27 + $0xe0] sm:$0xf]  ;;  %v15186_v7 = vld [vmem:[%s15286_s27 + $0xe4] sm:$0xf] }
 0x19e   : > { %19491 = vst [vmem:[#allocation179_spill] sm:$0xff] %v17031_v51  ;;  %19493 = vst [vmem:[#allocation181_spill] sm:$0xff] %v17038_v9  ;;  %v17066_v58 = vcombine.low %v4240_v62, %v4243_v20  ;;  %v4244_v2 = vrot.slane %v4242_v5, 4  ;;  %v4247_v48 = vrot.slane %v4245_v30, 4  ;;  %v4248_v33 = vrot.slane %v16284_v49, 5 }
 0x19f   : > { %19494 = vst [vmem:[#allocation182_spill] sm:$0xff] %v17062_v8  ;;  %19495 = vst [vmem:[#allocation183_spill] sm:$0xff] %v17064_v26  ;;  %v17071_v50 = vcombine.low %v15184_v37, %v15185_v60  ;;  %v11337_v35 = vrot.slane %v16313_v61, 9  ;;  %v4254_v47 = vrot.slane %v4252_v16, 4  ;;  %v4255_v12 = vrot.slane %v16332_v46, 5 }
 0x1a0   : > { %13461 = vmatmul.mubr.msk.bf16.gmra.mrb[96].mxu0 %vm2035_vm4, %v16998_v31  ;;  %19496 = vst [vmem:[#allocation184_spill] sm:$0xff] %v17066_v58  ;;  %v4246_v49 = vsel %vm15726_vm8, %v4244_v2, %v4245_v30  ;;  %v4249_v61 = vsel %vm15726_vm8, %v4247_v48, %v4248_v33  ;;  %v4258_v57 = vrot.slane %v16352_v39, 5  ;;  %v4265_v17 = vrot.slane %v16399_v53, 5  ;;  %v15187_v62 = vld [vmem:[%s15286_s27 + $0xe8] sm:$0xf] }
 0x1a1   : > { %12877 = vmatmul.mubr.msk.bf16.gmra.mrb[32].mxu1 %vm2035_vm4, %v16996_v43  ;;  %13464 = vmatprep.mubr.msk.bf16.mxu0 %vm2035_vm4, %v17000_v36  ;;  %19497 = vst [vmem:[#allocation185_spill] sm:$0xff] %v17071_v50  ;;  %v4253_v46 = vsel %vm15726_vm8, %v11337_v35, %v4252_v16  ;;  %v4256_v5 = vsel %vm15726_vm8, %v4254_v47, %v4255_v12  ;;  %v4257_v39 = vrot.slane %v4255_v12, 4  ;;  %v4261_v2 = vrot.slane %v16359_v6, 5  ;;  %v15188_v48 = vld [vmem:[%s15286_s27 + $0xf0] sm:$0xf] }
 0x1a2   : > { %12880 = vmatprep.mubr.msk.bf16.mxu1 %vm2035_vm4, %v17005_v27  ;;  %v17095_v30 = vcombine.low %v15186_v7, %v15187_v62  ;;  %v17097_v20 = vcombine.low %v4246_v49, %v4249_v61  ;;  %v17099_v0 = vcombine.low %v4253_v46, %v4256_v5  ;;  %v4260_v28 = vrot.slane %v4258_v57, 4  ;;  %v15189_v16 = vld [vmem:[%s15286_s27 + $0xf4] sm:$0xf]  ;;  %v15190_v49 = vld [vmem:[%s15286_s27 + $0xf8] sm:$0xf] }
 0x1a3   : > { %v17104_v33 = vcombine.low %v15188_v48, %v15189_v16  ;;  %v11338_v37 = vrot.slane %v16386_v56, 9  ;;  %v4267_v53 = vrot.slane %v4265_v17, 4  ;;  %v4268_v60 = vrot.slane %v16405_v21, 5 }
 0x1a4   : > { %19498 = vst [vmem:[#allocation186_spill] sm:$0xff] %v17095_v30  ;;  %19499 = vst [vmem:[#allocation187_spill] sm:$0xff] %v17097_v20  ;;  %v4259_v6 = vsel %vm15726_vm8, %v4257_v39, %v4258_v57  ;;  %v4262_v35 = vsel %vm15726_vm8, %v4260_v28, %v4261_v2  ;;  %v4271_v56 = vrot.slane %v16427_v54, 5  ;;  %v4278_v12 = vrot.slane %v16466_v38, 5  ;;  %v17142_v28 = vld [vmem:[%s15286_s27 + $0x284] sm:$0xf] }
 0x1a5   : > { %19500 = vst [vmem:[#allocation188_spill] sm:$0xff] %v17099_v0  ;;  %19501 = vst [vmem:[#allocation189_spill] sm:$0xff] %v17104_v33  ;;  %v4266_v21 = vsel %vm15726_vm8, %v11338_v37, %v4265_v17  ;;  %v4269_v47 = vsel %vm15726_vm8, %v4267_v53, %v4268_v60  ;;  %v17128_v61 = vcombine.low %v15190_v49, %v16249_v44  ;;  %v4270_v54 = vrot.slane %v4268_v60, 4  ;;  %v17163_v37 = vld [vmem:[%s15286_s27 + $0x280] sm:$0xf] }
 0x1a6   : > { %v17130_v57 = vcombine.low %v4259_v6, %v4262_v35  ;;  %v17132_v46 = vcombine.low %v4266_v21, %v4269_v47  ;;  %v4273_v5 = vrot.slane %v4271_v56, 4  ;;  %v4274_v7 = vrot.slane %v16430_v3, 5  ;;  %v17166_v53 = vld [vmem:[%s15286_s27 + $0x288] sm:$0xf] }
 0x1a7   : > { %19502 = vst [vmem:[#allocation190_spill] sm:$0xff] %v17128_v61  ;;  %v17137_v17 = vcombine.low %v16289_v42, %v16295_v1  ;;  %v11339_v62 = vrot.slane %v16459_v11, 9  ;;  %v4280_v39 = vrot.slane %v4278_v12, 4  ;;  %v4281_v44 = vrot.slane %v16478_v29, 5 }
 0x1a8   : > { %13465 = vmatmul.mubr.msk.bf16.gmra.mrb[100].mxu0 %vm2035_vm4, %v17031_v51  ;;  %19503 = vst [vmem:[#allocation191_spill] sm:$0xff] %v17130_v57  ;;  %19504 = vst [vmem:[#allocation192_spill] sm:$0xff] %v17132_v46  ;;  %v4272_v3 = vsel %vm15726_vm8, %v4270_v54, %v4271_v56  ;;  %v4275_v42 = vsel %vm15726_vm8, %v4273_v5, %v4274_v7  ;;  %v4284_v1 = vrot.slane %v16498_v19, 5  ;;  %v6779_v16 = vrot.slane %v17142_v28, 5 }
 0x1a9   : > { %12881 = vmatmul.mubr.msk.bf16.gmra.mrb[36].mxu1 %vm2035_vm4, %v17029_v34  ;;  %13468 = vmatprep.mubr.msk.bf16.mxu0 %vm2035_vm4, %v17033_v23  ;;  %19505 = vst [vmem:[#allocation193_spill] sm:$0xff] %v17137_v17  ;;  %v4279_v2 = vsel %vm15726_vm8, %v11339_v62, %v4278_v12  ;;  %v4282_v48 = vsel %vm15726_vm8, %v4280_v39, %v4281_v44  ;;  %v4283_v56 = vrot.slane %v4281_v44, 4  ;;  %v4287_v47 = vrot.slane %v16505_v4, 5  ;;  %v17204_v62 = vld [vmem:[%s15286_s27 + $0x290] sm:$0x1] }
 0x1aa   : > { %12884 = vmatprep.mubr.msk.bf16.mxu1 %vm2035_vm4, %v17038_v9  ;;  %v17170_v60 = vcombine.low %v16299_v18, %v16327_v10  ;;  %v17172_v6 = vcombine.low %v4272_v3, %v4275_v42  ;;  %v17174_v35 = vcombine.low %v4279_v2, %v4282_v48  ;;  %v4286_v21 = vrot.slane %v4284_v1, 4  ;;  %v17184_v18 = vld [vmem:[%s15286_s27 + $0x28c] sm:$0xf]  ;;  %19510 = vst [vmem:[#allocation198_spill] sm:$0xff] %v17204_v62 }
 0x1ab   : > { %v17179_v12 = vcombine.low %v16362_v24, %v16366_v41  ;;  %v11600_v49 = vrot.slane %v17163_v37, 9  ;;  %v6781_v54 = vrot.slane %v6779_v16, 4  ;;  %v6782_v5 = vrot.slane %v17166_v53, 5 }
 0x1ac   : > { %19506 = vst [vmem:[#allocation194_spill] sm:$0xff] %v17170_v60  ;;  %19507 = vst [vmem:[#allocation195_spill] sm:$0xff] %v17172_v6  ;;  %v4285_v24 = vsel %vm15726_vm8, %v4283_v56, %v4284_v1  ;;  %v4288_v10 = vsel %vm15726_vm8, %v4286_v21, %v4287_v47  ;;  %v6785_v41 = vrot.slane %v17184_v18, 5  ;;  %v17208_v39 = vcombine.low %v16370_v25, %v16395_v52  ;;  %v19521_v21 = vld [vmem:[#allocation109_spill] sm:$0xff] }
 0x1ad   : > { %19508 = vst [vmem:[#allocation196_spill] sm:$0xff] %v17174_v35  ;;  %19509 = vst [vmem:[#allocation197_spill] sm:$0xff] %v17179_v12  ;;  %v6780_v4 = vsel %vm15726_vm8, %v11600_v49, %v6779_v16  ;;  %v6783_v7 = vsel %vm15726_vm8, %v6781_v54, %v6782_v5  ;;  %v17210_v44 = vcombine.low %v4285_v24, %v4288_v10  ;;  %v6784_v42 = vrot.slane %v6782_v5, 4  ;;  %v19517_v16 = vld [vmem:[#allocation93_spill] sm:$0xff]  ;;  %v19522_v49 = vld [vmem:[#allocation100_spill] sm:$0xff] }
 0x1ae   : > { %19511 = vst [vmem:[#allocation199_spill] sm:$0xff] %v17208_v39  ;;  %v17212_v3 = vcombine.low %v6780_v4, %v6783_v7  ;;  %v6787_v1 = vrot.slane %v6785_v41, 4  ;;  %v6788_v2 = vrot.slane %v17204_v62, 5  ;;  %v17217_v48 = vcombine.low %v16435_v13, %v16441_v22  ;;  %v19523_v54 = vld [vmem:[#allocation97_spill] sm:$0xff]  ;;  %v19525_v24 = vld [vmem:[#allocation128_spill] sm:$0xff]  ;;  %v19526_v10 = vld [vmem:[#allocation131_spill] sm:$0xff] }
 0x1af   : > { %19512 = vst [vmem:[#allocation200_spill] sm:$0xff] %v17210_v44  ;;  %v6786_v25 = vsel %vm15726_vm8, %v6784_v42, %v6785_v41  ;;  %v17235_v22 = vcombine.low %v16445_v14, %v16473_v63  ;;  %v17239_v56 = vcombine.low %v19517_v16, %v16512_v15  ;;  %v17252_v14 = vld [vmem:[%s18989_s1 + $0xc] sm:$0xf]  ;;  %v19519_v63 = vld [vmem:[#allocation94_spill] sm:$0xff]  ;;  %v8229_v47 = vsel %vm2228_vm1, %v19521_v21, 0  ;;  %v19528_v41 = vld [vmem:[#allocation101_spill] sm:$0xff] }
 0x1b0   : > { %13469 = vmatmul.mubr.msk.bf16.gmra.mrb[104].mxu0 %vm2035_vm4, %v17064_v26  ;;  %19513 = vst [vmem:[#allocation201_spill] sm:$0xff] %v17212_v3  ;;  %19514 = vst [vmem:[#allocation202_spill] sm:$0xff] %v17217_v48  ;;  %v6789_v52 = vsel %vm15726_vm8, %v6787_v1, %v6788_v2  ;;  %14911 = vmatprep.subr.msk.bf16.mxu1 %vm2228_vm1, %v17252_v14  ;;  %v17258_v15 = vcombine.low %v19519_v63, %v16538_v45  ;;  %v19527_v45 = vld [vmem:[#allocation102_spill] sm:$0xff]  ;;  %v19530_v42 = vld [vmem:[#allocation105_spill] sm:$0xff] }
 0x1b1   : > { %12885 = vmatmul.mubr.msk.bf16.gmra.mrb[40].mxu1 %vm2035_vm4, %v17062_v8  ;;  %13472 = vmatprep.mubr.msk.bf16.mxu0 %vm2035_vm4, %v17066_v58  ;;  %v17231_v13 = vcombine.low %v6786_v25, %v6789_v52  ;;  %19516 = vst [vmem:[#allocation204_spill] sm:$0xff] %v17235_v22  ;;  %19518 = vst [vmem:[#allocation93_spill] sm:$0xff] %v17239_v56  ;;  %v17264_v5 = vcombine.low %v19523_v54, %v19522_v49  ;;  %v19529_v7 = vld [vmem:[#allocation106_spill] sm:$0xff]  ;;  %v19531_v2 = vld [vmem:[#allocation136_spill] sm:$0xff] }
 0x1b2   : > { %12888 = vmatprep.mubr.msk.bf16.mxu1 %vm2035_vm4, %v17071_v50  ;;  %19520 = vst [vmem:[#allocation94_spill] sm:$0xff] %v17258_v15  ;;  %v17276_v4 = vcombine.low %v19528_v41, %v19527_v45  ;;  %v17280_v1 = vcombine.low %v19530_v42, %v19529_v7  ;;  %v19532_v25 = vld [vmem:[#allocation139_spill] sm:$0xff]  ;;  %v19533_v52 = vld [vmem:[#allocation110_spill] sm:$0xff]  ;;  %v19537_v54 = vld [vmem:[#allocation144_spill] sm:$0xff] }
 0x1b3   : > { %19515 = vst [vmem:[#allocation203_spill] sm:$0xff] %v17231_v13  ;;  %19524 = vst [vmem:[#allocation109_spill] sm:$0xff] %v17264_v5  ;;  %v19534_v16 = vld [vmem:[#allocation107_spill] sm:$0xff]  ;;  %v19535_v21 = vld [vmem:[#allocation114_spill] sm:$0xff] }
 0x1b4   : > { %v17292_v63 = vcombine.low %v19534_v16, %v19533_v52  ;;  %v19538_v45 = vld [vmem:[#allocation147_spill] sm:$0xff]  ;;  %v19540_v7 = vld [vmem:[#allocation118_spill] sm:$0xff]  ;;  %v19541_v52 = vld [vmem:[#allocation120_spill] sm:$0xff] }
 0x1b5   : > { %v19539_v41 = vld [vmem:[#allocation119_spill] sm:$0xff]  ;;  %v19542_v16 = vld [vmem:[#allocation124_spill] sm:$0xff]  ;;  %v19546_v62 = vld [vmem:[#allocation125_spill] sm:$0xff] }
 0x1b6   : > { %v17308_v42 = vcombine.low %v19540_v7, %v19539_v41  ;;  %v19547_v7 = vld [vmem:[#allocation127_spill] sm:$0xff] }
 0x1b8   : > { %13473 = vmatmul.mubr.msk.bf16.gmra.mrb[108].mxu0 %vm2035_vm4, %v17097_v20 }
 0x1b9   : > { %12889 = vmatmul.mubr.msk.bf16.gmra.mrb[44].mxu1 %vm2035_vm4, %v17095_v30  ;;  %13476 = vmatprep.mubr.msk.bf16.mxu0 %vm2035_vm4, %v17099_v0 }
 0x1ba   : > { %12892 = vmatprep.mubr.msk.bf16.mxu1 %vm2035_vm4, %v17104_v33 }
 0x1c0   : > { %13477 = vmatmul.mubr.msk.bf16.gmra.mrb[112].mxu0 %vm2035_vm4, %v17130_v57 }
 0x1c1   : > { %12893 = vmatmul.mubr.msk.bf16.gmra.mrb[48].mxu1 %vm2035_vm4, %v17128_v61  ;;  %13480 = vmatprep.mubr.msk.bf16.mxu0 %vm2035_vm4, %v17132_v46 }
 0x1c2   : > { %12896 = vmatprep.mubr.msk.bf16.mxu1 %vm2035_vm4, %v17137_v17 }
 0x1c8   : > { %13481 = vmatmul.mubr.msk.bf16.gmra.mrb[116].mxu0 %vm2035_vm4, %v17172_v6 }
 0x1c9   : > { %12897 = vmatmul.mubr.msk.bf16.gmra.mrb[52].mxu1 %vm2035_vm4, %v17170_v60  ;;  %13484 = vmatprep.mubr.msk.bf16.mxu0 %vm2035_vm4, %v17174_v35 }
 0x1ca   : > { %12900 = vmatprep.mubr.msk.bf16.mxu1 %vm2035_vm4, %v17179_v12 }
 0x1d0   : > { %13485 = vmatmul.mubr.msk.bf16.gmra.mrb[120].mxu0 %vm2035_vm4, %v17210_v44 }
 0x1d1   : > { %12901 = vmatmul.mubr.msk.bf16.gmra.mrb[56].mxu1 %vm2035_vm4, %v17208_v39  ;;  %13488 = vmatprep.mubr.msk.bf16.mxu0 %vm2035_vm4, %v17212_v3  ;;  %v19545_v3 = vld [vmem:[#allocation126_spill] sm:$0xff] }
 0x1d2   : > { %12904 = vmatprep.mubr.msk.bf16.mxu1 %vm2035_vm4, %v17217_v48  ;;  %v17324_v41 = vcombine.low %v19546_v62, %v19545_v3  ;;  %v19553_v3 = vld [vmem:[#allocation135_spill] sm:$0xff] }
 0x1d8   : > { %13489 = vmatmul.mubr.msk.bf16.gmra.mrb[124].mxu0 %vm2035_vm4, %v17231_v13  ;;  %v19544_v13 = vld [vmem:[#allocation155_spill] sm:$0xff] }
 0x1d9   : > { %12905 = vmatmul.mubr.msk.bf16.gmra.mrb[60].mxu1 %vm2035_vm4, %v17235_v22  ;;  %13494 = vmatprep.mubr.msk.bf16.mxu0 %vm2035_vm4, %v16696_v40 }
 0x1da   : > { %12908 = vmatprep.mubr.msk.bf16.mxu1 %vm2035_vm4, %v17239_v56 }
 0x1e0   : > { %13495 = vmatmul.mubr.msk.bf16.vlgmr.msra.gmra.mrb[0].mxu0 %vm2035_vm4, %v19525_v24 }
 0x1e1   : > { %12909 = vmatmul.mubr.msk.bf16.gmra.mrb[64].mxu1 %vm2035_vm4, %v17258_v15  ;;  %13623 = vmatpush3.bf16.msra.mxu0 %v8229_v47  ;;  %v19536_v47 = vld [vmem:[#allocation117_spill] sm:$0xff] }
 0x1e2   : > { %12912 = vmatprep.mubr.msk.bf16.mxu1 %vm2035_vm4, %v17264_v5  ;;  %13498 = vmatprep.mubr.msk.bf16.mxu0 %vm2035_vm4, %v19526_v10  ;;  %v17296_v49 = vcombine.low %v19536_v47, %v19535_v21  ;;  %v17312_v21 = vcombine.low %v19542_v16, %v19541_v52  ;;  %v19543_v47 = vld [vmem:[#allocation152_spill] sm:$0xff]  ;;  %v19586_v10 = vld [vmem:[#allocation111_spill] sm:$0xff] }
 0x1e3   : > { %v19549_v16 = vld [vmem:[#allocation160_spill] sm:$0xff]  ;;  %v3878_v24 = vrot.slane %v19586_v10, 5 }
 0x1e8   : > { %13499 = vmatmul.mubr.msk.bf16.gmra.mrb[4].mxu0 %vm2035_vm4, %v19531_v2 }
 0x1e9   : > { %12913 = vmatmul.mubr.msk.bf16.gmra.mrb[68].mxu1 %vm2035_vm4, %v17276_v4  ;;  %13502 = vmatprep.mubr.msk.bf16.mxu0 %vm2035_vm4, %v19532_v25  ;;  %v19554_v25 = vld [vmem:[#allocation140_spill] sm:$0xff] }
 0x1ea   : > { %12916 = vmatprep.mubr.msk.bf16.mxu1 %vm2035_vm4, %v17280_v1 }
 0x1f0   : > { %13503 = vmatmul.mubr.msk.bf16.gmra.mrb[8].mxu0 %vm2035_vm4, %v19537_v54  ;;  %v19552_v54 = vld [vmem:[#allocation133_spill] sm:$0xff] }
 0x1f1   : > { %12917 = vmatmul.mubr.msk.bf16.gmra.mrb[72].mxu1 %vm2035_vm4, %v17292_v63  ;;  %13506 = vmatprep.mubr.msk.bf16.mxu0 %vm2035_vm4, %v19538_v45  ;;  %v19548_v45 = vld [vmem:[#allocation132_spill] sm:$0xff] }
 0x1f2   : > { %12920 = vmatprep.mubr.msk.bf16.mxu1 %vm2035_vm4, %v17296_v49  ;;  %v17328_v52 = vcombine.low %v19548_v45, %v19547_v7  ;;  %v17344_v45 = vcombine.low %v19554_v25, %v19553_v3  ;;  %v19555_v7 = vld [vmem:[#allocation142_spill] sm:$0xff] }
 0x1f3   : > { %v19559_v3 = vld [vmem:[#allocation150_spill] sm:$0xff] }
 0x1f8   : > { %13507 = vmatmul.mubr.msk.bf16.gmra.mrb[12].mxu0 %vm2035_vm4, %v19543_v47  ;;  %v19550_v47 = vld [vmem:[#allocation163_spill] sm:$0xff] }
 0x1f9   : > { %12921 = vmatmul.mubr.msk.bf16.gmra.mrb[76].mxu1 %vm2035_vm4, %v17308_v42  ;;  %13510 = vmatprep.mubr.msk.bf16.mxu0 %vm2035_vm4, %v19544_v13  ;;  %v19551_v13 = vld [vmem:[#allocation134_spill] sm:$0xff] }
 0x1fa   : > { %12924 = vmatprep.mubr.msk.bf16.mxu1 %vm2035_vm4, %v17312_v21  ;;  %v17340_v62 = vcombine.low %v19552_v54, %v19551_v13  ;;  %v19557_v54 = vld [vmem:[#allocation143_spill] sm:$0xff] }
 0x200   : > { %13511 = vmatmul.mubr.msk.bf16.gmra.mrb[16].mxu0 %vm2035_vm4, %v19549_v16  ;;  %v19558_v16 = vld [vmem:[#allocation148_spill] sm:$0xff] }
 0x201   : > { %12925 = vmatmul.mubr.msk.bf16.gmra.mrb[80].mxu1 %vm2035_vm4, %v17324_v41  ;;  %13514 = vmatprep.mubr.msk.bf16.mxu0 %vm2035_vm4, %v19550_v47  ;;  %v19556_v47 = vld [vmem:[#allocation141_spill] sm:$0xff]  ;;  %v17360_v25 = vcombine.low %v19558_v16, %v19557_v54 }
 0x202   : > { %12928 = vmatprep.mubr.msk.bf16.mxu1 %vm2035_vm4, %v17328_v52  ;;  %v17356_v13 = vcombine.low %v19556_v47, %v19555_v7  ;;  %v19561_v7 = vld [vmem:[#allocation151_spill] sm:$0xff]  ;;  %v19564_v54 = vld [vmem:[#allocation157_spill] sm:$0xff] }
 0x208   : > { %13515 = vmatmul.mubr.msk.bf16.gmra.mrb[20].mxu0 %vm2035_vm4, %v16957_v32  ;;  %v19562_v32 = vld [vmem:[#allocation156_spill] sm:$0xff] }
 0x209   : > { %12929 = vmatmul.mubr.msk.bf16.gmra.mrb[84].mxu1 %vm2035_vm4, %v17340_v62  ;;  %13518 = vmatprep.mubr.msk.bf16.mxu0 %vm2035_vm4, %v16966_v55  ;;  %v19560_v55 = vld [vmem:[#allocation149_spill] sm:$0xff]  ;;  %v17376_v16 = vcombine.low %v19562_v32, %v19561_v7  ;;  %v19565_v32 = vld [vmem:[#allocation159_spill] sm:$0xff]  ;;  %v19566_v7 = vld [vmem:[#allocation164_spill] sm:$0xff] }
 0x20a   : > { %12932 = vmatprep.mubr.msk.bf16.mxu1 %vm2035_vm4, %v17344_v45  ;;  %v17372_v47 = vcombine.low %v19560_v55, %v19559_v3  ;;  %v19563_v55 = vld [vmem:[#allocation158_spill] sm:$0xff] }
 0x20b   : > { %v17388_v3 = vcombine.low %v19564_v54, %v19563_v55  ;;  %v19570_v54 = vld [vmem:[#allocation167_spill] sm:$0xff] }
 0x210   : > { %13519 = vmatmul.mubr.msk.bf16.gmra.mrb[24].mxu0 %vm2035_vm4, %v16996_v43 }
 0x211   : > { %12933 = vmatmul.mubr.msk.bf16.gmra.mrb[88].mxu1 %vm2035_vm4, %v17356_v13  ;;  %13522 = vmatprep.mubr.msk.bf16.mxu0 %vm2035_vm4, %v17005_v27  ;;  %v17392_v27 = vcombine.low %v19566_v7, %v19565_v32  ;;  %v19571_v32 = vld [vmem:[#allocation172_spill] sm:$0xff] }
 0x212   : > { %12936 = vmatprep.mubr.msk.bf16.mxu1 %vm2035_vm4, %v17360_v25  ;;  %v17408_v7 = vcombine.low %v19571_v32, %v19570_v54  ;;  %v15192_v54 = vld [vmem:[%s15286_s27 + $0x21c] sm:$0xf]  ;;  %v15193_v32 = vld [vmem:[%s15286_s27 + $0x220] sm:$0xf] }
 0x214   : > { %19572 = vst [vmem:[#allocation97_spill] sm:$0xff] %v17408_v7 }
 0x218   : > { %13523 = vmatmul.mubr.msk.bf16.gmra.mrb[28].mxu0 %vm2035_vm4, %v17029_v34  ;;  %v19568_v34 = vld [vmem:[#allocation165_spill] sm:$0xff] }
 0x219   : > { %12937 = vmatmul.mubr.msk.bf16.gmra.mrb[92].mxu1 %vm2035_vm4, %v17372_v47  ;;  %13526 = vmatprep.mubr.msk.bf16.mxu0 %vm2035_vm4, %v17038_v9  ;;  %v19567_v9 = vld [vmem:[#allocation166_spill] sm:$0xff] }
 0x21a   : > { %12940 = vmatprep.mubr.msk.bf16.mxu1 %vm2035_vm4, %v17376_v16  ;;  %v17404_v55 = vcombine.low %v19568_v34, %v19567_v9  ;;  %v15191_v34 = vld [vmem:[%s15286_s27 + $0x214] sm:$0xf]  ;;  %v19573_v9 = vld [vmem:[#allocation173_spill] sm:$0xff] }
 0x21c   : > { %19569 = vst [vmem:[#allocation100_spill] sm:$0xff] %v17404_v55 }
 0x220   : > { %13527 = vmatmul.mubr.msk.bf16.gmra.mrb[32].mxu0 %vm2035_vm4, %v17062_v8  ;;  %v17424_v8 = vcombine.low %v15192_v54, %v15193_v32  ;;  %v15196_v54 = vld [vmem:[%s15286_s27 + $0x230] sm:$0xf]  ;;  %v15197_v32 = vld [vmem:[%s15286_s27 + $0x234] sm:$0xf] }
 0x221   : > { %12941 = vmatmul.mubr.msk.bf16.gmra.mrb[96].mxu1 %vm2035_vm4, %v17388_v3  ;;  %13530 = vmatprep.mubr.msk.bf16.mxu0 %vm2035_vm4, %v17071_v50  ;;  %v17420_v50 = vcombine.low %v19573_v9, %v15191_v34  ;;  %v15194_v34 = vld [vmem:[%s15286_s27 + $0x224] sm:$0xf]  ;;  %v15195_v9 = vld [vmem:[%s15286_s27 + $0x228] sm:$0xf] }
 0x222   : > { %12944 = vmatprep.mubr.msk.bf16.mxu1 %vm2035_vm4, %v17392_v27  ;;  %19575 = vst [vmem:[#allocation101_spill] sm:$0xff] %v17424_v8 }
 0x223   : > { %19574 = vst [vmem:[#allocation102_spill] sm:$0xff] %v17420_v50 }
 0x228   : > { %13531 = vmatmul.mubr.msk.bf16.gmra.mrb[36].mxu0 %vm2035_vm4, %v17095_v30  ;;  %v17440_v30 = vcombine.low %v15196_v54, %v15197_v32  ;;  %v15200_v54 = vld [vmem:[%s15286_s27 + $0x244] sm:$0xf]  ;;  %v15201_v32 = vld [vmem:[%s15286_s27 + $0x248] sm:$0xf] }
 0x229   : > { %12945 = vmatmul.mubr.msk.bf16.gmra.mrb[100].mxu1 %vm2035_vm4, %v17404_v55  ;;  %13534 = vmatprep.mubr.msk.bf16.mxu0 %vm2035_vm4, %v17104_v33  ;;  %v17436_v33 = vcombine.low %v15194_v34, %v15195_v9  ;;  %v15198_v34 = vld [vmem:[%s15286_s27 + $0x238] sm:$0xf]  ;;  %v15199_v9 = vld [vmem:[%s15286_s27 + $0x23c] sm:$0xf] }
 0x22a   : > { %12948 = vmatprep.mubr.msk.bf16.mxu1 %vm2035_vm4, %v17408_v7  ;;  %19577 = vst [vmem:[#allocation105_spill] sm:$0xff] %v17440_v30 }
 0x22b   : > { %19576 = vst [vmem:[#allocation106_spill] sm:$0xff] %v17436_v33 }
 0x230   : > { %13535 = vmatmul.mubr.msk.bf16.gmra.mrb[40].mxu0 %vm2035_vm4, %v17128_v61  ;;  %v17456_v61 = vcombine.low %v15200_v54, %v15201_v32  ;;  %v15204_v54 = vld [vmem:[%s15286_s27 + $0x258] sm:$0xf]  ;;  %v15205_v32 = vld [vmem:[%s15286_s27 + $0x25c] sm:$0xf] }
 0x231   : > { %12949 = vmatmul.mubr.msk.bf16.gmra.mrb[104].mxu1 %vm2035_vm4, %v17420_v50  ;;  %13538 = vmatprep.mubr.msk.bf16.mxu0 %vm2035_vm4, %v17137_v17  ;;  %v17452_v17 = vcombine.low %v15198_v34, %v15199_v9  ;;  %v15202_v34 = vld [vmem:[%s15286_s27 + $0x24c] sm:$0xf]  ;;  %v15203_v9 = vld [vmem:[%s15286_s27 + $0x250] sm:$0xf] }
 0x232   : > { %12952 = vmatprep.mubr.msk.bf16.mxu1 %vm2035_vm4, %v17424_v8  ;;  %19579 = vst [vmem:[#allocation107_spill] sm:$0xff] %v17456_v61 }
 0x233   : > { %19578 = vst [vmem:[#allocation110_spill] sm:$0xff] %v17452_v17 }
 0x238   : > { %13539 = vmatmul.mubr.msk.bf16.gmra.mrb[44].mxu0 %vm2035_vm4, %v17170_v60  ;;  %v17472_v60 = vcombine.low %v15204_v54, %v15205_v32  ;;  %v17489_v54 = vcombine.low %v16459_v11, %v16466_v38  ;;  %v19585_v32 = vld [vmem:[#allocation98_spill] sm:$0xff] }
 0x239   : > { %12953 = vmatmul.mubr.msk.bf16.gmra.mrb[108].mxu1 %vm2035_vm4, %v17436_v33  ;;  %13542 = vmatprep.mubr.msk.bf16.mxu0 %vm2035_vm4, %v17179_v12  ;;  %v17468_v12 = vcombine.low %v15202_v34, %v15203_v9  ;;  %v15206_v34 = vld [vmem:[%s15286_s27 + $0x260] sm:$0xf]  ;;  %v15207_v9 = vld [vmem:[%s15286_s27 + $0x264] sm:$0xf] }
 0x23a   : > { %12956 = vmatprep.mubr.msk.bf16.mxu1 %vm2035_vm4, %v17440_v30  ;;  %19581 = vst [vmem:[#allocation117_spill] sm:$0xff] %v17472_v60  ;;  %v17485_v43 = vcombine.low %v15206_v34, %v15207_v9  ;;  %19584 = vst [vmem:[#allocation118_spill] sm:$0xff] %v17489_v54  ;;  %v17508_v34 = vcombine.low %v16478_v29, %v16498_v19  ;;  %v15208_v9 = vld [vmem:[%s15286_s27 + $0x10] sm:$0x1] }
 0x23b   : > { %19580 = vst [vmem:[#allocation114_spill] sm:$0xff] %v17468_v12 }
 0x23c   : > { %19583 = vst [vmem:[#allocation119_spill] sm:$0xff] %v17485_v43  ;;  %19588 = vst [vmem:[#allocation120_spill] sm:$0xff] %v17508_v34 }
 0x240   : > { %13543 = vmatmul.mubr.msk.bf16.gmra.mrb[48].mxu0 %vm2035_vm4, %v17208_v39 }
 0x241   : > { %12957 = vmatmul.mubr.msk.bf16.gmra.mrb[112].mxu1 %vm2035_vm4, %v17452_v17  ;;  %13546 = vmatprep.mubr.msk.bf16.mxu0 %vm2035_vm4, %v17217_v48  ;;  %v19582_v48 = vld [vmem:[#allocation99_spill] sm:$0xff] }
 0x242   : > { %12960 = vmatprep.mubr.msk.bf16.mxu1 %vm2035_vm4, %v17456_v61  ;;  %v3875_v39 = vrot.slane %v19582_v48, 5  ;;  %v19587_v48 = vld [vmem:[#allocation112_spill] sm:$0xff] }
 0x243   : > { %v3881_v11 = vrot.slane %v19587_v48, 5  ;;  %v19593_v48 = vld [vmem:[#allocation41_spill] sm:$0xff] }
 0x244   : > { %v3877_v2 = vrot.slane %v3875_v39, 4 }
 0x246   : > { %v3879_v10 = vsel %vm15726_vm8, %v3877_v2, %v3878_v24  ;;  %v19592_v2 = vld [vmem:[#allocation39_spill] sm:$0xff] }
 0x248   : > { %13547 = vmatmul.mubr.msk.bf16.gmra.mrb[52].mxu0 %vm2035_vm4, %v17235_v22  ;;  %v11308_v22 = vrot.slane %v19585_v32, 9  ;;  %v3884_v32 = vrot.slane %v15208_v9, 5  ;;  %v19597_v9 = vld [vmem:[#allocation50_spill] sm:$0xff] }
 0x249   : > { %12961 = vmatmul.mubr.msk.bf16.gmra.mrb[116].mxu1 %vm2035_vm4, %v17468_v12  ;;  %13550 = vmatprep.mubr.msk.bf16.mxu0 %vm2035_vm4, %v17239_v56 }
 0x24a   : > { %12964 = vmatprep.mubr.msk.bf16.mxu1 %vm2035_vm4, %v17472_v60  ;;  %v3876_v38 = vsel %vm15726_vm8, %v11308_v22, %v3875_v39  ;;  %v17525_v39 = vld [vmem:[%s18989_s1 + $0x20] sm:$0xf] }
 0x24b   : > { %v11340_v56 = vcombine.low %v3876_v38, %v3879_v10  ;;  %14917 = vmatprep.subr.msk.bf16.mxu0 %vm2228_vm1, %v17525_v39  ;;  %v19595_v38 = vld [vmem:[#allocation45_spill] sm:$0xff]  ;;  %v19596_v10 = vld [vmem:[#allocation47_spill] sm:$0xff] }
 0x250   : > { %13551 = vmatmul.mubr.msk.bf16.gmra.mrb[56].mxu0 %vm2035_vm4, %v17258_v15  ;;  %v3880_v15 = vrot.slane %v3878_v24, 4  ;;  %v5367_v24 = vsel %vm2228_vm1, %v17252_v14, 0  ;;  %v19590_v14 = vld [vmem:[#allocation36_spill] sm:$0xff] }
 0x251   : > { %12965 = vmatmul.mubr.msk.bf16.gmra.mrb[120].mxu1 %vm2035_vm4, %v17485_v43  ;;  %13554 = vmatprep.mubr.msk.bf16.mxu0 %vm2035_vm4, %v17264_v5  ;;  %v3883_v5 = vrot.slane %v3881_v11, 4 }
 0x252   : > { %12968 = vmatprep.mubr.msk.bf16.mxu1 %vm2035_vm4, %v17489_v54  ;;  %v3882_v19 = vsel %vm15726_vm8, %v3880_v15, %v3881_v11  ;;  %v15209_v15 = vld [vmem:[%s18989_s1 + $0x10] sm:$0xf]  ;;  %v19594_v11 = vld [vmem:[#allocation43_spill] sm:$0xff] }
 0x253   : > { %v3885_v29 = vsel %vm15726_vm8, %v3883_v5, %v3884_v32  ;;  %v19591_v5 = vld [vmem:[#allocation37_spill] sm:$0xff]  ;;  %v19598_v32 = vld [vmem:[#allocation52_spill] sm:$0xff] }
 0x254   : > { %v11341_v22 = vcombine.low %v3882_v19, %v3885_v29  ;;  %v19599_v19 = vld [vmem:[#allocation53_spill] sm:$0xff]  ;;  %v19600_v29 = vld [vmem:[#allocation55_spill] sm:$0xff] }
 0x258   : > { %13555 = vmatmul.mubr.msk.bf16.gmra.mrb[60].mxu0 %vm2035_vm4, %v17276_v4 }
 0x259   : > { %12969 = vmatmul.mubr.msk.bf16.gmra.mrb[124].mxu1 %vm2035_vm4, %v17508_v34  ;;  %13558 = vmatprep.mubr.msk.bf16.mxu0 %vm2035_vm4, %v17280_v1 }
 0x25a   : > { %12974 = vmatprep.mubr.msk.bf16.mxu1 %vm2035_vm4, %v11340_v56  ;;  %v19589_v56 = vld [vmem:[#allocation35_spill] sm:$0xff] }
 0x260   : > { %13559 = vmatmul.mubr.msk.bf16.gmra.mrb[64].mxu0 %vm2035_vm4, %v17292_v63 }
 0x261   : > { %12975 = vmatmul.mubr.msk.bf16.vlgmr.msra.gmra.mrb[0].mxu1 %vm2035_vm4, %v11341_v22  ;;  %13562 = vmatprep.mubr.msk.bf16.mxu0 %vm2035_vm4, %v17296_v49  ;;  %v19601_v22 = vld [vmem:[#allocation58_spill] sm:$0xff] }
 0x262   : > { %13103 = vmatpush3.bf16.msra.mxu1 %v5367_v24  ;;  %12978 = vmatprep.mubr.msk.bf16.mxu1 %vm2035_vm4, %v19589_v56  ;;  %v19602_v24 = vld [vmem:[#allocation60_spill] sm:$0xff]  ;;  %v19603_v56 = vld [vmem:[#allocation61_spill] sm:$0xff] }
 0x263   : > { %14913 = vmatprep.subr.msk.bf16.mxu1 %vm2228_vm1, %v15209_v15  ;;  %v19604_v15 = vld [vmem:[#allocation63_spill] sm:$0xff] }
 0x268   : > { %13563 = vmatmul.mubr.msk.bf16.gmra.mrb[68].mxu0 %vm2035_vm4, %v17308_v42 }
 0x269   : > { %12979 = vmatmul.mubr.msk.bf16.gmra.mrb[4].mxu1 %vm2035_vm4, %v19590_v14  ;;  %13566 = vmatprep.mubr.msk.bf16.mxu0 %vm2035_vm4, %v17312_v21  ;;  %v19605_v14 = vld [vmem:[#allocation66_spill] sm:$0xff] }
 0x26a   : > { %12982 = vmatprep.mubr.msk.bf16.mxu1 %vm2035_vm4, %v19591_v5 }
 0x270   : > { %13567 = vmatmul.mubr.msk.bf16.gmra.mrb[72].mxu0 %vm2035_vm4, %v17324_v41 }
 0x271   : > { %12983 = vmatmul.mubr.msk.bf16.gmra.mrb[8].mxu1 %vm2035_vm4, %v19592_v2  ;;  %13570 = vmatprep.mubr.msk.bf16.mxu0 %vm2035_vm4, %v17328_v52 }
 0x272   : > { %12986 = vmatprep.mubr.msk.bf16.mxu1 %vm2035_vm4, %v19593_v48 }
 0x278   : > { %13571 = vmatmul.mubr.msk.bf16.gmra.mrb[76].mxu0 %vm2035_vm4, %v17340_v62 }
 0x279   : > { %12987 = vmatmul.mubr.msk.bf16.gmra.mrb[12].mxu1 %vm2035_vm4, %v19594_v11  ;;  %13574 = vmatprep.mubr.msk.bf16.mxu0 %vm2035_vm4, %v17344_v45 }
 0x27a   : > { %12990 = vmatprep.mubr.msk.bf16.mxu1 %vm2035_vm4, %v19595_v38 }
 0x280   : > { %13575 = vmatmul.mubr.msk.bf16.gmra.mrb[80].mxu0 %vm2035_vm4, %v17356_v13 }
 0x281   : > { %12991 = vmatmul.mubr.msk.bf16.gmra.mrb[16].mxu1 %vm2035_vm4, %v19596_v10  ;;  %13578 = vmatprep.mubr.msk.bf16.mxu0 %vm2035_vm4, %v17360_v25 }
 0x282   : > { %12994 = vmatprep.mubr.msk.bf16.mxu1 %vm2035_vm4, %v19597_v9 }
 0x288   : > { %13579 = vmatmul.mubr.msk.bf16.gmra.mrb[84].mxu0 %vm2035_vm4, %v17372_v47 }
 0x289   : > { %12995 = vmatmul.mubr.msk.bf16.gmra.mrb[20].mxu1 %vm2035_vm4, %v19598_v32  ;;  %13582 = vmatprep.mubr.msk.bf16.mxu0 %vm2035_vm4, %v17376_v16 }
 0x28a   : > { %12998 = vmatprep.mubr.msk.bf16.mxu1 %vm2035_vm4, %v19599_v19 }
 0x290   : > { %13583 = vmatmul.mubr.msk.bf16.gmra.mrb[88].mxu0 %vm2035_vm4, %v17388_v3 }
 0x291   : > { %12999 = vmatmul.mubr.msk.bf16.gmra.mrb[24].mxu1 %vm2035_vm4, %v19600_v29  ;;  %13586 = vmatprep.mubr.msk.bf16.mxu0 %vm2035_vm4, %v17392_v27 }
 0x292   : > { %13002 = vmatprep.mubr.msk.bf16.mxu1 %vm2035_vm4, %v19601_v22 }
 0x298   : > { %13587 = vmatmul.mubr.msk.bf16.gmra.mrb[92].mxu0 %vm2035_vm4, %v17404_v55  ;;  %v19626_v55 = vld [vmem:[#allocation5_spill] sm:$0xff] }
 0x299   : > { %13003 = vmatmul.mubr.msk.bf16.gmra.mrb[28].mxu1 %vm2035_vm4, %v19602_v24  ;;  %13590 = vmatprep.mubr.msk.bf16.mxu0 %vm2035_vm4, %v17408_v7  ;;  %v19607_v7 = vld [vmem:[#allocation69_spill] sm:$0xff] }
 0x29a   : > { %13006 = vmatprep.mubr.msk.bf16.mxu1 %vm2035_vm4, %v19603_v56 }
 0x2a0   : > { %13591 = vmatmul.mubr.msk.bf16.gmra.mrb[96].mxu0 %vm2035_vm4, %v17420_v50  ;;  %v19608_v50 = vld [vmem:[#allocation71_spill] sm:$0xff] }
 0x2a1   : > { %13007 = vmatmul.mubr.msk.bf16.gmra.mrb[32].mxu1 %vm2035_vm4, %v19604_v15  ;;  %13594 = vmatprep.mubr.msk.bf16.mxu0 %vm2035_vm4, %v17424_v8  ;;  %v19615_v8 = vld [vmem:[#allocation84_spill] sm:$0xff] }
 0x2a2   : > { %13010 = vmatprep.mubr.msk.bf16.mxu1 %vm2035_vm4, %v19605_v14 }
 0x2a8   : > { %13595 = vmatmul.mubr.msk.bf16.gmra.mrb[100].mxu0 %vm2035_vm4, %v17436_v33  ;;  %v19609_v33 = vld [vmem:[#allocation74_spill] sm:$0xff] }
 0x2a9   : > { %13011 = vmatmul.mubr.msk.bf16.gmra.mrb[36].mxu1 %vm2035_vm4, %v19606_v59  ;;  %13598 = vmatprep.mubr.msk.bf16.mxu0 %vm2035_vm4, %v17440_v30  ;;  %v19610_v30 = vld [vmem:[#allocation76_spill] sm:$0xff] }
 0x2aa   : > { %13014 = vmatprep.mubr.msk.bf16.mxu1 %vm2035_vm4, %v19607_v7 }
 0x2b0   : > { %13599 = vmatmul.mubr.msk.bf16.gmra.mrb[104].mxu0 %vm2035_vm4, %v17452_v17  ;;  %v19611_v17 = vld [vmem:[#allocation77_spill] sm:$0xff] }
 0x2b1   : > { %13015 = vmatmul.mubr.msk.bf16.gmra.mrb[40].mxu1 %vm2035_vm4, %v19608_v50  ;;  %13602 = vmatprep.mubr.msk.bf16.mxu0 %vm2035_vm4, %v17456_v61  ;;  %v19612_v61 = vld [vmem:[#allocation79_spill] sm:$0xff]  ;;  %v17943_v50 = vld [vmem:[%s15286_s27 + $0x2a4] sm:$0x1] }
 0x2b2   : > { %13018 = vmatprep.mubr.msk.bf16.mxu1 %vm2035_vm4, %v19609_v33  ;;  %v19623_v33 = vld [vmem:[#allocation92_spill] sm:$0xff] }
 0x2b8   : > { %13603 = vmatmul.mubr.msk.bf16.gmra.mrb[108].mxu0 %vm2035_vm4, %v17468_v12  ;;  %v19613_v12 = vld [vmem:[#allocation82_spill] sm:$0xff] }
 0x2b9   : > { %13019 = vmatmul.mubr.msk.bf16.gmra.mrb[44].mxu1 %vm2035_vm4, %v19610_v30  ;;  %13606 = vmatprep.mubr.msk.bf16.mxu0 %vm2035_vm4, %v17472_v60  ;;  %v17640_v60 = vcombine.low %v17163_v37, %v17142_v28 }
 0x2ba   : > { %13022 = vmatprep.mubr.msk.bf16.mxu1 %vm2035_vm4, %v19611_v17  ;;  %v19622_v17 = vld [vmem:[#allocation90_spill] sm:$0xff] }
 0x2bb   : > { %19614 = vst [vmem:[#allocation124_spill] sm:$0xff] %v17640_v60 }
 0x2c0   : > { %13607 = vmatmul.mubr.msk.bf16.gmra.mrb[112].mxu0 %vm2035_vm4, %v17485_v43  ;;  %v19616_v43 = vld [vmem:[#allocation85_spill] sm:$0xff] }
 0x2c1   : > { %13023 = vmatmul.mubr.msk.bf16.gmra.mrb[48].mxu1 %vm2035_vm4, %v19612_v61  ;;  %13610 = vmatprep.mubr.msk.bf16.mxu0 %vm2035_vm4, %v17489_v54  ;;  %v17651_v54 = vld [vmem:[%s15286_s27 + $0x294] sm:$0xf]  ;;  %v17654_v61 = vld [vmem:[%s15286_s27 + $0x298] sm:$0xf] }
 0x2c2   : > { %13026 = vmatprep.mubr.msk.bf16.mxu1 %vm2035_vm4, %v19613_v12  ;;  %19617 = vst [vmem:[#allocation126_spill] sm:$0xff] %v17651_v54  ;;  %19618 = vst [vmem:[#allocation125_spill] sm:$0xff] %v17654_v61  ;;  %v17658_v12 = vcombine.low %v17166_v53, %v17184_v18 }
 0x2c4   : > { %19619 = vst [vmem:[#allocation127_spill] sm:$0xff] %v17658_v12 }
 0x2c8   : > { %13611 = vmatmul.mubr.msk.bf16.gmra.mrb[116].mxu0 %vm2035_vm4, %v17508_v34  ;;  %v11667_v34 = vcombine.low %v17651_v54, %v17654_v61 }
 0x2c9   : > { %13027 = vmatmul.mubr.msk.bf16.gmra.mrb[52].mxu1 %vm2035_vm4, %v19615_v8  ;;  %13614 = vmatprep.mubr.msk.bf16.mxu0 %vm2035_vm4, %v17640_v60  ;;  %v19620_v8 = vld [vmem:[#allocation87_spill] sm:$0xff]  ;;  %v17668_v60 = vld [vmem:[%s15286_s27 + $0x29c] sm:$0xf] }
 0x2ca   : > { %13030 = vmatprep.mubr.msk.bf16.mxu1 %vm2035_vm4, %v19616_v43  ;;  %19621 = vst [vmem:[#allocation132_spill] sm:$0xff] %v17668_v60  ;;  %v17671_v43 = vld [vmem:[%s15286_s27 + $0x2a0] sm:$0xf] }
 0x2cb   : > { %v11668_v30 = vcombine.low %v17668_v60, %v17671_v43 }
 0x2d0   : > { %13615 = vmatmul.mubr.msk.bf16.gmra.mrb[120].mxu0 %vm2035_vm4, %v17658_v12  ;;  %v19624_v12 = vld [vmem:[#allocation4_spill] sm:$0xff] }
 0x2d1   : > { %13031 = vmatmul.mubr.msk.bf16.gmra.mrb[56].mxu1 %vm2035_vm4, %v19620_v8  ;;  %13618 = vmatprep.mubr.msk.bf16.mxu0 %vm2035_vm4, %v11667_v34  ;;  %v19625_v8 = vld [vmem:[#allocation95_spill] sm:$0xff]  ;;  %v8932_v34 = vsel %vm2228_vm1, %v17525_v39, 0  ;;  %v19632_v39 = vld [vmem:[#allocation8_spill] sm:$0xff] }
 0x2d2   : > { %13034 = vmatprep.mubr.msk.bf16.mxu1 %vm2035_vm4, %v19622_v17  ;;  %v19627_v17 = vld [vmem:[#allocation103_spill] sm:$0xff] }
 0x2d8   : > { %13619 = vmatmul.mubr.msk.bf16.gmra.mrb[124].mxu0 %vm2035_vm4, %v11668_v30  ;;  %v19628_v30 = vld [vmem:[#allocation108_spill] sm:$0xff] }
 0x2d9   : > { %13035 = vmatmul.mubr.msk.bf16.gmra.mrb[60].mxu1 %vm2035_vm4, %v19623_v33  ;;  %13624 = vmatprep.mubr.msk.bf16.mxu0 %vm2035_vm4, %v19624_v12  ;;  %v19629_v33 = vld [vmem:[#allocation6_spill] sm:$0xff]  ;;  %v19630_v12 = vld [vmem:[#allocation7_spill] sm:$0xff] }
 0x2da   : > { %13038 = vmatprep.mubr.msk.bf16.mxu1 %vm2035_vm4, %v19625_v8  ;;  %v19631_v8 = vld [vmem:[#allocation113_spill] sm:$0xff] }
 0x2e0   : > { %13625 = vmatmul.mubr.msk.bf16.vlgmr.msra.gmra.mrb[0].mxu0 %vm2035_vm4, %v19626_v55  ;;  %v19633_v55 = vld [vmem:[#allocation115_spill] sm:$0xff] }
 0x2e1   : > { %13039 = vmatmul.mubr.msk.bf16.gmra.mrb[64].mxu1 %vm2035_vm4, %v19627_v17  ;;  %13753 = vmatpush3.bf16.msra.mxu0 %v8932_v34  ;;  %v19634_v17 = vld [vmem:[#allocation9_spill] sm:$0xff]  ;;  %v19635_v34 = vld [vmem:[#allocation122_spill] sm:$0xff] }
 0x2e2   : > { %13042 = vmatprep.mubr.msk.bf16.mxu1 %vm2035_vm4, %v19628_v30  ;;  %13628 = vmatprep.mubr.msk.bf16.mxu0 %vm2035_vm4, %v19629_v33  ;;  %v19636_v30 = vld [vmem:[#allocation10_spill] sm:$0xff]  ;;  %v19637_v33 = vld [vmem:[#allocation123_spill] sm:$0xff] }
 0x2e8   : > { %13629 = vmatmul.mubr.msk.bf16.gmra.mrb[4].mxu0 %vm2035_vm4, %v19630_v12  ;;  %v19638_v12 = vld [vmem:[#allocation11_spill] sm:$0xff] }
 0x2e9   : > { %13043 = vmatmul.mubr.msk.bf16.gmra.mrb[68].mxu1 %vm2035_vm4, %v19631_v8  ;;  %13632 = vmatprep.mubr.msk.bf16.mxu0 %vm2035_vm4, %v19632_v39  ;;  %v19639_v8 = vld [vmem:[#allocation129_spill] sm:$0xff]  ;;  %v19640_v39 = vld [vmem:[#allocation12_spill] sm:$0xff] }
 0x2ea   : > { %13046 = vmatprep.mubr.msk.bf16.mxu1 %vm2035_vm4, %v19633_v55  ;;  %v19641_v55 = vld [vmem:[#allocation130_spill] sm:$0xff] }
 0x2f0   : > { %13633 = vmatmul.mubr.msk.bf16.gmra.mrb[8].mxu0 %vm2035_vm4, %v19634_v17  ;;  %v19642_v17 = vld [vmem:[#allocation13_spill] sm:$0xff] }
 0x2f1   : > { %13047 = vmatmul.mubr.msk.bf16.gmra.mrb[72].mxu1 %vm2035_vm4, %v19635_v34  ;;  %13636 = vmatprep.mubr.msk.bf16.mxu0 %vm2035_vm4, %v19636_v30  ;;  %v19643_v34 = vld [vmem:[#allocation137_spill] sm:$0xff]  ;;  %v19644_v30 = vld [vmem:[#allocation14_spill] sm:$0xff] }
 0x2f2   : > { %13050 = vmatprep.mubr.msk.bf16.mxu1 %vm2035_vm4, %v19637_v33  ;;  %v19645_v33 = vld [vmem:[#allocation138_spill] sm:$0xff] }
 0x2f8   : > { %13637 = vmatmul.mubr.msk.bf16.gmra.mrb[12].mxu0 %vm2035_vm4, %v19638_v12  ;;  %v19646_v12 = vld [vmem:[#allocation15_spill] sm:$0xff] }
 0x2f9   : > { %13051 = vmatmul.mubr.msk.bf16.gmra.mrb[76].mxu1 %vm2035_vm4, %v19639_v8  ;;  %13640 = vmatprep.mubr.msk.bf16.mxu0 %vm2035_vm4, %v19640_v39  ;;  %v19647_v8 = vld [vmem:[#allocation145_spill] sm:$0xff]  ;;  %v19648_v39 = vld [vmem:[#allocation16_spill] sm:$0xff] }
 0x2fa   : > { %13054 = vmatprep.mubr.msk.bf16.mxu1 %vm2035_vm4, %v19641_v55  ;;  %v19649_v55 = vld [vmem:[#allocation146_spill] sm:$0xff] }
 0x300   : > { %13641 = vmatmul.mubr.msk.bf16.gmra.mrb[16].mxu0 %vm2035_vm4, %v19642_v17  ;;  %v19650_v17 = vld [vmem:[#allocation17_spill] sm:$0xff] }
 0x301   : > { %13055 = vmatmul.mubr.msk.bf16.gmra.mrb[80].mxu1 %vm2035_vm4, %v19643_v34  ;;  %13644 = vmatprep.mubr.msk.bf16.mxu0 %vm2035_vm4, %v19644_v30  ;;  %v19651_v34 = vld [vmem:[#allocation153_spill] sm:$0xff]  ;;  %v19652_v30 = vld [vmem:[#allocation18_spill] sm:$0xff] }
 0x302   : > { %13058 = vmatprep.mubr.msk.bf16.mxu1 %vm2035_vm4, %v19645_v33  ;;  %v19653_v33 = vld [vmem:[#allocation154_spill] sm:$0xff] }
 0x308   : > { %13645 = vmatmul.mubr.msk.bf16.gmra.mrb[20].mxu0 %vm2035_vm4, %v19646_v12  ;;  %v19654_v12 = vld [vmem:[#allocation19_spill] sm:$0xff] }
 0x309   : > { %13059 = vmatmul.mubr.msk.bf16.gmra.mrb[84].mxu1 %vm2035_vm4, %v19647_v8  ;;  %13648 = vmatprep.mubr.msk.bf16.mxu0 %vm2035_vm4, %v19648_v39  ;;  %v19655_v8 = vld [vmem:[#allocation161_spill] sm:$0xff]  ;;  %v19656_v39 = vld [vmem:[#allocation20_spill] sm:$0xff] }
 0x30a   : > { %13062 = vmatprep.mubr.msk.bf16.mxu1 %vm2035_vm4, %v19649_v55  ;;  %v19657_v55 = vld [vmem:[#allocation162_spill] sm:$0xff] }
 0x310   : > { %13649 = vmatmul.mubr.msk.bf16.gmra.mrb[24].mxu0 %vm2035_vm4, %v19650_v17  ;;  %v19658_v17 = vld [vmem:[#allocation21_spill] sm:$0xff] }
 0x311   : > { %13063 = vmatmul.mubr.msk.bf16.gmra.mrb[88].mxu1 %vm2035_vm4, %v19651_v34  ;;  %13652 = vmatprep.mubr.msk.bf16.mxu0 %vm2035_vm4, %v19652_v30  ;;  %v19659_v34 = vld [vmem:[#allocation169_spill] sm:$0xff]  ;;  %v19660_v30 = vld [vmem:[#allocation22_spill] sm:$0xff] }
 0x312   : > { %13066 = vmatprep.mubr.msk.bf16.mxu1 %vm2035_vm4, %v19653_v33  ;;  %v19661_v33 = vld [vmem:[#allocation170_spill] sm:$0xff] }
 0x318   : > { %13653 = vmatmul.mubr.msk.bf16.gmra.mrb[28].mxu0 %vm2035_vm4, %v19654_v12  ;;  %v19662_v12 = vld [vmem:[#allocation23_spill] sm:$0xff] }
 0x319   : > { %13067 = vmatmul.mubr.msk.bf16.gmra.mrb[92].mxu1 %vm2035_vm4, %v19655_v8  ;;  %13656 = vmatprep.mubr.msk.bf16.mxu0 %vm2035_vm4, %v19656_v39  ;;  %v19663_v39 = vld [vmem:[#allocation24_spill] sm:$0xff] }
 0x31a   : > { %13070 = vmatprep.mubr.msk.bf16.mxu1 %vm2035_vm4, %v19657_v55  ;;  %v19720_v55 = vld [vmem:[#allocation189_spill] sm:$0xff] }
 0x320   : > { %13657 = vmatmul.mubr.msk.bf16.gmra.mrb[32].mxu0 %vm2035_vm4, %v19658_v17  ;;  %v19664_v17 = vld [vmem:[#allocation25_spill] sm:$0xff] }
 0x321   : > { %13071 = vmatmul.mubr.msk.bf16.gmra.mrb[96].mxu1 %vm2035_vm4, %v19659_v34  ;;  %13660 = vmatprep.mubr.msk.bf16.mxu0 %vm2035_vm4, %v19660_v30  ;;  %v19665_v30 = vld [vmem:[#allocation26_spill] sm:$0xff]  ;;  %v19701_v34 = vld [vmem:[#allocation67_spill] sm:$0xff] }
 0x322   : > { %13074 = vmatprep.mubr.msk.bf16.mxu1 %vm2035_vm4, %v19661_v33  ;;  %v19699_v33 = vld [vmem:[#allocation65_spill] sm:$0xff] }
 0x328   : > { %13661 = vmatmul.mubr.msk.bf16.gmra.mrb[36].mxu0 %vm2035_vm4, %v19662_v12  ;;  %v19666_v12 = vld [vmem:[#allocation27_spill] sm:$0xff] }
 0x329   : > { %13075 = vmatmul.mubr.msk.bf16.gmra.mrb[100].mxu1 %vm2035_vm4, %v16998_v31  ;;  %13664 = vmatprep.mubr.msk.bf16.mxu0 %vm2035_vm4, %v19663_v39  ;;  %v19667_v39 = vld [vmem:[#allocation28_spill] sm:$0xff] }
 0x32a   : > { %13078 = vmatprep.mubr.msk.bf16.mxu1 %vm2035_vm4, %v17000_v36  ;;  %v19695_v36 = vld [vmem:[#allocation62_spill] sm:$0xff]  ;;  %v19697_v31 = vld [vmem:[#allocation64_spill] sm:$0xff] }
 0x330   : > { %13665 = vmatmul.mubr.msk.bf16.gmra.mrb[40].mxu0 %vm2035_vm4, %v19664_v17  ;;  %v19668_v17 = vld [vmem:[#allocation29_spill] sm:$0xff] }
 0x331   : > { %13079 = vmatmul.mubr.msk.bf16.gmra.mrb[104].mxu1 %vm2035_vm4, %v17031_v51  ;;  %13668 = vmatprep.mubr.msk.bf16.mxu0 %vm2035_vm4, %v19665_v30  ;;  %v19669_v30 = vld [vmem:[#allocation30_spill] sm:$0xff]  ;;  %v19693_v51 = vld [vmem:[#allocation59_spill] sm:$0xff] }
 0x332   : > { %13082 = vmatprep.mubr.msk.bf16.mxu1 %vm2035_vm4, %v17033_v23  ;;  %v19691_v23 = vld [vmem:[#allocation57_spill] sm:$0xff] }
 0x338   : > { %13669 = vmatmul.mubr.msk.bf16.gmra.mrb[44].mxu0 %vm2035_vm4, %v19666_v12  ;;  %v19670_v12 = vld [vmem:[#allocation31_spill] sm:$0xff] }
 0x339   : > { %13083 = vmatmul.mubr.msk.bf16.gmra.mrb[108].mxu1 %vm2035_vm4, %v17064_v26  ;;  %13672 = vmatprep.mubr.msk.bf16.mxu0 %vm2035_vm4, %v19667_v39  ;;  %v19671_v39 = vld [vmem:[#allocation33_spill] sm:$0xff]  ;;  %v19689_v26 = vld [vmem:[#allocation56_spill] sm:$0xff] }
 0x33a   : > { %13086 = vmatprep.mubr.msk.bf16.mxu1 %vm2035_vm4, %v17066_v58  ;;  %v19686_v58 = vld [vmem:[#allocation136_spill] sm:$0xff] }
 0x340   : > { %13673 = vmatmul.mubr.msk.bf16.gmra.mrb[48].mxu0 %vm2035_vm4, %v19668_v17  ;;  %v19672_v17 = vld [vmem:[#allocation34_spill] sm:$0xff] }
 0x341   : > { %13087 = vmatmul.mubr.msk.bf16.gmra.mrb[112].mxu1 %vm2035_vm4, %v17097_v20  ;;  %13676 = vmatprep.mubr.msk.bf16.mxu0 %vm2035_vm4, %v19669_v30  ;;  %v19673_v30 = vld [vmem:[#allocation38_spill] sm:$0xff]  ;;  %v19684_v20 = vld [vmem:[#allocation131_spill] sm:$0xff] }
 0x342   : > { %13090 = vmatprep.mubr.msk.bf16.mxu1 %vm2035_vm4, %v17099_v0  ;;  %v19682_v0 = vld [vmem:[#allocation128_spill] sm:$0xff] }
 0x348   : > { %13677 = vmatmul.mubr.msk.bf16.gmra.mrb[52].mxu0 %vm2035_vm4, %v19670_v12  ;;  %v19674_v12 = vld [vmem:[#allocation40_spill] sm:$0xff] }
 0x349   : > { %13091 = vmatmul.mubr.msk.bf16.gmra.mrb[116].mxu1 %vm2035_vm4, %v17130_v57  ;;  %13680 = vmatprep.mubr.msk.bf16.mxu0 %vm2035_vm4, %v19671_v39  ;;  %v19675_v39 = vld [vmem:[#allocation42_spill] sm:$0xff] }
 0x34a   : > { %13094 = vmatprep.mubr.msk.bf16.mxu1 %vm2035_vm4, %v17132_v46  ;;  %v19676_v46 = vld [vmem:[#allocation116_spill] sm:$0xff]  ;;  %v19679_v57 = vld [vmem:[#allocation46_spill] sm:$0xff] }
 0x350   : > { %13681 = vmatmul.mubr.msk.bf16.gmra.mrb[56].mxu0 %vm2035_vm4, %v19672_v17  ;;  %v19677_v17 = vld [vmem:[#allocation44_spill] sm:$0xff] }
 0x351   : > { %13095 = vmatmul.mubr.msk.bf16.gmra.mrb[120].mxu1 %vm2035_vm4, %v17172_v6  ;;  %13684 = vmatprep.mubr.msk.bf16.mxu0 %vm2035_vm4, %v19673_v30  ;;  %v19678_v6 = vld [vmem:[#allocation121_spill] sm:$0xff] }
 0x352   : > { %13098 = vmatprep.mubr.msk.bf16.mxu1 %vm2035_vm4, %v17174_v35  ;;  %v19680_v35 = vld [vmem:[#allocation2_spill] sm:$0xff] }
 0x358   : > { %13685 = vmatmul.mubr.msk.bf16.gmra.mrb[60].mxu0 %vm2035_vm4, %v19674_v12 }
 0x359   : > { %13099 = vmatmul.mubr.msk.bf16.gmra.mrb[124].mxu1 %vm2035_vm4, %v17210_v44  ;;  %13688 = vmatprep.mubr.msk.bf16.mxu0 %vm2035_vm4, %v19675_v39  ;;  %v19681_v44 = vld [vmem:[#allocation48_spill] sm:$0xff]  ;;  %v19725_v39 = vld [vmem:[#allocation91_spill] sm:$0xff] }
 0x35a   : > { %13104 = vmatprep.mubr.msk.bf16.mxu1 %vm2035_vm4, %v19676_v46  ;;  %v19683_v46 = vld [vmem:[#allocation49_spill] sm:$0xff] }
 0x360   : > { %13689 = vmatmul.mubr.msk.bf16.gmra.mrb[64].mxu0 %vm2035_vm4, %v19677_v17  ;;  %v8196_v17 = vshrl.u32 %v17668_v60, 16 }
 0x361   : > { %13105 = vmatmul.mubr.msk.bf16.vlgmr.msra.gmra.mrb[0].mxu1 %vm2035_vm4, %v19678_v6  ;;  %13692 = vmatprep.mubr.msk.bf16.mxu0 %vm2035_vm4, %v19679_v57  ;;  %v19685_v6 = vld [vmem:[#allocation51_spill] sm:$0xff] }
 0x362   : > { %13883 = vmatpush3.bf16.msra.mxu1 %v19680_v35  ;;  %13108 = vmatprep.mubr.msk.bf16.mxu1 %vm2035_vm4, %v16696_v40  ;;  %v19687_v35 = vld [vmem:[#allocation54_spill] sm:$0xff]  ;;  %v19688_v40 = vld [vmem:[#allocation139_spill] sm:$0xff] }
 0x368   : > { %13693 = vmatmul.mubr.msk.bf16.gmra.mrb[68].mxu0 %vm2035_vm4, %v19681_v44 }
 0x369   : > { %13109 = vmatmul.mubr.msk.bf16.gmra.mrb[4].mxu1 %vm2035_vm4, %v19682_v0  ;;  %13696 = vmatprep.mubr.msk.bf16.mxu0 %vm2035_vm4, %v19683_v46  ;;  %v19690_v0 = vld [vmem:[#allocation144_spill] sm:$0xff] }
 0x36a   : > { %13112 = vmatprep.mubr.msk.bf16.mxu1 %vm2035_vm4, %v19684_v20  ;;  %v19692_v20 = vld [vmem:[#allocation147_spill] sm:$0xff] }
 0x370   : > { %13697 = vmatmul.mubr.msk.bf16.gmra.mrb[72].mxu0 %vm2035_vm4, %v19685_v6 }
 0x371   : > { %13113 = vmatmul.mubr.msk.bf16.gmra.mrb[8].mxu1 %vm2035_vm4, %v19686_v58  ;;  %13700 = vmatprep.mubr.msk.bf16.mxu0 %vm2035_vm4, %v19687_v35  ;;  %v19694_v58 = vld [vmem:[#allocation152_spill] sm:$0xff]  ;;  %v19722_v35 = vld [vmem:[#allocation190_spill] sm:$0xff] }
 0x372   : > { %13116 = vmatprep.mubr.msk.bf16.mxu1 %vm2035_vm4, %v19688_v40  ;;  %v19696_v40 = vld [vmem:[#allocation155_spill] sm:$0xff] }
 0x378   : > { %13701 = vmatmul.mubr.msk.bf16.gmra.mrb[76].mxu0 %vm2035_vm4, %v19689_v26  ;;  %v6077_v26 = vshrl.u32 %v17184_v18, 16 }
 0x379   : > { %13117 = vmatmul.mubr.msk.bf16.gmra.mrb[12].mxu1 %vm2035_vm4, %v19690_v0  ;;  %13704 = vmatprep.mubr.msk.bf16.mxu0 %vm2035_vm4, %v19691_v23  ;;  %v19698_v0 = vld [vmem:[#allocation160_spill] sm:$0xff] }
 0x37a   : > { %13120 = vmatprep.mubr.msk.bf16.mxu1 %vm2035_vm4, %v19692_v20  ;;  %v19700_v20 = vld [vmem:[#allocation163_spill] sm:$0xff]  ;;  %v19721_v23 = vld [vmem:[#allocation88_spill] sm:$0xff] }
 0x380   : > { %13705 = vmatmul.mubr.msk.bf16.gmra.mrb[80].mxu0 %vm2035_vm4, %v19693_v51 }
 0x381   : > { %13121 = vmatmul.mubr.msk.bf16.gmra.mrb[16].mxu1 %vm2035_vm4, %v19694_v58  ;;  %13708 = vmatprep.mubr.msk.bf16.mxu0 %vm2035_vm4, %v19695_v36  ;;  %v19702_v58 = vld [vmem:[#allocation168_spill] sm:$0xff]  ;;  %v19703_v36 = vld [vmem:[#allocation70_spill] sm:$0xff] }
 0x382   : > { %13124 = vmatprep.mubr.msk.bf16.mxu1 %vm2035_vm4, %v19696_v40  ;;  %v19704_v40 = vld [vmem:[#allocation171_spill] sm:$0xff] }
 0x388   : > { %13709 = vmatmul.mubr.msk.bf16.gmra.mrb[84].mxu0 %vm2035_vm4, %v19697_v31  ;;  %v19705_v31 = vld [vmem:[#allocation72_spill] sm:$0xff] }
 0x389   : > { %13125 = vmatmul.mubr.msk.bf16.gmra.mrb[20].mxu1 %vm2035_vm4, %v19698_v0  ;;  %13712 = vmatprep.mubr.msk.bf16.mxu0 %vm2035_vm4, %v19699_v33  ;;  %v19706_v0 = vld [vmem:[#allocation174_spill] sm:$0xff]  ;;  %v19707_v33 = vld [vmem:[#allocation73_spill] sm:$0xff] }
 0x38a   : > { %13128 = vmatprep.mubr.msk.bf16.mxu1 %vm2035_vm4, %v19700_v20  ;;  %v19708_v20 = vld [vmem:[#allocation177_spill] sm:$0xff] }
 0x390   : > { %13713 = vmatmul.mubr.msk.bf16.gmra.mrb[88].mxu0 %vm2035_vm4, %v19701_v34  ;;  %v19709_v34 = vld [vmem:[#allocation75_spill] sm:$0xff] }
 0x391   : > { %13129 = vmatmul.mubr.msk.bf16.gmra.mrb[24].mxu1 %vm2035_vm4, %v19702_v58  ;;  %13716 = vmatprep.mubr.msk.bf16.mxu0 %vm2035_vm4, %v19703_v36  ;;  %v19710_v58 = vld [vmem:[#allocation178_spill] sm:$0xff] }
 0x392   : > { %13132 = vmatprep.mubr.msk.bf16.mxu1 %vm2035_vm4, %v19704_v40  ;;  %v19711_v36 = vld [vmem:[#allocation78_spill] sm:$0xff]  ;;  %v19712_v40 = vld [vmem:[#allocation181_spill] sm:$0xff] }
 0x398   : > { %13717 = vmatmul.mubr.msk.bf16.gmra.mrb[92].mxu0 %vm2035_vm4, %v19705_v31  ;;  %v19713_v31 = vld [vmem:[#allocation80_spill] sm:$0xff] }
 0x399   : > { %13133 = vmatmul.mubr.msk.bf16.gmra.mrb[28].mxu1 %vm2035_vm4, %v19706_v0  ;;  %13720 = vmatprep.mubr.msk.bf16.mxu0 %vm2035_vm4, %v19707_v33  ;;  %v19714_v0 = vld [vmem:[#allocation182_spill] sm:$0xff]  ;;  %v19715_v33 = vld [vmem:[#allocation81_spill] sm:$0xff] }
 0x39a   : > { %13136 = vmatprep.mubr.msk.bf16.mxu1 %vm2035_vm4, %v19708_v20  ;;  %v19716_v20 = vld [vmem:[#allocation185_spill] sm:$0xff] }
 0x3a0   : > { %13721 = vmatmul.mubr.msk.bf16.gmra.mrb[96].mxu0 %vm2035_vm4, %v19709_v34  ;;  %v19717_v34 = vld [vmem:[#allocation83_spill] sm:$0xff] }
 0x3a1   : > { %13137 = vmatmul.mubr.msk.bf16.gmra.mrb[32].mxu1 %vm2035_vm4, %v19710_v58  ;;  %13724 = vmatprep.mubr.msk.bf16.mxu0 %vm2035_vm4, %v19711_v36  ;;  %v19718_v58 = vld [vmem:[#allocation186_spill] sm:$0xff] }
 0x3a2   : > { %13140 = vmatprep.mubr.msk.bf16.mxu1 %vm2035_vm4, %v19712_v40  ;;  %v19719_v36 = vld [vmem:[#allocation86_spill] sm:$0xff]  ;;  %v6044_v40 = vshrl.u32 %v17163_v37, 16 }
 0x3a8   : > { %13725 = vmatmul.mubr.msk.bf16.gmra.mrb[100].mxu0 %vm2035_vm4, %v19713_v31  ;;  %v6047_v31 = vshll.u32 %v17163_v37, 16  ;;  %v6073_v37 = vshll.u32 %v17184_v18, 16 }
 0x3a9   : > { %13141 = vmatmul.mubr.msk.bf16.gmra.mrb[36].mxu1 %vm2035_vm4, %v19714_v0  ;;  %13728 = vmatprep.mubr.msk.bf16.mxu0 %vm2035_vm4, %v19715_v33  ;;  %v6053_v0 = vshll.u32 %v17142_v28, 16  ;;  %v6057_v33 = vshrl.u32 %v17142_v28, 16  ;;  %v19723_v28 = vld [vmem:[#allocation89_spill] sm:$0xff] }
 0x3aa   : > { %13144 = vmatprep.mubr.msk.bf16.mxu1 %vm2035_vm4, %v19716_v20  ;;  %v6046_v20 = vrot.slane %v6044_v40, 4  ;;  %v6049_v51 = vrot.slane %v6047_v31, 5  ;;  %v8176_v40 = vshll.u32 %v17651_v54, 16  ;;  %v6075_v46 = vrot.slane %v6073_v37, 5  ;;  %v19759_v37 = vld [vmem:[#allocation119_spill] sm:$0xff] }
 0x3ab   : > { %v6059_v8 = vrot.slane %v6057_v33, 4  ;;  %v8173_v33 = vshrl.u32 %v17651_v54, 16  ;;  %v8206_v54 = vshrl.u32 %v17671_v43, 16 }
 0x3ac   : > { %v6050_v31 = vor.u32 %v6049_v51, %v6046_v20  ;;  %v8178_v51 = vrot.slane %v8176_v40, 5  ;;  %v19730_v40 = vld [vmem:[#allocation197_spill] sm:$0xff] }
 0x3ad   : > { %v8208_v30 = vrot.slane %v8206_v54, 4 }
 0x3ae   : > { %v6051_v44 = vrot.slane %v6050_v31, 4 }
 0x3b0   : > { %13729 = vmatmul.mubr.msk.bf16.gmra.mrb[104].mxu0 %vm2035_vm4, %v19717_v34  ;;  %v6055_v34 = vrot.slane %v6053_v0, 5  ;;  %v8186_v0 = vshrl.u32 %v17654_v61, 16 }
 0x3b1   : > { %13145 = vmatmul.mubr.msk.bf16.gmra.mrb[40].mxu1 %vm2035_vm4, %v19718_v58  ;;  %13732 = vmatprep.mubr.msk.bf16.mxu0 %vm2035_vm4, %v19719_v36  ;;  %v6063_v58 = vshll.u32 %v17166_v53, 16  ;;  %v6067_v36 = vshrl.u32 %v17166_v53, 16  ;;  %v8182_v53 = vshll.u32 %v17654_v61, 16  ;;  %v19726_v61 = vld [vmem:[#allocation198_spill] sm:$0xff] }
 0x3b2   : > { %13148 = vmatprep.mubr.msk.bf16.mxu1 %vm2035_vm4, %v19720_v55  ;;  %v6060_v55 = vor.u32 %v6059_v8, %v6055_v34  ;;  %v8188_v20 = vrot.slane %v8186_v0, 4  ;;  %v6056_v31 = vsel %vm15320_vm5, %v6051_v44, %v6055_v34  ;;  %v8198_v44 = vrot.slane %v8196_v17, 4 }
 0x3b3   : > { %v6065_v18 = vrot.slane %v6063_v58, 5  ;;  %v6069_v6 = vrot.slane %v6067_v36, 4  ;;  %v8184_v8 = vrot.slane %v8182_v53, 5  ;;  %v6083_v58 = vshll.u32 %v19726_v61, 16  ;;  %v19727_v36 = vld [vmem:[#allocation194_spill] sm:$0xff] }
 0x3b4   : > { %v6061_v57 = vrot.slane %v6060_v55, 4 }
 0x3b5   : > { %v8189_v0 = vor.u32 %v8188_v20, %v8184_v8  ;;  %v8212_v20 = vshll.u32 %v17943_v50, 16 }
 0x3b6   : > { %v6066_v55 = vsel %vm15320_vm5, %v6061_v57, %v6065_v18 }
 0x3b7   : > { %v17940_v53 = vcombine.low %v6056_v31, %v6066_v55 }
 0x3b8   : > { %13733 = vmatmul.mubr.msk.bf16.gmra.mrb[108].mxu0 %vm2035_vm4, %v19721_v23  ;;  %v19724_v23 = vld [vmem:[#allocation193_spill] sm:$0xff] }
 0x3b9   : > { %13149 = vmatmul.mubr.msk.bf16.gmra.mrb[44].mxu1 %vm2035_vm4, %v19722_v35  ;;  %13736 = vmatprep.mubr.msk.bf16.mxu0 %vm2035_vm4, %v19723_v28  ;;  %v6079_v35 = vrot.slane %v6077_v26, 4  ;;  %v8175_v28 = vrot.slane %v8173_v33, 4  ;;  %v19728_v26 = vld [vmem:[#allocation96_spill] sm:$0xff]  ;;  %v8192_v33 = vshll.u32 %v17668_v60, 16 }
 0x3ba   : > { %13152 = vmatprep.mubr.msk.bf16.mxu1 %vm2035_vm4, %v19724_v23  ;;  %v6070_v23 = vor.u32 %v6069_v6, %v6065_v18  ;;  %v8202_v6 = vshll.u32 %v17671_v43, 16  ;;  %v8190_v18 = vrot.slane %v8189_v0, 4  ;;  %v19731_v60 = vld [vmem:[#allocation104_spill] sm:$0xff]  ;;  %v19736_v0 = vld [vmem:[#allocation94_spill] sm:$0xff] }
 0x3bb   : > { %v6080_v12 = vor.u32 %v6079_v35, %v6075_v46  ;;  %v8179_v61 = vor.u32 %v8178_v51, %v8175_v28  ;;  %v19732_v51 = vld [vmem:[#allocation199_spill] sm:$0xff] }
 0x3bc   : > { %v6071_v35 = vrot.slane %v6070_v23, 4  ;;  %v8204_v34 = vrot.slane %v8202_v6, 5  ;;  %v19733_v23 = vld [vmem:[#allocation202_spill] sm:$0xff] }
 0x3bd   : > { %v8180_v57 = vrot.slane %v8179_v61, 4 }
 0x3be   : > { %v6076_v28 = vsel %vm15320_vm5, %v6071_v35, %v6075_v46  ;;  %v8209_v17 = vor.u32 %v8208_v30, %v8204_v34  ;;  %v19734_v30 = vld [vmem:[#allocation204_spill] sm:$0xff]  ;;  %v19737_v35 = vld [vmem:[#allocation109_spill] sm:$0xff] }
 0x3c0   : > { %13737 = vmatmul.mubr.msk.bf16.gmra.mrb[112].mxu0 %vm2035_vm4, %v19725_v39  ;;  %v8194_v39 = vrot.slane %v8192_v33, 5  ;;  %v8210_v6 = vrot.slane %v8209_v17, 4  ;;  %v19765_v17 = vld [vmem:[#allocation124_spill] sm:$0xff] }
 0x3c1   : > { %13153 = vmatmul.mubr.msk.bf16.gmra.mrb[48].mxu1 %vm2035_vm4, %v19727_v36  ;;  %13740 = vmatprep.mubr.msk.bf16.mxu0 %vm2035_vm4, %v19728_v26  ;;  %v6081_v36 = vrot.slane %v6080_v12, 4  ;;  %v6085_v26 = vrot.slane %v6083_v58, 5  ;;  %v8185_v58 = vsel %vm15320_vm5, %v8180_v57, %v8184_v8 }
 0x3c2   : > { %13156 = vmatprep.mubr.msk.bf16.mxu1 %vm2035_vm4, %v19730_v40  ;;  %v8199_v54 = vor.u32 %v8198_v44, %v8194_v39  ;;  %v8195_v46 = vsel %vm15320_vm5, %v8190_v18, %v8194_v39  ;;  %v8214_v40 = vrot.slane %v8212_v20, 5  ;;  %v19761_v44 = vld [vmem:[#allocation118_spill] sm:$0xff] }
 0x3c3   : > { %v6086_v12 = vsel %vm15320_vm5, %v6081_v36, %v6085_v26  ;;  %v11733_v55 = vcombine.low %v8185_v58, %v8195_v46  ;;  %v19735_v26 = vld [vmem:[#allocation93_spill] sm:$0xff]  ;;  %v19760_v36 = vld [vmem:[#allocation95_spill] sm:$0xff] }
 0x3c4   : > { %v17962_v31 = vcombine.low %v6076_v28, %v6086_v12  ;;  %v8200_v33 = vrot.slane %v8199_v54, 4  ;;  %v8215_v39 = vsel %vm15320_vm5, %v8210_v6, %v8214_v40  ;;  %v19763_v12 = vld [vmem:[#allocation120_spill] sm:$0xff]  ;;  %v19768_v6 = vld [vmem:[#allocation115_spill] sm:$0xff]  ;;  %v19769_v40 = vld [vmem:[#allocation38_spill] sm:$0xff] }
 0x3c5   : > { %v19764_v54 = vld [vmem:[#allocation108_spill] sm:$0xff] }
 0x3c6   : > { %v8205_v8 = vsel %vm15320_vm5, %v8200_v33, %v8204_v34  ;;  %v19767_v33 = vld [vmem:[#allocation127_spill] sm:$0xff] }
 0x3c7   : > { %v11734_v61 = vcombine.low %v8205_v8, %v8215_v39 }
 0x3c8   : > { %13741 = vmatmul.mubr.msk.bf16.gmra.mrb[116].mxu0 %vm2035_vm4, %v19731_v60 }
 0x3c9   : > { %13157 = vmatmul.mubr.msk.bf16.gmra.mrb[52].mxu1 %vm2035_vm4, %v19732_v51  ;;  %13744 = vmatprep.mubr.msk.bf16.mxu0 %vm2035_vm4, %v17940_v53  ;;  %v19762_v51 = vld [vmem:[#allocation103_spill] sm:$0xff] }
 0x3ca   : > { %13160 = vmatprep.mubr.msk.bf16.mxu1 %vm2035_vm4, %v19733_v23 }
 0x3d0   : > { %13745 = vmatmul.mubr.msk.bf16.gmra.mrb[120].mxu0 %vm2035_vm4, %v17962_v31 }
 0x3d1   : > { %13161 = vmatmul.mubr.msk.bf16.gmra.mrb[56].mxu1 %vm2035_vm4, %v19734_v30  ;;  %13748 = vmatprep.mubr.msk.bf16.mxu0 %vm2035_vm4, %v11733_v55  ;;  %v19766_v55 = vld [vmem:[#allocation113_spill] sm:$0xff] }
 0x3d2   : > { %13164 = vmatprep.mubr.msk.bf16.mxu1 %vm2035_vm4, %v19735_v26 }
 0x3d8   : > { %13749 = vmatmul.mubr.msk.bf16.gmra.mrb[124].mxu0 %vm2035_vm4, %v11734_v61  ;;  %v19770_v61 = vld [vmem:[#allocation122_spill] sm:$0xff] }
 0x3d9   : > { %13165 = vmatmul.mubr.msk.bf16.gmra.mrb[60].mxu1 %vm2035_vm4, %v19736_v0  ;;  %13754 = vmatprep.mubr.msk.bf16.mxu0 %vm2035_vm4, %v19591_v5  ;;  %v19752_v5 = vld [vmem:[#allocation85_spill] sm:$0xff]  ;;  %v19771_v0 = vld [vmem:[#allocation40_spill] sm:$0xff] }
 0x3da   : > { %13168 = vmatprep.mubr.msk.bf16.mxu1 %vm2035_vm4, %v19737_v35  ;;  %v19772_v35 = vld [vmem:[#allocation123_spill] sm:$0xff] }
 0x3e0   : > { %13755 = vmatmul.mubr.msk.bf16.vlgmr.msra.gmra.mrb[0].mxu0 %vm2035_vm4, %v19592_v2  ;;  %v19753_v2 = vld [vmem:[#allocation107_spill] sm:$0xff] }
 0x3e1   : > { %13169 = vmatmul.mubr.msk.bf16.gmra.mrb[64].mxu1 %vm2035_vm4, %v17276_v4  ;;  %13758 = vmatprep.mubr.msk.bf16.mxu0 %vm2035_vm4, %v19593_v48  ;;  %v19738_v4 = vld [vmem:[#allocation71_spill] sm:$0xff] }
 0x3e2   : > { %13172 = vmatprep.mubr.msk.bf16.mxu1 %vm2035_vm4, %v17280_v1  ;;  %v19739_v1 = vld [vmem:[#allocation100_spill] sm:$0xff] }
 0x3e8   : > { %13759 = vmatmul.mubr.msk.bf16.gmra.mrb[4].mxu0 %vm2035_vm4, %v19594_v11 }
 0x3e9   : > { %13173 = vmatmul.mubr.msk.bf16.gmra.mrb[68].mxu1 %vm2035_vm4, %v17292_v63  ;;  %13762 = vmatprep.mubr.msk.bf16.mxu0 %vm2035_vm4, %v19595_v38  ;;  %v19740_v63 = vld [vmem:[#allocation74_spill] sm:$0xff] }
 0x3ea   : > { %13176 = vmatprep.mubr.msk.bf16.mxu1 %vm2035_vm4, %v17296_v49  ;;  %v19741_v49 = vld [vmem:[#allocation97_spill] sm:$0xff] }
 0x3f0   : > { %13763 = vmatmul.mubr.msk.bf16.gmra.mrb[8].mxu0 %vm2035_vm4, %v19596_v10 }
 0x3f1   : > { %13177 = vmatmul.mubr.msk.bf16.gmra.mrb[72].mxu1 %vm2035_vm4, %v17308_v42  ;;  %13766 = vmatprep.mubr.msk.bf16.mxu0 %vm2035_vm4, %v19597_v9  ;;  %v19743_v42 = vld [vmem:[#allocation102_spill] sm:$0xff]  ;;  %v19754_v9 = vld [vmem:[#allocation87_spill] sm:$0xff] }
 0x3f2   : > { %13180 = vmatprep.mubr.msk.bf16.mxu1 %vm2035_vm4, %v17312_v21  ;;  %v19744_v21 = vld [vmem:[#allocation77_spill] sm:$0xff] }
 0x3f8   : > { %13767 = vmatmul.mubr.msk.bf16.gmra.mrb[12].mxu0 %vm2035_vm4, %v19598_v32  ;;  %v19755_v32 = vld [vmem:[#allocation114_spill] sm:$0xff] }
 0x3f9   : > { %13181 = vmatmul.mubr.msk.bf16.gmra.mrb[76].mxu1 %vm2035_vm4, %v17324_v41  ;;  %13770 = vmatprep.mubr.msk.bf16.mxu0 %vm2035_vm4, %v19599_v19  ;;  %v19746_v41 = vld [vmem:[#allocation79_spill] sm:$0xff]  ;;  %v19756_v19 = vld [vmem:[#allocation90_spill] sm:$0xff] }
 0x3fa   : > { %13184 = vmatprep.mubr.msk.bf16.mxu1 %vm2035_vm4, %v17328_v52  ;;  %v19747_v52 = vld [vmem:[#allocation106_spill] sm:$0xff] }
 0x400   : > { %13771 = vmatmul.mubr.msk.bf16.gmra.mrb[16].mxu0 %vm2035_vm4, %v19600_v29  ;;  %v19757_v29 = vld [vmem:[#allocation117_spill] sm:$0xff] }
 0x401   : > { %13185 = vmatmul.mubr.msk.bf16.gmra.mrb[80].mxu1 %vm2035_vm4, %v17340_v62  ;;  %13774 = vmatprep.mubr.msk.bf16.mxu0 %vm2035_vm4, %v19601_v22  ;;  %v19748_v62 = vld [vmem:[#allocation82_spill] sm:$0xff] }
 0x402   : > { %13188 = vmatprep.mubr.msk.bf16.mxu1 %vm2035_vm4, %v17344_v45  ;;  %v19749_v45 = vld [vmem:[#allocation105_spill] sm:$0xff] }
 0x408   : > { %13775 = vmatmul.mubr.msk.bf16.gmra.mrb[20].mxu0 %vm2035_vm4, %v19602_v24 }
 0x409   : > { %13189 = vmatmul.mubr.msk.bf16.gmra.mrb[84].mxu1 %vm2035_vm4, %v17356_v13  ;;  %13778 = vmatprep.mubr.msk.bf16.mxu0 %vm2035_vm4, %v19603_v56 }
 0x40a   : > { %13192 = vmatprep.mubr.msk.bf16.mxu1 %vm2035_vm4, %v17360_v25 }
 0x410   : > { %13779 = vmatmul.mubr.msk.bf16.gmra.mrb[24].mxu0 %vm2035_vm4, %v19604_v15 }
 0x411   : > { %13193 = vmatmul.mubr.msk.bf16.gmra.mrb[88].mxu1 %vm2035_vm4, %v17372_v47  ;;  %13782 = vmatprep.mubr.msk.bf16.mxu0 %vm2035_vm4, %v19605_v14  ;;  %v19758_v14 = vld [vmem:[#allocation92_spill] sm:$0xff] }
 0x412   : > { %13196 = vmatprep.mubr.msk.bf16.mxu1 %vm2035_vm4, %v17376_v16 }
 0x418   : > { %13783 = vmatmul.mubr.msk.bf16.gmra.mrb[28].mxu0 %vm2035_vm4, %v19606_v59  ;;  %v19742_v59 = vld [vmem:[#allocation76_spill] sm:$0xff] }
 0x419   : > { %13197 = vmatmul.mubr.msk.bf16.gmra.mrb[92].mxu1 %vm2035_vm4, %v17388_v3  ;;  %13786 = vmatprep.mubr.msk.bf16.mxu0 %vm2035_vm4, %v19607_v7  ;;  %v19750_v3 = vld [vmem:[#allocation84_spill] sm:$0xff]  ;;  %v19751_v7 = vld [vmem:[#allocation110_spill] sm:$0xff] }
 0x41a   : > { %13200 = vmatprep.mubr.msk.bf16.mxu1 %vm2035_vm4, %v17392_v27  ;;  %v19745_v27 = vld [vmem:[#allocation101_spill] sm:$0xff] }
 0x420   : > { %13787 = vmatmul.mubr.msk.bf16.gmra.mrb[32].mxu0 %vm2035_vm4, %v19738_v4  ;;  %v19773_v4 = vld [vmem:[#allocation42_spill] sm:$0xff] }
 0x421   : > { %13201 = vmatmul.mubr.msk.bf16.gmra.mrb[96].mxu1 %vm2035_vm4, %v19739_v1  ;;  %13790 = vmatprep.mubr.msk.bf16.mxu0 %vm2035_vm4, %v19740_v63 }
 0x422   : > { %13204 = vmatprep.mubr.msk.bf16.mxu1 %vm2035_vm4, %v19741_v49 }
 0x428   : > { %13791 = vmatmul.mubr.msk.bf16.gmra.mrb[36].mxu0 %vm2035_vm4, %v19742_v59 }
 0x429   : > { %13205 = vmatmul.mubr.msk.bf16.gmra.mrb[100].mxu1 %vm2035_vm4, %v19743_v42  ;;  %13794 = vmatprep.mubr.msk.bf16.mxu0 %vm2035_vm4, %v19744_v21  ;;  %v19774_v42 = vld [vmem:[#allocation129_spill] sm:$0xff]  ;;  %v19775_v21 = vld [vmem:[#allocation44_spill] sm:$0xff] }
 0x42a   : > { %13208 = vmatprep.mubr.msk.bf16.mxu1 %vm2035_vm4, %v19745_v27  ;;  %v19776_v27 = vld [vmem:[#allocation130_spill] sm:$0xff] }
 0x430   : > { %13795 = vmatmul.mubr.msk.bf16.gmra.mrb[40].mxu0 %vm2035_vm4, %v19746_v41  ;;  %v19777_v41 = vld [vmem:[#allocation46_spill] sm:$0xff] }
 0x431   : > { %13209 = vmatmul.mubr.msk.bf16.gmra.mrb[104].mxu1 %vm2035_vm4, %v19747_v52  ;;  %13798 = vmatprep.mubr.msk.bf16.mxu0 %vm2035_vm4, %v19748_v62 }
 0x432   : > { %13212 = vmatprep.mubr.msk.bf16.mxu1 %vm2035_vm4, %v19749_v45 }
 0x434   : > { %v18070_v13 = vpop.f32.mrb[0].mxu1 }
 0x435   : > { %v18072_v25 = vpop.f32.mrb[1].mxu1 }
 0x436   : > { %v18074_v47 = vpop.f32.mrb[2].mxu1 }
 0x437   : > { %v18076_v16 = vpop.f32.mrb[3].mxu1 }
 0x438   : > { %13799 = vmatmul.mubr.msk.bf16.gmra.mrb[44].mxu0 %vm2035_vm4, %v19750_v3 }
 0x439   : > { %13213 = vmatmul.mubr.msk.bf16.gmra.mrb[108].mxu1 %vm2035_vm4, %v19751_v7  ;;  %13802 = vmatprep.mubr.msk.bf16.mxu0 %vm2035_vm4, %v19752_v5  ;;  %v19778_v7 = vld [vmem:[#allocation137_spill] sm:$0xff]  ;;  %v19779_v5 = vld [vmem:[#allocation48_spill] sm:$0xff] }
 0x43a   : > { %13216 = vmatprep.mubr.msk.bf16.mxu1 %vm2035_vm4, %v19753_v2  ;;  %v19780_v2 = vld [vmem:[#allocation138_spill] sm:$0xff] }
 0x43c   : > { %v18086_v48 = vpop.f32.mrb[4].mxu1 }
 0x43d   : > { %v18088_v11 = vpop.f32.mrb[5].mxu1 }
 0x43e   : > { %v18090_v38 = vpop.f32.mrb[6].mxu1 }
 0x43f   : > { %v18092_v10 = vpop.f32.mrb[7].mxu1 }
 0x440   : > { %13803 = vmatmul.mubr.msk.bf16.gmra.mrb[48].mxu0 %vm2035_vm4, %v19754_v9  ;;  %v19781_v9 = vld [vmem:[#allocation49_spill] sm:$0xff] }
 0x441   : > { %13217 = vmatmul.mubr.msk.bf16.gmra.mrb[112].mxu1 %vm2035_vm4, %v19755_v32  ;;  %13806 = vmatprep.mubr.msk.bf16.mxu0 %vm2035_vm4, %v19756_v19 }
 0x442   : > { %13220 = vmatprep.mubr.msk.bf16.mxu1 %vm2035_vm4, %v19757_v29 }
 0x444   : > { %v18102_v22 = vpop.f32.mrb[8].mxu1 }
 0x445   : > { %v18104_v24 = vpop.f32.mrb[9].mxu1 }
 0x446   : > { %v18106_v56 = vpop.f32.mrb[10].mxu1 }
 0x447   : > { %v18108_v15 = vpop.f32.mrb[11].mxu1 }
 0x448   : > { %13807 = vmatmul.mubr.msk.bf16.gmra.mrb[52].mxu0 %vm2035_vm4, %v19758_v14 }
 0x449   : > { %13221 = vmatmul.mubr.msk.bf16.gmra.mrb[116].mxu1 %vm2035_vm4, %v19759_v37  ;;  %13810 = vmatprep.mubr.msk.bf16.mxu0 %vm2035_vm4, %v19760_v36  ;;  %v19782_v37 = vld [vmem:[#allocation145_spill] sm:$0xff]  ;;  %v19783_v36 = vld [vmem:[#allocation51_spill] sm:$0xff] }
 0x44a   : > { %13224 = vmatprep.mubr.msk.bf16.mxu1 %vm2035_vm4, %v19761_v44  ;;  %v19784_v44 = vld [vmem:[#allocation146_spill] sm:$0xff] }
 0x44c   : > { %v18118_v34 = vpop.f32.mrb[12].mxu1 }
 0x44d   : > { %v18120_v57 = vpop.f32.mrb[13].mxu1 }
 0x44e   : > { %v18122_v18 = vpop.f32.mrb[14].mxu1 }
 0x44f   : > { %v18124_v28 = vpop.f32.mrb[15].mxu1 }
 0x450   : > { %13811 = vmatmul.mubr.msk.bf16.gmra.mrb[56].mxu0 %vm2035_vm4, %v19762_v51  ;;  %v19785_v51 = vld [vmem:[#allocation54_spill] sm:$0xff] }
 0x451   : > { %13225 = vmatmul.mubr.msk.bf16.gmra.mrb[120].mxu1 %vm2035_vm4, %v19763_v12  ;;  %13814 = vmatprep.mubr.msk.bf16.mxu0 %vm2035_vm4, %v19764_v54 }
 0x452   : > { %13228 = vmatprep.mubr.msk.bf16.mxu1 %vm2035_vm4, %v19765_v17 }
 0x454   : > { %v18134_v20 = vpop.f32.mrb[16].mxu1 }
 0x455   : > { %v18136_v23 = vpop.f32.mrb[17].mxu1 }
 0x456   : > { %v18138_v58 = vpop.f32.mrb[18].mxu1 }
 0x457   : > { %v18140_v46 = vpop.f32.mrb[19].mxu1 }
 0x458   : > { %13815 = vmatmul.mubr.msk.bf16.gmra.mrb[60].mxu0 %vm2035_vm4, %v19766_v55 }
 0x459   : > { %13229 = vmatmul.mubr.msk.bf16.gmra.mrb[124].mxu1 %vm2035_vm4, %v19767_v33  ;;  %13818 = vmatprep.mubr.msk.bf16.mxu0 %vm2035_vm4, %v19768_v6  ;;  %v19787_v33 = vld [vmem:[#allocation153_spill] sm:$0xff]  ;;  %v19788_v6 = vld [vmem:[#allocation56_spill] sm:$0xff] }
 0x45a   : > { %13298 = vmatprep.mubr.msk.bf16.mxu1 %vm2035_vm4, %v19769_v40  ;;  %v19789_v40 = vld [vmem:[#allocation154_spill] sm:$0xff] }
 0x45c   : > { %v18150_v30 = vpop.f32.mrb[20].mxu1 }
 0x45d   : > { %v18152_v8 = vpop.f32.mrb[21].mxu1 }
 0x45e   : > { %v18154_v39 = vpop.f32.mrb[22].mxu1 }
 0x45f   : > { %v18156_v26 = vpop.f32.mrb[23].mxu1 }
 0x460   : > { %13819 = vmatmul.mubr.msk.bf16.gmra.mrb[64].mxu0 %vm2035_vm4, %v19770_v61  ;;  %v19790_v61 = vld [vmem:[#allocation57_spill] sm:$0xff] }
 0x461   : > { %13299 = vmatmul.mubr.msk.bf16.vlgmr.msra.gmra.mrb[64].mxu1 %vm2035_vm4, %v19771_v0  ;;  %13822 = vmatprep.mubr.msk.bf16.mxu0 %vm2035_vm4, %v19772_v35 }
 0x462   : > { %13302 = vmatprep.mubr.msk.bf16.mxu1 %vm2035_vm4, %v19773_v4 }
 0x464   : > { %v18166_v1 = vpop.f32.mrb[24].mxu1 }
 0x465   : > { %v18168_v63 = vpop.f32.mrb[25].mxu1 }
 0x466   : > { %v18170_v49 = vpop.f32.mrb[26].mxu1 }
 0x467   : > { %v18172_v59 = vpop.f32.mrb[27].mxu1 }
 0x468   : > { %13823 = vmatmul.mubr.msk.bf16.gmra.mrb[68].mxu0 %vm2035_vm4, %v19774_v42 }
 0x469   : > { %13303 = vmatmul.mubr.msk.bf16.gmra.mrb[68].mxu1 %vm2035_vm4, %v19775_v21  ;;  %13826 = vmatprep.mubr.msk.bf16.mxu0 %vm2035_vm4, %v19776_v27  ;;  %v19795_v21 = vld [vmem:[#allocation161_spill] sm:$0xff]  ;;  %v19796_v27 = vld [vmem:[#allocation59_spill] sm:$0xff] }
 0x46a   : > { %13306 = vmatprep.mubr.msk.bf16.mxu1 %vm2035_vm4, %v19777_v41  ;;  %v19797_v41 = vld [vmem:[#allocation162_spill] sm:$0xff] }
 0x46c   : > { %v18182_v52 = vpop.f32.mrb[28].mxu1 }
 0x46d   : > { %v18184_v62 = vpop.f32.mrb[29].mxu1 }
 0x46e   : > { %v18186_v45 = vpop.f32.mrb[30].mxu1 }
 0x46f   : > { %v18188_v3 = vpop.f32.mrb[31].mxu1 }
 0x470   : > { %13827 = vmatmul.mubr.msk.bf16.gmra.mrb[72].mxu0 %vm2035_vm4, %v19778_v7  ;;  %v19798_v7 = vld [vmem:[#allocation62_spill] sm:$0xff] }
 0x471   : > { %13307 = vmatmul.mubr.msk.bf16.gmra.mrb[72].mxu1 %vm2035_vm4, %v19779_v5  ;;  %13830 = vmatprep.mubr.msk.bf16.mxu0 %vm2035_vm4, %v19780_v2 }
 0x472   : > { %13310 = vmatprep.mubr.msk.bf16.mxu1 %vm2035_vm4, %v19781_v9 }
 0x474   : > { %v18198_v32 = vpop.f32.mrb[32].mxu1 }
 0x475   : > { %v18200_v19 = vpop.f32.mrb[33].mxu1 }
 0x476   : > { %v18202_v29 = vpop.f32.mrb[34].mxu1 }
 0x477   : > { %v18204_v14 = vpop.f32.mrb[35].mxu1 }
 0x478   : > { %13831 = vmatmul.mubr.msk.bf16.gmra.mrb[76].mxu0 %vm2035_vm4, %v19782_v37 }
 0x479   : > { %13311 = vmatmul.mubr.msk.bf16.gmra.mrb[76].mxu1 %vm2035_vm4, %v19783_v36  ;;  %13834 = vmatprep.mubr.msk.bf16.mxu0 %vm2035_vm4, %v19784_v44  ;;  %v19803_v36 = vld [vmem:[#allocation169_spill] sm:$0xff]  ;;  %v19804_v44 = vld [vmem:[#allocation64_spill] sm:$0xff] }
 0x47a   : > { %13314 = vmatprep.mubr.msk.bf16.mxu1 %vm2035_vm4, %v19785_v51  ;;  %v19805_v51 = vld [vmem:[#allocation170_spill] sm:$0xff] }
 0x47c   : > { %v18214_v12 = vpop.f32.mrb[36].mxu1 }
 0x47d   : > { %v18216_v54 = vpop.f32.mrb[37].mxu1 }
 0x47e   : > { %v18218_v17 = vpop.f32.mrb[38].mxu1 }
 0x47f   : > { %v18220_v55 = vpop.f32.mrb[39].mxu1 }
 0x480   : > { %19786 = vst [vmem:[#allocation134_spill] sm:$0xff] %v18220_v55  ;;  %13835 = vmatmul.mubr.msk.bf16.gmra.mrb[80].mxu0 %vm2035_vm4, %v19787_v33  ;;  %v19806_v33 = vld [vmem:[#allocation65_spill] sm:$0xff] }
 0x481   : > { %13315 = vmatmul.mubr.msk.bf16.gmra.mrb[80].mxu1 %vm2035_vm4, %v19788_v6  ;;  %13838 = vmatprep.mubr.msk.bf16.mxu0 %vm2035_vm4, %v19789_v40 }
 0x482   : > { %13318 = vmatprep.mubr.msk.bf16.mxu1 %vm2035_vm4, %v19790_v61 }
 0x484   : > { %v18230_v0 = vpop.f32.mrb[40].mxu1 }
 0x485   : > { %19791 = vst [vmem:[#allocation133_spill] sm:$0xff] %v18230_v0  ;;  %v18232_v35 = vpop.f32.mrb[41].mxu1 }
 0x486   : > { %19792 = vst [vmem:[#allocation135_spill] sm:$0xff] %v18232_v35  ;;  %v18234_v4 = vpop.f32.mrb[42].mxu1 }
 0x487   : > { %19793 = vst [vmem:[#allocation140_spill] sm:$0xff] %v18234_v4  ;;  %v18236_v42 = vpop.f32.mrb[43].mxu1  ;;  %v19844_v4 = vld [vmem:[#allocation132_spill] sm:$0xff] }
 0x488   : > { %19794 = vst [vmem:[#allocation142_spill] sm:$0xff] %v18236_v42  ;;  %13839 = vmatmul.mubr.msk.bf16.gmra.mrb[84].mxu0 %vm2035_vm4, %v19795_v21 }
 0x489   : > { %13319 = vmatmul.mubr.msk.bf16.gmra.mrb[84].mxu1 %vm2035_vm4, %v19796_v27  ;;  %13842 = vmatprep.mubr.msk.bf16.mxu0 %vm2035_vm4, %v19797_v41  ;;  %v19811_v27 = vld [vmem:[#allocation175_spill] sm:$0xff] }
 0x48a   : > { %13322 = vmatprep.mubr.msk.bf16.mxu1 %vm2035_vm4, %v19798_v7  ;;  %v19812_v41 = vld [vmem:[#allocation67_spill] sm:$0xff]  ;;  %v19813_v7 = vld [vmem:[#allocation176_spill] sm:$0xff] }
 0x48c   : > { %v18246_v5 = vpop.f32.mrb[44].mxu1 }
 0x48d   : > { %19799 = vst [vmem:[#allocation141_spill] sm:$0xff] %v18246_v5  ;;  %v18248_v2 = vpop.f32.mrb[45].mxu1 }
 0x48e   : > { %19800 = vst [vmem:[#allocation143_spill] sm:$0xff] %v18248_v2  ;;  %v18250_v9 = vpop.f32.mrb[46].mxu1 }
 0x48f   : > { %19801 = vst [vmem:[#allocation148_spill] sm:$0xff] %v18250_v9  ;;  %v18252_v37 = vpop.f32.mrb[47].mxu1 }
 0x490   : > { %19802 = vst [vmem:[#allocation150_spill] sm:$0xff] %v18252_v37  ;;  %13843 = vmatmul.mubr.msk.bf16.gmra.mrb[88].mxu0 %vm2035_vm4, %v19803_v36  ;;  %v19814_v36 = vld [vmem:[#allocation70_spill] sm:$0xff] }
 0x491   : > { %13323 = vmatmul.mubr.msk.bf16.gmra.mrb[88].mxu1 %vm2035_vm4, %v19804_v44  ;;  %13846 = vmatprep.mubr.msk.bf16.mxu0 %vm2035_vm4, %v19805_v51 }
 0x492   : > { %13326 = vmatprep.mubr.msk.bf16.mxu1 %vm2035_vm4, %v19806_v33 }
 0x494   : > { %v18262_v6 = vpop.f32.mrb[48].mxu1 }
 0x495   : > { %19807 = vst [vmem:[#allocation149_spill] sm:$0xff] %v18262_v6  ;;  %v18264_v40 = vpop.f32.mrb[49].mxu1 }
 0x496   : > { %19808 = vst [vmem:[#allocation151_spill] sm:$0xff] %v18264_v40  ;;  %v18266_v61 = vpop.f32.mrb[50].mxu1 }
 0x497   : > { %19809 = vst [vmem:[#allocation156_spill] sm:$0xff] %v18266_v61  ;;  %v18268_v21 = vpop.f32.mrb[51].mxu1 }
 0x498   : > { %19810 = vst [vmem:[#allocation158_spill] sm:$0xff] %v18268_v21  ;;  %13847 = vmatmul.mubr.msk.bf16.gmra.mrb[92].mxu0 %vm2035_vm4, %v19811_v27  ;;  %v19819_v21 = vld [vmem:[#allocation179_spill] sm:$0xff]  ;;  %v19820_v27 = vld [vmem:[#allocation72_spill] sm:$0xff] }
 0x499   : > { %13327 = vmatmul.mubr.msk.bf16.gmra.mrb[92].mxu1 %vm2035_vm4, %v19812_v41  ;;  %13850 = vmatprep.mubr.msk.bf16.mxu0 %vm2035_vm4, %v19813_v7  ;;  %v19821_v41 = vld [vmem:[#allocation180_spill] sm:$0xff]  ;;  %v19822_v7 = vld [vmem:[#allocation73_spill] sm:$0xff] }
 0x49a   : > { %13330 = vmatprep.mubr.msk.bf16.mxu1 %vm2035_vm4, %v19814_v36 }
 0x49c   : > { %v18278_v44 = vpop.f32.mrb[52].mxu1 }
 0x49d   : > { %19815 = vst [vmem:[#allocation157_spill] sm:$0xff] %v18278_v44  ;;  %v18280_v51 = vpop.f32.mrb[53].mxu1 }
 0x49e   : > { %19816 = vst [vmem:[#allocation159_spill] sm:$0xff] %v18280_v51  ;;  %v18282_v33 = vpop.f32.mrb[54].mxu1 }
 0x49f   : > { %19817 = vst [vmem:[#allocation164_spill] sm:$0xff] %v18282_v33  ;;  %v18284_v61 = vpop.f32.mrb[55].mxu1 }
 0x4a0   : > { %19818 = vst [vmem:[#allocation166_spill] sm:$0xff] %v18284_v61  ;;  %13851 = vmatmul.mubr.msk.bf16.gmra.mrb[96].mxu0 %vm2035_vm4, %v19819_v21  ;;  %v19827_v61 = vld [vmem:[#allocation183_spill] sm:$0xff] }
 0x4a1   : > { %13331 = vmatmul.mubr.msk.bf16.gmra.mrb[96].mxu1 %vm2035_vm4, %v19820_v27  ;;  %13854 = vmatprep.mubr.msk.bf16.mxu0 %vm2035_vm4, %v19821_v41  ;;  %v19828_v21 = vld [vmem:[#allocation75_spill] sm:$0xff]  ;;  %v19829_v27 = vld [vmem:[#allocation184_spill] sm:$0xff]  ;;  %v19830_v41 = vld [vmem:[#allocation78_spill] sm:$0xff] }
 0x4a2   : > { %13334 = vmatprep.mubr.msk.bf16.mxu1 %vm2035_vm4, %v19822_v7 }
 0x4a4   : > { %v18294_v36 = vpop.f32.mrb[56].mxu1 }
 0x4a5   : > { %19823 = vst [vmem:[#allocation165_spill] sm:$0xff] %v18294_v36  ;;  %v18296_v44 = vpop.f32.mrb[57].mxu1 }
 0x4a6   : > { %19824 = vst [vmem:[#allocation167_spill] sm:$0xff] %v18296_v44  ;;  %v18298_v51 = vpop.f32.mrb[58].mxu1 }
 0x4a7   : > { %19825 = vst [vmem:[#allocation172_spill] sm:$0xff] %v18298_v51  ;;  %v18300_v33 = vpop.f32.mrb[59].mxu1 }
 0x4a8   : > { %19826 = vst [vmem:[#allocation173_spill] sm:$0xff] %v18300_v33  ;;  %13855 = vmatmul.mubr.msk.bf16.gmra.mrb[100].mxu0 %vm2035_vm4, %v19827_v61  ;;  %v19835_v33 = vld [vmem:[#allocation187_spill] sm:$0xff]  ;;  %v19836_v61 = vld [vmem:[#allocation80_spill] sm:$0xff] }
 0x4a9   : > { %13335 = vmatmul.mubr.msk.bf16.gmra.mrb[100].mxu1 %vm2035_vm4, %v19828_v21  ;;  %13858 = vmatprep.mubr.msk.bf16.mxu0 %vm2035_vm4, %v19829_v27  ;;  %v19837_v21 = vld [vmem:[#allocation188_spill] sm:$0xff]  ;;  %v19838_v27 = vld [vmem:[#allocation81_spill] sm:$0xff] }
 0x4aa   : > { %13338 = vmatprep.mubr.msk.bf16.mxu1 %vm2035_vm4, %v19830_v41 }
 0x4ac   : > { %v18310_v7 = vpop.f32.mrb[60].mxu1 }
 0x4ad   : > { %19831 = vst [vmem:[#allocation99_spill] sm:$0xff] %v18310_v7  ;;  %v18312_v36 = vpop.f32.mrb[61].mxu1 }
 0x4ae   : > { %19832 = vst [vmem:[#allocation98_spill] sm:$0xff] %v18312_v36  ;;  %v18314_v44 = vpop.f32.mrb[62].mxu1 }
 0x4af   : > { %19833 = vst [vmem:[#allocation111_spill] sm:$0xff] %v18314_v44  ;;  %v18316_v51 = vpop.f32.mrb[63].mxu1 }
 0x4b0   : > { %19834 = vst [vmem:[#allocation112_spill] sm:$0xff] %v18316_v51  ;;  %13859 = vmatmul.mubr.msk.bf16.gmra.mrb[104].mxu0 %vm2035_vm4, %v19835_v33 }
 0x4b1   : > { %13339 = vmatmul.mubr.msk.bf16.gmra.mrb[104].mxu1 %vm2035_vm4, %v19836_v61  ;;  %13862 = vmatprep.mubr.msk.bf16.mxu0 %vm2035_vm4, %v19837_v21 }
 0x4b2   : > { %13342 = vmatprep.mubr.msk.bf16.mxu1 %vm2035_vm4, %v19838_v27 }
 0x4b3   : > { %v13756_v41 = vpop.f32.mrb[0].mxu0 }
 0x4b4   : > { %v13884_v36 = vadd.f32 %v13756_v41, %v18070_v13  ;;  %v8968_v44 = vpop.f32.mrb[1].mxu0  ;;  %v19839_v13 = vld [vmem:[#allocation191_spill] sm:$0xff] }
 0x4b5   : > { %v13885_v51 = vadd.f32 %v8968_v44, %v18072_v25  ;;  %v13757_v7 = vpop.f32.mrb[2].mxu0  ;;  %v19840_v41 = vld [vmem:[#allocation83_spill] sm:$0xff] }
 0x4b6   : > { %v12001_v33 = vpack.c.bf16 %v13884_v36, %v13884_v36  ;;  %v13886_v40 = vadd.f32 %v13757_v7, %v18074_v47  ;;  %v8971_v61 = vpop.f32.mrb[3].mxu0  ;;  %v10516_v27 = vmul.f32 %v13884_v36, %v13884_v36 }
 0x4b7   : > { %v11999_v6 = vpack.c.bf16 %v13885_v51, %v13885_v51  ;;  %v10514_v37 = vmul.f32 %v13885_v51, %v13885_v51  ;;  %v13887_v21 = vadd.f32 %v8971_v61, %v18076_v16  ;;  %v10249_v25 = vsel %vm2035_vm4, %v13885_v51, 0.0  ;;  %v19841_v16 = vld [vmem:[#allocation192_spill] sm:$0xff]  ;;  %v19842_v61 = vld [vmem:[#allocation86_spill] sm:$0xff] }
 0x4b8   : > { %10122 = vst.msk [vmem:[%s15281_s24 + $0x8] sm:$0xf] %vm10119_vm9, %v12001_v33  ;;  %v12002_v9 = vpack.c.bf16 %v13886_v40, %v13886_v40  ;;  %13863 = vmatmul.mubr.msk.bf16.gmra.mrb[108].mxu0 %vm2035_vm4, %v19839_v13  ;;  %v10517_v13 = vmul.f32 %v13886_v40, %v13886_v40 }
 0x4b9   : > { %10120 = vst.msk [vmem:[%s15281_s24] sm:$0xf] %vm10119_vm9, %v11999_v6  ;;  %v12000_v44 = vpack.c.bf16 %v13887_v21, %v13887_v21  ;;  %v10250_v47 = vsel %vm2035_vm4, %v13887_v21, 0.0  ;;  %v10515_v7 = vmul.f32 %v13887_v21, %v13887_v21  ;;  %13343 = vmatmul.mubr.msk.bf16.gmra.mrb[108].mxu1 %vm2035_vm4, %v19840_v41  ;;  %13866 = vmatprep.mubr.msk.bf16.mxu0 %vm2035_vm4, %v19841_v16  ;;  %v10252_v6 = vsel %vm2035_vm4, %v13884_v36, 0.0 }
 0x4ba   : > { %10123 = vst.msk [vmem:[%s15281_s24 + $0xc] sm:$0xf] %vm10119_vm9, %v12002_v9  ;;  %v10251_v33 = vadd.f32 %v10250_v47, %v10249_v25  ;;  %13346 = vmatprep.mubr.msk.bf16.mxu1 %vm2035_vm4, %v19842_v61  ;;  %v10642_v51 = vsel %vm2035_vm4, %v10514_v37, 0.0  ;;  %v19843_v9 = vld [vmem:[#allocation125_spill] sm:$0xff]  ;;  %v10645_v47 = vsel %vm2035_vm4, %v10516_v27, 0.0  ;;  %v10254_v36 = vsel %vm2035_vm4, %v13886_v40, 0.0 }
 0x4bb   : > { %10121 = vst.msk [vmem:[%s15281_s24 + $0x4] sm:$0xf] %vm10119_vm9, %v12000_v44  ;;  %v10643_v21 = vsel %vm2035_vm4, %v10515_v7, 0.0  ;;  %v13760_v2 = vpop.f32.mrb[4].mxu0  ;;  %v19309_v44 = vrot.slane %v19844_v4, 5 }
 0x4bc   : > { %v10253_v41 = vadd.f32 %v10252_v6, %v10251_v33  ;;  %v10644_v5 = vadd.f32 %v10643_v21, %v10642_v51  ;;  %v13888_v16 = vadd.f32 %v13760_v2, %v18086_v48  ;;  %v8984_v42 = vpop.f32.mrb[5].mxu0  ;;  %v19308_v48 = vrot.slane %v17671_v43, 5 }
 0x4bd   : > { %v13889_v37 = vadd.f32 %v8984_v42, %v18088_v11  ;;  %v13761_v61 = vpop.f32.mrb[6].mxu0  ;;  %v10647_v2 = vsel %vm2035_vm4, %v10517_v13, 0.0  ;;  %v19846_v13 = vld [vmem:[#allocation88_spill] sm:$0xff] }
 0x4be   : > { %v10255_v7 = vadd.f32 %v10254_v36, %v10253_v41  ;;  %v10646_v35 = vadd.f32 %v10645_v47, %v10644_v5  ;;  %v12005_v33 = vpack.c.bf16 %v13888_v16, %v13888_v16  ;;  %v8987_v6 = vpop.f32.mrb[7].mxu0  ;;  %v13890_v42 = vadd.f32 %v13761_v61, %v18090_v38  ;;  %v19845_v41 = vld [vmem:[#allocation195_spill] sm:$0xff]  ;;  %v19847_v47 = vld [vmem:[#allocation196_spill] sm:$0xff]  ;;  %v19848_v38 = vld [vmem:[#allocation89_spill] sm:$0xff] }
 0x4bf   : > { %v12003_v51 = vpack.c.bf16 %v13889_v37, %v13889_v37  ;;  %v10256_v21 = vsel %vm2035_vm4, %v13889_v37, 0.0  ;;  %v10518_v27 = vmul.f32 %v13889_v37, %v13889_v37  ;;  %v13891_v40 = vadd.f32 %v8987_v6, %v18092_v10  ;;  %v19849_v10 = vld [vmem:[#allocation126_spill] sm:$0xff] }
 0x4c0   : > { %v10648_v25 = vadd.f32 %v10647_v2, %v10646_v35  ;;  %10126 = vst.msk [vmem:[%s15281_s24 + $0x18] sm:$0xf] %vm10119_vm9, %v12005_v33  ;;  %v10257_v11 = vadd.f32 %v10256_v21, %v10255_v7  ;;  %13867 = vmatmul.mubr.msk.bf16.gmra.mrb[112].mxu0 %vm2035_vm4, %v19845_v41  ;;  %v10520_v35 = vmul.f32 %v13888_v16, %v13888_v16  ;;  %v11799_v61 = vrot.slane %v19849_v10, 9 }
 0x4c1   : > { %10124 = vst.msk [vmem:[%s15281_s24 + $0x10] sm:$0xf] %vm10119_vm9, %v12003_v51  ;;  %v10649_v5 = vsel %vm2035_vm4, %v10518_v27, 0.0  ;;  %13347 = vmatmul.mubr.msk.bf16.gmra.mrb[112].mxu1 %vm2035_vm4, %v19846_v13  ;;  %13870 = vmatprep.mubr.msk.bf16.mxu0 %vm2035_vm4, %v19847_v47  ;;  %v12006_v37 = vpack.c.bf16 %v13890_v42, %v13890_v42  ;;  %v12004_v7 = vpack.c.bf16 %v13891_v40, %v13891_v40  ;;  %v10258_v33 = vsel %vm2035_vm4, %v13891_v40, 0.0 }
 0x4c2   : > { %v10650_v36 = vadd.f32 %v10649_v5, %v10648_v25  ;;  %13350 = vmatprep.mubr.msk.bf16.mxu1 %vm2035_vm4, %v19848_v38  ;;  %v10519_v6 = vmul.f32 %v13891_v40, %v13891_v40  ;;  %v19850_v51 = vrot.slane %v19843_v9, 5  ;;  %v10259_v27 = vadd.f32 %v10258_v33, %v10257_v11 }
 0x4c3   : > { %v13764_v2 = vpop.f32.mrb[8].mxu0  ;;  %10127 = vst.msk [vmem:[%s15281_s24 + $0x1c] sm:$0xf] %vm10119_vm9, %v12006_v37  ;;  %v18384_v5 = vrot.slane %v19309_v44, 4  ;;  %v18388_v13 = vrot.slane %v19308_v48, 4  ;;  %v10260_v40 = vsel %vm2035_vm4, %v13888_v16, 0.0  ;;  %v10521_v47 = vmul.f32 %v13890_v42, %v13890_v42 }
 0x4c4   : > { %v8910_v21 = vrot.slane %v19850_v51, 4  ;;  %v13892_v25 = vadd.f32 %v13764_v2, %v18102_v22  ;;  %v9000_v41 = vpop.f32.mrb[9].mxu0  ;;  %10125 = vst.msk [vmem:[%s15281_s24 + $0x14] sm:$0xf] %vm10119_vm9, %v12004_v7  ;;  %v10651_v37 = vsel %vm2035_vm4, %v10519_v6, 0.0  ;;  %v10653_v38 = vsel %vm2035_vm4, %v10520_v35, 0.0 }
 0x4c5   : > { %v13893_v11 = vadd.f32 %v9000_v41, %v18104_v24  ;;  %v13765_v22 = vpop.f32.mrb[10].mxu0  ;;  %v10261_v10 = vadd.f32 %v10260_v40, %v10259_v27  ;;  %v10652_v33 = vadd.f32 %v10651_v37, %v10650_v36  ;;  %v10262_v48 = vsel %vm2035_vm4, %v13890_v42, 0.0  ;;  %v19851_v35 = vld [vmem:[#allocation200_spill] sm:$0xff]  ;;  %v19852_v27 = vld [vmem:[#allocation91_spill] sm:$0xff] }
 0x4c6   : > { %v12009_v2 = vpack.c.bf16 %v13892_v25, %v13892_v25  ;;  %v9003_v51 = vpop.f32.mrb[11].mxu0  ;;  %v13894_v24 = vadd.f32 %v13765_v22, %v18106_v56  ;;  %v10655_v36 = vsel %vm2035_vm4, %v10521_v47, 0.0  ;;  %v19854_v56 = vrot.slane %v19843_v9, 5  ;;  %v19857_v22 = vld [vmem:[#allocation96_spill] sm:$0xff] }
 0x4c7   : > { %v12007_v44 = vpack.c.bf16 %v13893_v11, %v13893_v11  ;;  %v10264_v16 = vsel %vm2035_vm4, %v13893_v11, 0.0  ;;  %v10522_v0 = vmul.f32 %v13893_v11, %v13893_v11  ;;  %v10263_v55 = vadd.f32 %v10262_v48, %v10261_v10  ;;  %v19853_v48 = vld [vmem:[#allocation201_spill] sm:$0xff] }
 0x4c8   : > { %v10654_v7 = vadd.f32 %v10653_v38, %v10652_v33  ;;  %10130 = vst.msk [vmem:[%s15281_s24 + $0x28] sm:$0xf] %vm10119_vm9, %v12009_v2  ;;  %v13895_v6 = vadd.f32 %v9003_v51, %v18108_v15  ;;  %13871 = vmatmul.mubr.msk.bf16.gmra.mrb[116].mxu0 %vm2035_vm4, %v19851_v35  ;;  %v8909_v15 = vsel %vm15726_vm8, %v11799_v61, %v19854_v56  ;;  %v19856_v40 = vrot.slane %v19844_v4, 5 }
 0x4c9   : > { %10128 = vst.msk [vmem:[%s15281_s24 + $0x20] sm:$0xf] %vm10119_vm9, %v12007_v44  ;;  %v10657_v42 = vsel %vm2035_vm4, %v10522_v0, 0.0  ;;  %13351 = vmatmul.mubr.msk.bf16.gmra.mrb[116].mxu1 %vm2035_vm4, %v19852_v27  ;;  %13874 = vmatprep.mubr.msk.bf16.mxu0 %vm2035_vm4, %v19853_v48  ;;  %v10524_v37 = vmul.f32 %v13892_v25, %v13892_v25  ;;  %v10265_v0 = vadd.f32 %v10264_v16, %v10263_v55  ;;  %v8917_v61 = vrot.slane %v17943_v50, 5 }
 0x4ca   : > { %v8912_v47 = vsel %vm15726_vm8, %v8910_v21, %v19856_v40  ;;  %v10656_v44 = vadd.f32 %v10655_v36, %v10654_v7  ;;  %v12010_v11 = vpack.c.bf16 %v13894_v24, %v13894_v24  ;;  %13354 = vmatprep.mubr.msk.bf16.mxu1 %vm2035_vm4, %v19857_v22  ;;  %v12008_v38 = vpack.c.bf16 %v13895_v6, %v13895_v6 }
 0x4cb   : > { %v10266_v10 = vsel %vm2035_vm4, %v13895_v6, 0.0  ;;  %v10523_v9 = vmul.f32 %v13895_v6, %v13895_v6  ;;  %v13768_v33 = vpop.f32.mrb[12].mxu0  ;;  %v11800_v55 = vcombine.low %v8909_v15, %v8912_v47  ;;  %v10268_v16 = vsel %vm2035_vm4, %v13892_v25, 0.0 }
 0x4cc   : > { %v10658_v2 = vadd.f32 %v10657_v42, %v10656_v44  ;;  %10131 = vst.msk [vmem:[%s15281_s24 + $0x2c] sm:$0xf] %vm10119_vm9, %v12010_v11  ;;  %v10267_v4 = vadd.f32 %v10266_v10, %v10265_v0  ;;  %v13896_v21 = vadd.f32 %v13768_v33, %v18118_v34  ;;  %v9016_v51 = vpop.f32.mrb[13].mxu0  ;;  %v10525_v7 = vmul.f32 %v13894_v24, %v13894_v24 }
 0x4cd   : > { %10129 = vst.msk [vmem:[%s15281_s24 + $0x24] sm:$0xf] %vm10119_vm9, %v12008_v38  ;;  %v10659_v35 = vsel %vm2035_vm4, %v10523_v9, 0.0  ;;  %v13897_v6 = vadd.f32 %v9016_v51, %v18120_v57  ;;  %v13769_v36 = vpop.f32.mrb[14].mxu0  ;;  %v10661_v50 = vsel %vm2035_vm4, %v10524_v37, 0.0  ;;  %v10270_v56 = vsel %vm2035_vm4, %v13894_v24, 0.0 }
 0x4ce   : > { %v10269_v42 = vadd.f32 %v10268_v16, %v10267_v4  ;;  %v10660_v27 = vadd.f32 %v10659_v35, %v10658_v2  ;;  %v12013_v48 = vpack.c.bf16 %v13896_v21, %v13896_v21  ;;  %v9019_v34 = vpop.f32.mrb[15].mxu0  ;;  %v13898_v57 = vadd.f32 %v13769_v36, %v18122_v18  ;;  %v19858_v37 = vld [vmem:[#allocation203_spill] sm:$0xff] }
 0x4cf   : > { %v12011_v15 = vpack.c.bf16 %v13897_v6, %v13897_v6  ;;  %v10272_v25 = vsel %vm2035_vm4, %v13897_v6, 0.0  ;;  %v10526_v40 = vmul.f32 %v13897_v6, %v13897_v6  ;;  %v13899_v0 = vadd.f32 %v9019_v34, %v18124_v28 }
 0x4d0   : > { %v10271_v47 = vadd.f32 %v10270_v56, %v10269_v42  ;;  %v10662_v44 = vadd.f32 %v10661_v50, %v10660_v27  ;;  %10134 = vst.msk [vmem:[%s15281_s24 + $0x38] sm:$0xf] %vm10119_vm9, %v12013_v48  ;;  %13875 = vmatmul.mubr.msk.bf16.gmra.mrb[120].mxu0 %vm2035_vm4, %v19858_v37  ;;  %v10663_v11 = vsel %vm2035_vm4, %v10525_v7, 0.0  ;;  %v19859_v22 = vrot.slane %v17671_v43, 5 }
 0x4d1   : > { %10132 = vst.msk [vmem:[%s15281_s24 + $0x30] sm:$0xf] %vm10119_vm9, %v12011_v15  ;;  %v10665_v24 = vsel %vm2035_vm4, %v10526_v40, 0.0  ;;  %13355 = vmatmul.mubr.msk.bf16.gmra.mrb[120].mxu1 %vm2035_vm4, %v19731_v60  ;;  %13878 = vmatprep.mubr.msk.bf16.mxu0 %vm2035_vm4, %v11800_v55  ;;  %v8918_v28 = vsel %vm15726_vm8, %v18388_v13, %v8917_v61  ;;  %v10528_v10 = vmul.f32 %v13896_v21, %v13896_v21  ;;  %v10274_v2 = vsel %vm2035_vm4, %v13899_v0, 0.0 }
 0x4d2   : > { %v8915_v18 = vsel %vm15726_vm8, %v18384_v5, %v19859_v22  ;;  %v10664_v38 = vadd.f32 %v10663_v11, %v10662_v44  ;;  %v10273_v9 = vadd.f32 %v10272_v25, %v10271_v47  ;;  %v12014_v33 = vpack.c.bf16 %v13898_v57, %v13898_v57  ;;  %13358 = vmatprep.mubr.msk.bf16.mxu1 %vm2035_vm4, %v17940_v53 }
 0x4d3   : > { %v12012_v60 = vpack.c.bf16 %v13899_v0, %v13899_v0  ;;  %v10527_v43 = vmul.f32 %v13899_v0, %v13899_v0  ;;  %v13772_v4 = vpop.f32.mrb[16].mxu0  ;;  %v11801_v61 = vcombine.low %v8915_v18, %v8918_v28  ;;  %v10276_v55 = vsel %vm2035_vm4, %v13896_v21, 0.0 }
 0x4d4   : > { %v10666_v51 = vadd.f32 %v10665_v24, %v10664_v38  ;;  %10135 = vst.msk [vmem:[%s15281_s24 + $0x3c] sm:$0xf] %vm10119_vm9, %v12014_v33  ;;  %v10275_v5 = vadd.f32 %v10274_v2, %v10273_v9  ;;  %v13900_v41 = vadd.f32 %v13772_v4, %v18134_v20  ;;  %v9032_v13 = vpop.f32.mrb[17].mxu0  ;;  %v10529_v16 = vmul.f32 %v13898_v57, %v13898_v57 }
 0x4d5   : > { %10133 = vst.msk [vmem:[%s15281_s24 + $0x34] sm:$0xf] %vm10119_vm9, %v12012_v60  ;;  %v10667_v53 = vsel %vm2035_vm4, %v10527_v43, 0.0  ;;  %v13901_v7 = vadd.f32 %v9032_v13, %v18136_v23  ;;  %v13773_v35 = vpop.f32.mrb[18].mxu0  ;;  %v10669_v6 = vsel %vm2035_vm4, %v10528_v10, 0.0  ;;  %v10278_v27 = vsel %vm2035_vm4, %v13898_v57, 0.0 }
 0x4d6   : > { %v10277_v36 = vadd.f32 %v10276_v55, %v10275_v5  ;;  %v10668_v50 = vadd.f32 %v10667_v53, %v10666_v51  ;;  %v12017_v42 = vpack.c.bf16 %v13900_v41, %v13900_v41  ;;  %v9035_v20 = vpop.f32.mrb[19].mxu0  ;;  %v13902_v23 = vadd.f32 %v13773_v35, %v18138_v58 }
 0x4d7   : > { %v12015_v48 = vpack.c.bf16 %v13901_v7, %v13901_v7  ;;  %v10280_v21 = vsel %vm2035_vm4, %v13901_v7, 0.0  ;;  %v10530_v34 = vmul.f32 %v13901_v7, %v13901_v7  ;;  %v13903_v25 = vadd.f32 %v9035_v20, %v18140_v46 }
 0x4d8   : > { %v10279_v56 = vadd.f32 %v10278_v27, %v10277_v36  ;;  %v10670_v15 = vadd.f32 %v10669_v6, %v10668_v50  ;;  %10138 = vst.msk [vmem:[%s15281_s24 + $0x48] sm:$0xf] %vm10119_vm9, %v12017_v42  ;;  %13879 = vmatmul.mubr.msk.bf16.gmra.mrb[124].mxu0 %vm2035_vm4, %v11801_v61  ;;  %v10671_v40 = vsel %vm2035_vm4, %v10529_v16, 0.0  ;;  %v10532_v57 = vmul.f32 %v13900_v41, %v13900_v41 }
 0x4d9   : > { %10136 = vst.msk [vmem:[%s15281_s24 + $0x40] sm:$0xf] %vm10119_vm9, %v12015_v48  ;;  %v10673_v47 = vsel %vm2035_vm4, %v10530_v34, 0.0  ;;  %13359 = vmatmul.mubr.msk.bf16.gmra.mrb[124].mxu1 %vm2035_vm4, %v17962_v31  ;;  %v12018_v37 = vpack.c.bf16 %v13902_v23, %v13902_v23  ;;  %v12016_v58 = vpack.c.bf16 %v13903_v25, %v13903_v25  ;;  %v10282_v11 = vsel %vm2035_vm4, %v13903_v25, 0.0 }
 0x4da   : > { %v10672_v44 = vadd.f32 %v10671_v40, %v10670_v15  ;;  %v10281_v0 = vadd.f32 %v10280_v21, %v10279_v56  ;;  %v10531_v46 = vmul.f32 %v13903_v25, %v13903_v25  ;;  %v10284_v10 = vsel %vm2035_vm4, %v13900_v41, 0.0 }
 0x4db   : > { %v13776_v24 = vpop.f32.mrb[20].mxu0  ;;  %10139 = vst.msk [vmem:[%s15281_s24 + $0x4c] sm:$0xf] %vm10119_vm9, %v12018_v37  ;;  %v10533_v31 = vmul.f32 %v13902_v23, %v13902_v23  ;;  %10137 = vst.msk [vmem:[%s15281_s24 + $0x44] sm:$0xf] %vm10119_vm9, %v12016_v58  ;;  %v10677_v2 = vsel %vm2035_vm4, %v10532_v57, 0.0 }
 0x4dc   : > { %v10674_v22 = vadd.f32 %v10673_v47, %v10672_v44  ;;  %v10283_v18 = vadd.f32 %v10282_v11, %v10281_v0  ;;  %v13904_v28 = vadd.f32 %v13776_v24, %v18150_v30  ;;  %v9048_v38 = vpop.f32.mrb[21].mxu0  ;;  %v10675_v9 = vsel %vm2035_vm4, %v10531_v46, 0.0 }
 0x4dd   : > { %v13905_v33 = vadd.f32 %v9048_v38, %v18152_v8  ;;  %v13777_v60 = vpop.f32.mrb[22].mxu0  ;;  %v10286_v30 = vsel %vm2035_vm4, %v13902_v23, 0.0  ;;  %v10679_v7 = vsel %vm2035_vm4, %v10533_v31, 0.0 }
 0x4de   : > { %v10285_v43 = vadd.f32 %v10284_v10, %v10283_v18  ;;  %v10676_v4 = vadd.f32 %v10675_v9, %v10674_v22  ;;  %v12021_v51 = vpack.c.bf16 %v13904_v28, %v13904_v28  ;;  %v9051_v5 = vpop.f32.mrb[23].mxu0  ;;  %v13906_v8 = vadd.f32 %v13777_v60, %v18154_v39 }
 0x4df   : > { %v12019_v13 = vpack.c.bf16 %v13905_v33, %v13905_v33  ;;  %v10288_v41 = vsel %vm2035_vm4, %v13905_v33, 0.0  ;;  %v10534_v61 = vmul.f32 %v13905_v33, %v13905_v33  ;;  %v13907_v53 = vadd.f32 %v9051_v5, %v18156_v26 }
 0x4e0   : > { %v10287_v55 = vadd.f32 %v10286_v30, %v10285_v43  ;;  %v10678_v16 = vadd.f32 %v10677_v2, %v10676_v4  ;;  %10142 = vst.msk [vmem:[%s15281_s24 + $0x58] sm:$0xf] %vm10119_vm9, %v12021_v51  ;;  %v10536_v36 = vmul.f32 %v13904_v28, %v13904_v28  ;;  %v12022_v42 = vpack.c.bf16 %v13906_v8, %v13906_v8 }
 0x4e1   : > { %10140 = vst.msk [vmem:[%s15281_s24 + $0x50] sm:$0xf] %vm10119_vm9, %v12019_v13  ;;  %v10681_v35 = vsel %vm2035_vm4, %v10534_v61, 0.0  ;;  %v12020_v20 = vpack.c.bf16 %v13907_v53, %v13907_v53  ;;  %v10290_v27 = vsel %vm2035_vm4, %v13907_v53, 0.0  ;;  %v10535_v48 = vmul.f32 %v13907_v53, %v13907_v53 }
 0x4e2   : > { %v10680_v6 = vadd.f32 %v10679_v7, %v10678_v16  ;;  %v10289_v50 = vadd.f32 %v10288_v41, %v10287_v55  ;;  %10143 = vst.msk [vmem:[%s15281_s24 + $0x5c] sm:$0xf] %vm10119_vm9, %v12022_v42  ;;  %v10292_v15 = vsel %vm2035_vm4, %v13904_v28, 0.0  ;;  %v10537_v23 = vmul.f32 %v13906_v8, %v13906_v8 }
 0x4e3   : > { %v13780_v21 = vpop.f32.mrb[24].mxu0  ;;  %10141 = vst.msk [vmem:[%s15281_s24 + $0x54] sm:$0xf] %vm10119_vm9, %v12020_v20  ;;  %v10683_v25 = vsel %vm2035_vm4, %v10535_v48, 0.0  ;;  %v10685_v44 = vsel %vm2035_vm4, %v10536_v36, 0.0 }
 0x4e4   : > { %v10682_v34 = vadd.f32 %v10681_v35, %v10680_v6  ;;  %v10291_v39 = vadd.f32 %v10290_v27, %v10289_v50  ;;  %v13908_v26 = vadd.f32 %v13780_v21, %v18166_v1  ;;  %v9064_v56 = vpop.f32.mrb[25].mxu0  ;;  %v10294_v1 = vsel %vm2035_vm4, %v13906_v8, 0.0 }
 0x4e5   : > { %v13909_v40 = vadd.f32 %v9064_v56, %v18168_v63  ;;  %v13781_v47 = vpop.f32.mrb[26].mxu0  ;;  %v10687_v38 = vsel %vm2035_vm4, %v10537_v23, 0.0 }
 0x4e6   : > { %v10293_v57 = vadd.f32 %v10292_v15, %v10291_v39  ;;  %v10684_v0 = vadd.f32 %v10683_v25, %v10682_v34  ;;  %v12025_v37 = vpack.c.bf16 %v13908_v26, %v13908_v26  ;;  %v9067_v58 = vpop.f32.mrb[27].mxu0  ;;  %v13910_v63 = vadd.f32 %v13781_v47, %v18170_v49 }
 0x4e7   : > { %v12023_v11 = vpack.c.bf16 %v13909_v40, %v13909_v40  ;;  %v10296_v46 = vsel %vm2035_vm4, %v13909_v40, 0.0  ;;  %v10538_v24 = vmul.f32 %v13909_v40, %v13909_v40  ;;  %v13911_v28 = vadd.f32 %v9067_v58, %v18172_v59 }
 0x4e8   : > { %v10295_v22 = vadd.f32 %v10294_v1, %v10293_v57  ;;  %v10686_v18 = vadd.f32 %v10685_v44, %v10684_v0  ;;  %10146 = vst.msk [vmem:[%s15281_s24 + $0x68] sm:$0xf] %vm10119_vm9, %v12025_v37  ;;  %v10540_v9 = vmul.f32 %v13908_v26, %v13908_v26  ;;  %v12026_v60 = vpack.c.bf16 %v13910_v63, %v13910_v63 }
 0x4e9   : > { %10144 = vst.msk [vmem:[%s15281_s24 + $0x60] sm:$0xf] %vm10119_vm9, %v12023_v11  ;;  %v10689_v10 = vsel %vm2035_vm4, %v10538_v24, 0.0  ;;  %v12024_v2 = vpack.c.bf16 %v13911_v28, %v13911_v28  ;;  %v10298_v43 = vsel %vm2035_vm4, %v13911_v28, 0.0  ;;  %v10539_v4 = vmul.f32 %v13911_v28, %v13911_v28 }
 0x4ea   : > { %v10688_v31 = vadd.f32 %v10687_v38, %v10686_v18  ;;  %v10297_v33 = vadd.f32 %v10296_v46, %v10295_v22  ;;  %10147 = vst.msk [vmem:[%s15281_s24 + $0x6c] sm:$0xf] %vm10119_vm9, %v12026_v60  ;;  %v10300_v13 = vsel %vm2035_vm4, %v13908_v26, 0.0  ;;  %v10541_v41 = vmul.f32 %v13910_v63, %v13910_v63 }
 0x4eb   : > { %v13784_v51 = vpop.f32.mrb[28].mxu0  ;;  %10145 = vst.msk [vmem:[%s15281_s24 + $0x64] sm:$0xf] %vm10119_vm9, %v12024_v2  ;;  %v10691_v61 = vsel %vm2035_vm4, %v10539_v4, 0.0  ;;  %v10693_v8 = vsel %vm2035_vm4, %v10540_v9, 0.0 }
 0x4ec   : > { %v10690_v5 = vadd.f32 %v10689_v10, %v10688_v31  ;;  %v10299_v49 = vadd.f32 %v10298_v43, %v10297_v33  ;;  %v13912_v59 = vadd.f32 %v13784_v51, %v18182_v52  ;;  %v9080_v30 = vpop.f32.mrb[29].mxu0  ;;  %v10302_v52 = vsel %vm2035_vm4, %v13910_v63, 0.0 }
 0x4ed   : > { %v13913_v55 = vadd.f32 %v9080_v30, %v18184_v62  ;;  %v13785_v16 = vpop.f32.mrb[30].mxu0  ;;  %v10695_v21 = vsel %vm2035_vm4, %v10541_v41, 0.0 }
 0x4ee   : > { %v10301_v53 = vadd.f32 %v10300_v13, %v10299_v49  ;;  %v10692_v7 = vadd.f32 %v10691_v61, %v10690_v5  ;;  %v12029_v35 = vpack.c.bf16 %v13912_v59, %v13912_v59  ;;  %v9083_v6 = vpop.f32.mrb[31].mxu0  ;;  %v13914_v62 = vadd.f32 %v13785_v16, %v18186_v45 }
 0x4ef   : > { %v12027_v36 = vpack.c.bf16 %v13913_v55, %v13913_v55  ;;  %v10304_v50 = vsel %vm2035_vm4, %v13913_v55, 0.0  ;;  %v10542_v42 = vmul.f32 %v13913_v55, %v13913_v55  ;;  %v13915_v48 = vadd.f32 %v9083_v6, %v18188_v3 }
 0x4f0   : > { %v10303_v20 = vadd.f32 %v10302_v52, %v10301_v53  ;;  %v10694_v27 = vadd.f32 %v10693_v8, %v10692_v7  ;;  %10150 = vst.msk [vmem:[%s15281_s24 + $0x78] sm:$0xf] %vm10119_vm9, %v12029_v35  ;;  %v10544_v26 = vmul.f32 %v13912_v59, %v13912_v59  ;;  %v12030_v15 = vpack.c.bf16 %v13914_v62, %v13914_v62 }
 0x4f1   : > { %10148 = vst.msk [vmem:[%s15281_s24 + $0x70] sm:$0xf] %vm10119_vm9, %v12027_v36  ;;  %v10697_v34 = vsel %vm2035_vm4, %v10542_v42, 0.0  ;;  %v12028_v23 = vpack.c.bf16 %v13915_v48, %v13915_v48  ;;  %v10306_v25 = vsel %vm2035_vm4, %v13915_v48, 0.0  ;;  %v10543_v40 = vmul.f32 %v13915_v48, %v13915_v48 }
 0x4f2   : > { %v10696_v39 = vadd.f32 %v10695_v21, %v10694_v27  ;;  %v10305_v56 = vadd.f32 %v10304_v50, %v10303_v20  ;;  %10151 = vst.msk [vmem:[%s15281_s24 + $0x7c] sm:$0xf] %vm10119_vm9, %v12030_v15  ;;  %v10308_v0 = vsel %vm2035_vm4, %v13912_v59, 0.0  ;;  %v10545_v37 = vmul.f32 %v13914_v62, %v13914_v62  ;;  %v19860_v21 = vld [vmem:[#allocation134_spill] sm:$0xff] }
 0x4f3   : > { %v13788_v47 = vpop.f32.mrb[32].mxu0  ;;  %10149 = vst.msk [vmem:[%s15281_s24 + $0x74] sm:$0xf] %vm10119_vm9, %v12028_v23  ;;  %v10699_v58 = vsel %vm2035_vm4, %v10543_v40, 0.0  ;;  %v10701_v46 = vsel %vm2035_vm4, %v10544_v26, 0.0 }
 0x4f4   : > { %v10698_v44 = vadd.f32 %v10697_v34, %v10696_v39  ;;  %v10307_v45 = vadd.f32 %v10306_v25, %v10305_v56  ;;  %v13916_v3 = vadd.f32 %v13788_v47, %v18198_v32  ;;  %v9096_v57 = vpop.f32.mrb[33].mxu0  ;;  %v10310_v32 = vsel %vm2035_vm4, %v13914_v62, 0.0 }
 0x4f5   : > { %v13917_v1 = vadd.f32 %v9096_v57, %v18200_v19  ;;  %v13789_v11 = vpop.f32.mrb[34].mxu0  ;;  %v10703_v60 = vsel %vm2035_vm4, %v10545_v37, 0.0  ;;  %v19861_v57 = vld [vmem:[#allocation133_spill] sm:$0xff] }
 0x4f6   : > { %v10309_v24 = vadd.f32 %v10308_v0, %v10307_v45  ;;  %v10700_v22 = vadd.f32 %v10699_v58, %v10698_v44  ;;  %v12033_v18 = vpack.c.bf16 %v13916_v3, %v13916_v3  ;;  %v9099_v63 = vpop.f32.mrb[35].mxu0  ;;  %v13918_v19 = vadd.f32 %v13789_v11, %v18202_v29 }
 0x4f7   : > { %v12031_v28 = vpack.c.bf16 %v13917_v1, %v13917_v1  ;;  %v10312_v38 = vsel %vm2035_vm4, %v13917_v1, 0.0  ;;  %v10546_v10 = vmul.f32 %v13917_v1, %v13917_v1  ;;  %v13919_v33 = vadd.f32 %v9099_v63, %v18204_v14 }
 0x4f8   : > { %v10311_v31 = vadd.f32 %v10310_v32, %v10309_v24  ;;  %v10702_v9 = vadd.f32 %v10701_v46, %v10700_v22  ;;  %10154 = vst.msk [vmem:[%s15281_s24 + $0x88] sm:$0xf] %vm10119_vm9, %v12033_v18  ;;  %v10548_v4 = vmul.f32 %v13916_v3, %v13916_v3  ;;  %v12034_v5 = vpack.c.bf16 %v13918_v19, %v13918_v19  ;;  %v19862_v46 = vld [vmem:[#allocation135_spill] sm:$0xff] }
 0x4f9   : > { %10152 = vst.msk [vmem:[%s15281_s24 + $0x80] sm:$0xf] %vm10119_vm9, %v12031_v28  ;;  %v10705_v2 = vsel %vm2035_vm4, %v10546_v10, 0.0  ;;  %v12032_v49 = vpack.c.bf16 %v13919_v33, %v13919_v33  ;;  %v10314_v59 = vsel %vm2035_vm4, %v13919_v33, 0.0  ;;  %v10547_v30 = vmul.f32 %v13919_v33, %v13919_v33 }
 0x4fa   : > { %v10704_v43 = vadd.f32 %v10703_v60, %v10702_v9  ;;  %v10313_v51 = vadd.f32 %v10312_v38, %v10311_v31  ;;  %10155 = vst.msk [vmem:[%s15281_s24 + $0x8c] sm:$0xf] %vm10119_vm9, %v12034_v5  ;;  %v10316_v55 = vsel %vm2035_vm4, %v13916_v3, 0.0  ;;  %v10549_v16 = vmul.f32 %v13918_v19, %v13918_v19 }
 0x4fb   : > { %v13792_v13 = vpop.f32.mrb[36].mxu0  ;;  %10153 = vst.msk [vmem:[%s15281_s24 + $0x84] sm:$0xf] %vm10119_vm9, %v12032_v49  ;;  %v10707_v8 = vsel %vm2035_vm4, %v10547_v30, 0.0  ;;  %v10709_v35 = vsel %vm2035_vm4, %v10548_v4, 0.0  ;;  %v19864_v4 = vld [vmem:[#allocation142_spill] sm:$0xff] }
 0x4fc   : > { %v10706_v41 = vadd.f32 %v10705_v2, %v10704_v43  ;;  %v10315_v29 = vadd.f32 %v10314_v59, %v10313_v51  ;;  %v13920_v14 = vadd.f32 %v13792_v13, %v18214_v12  ;;  %v9112_v61 = vpop.f32.mrb[37].mxu0  ;;  %v10318_v12 = vsel %vm2035_vm4, %v13918_v19, 0.0  ;;  %v19863_v2 = vld [vmem:[#allocation140_spill] sm:$0xff] }
 0x4fd   : > { %v13921_v53 = vadd.f32 %v9112_v61, %v18216_v54  ;;  %v13793_v7 = vpop.f32.mrb[38].mxu0  ;;  %v10711_v39 = vsel %vm2035_vm4, %v10549_v16, 0.0 }
 0x4fe   : > { %v10317_v6 = vadd.f32 %v10316_v55, %v10315_v29  ;;  %v10708_v52 = vadd.f32 %v10707_v8, %v10706_v41  ;;  %v12037_v36 = vpack.c.bf16 %v13920_v14, %v13920_v14  ;;  %v9115_v50 = vpop.f32.mrb[39].mxu0  ;;  %v13922_v54 = vadd.f32 %v13793_v7, %v18218_v17 }
 0x4ff   : > { %v12035_v42 = vpack.c.bf16 %v13921_v53, %v13921_v53  ;;  %v10320_v20 = vsel %vm2035_vm4, %v13921_v53, 0.0  ;;  %v10550_v27 = vmul.f32 %v13921_v53, %v13921_v53  ;;  %v13923_v34 = vadd.f32 %v9115_v50, %v19860_v21  ;;  %v19865_v53 = vld [vmem:[#allocation141_spill] sm:$0xff]  ;;  %v19866_v50 = vld [vmem:[#allocation143_spill] sm:$0xff] }
 0x500   : > { %v10319_v62 = vadd.f32 %v10318_v12, %v10317_v6  ;;  %v10710_v48 = vadd.f32 %v10709_v35, %v10708_v52  ;;  %10158 = vst.msk [vmem:[%s15281_s24 + $0x98] sm:$0xf] %vm10119_vm9, %v12037_v36  ;;  %v10552_v15 = vmul.f32 %v13920_v14, %v13920_v14  ;;  %v12038_v25 = vpack.c.bf16 %v13922_v54, %v13922_v54 }
 0x501   : > { %10156 = vst.msk [vmem:[%s15281_s24 + $0x90] sm:$0xf] %vm10119_vm9, %v12035_v42  ;;  %v10713_v26 = vsel %vm2035_vm4, %v10550_v27, 0.0  ;;  %v12036_v40 = vpack.c.bf16 %v13923_v34, %v13923_v34  ;;  %v10322_v47 = vsel %vm2035_vm4, %v13923_v34, 0.0  ;;  %v10551_v44 = vmul.f32 %v13923_v34, %v13923_v34 }
 0x502   : > { %v10712_v56 = vadd.f32 %v10711_v39, %v10710_v48  ;;  %v10321_v23 = vadd.f32 %v10320_v20, %v10319_v62  ;;  %10159 = vst.msk [vmem:[%s15281_s24 + $0x9c] sm:$0xf] %vm10119_vm9, %v12038_v25  ;;  %v10324_v58 = vsel %vm2035_vm4, %v13920_v14, 0.0  ;;  %v10553_v1 = vmul.f32 %v13922_v54, %v13922_v54 }
 0x503   : > { %v13796_v45 = vpop.f32.mrb[40].mxu0  ;;  %10157 = vst.msk [vmem:[%s15281_s24 + $0x94] sm:$0xf] %vm10119_vm9, %v12036_v40  ;;  %v10715_v11 = vsel %vm2035_vm4, %v10551_v44, 0.0  ;;  %v10717_v18 = vsel %vm2035_vm4, %v10552_v15, 0.0  ;;  %v10326_v10 = vsel %vm2035_vm4, %v13922_v54, 0.0 }
 0x504   : > { %v10714_v3 = vadd.f32 %v10713_v26, %v10712_v56  ;;  %v10323_v17 = vadd.f32 %v10322_v47, %v10321_v23  ;;  %v13924_v0 = vadd.f32 %v13796_v45, %v19861_v57  ;;  %v9128_v37 = vpop.f32.mrb[41].mxu0  ;;  %v10719_v5 = vsel %vm2035_vm4, %v10553_v1, 0.0  ;;  %v19867_v23 = vld [vmem:[#allocation148_spill] sm:$0xff]  ;;  %v19868_v40 = vld [vmem:[#allocation150_spill] sm:$0xff] }
 0x505   : > { %v13925_v24 = vadd.f32 %v9128_v37, %v19862_v46  ;;  %v13797_v22 = vpop.f32.mrb[42].mxu0 }
 0x506   : > { %v10325_v63 = vadd.f32 %v10324_v58, %v10323_v17  ;;  %v10716_v32 = vadd.f32 %v10715_v11, %v10714_v3  ;;  %v12041_v28 = vpack.c.bf16 %v13924_v0, %v13924_v0  ;;  %v9131_v38 = vpop.f32.mrb[43].mxu0  ;;  %v13926_v43 = vadd.f32 %v13797_v22, %v19863_v2  ;;  %v19869_v22 = vld [vmem:[#allocation149_spill] sm:$0xff] }
 0x507   : > { %v12039_v31 = vpack.c.bf16 %v13925_v24, %v13925_v24  ;;  %v10328_v9 = vsel %vm2035_vm4, %v13925_v24, 0.0  ;;  %v10554_v19 = vmul.f32 %v13925_v24, %v13925_v24  ;;  %v13927_v51 = vadd.f32 %v9131_v38, %v19864_v4 }
 0x508   : > { %v10327_v33 = vadd.f32 %v10326_v10, %v10325_v63  ;;  %v10718_v60 = vadd.f32 %v10717_v18, %v10716_v32  ;;  %10162 = vst.msk [vmem:[%s15281_s24 + $0xa8] sm:$0xf] %vm10119_vm9, %v12041_v28  ;;  %v10556_v30 = vmul.f32 %v13924_v0, %v13924_v0  ;;  %v12042_v41 = vpack.c.bf16 %v13926_v43, %v13926_v43  ;;  %v19870_v10 = vld [vmem:[#allocation151_spill] sm:$0xff] }
 0x509   : > { %10160 = vst.msk [vmem:[%s15281_s24 + $0xa0] sm:$0xf] %vm10119_vm9, %v12039_v31  ;;  %v10721_v49 = vsel %vm2035_vm4, %v10554_v19, 0.0  ;;  %v12040_v29 = vpack.c.bf16 %v13927_v51, %v13927_v51  ;;  %v10330_v14 = vsel %vm2035_vm4, %v13927_v51, 0.0  ;;  %v10555_v61 = vmul.f32 %v13927_v51, %v13927_v51 }
 0x50a   : > { %v10720_v59 = vadd.f32 %v10719_v5, %v10718_v60  ;;  %v10329_v13 = vadd.f32 %v10328_v9, %v10327_v33  ;;  %10163 = vst.msk [vmem:[%s15281_s24 + $0xac] sm:$0xf] %vm10119_vm9, %v12042_v41  ;;  %v10332_v6 = vsel %vm2035_vm4, %v13924_v0, 0.0  ;;  %v10557_v52 = vmul.f32 %v13926_v43, %v13926_v43 }
 0x50b   : > { %v13800_v55 = vpop.f32.mrb[44].mxu0  ;;  %10161 = vst.msk [vmem:[%s15281_s24 + $0xa4] sm:$0xf] %vm10119_vm9, %v12040_v29  ;;  %v10723_v36 = vsel %vm2035_vm4, %v10555_v61, 0.0  ;;  %v10725_v20 = vsel %vm2035_vm4, %v10556_v30, 0.0  ;;  %v10334_v21 = vsel %vm2035_vm4, %v13926_v43, 0.0 }
 0x50c   : > { %v10722_v16 = vadd.f32 %v10721_v49, %v10720_v59  ;;  %v10331_v8 = vadd.f32 %v10330_v14, %v10329_v13  ;;  %v13928_v7 = vadd.f32 %v13800_v55, %v19865_v53  ;;  %v9144_v35 = vpop.f32.mrb[45].mxu0  ;;  %v10727_v44 = vsel %vm2035_vm4, %v10557_v52, 0.0  ;;  %v19871_v13 = vld [vmem:[#allocation156_spill] sm:$0xff]  ;;  %v19872_v29 = vld [vmem:[#allocation158_spill] sm:$0xff] }
 0x50d   : > { %v13929_v12 = vadd.f32 %v9144_v35, %v19866_v50  ;;  %v13801_v42 = vpop.f32.mrb[46].mxu0 }
 0x50e   : > { %v10333_v27 = vadd.f32 %v10332_v6, %v10331_v8  ;;  %v10724_v62 = vadd.f32 %v10723_v36, %v10722_v16  ;;  %v12045_v48 = vpack.c.bf16 %v13928_v7, %v13928_v7  ;;  %v9147_v54 = vpop.f32.mrb[47].mxu0  ;;  %v13930_v25 = vadd.f32 %v13801_v42, %v19867_v23  ;;  %v19873_v42 = vld [vmem:[#allocation157_spill] sm:$0xff] }
 0x50f   : > { %v12043_v34 = vpack.c.bf16 %v13929_v12, %v13929_v12  ;;  %v10336_v39 = vsel %vm2035_vm4, %v13929_v12, 0.0  ;;  %v10558_v26 = vmul.f32 %v13929_v12, %v13929_v12  ;;  %v13931_v47 = vadd.f32 %v9147_v54, %v19868_v40 }
 0x510   : > { %v10335_v56 = vadd.f32 %v10334_v21, %v10333_v27  ;;  %v10726_v15 = vadd.f32 %v10725_v20, %v10724_v62  ;;  %10166 = vst.msk [vmem:[%s15281_s24 + $0xb8] sm:$0xf] %vm10119_vm9, %v12045_v48  ;;  %v10560_v17 = vmul.f32 %v13928_v7, %v13928_v7  ;;  %v12046_v0 = vpack.c.bf16 %v13930_v25, %v13930_v25  ;;  %v19874_v21 = vld [vmem:[#allocation159_spill] sm:$0xff] }
 0x511   : > { %10164 = vst.msk [vmem:[%s15281_s24 + $0xb0] sm:$0xf] %vm10119_vm9, %v12043_v34  ;;  %v10729_v45 = vsel %vm2035_vm4, %v10558_v26, 0.0  ;;  %v12044_v37 = vpack.c.bf16 %v13931_v47, %v13931_v47  ;;  %v10338_v58 = vsel %vm2035_vm4, %v13931_v47, 0.0  ;;  %v10559_v1 = vmul.f32 %v13931_v47, %v13931_v47 }
 0x512   : > { %v10728_v3 = vadd.f32 %v10727_v44, %v10726_v15  ;;  %v10337_v57 = vadd.f32 %v10336_v39, %v10335_v56  ;;  %10167 = vst.msk [vmem:[%s15281_s24 + $0xbc] sm:$0xf] %vm10119_vm9, %v12046_v0  ;;  %v10340_v32 = vsel %vm2035_vm4, %v13928_v7, 0.0  ;;  %v10561_v28 = vmul.f32 %v13930_v25, %v13930_v25 }
 0x513   : > { %v13804_v11 = vpop.f32.mrb[48].mxu0  ;;  %10165 = vst.msk [vmem:[%s15281_s24 + $0xb4] sm:$0xf] %vm10119_vm9, %v12044_v37  ;;  %v10731_v38 = vsel %vm2035_vm4, %v10559_v1, 0.0  ;;  %v10733_v19 = vsel %vm2035_vm4, %v10560_v17, 0.0  ;;  %v10342_v4 = vsel %vm2035_vm4, %v13930_v25, 0.0 }
 0x514   : > { %v10730_v46 = vadd.f32 %v10729_v45, %v10728_v3  ;;  %v10339_v24 = vadd.f32 %v10338_v58, %v10337_v57  ;;  %v13932_v18 = vadd.f32 %v13804_v11, %v19869_v22  ;;  %v9160_v63 = vpop.f32.mrb[49].mxu0  ;;  %v10735_v61 = vsel %vm2035_vm4, %v10561_v28, 0.0  ;;  %v19875_v57 = vld [vmem:[#allocation164_spill] sm:$0xff]  ;;  %v19876_v37 = vld [vmem:[#allocation166_spill] sm:$0xff] }
 0x515   : > { %v13933_v31 = vadd.f32 %v9160_v63, %v19870_v10  ;;  %v13805_v9 = vpop.f32.mrb[50].mxu0 }
 0x516   : > { %v10341_v33 = vadd.f32 %v10340_v32, %v10339_v24  ;;  %v10732_v60 = vadd.f32 %v10731_v38, %v10730_v46  ;;  %v12049_v2 = vpack.c.bf16 %v13932_v18, %v13932_v18  ;;  %v9163_v43 = vpop.f32.mrb[51].mxu0  ;;  %v13934_v41 = vadd.f32 %v13805_v9, %v19871_v13  ;;  %v19877_v9 = vld [vmem:[#allocation165_spill] sm:$0xff] }
 0x517   : > { %v12047_v51 = vpack.c.bf16 %v13933_v31, %v13933_v31  ;;  %v10344_v5 = vsel %vm2035_vm4, %v13933_v31, 0.0  ;;  %v10562_v49 = vmul.f32 %v13933_v31, %v13933_v31  ;;  %v13935_v14 = vadd.f32 %v9163_v43, %v19872_v29 }
 0x518   : > { %v10343_v59 = vadd.f32 %v10342_v4, %v10341_v33  ;;  %v10734_v30 = vadd.f32 %v10733_v19, %v10732_v60  ;;  %10170 = vst.msk [vmem:[%s15281_s24 + $0xc8] sm:$0xf] %vm10119_vm9, %v12049_v2  ;;  %v10564_v8 = vmul.f32 %v13932_v18, %v13932_v18  ;;  %v12050_v7 = vpack.c.bf16 %v13934_v41, %v13934_v41  ;;  %v19878_v4 = vld [vmem:[#allocation167_spill] sm:$0xff] }
 0x519   : > { %10168 = vst.msk [vmem:[%s15281_s24 + $0xc0] sm:$0xf] %vm10119_vm9, %v12047_v51  ;;  %v10737_v55 = vsel %vm2035_vm4, %v10562_v49, 0.0  ;;  %v12048_v35 = vpack.c.bf16 %v13935_v14, %v13935_v14  ;;  %v10346_v6 = vsel %vm2035_vm4, %v13935_v14, 0.0  ;;  %v10563_v52 = vmul.f32 %v13935_v14, %v13935_v14 }
 0x51a   : > { %v10736_v16 = vadd.f32 %v10735_v61, %v10734_v30  ;;  %v10345_v53 = vadd.f32 %v10344_v5, %v10343_v59  ;;  %10171 = vst.msk [vmem:[%s15281_s24 + $0xcc] sm:$0xf] %vm10119_vm9, %v12050_v7  ;;  %v10348_v62 = vsel %vm2035_vm4, %v13932_v18, 0.0  ;;  %v10565_v48 = vmul.f32 %v13934_v41, %v13934_v41 }
 0x51b   : > { %v13808_v36 = vpop.f32.mrb[52].mxu0  ;;  %10169 = vst.msk [vmem:[%s15281_s24 + $0xc4] sm:$0xf] %vm10119_vm9, %v12048_v35  ;;  %v10739_v54 = vsel %vm2035_vm4, %v10563_v52, 0.0  ;;  %v10741_v26 = vsel %vm2035_vm4, %v10564_v8, 0.0  ;;  %v10350_v40 = vsel %vm2035_vm4, %v13934_v41, 0.0 }
 0x51c   : > { %v10738_v50 = vadd.f32 %v10737_v55, %v10736_v16  ;;  %v10347_v12 = vadd.f32 %v10346_v6, %v10345_v53  ;;  %v13936_v20 = vadd.f32 %v13808_v36, %v19873_v42  ;;  %v9176_v27 = vpop.f32.mrb[53].mxu0  ;;  %v10743_v1 = vsel %vm2035_vm4, %v10565_v48, 0.0  ;;  %v19879_v53 = vld [vmem:[#allocation172_spill] sm:$0xff]  ;;  %v19880_v35 = vld [vmem:[#allocation173_spill] sm:$0xff] }
 0x51d   : > { %v13937_v34 = vadd.f32 %v9176_v27, %v19874_v21  ;;  %v13809_v39 = vpop.f32.mrb[54].mxu0 }
 0x51e   : > { %v10349_v56 = vadd.f32 %v10348_v62, %v10347_v12  ;;  %v10740_v15 = vadd.f32 %v10739_v54, %v10738_v50  ;;  %v12053_v23 = vpack.c.bf16 %v13936_v20, %v13936_v20  ;;  %v9179_v25 = vpop.f32.mrb[55].mxu0  ;;  %v13938_v0 = vadd.f32 %v13809_v39, %v19875_v57  ;;  %v19881_v39 = vld [vmem:[#allocation99_spill] sm:$0xff] }
 0x51f   : > { %v12051_v47 = vpack.c.bf16 %v13937_v34, %v13937_v34  ;;  %v10352_v44 = vsel %vm2035_vm4, %v13937_v34, 0.0  ;;  %v10566_v45 = vmul.f32 %v13937_v34, %v13937_v34  ;;  %v13939_v58 = vadd.f32 %v9179_v25, %v19876_v37 }
 0x520   : > { %v10351_v3 = vadd.f32 %v10350_v40, %v10349_v56  ;;  %v10742_v17 = vadd.f32 %v10741_v26, %v10740_v15  ;;  %10174 = vst.msk [vmem:[%s15281_s24 + $0xd8] sm:$0xf] %vm10119_vm9, %v12053_v23  ;;  %v10568_v24 = vmul.f32 %v13936_v20, %v13936_v20  ;;  %v12054_v18 = vpack.c.bf16 %v13938_v0, %v13938_v0  ;;  %v19882_v40 = vld [vmem:[#allocation98_spill] sm:$0xff] }
 0x521   : > { %10172 = vst.msk [vmem:[%s15281_s24 + $0xd0] sm:$0xf] %vm10119_vm9, %v12051_v47  ;;  %v10745_v11 = vsel %vm2035_vm4, %v10566_v45, 0.0  ;;  %v12052_v63 = vpack.c.bf16 %v13939_v58, %v13939_v58  ;;  %v10354_v32 = vsel %vm2035_vm4, %v13939_v58, 0.0  ;;  %v10567_v28 = vmul.f32 %v13939_v58, %v13939_v58 }
 0x522   : > { %v10744_v46 = vadd.f32 %v10743_v1, %v10742_v17  ;;  %v10353_v22 = vadd.f32 %v10352_v44, %v10351_v3  ;;  %10175 = vst.msk [vmem:[%s15281_s24 + $0xdc] sm:$0xf] %vm10119_vm9, %v12054_v18  ;;  %v10356_v60 = vsel %vm2035_vm4, %v13936_v20, 0.0  ;;  %v10569_v2 = vmul.f32 %v13938_v0, %v13938_v0 }
 0x523   : > { %v13812_v38 = vpop.f32.mrb[56].mxu0  ;;  %10173 = vst.msk [vmem:[%s15281_s24 + $0xd4] sm:$0xf] %vm10119_vm9, %v12052_v63  ;;  %v10747_v43 = vsel %vm2035_vm4, %v10567_v28, 0.0  ;;  %v10749_v49 = vsel %vm2035_vm4, %v10568_v24, 0.0  ;;  %v10358_v29 = vsel %vm2035_vm4, %v13938_v0, 0.0 }
 0x524   : > { %v10746_v10 = vadd.f32 %v10745_v11, %v10744_v46  ;;  %v10355_v31 = vadd.f32 %v10354_v32, %v10353_v22  ;;  %v13940_v19 = vadd.f32 %v13812_v38, %v19877_v9  ;;  %v9192_v33 = vpop.f32.mrb[57].mxu0  ;;  %v10751_v52 = vsel %vm2035_vm4, %v10569_v2, 0.0  ;;  %v19883_v22 = vld [vmem:[#allocation111_spill] sm:$0xff]  ;;  %v19884_v63 = vld [vmem:[#allocation112_spill] sm:$0xff] }
 0x525   : > { %v13941_v51 = vadd.f32 %v9192_v33, %v19878_v4  ;;  %v13813_v5 = vpop.f32.mrb[58].mxu0 }
 0x526   : > { %v10357_v59 = vadd.f32 %v10356_v60, %v10355_v31  ;;  %v10748_v30 = vadd.f32 %v10747_v43, %v10746_v10  ;;  %v12057_v13 = vpack.c.bf16 %v13940_v19, %v13940_v19  ;;  %v9195_v41 = vpop.f32.mrb[59].mxu0  ;;  %v13942_v7 = vadd.f32 %v13813_v5, %v19879_v53 }
 0x527   : > { %v12055_v14 = vpack.c.bf16 %v13941_v51, %v13941_v51  ;;  %v10360_v61 = vsel %vm2035_vm4, %v13941_v51, 0.0  ;;  %v10570_v55 = vmul.f32 %v13941_v51, %v13941_v51  ;;  %v13943_v6 = vadd.f32 %v9195_v41, %v19880_v35 }
 0x528   : > { %v10359_v16 = vadd.f32 %v10358_v29, %v10357_v59  ;;  %v10750_v8 = vadd.f32 %v10749_v49, %v10748_v30  ;;  %10178 = vst.msk [vmem:[%s15281_s24 + $0xe8] sm:$0xf] %vm10119_vm9, %v12057_v13  ;;  %v10572_v12 = vmul.f32 %v13940_v19, %v13940_v19  ;;  %v12058_v20 = vpack.c.bf16 %v13942_v7, %v13942_v7 }
 0x529   : > { %10176 = vst.msk [vmem:[%s15281_s24 + $0xe0] sm:$0xf] %vm10119_vm9, %v12055_v14  ;;  %v10753_v36 = vsel %vm2035_vm4, %v10570_v55, 0.0  ;;  %v12056_v27 = vpack.c.bf16 %v13943_v6, %v13943_v6  ;;  %v10362_v62 = vsel %vm2035_vm4, %v13943_v6, 0.0  ;;  %v10571_v48 = vmul.f32 %v13943_v6, %v13943_v6 }
 0x52a   : > { %v10752_v50 = vadd.f32 %v10751_v52, %v10750_v8  ;;  %v10361_v42 = vadd.f32 %v10360_v61, %v10359_v16  ;;  %10179 = vst.msk [vmem:[%s15281_s24 + $0xec] sm:$0xf] %vm10119_vm9, %v12058_v20  ;;  %v10364_v15 = vsel %vm2035_vm4, %v13940_v19, 0.0  ;;  %v10573_v23 = vmul.f32 %v13942_v7, %v13942_v7 }
 0x52b   : > { %v13816_v54 = vpop.f32.mrb[60].mxu0  ;;  %10177 = vst.msk [vmem:[%s15281_s24 + $0xe4] sm:$0xf] %vm10119_vm9, %v12056_v27  ;;  %v10755_v25 = vsel %vm2035_vm4, %v10571_v48, 0.0  ;;  %v10757_v45 = vsel %vm2035_vm4, %v10572_v12, 0.0  ;;  %v10366_v37 = vsel %vm2035_vm4, %v13942_v7, 0.0 }
 0x52c   : > { %v10754_v21 = vadd.f32 %v10753_v36, %v10752_v50  ;;  %v10363_v34 = vadd.f32 %v10362_v62, %v10361_v42  ;;  %v13944_v26 = vadd.f32 %v13816_v54, %v19881_v39  ;;  %v9208_v56 = vpop.f32.mrb[61].mxu0  ;;  %v10759_v28 = vsel %vm2035_vm4, %v10573_v23, 0.0 }
 0x52d   : > { %v13945_v47 = vadd.f32 %v9208_v56, %v19882_v40  ;;  %v13817_v44 = vpop.f32.mrb[62].mxu0 }
 0x52e   : > { %v10365_v3 = vadd.f32 %v10364_v15, %v10363_v34  ;;  %v10756_v17 = vadd.f32 %v10755_v25, %v10754_v21  ;;  %v12061_v57 = vpack.c.bf16 %v13944_v26, %v13944_v26  ;;  %v9211_v0 = vpop.f32.mrb[63].mxu0  ;;  %v13946_v18 = vadd.f32 %v13817_v44, %v19883_v22 }
 0x52f   : > { %v12059_v58 = vpack.c.bf16 %v13945_v47, %v13945_v47  ;;  %v10368_v1 = vsel %vm2035_vm4, %v13945_v47, 0.0  ;;  %v10574_v11 = vmul.f32 %v13945_v47, %v13945_v47  ;;  %v13947_v32 = vadd.f32 %v9211_v0, %v19884_v63 }
 0x530   : > { %v10367_v46 = vadd.f32 %v10366_v37, %v10365_v3  ;;  %v10758_v24 = vadd.f32 %v10757_v45, %v10756_v17  ;;  %10182 = vst.msk [vmem:[%s15281_s24 + $0xf8] sm:$0xf] %vm10119_vm9, %v12061_v57  ;;  %v12062_v9 = vpack.c.bf16 %v13946_v18, %v13946_v18  ;;  %v10576_v19 = vmul.f32 %v13944_v26, %v13944_v26 }
 0x531   : > { %10180 = vst.msk [vmem:[%s15281_s24 + $0xf0] sm:$0xf] %vm10119_vm9, %v12059_v58  ;;  %v10761_v38 = vsel %vm2035_vm4, %v10574_v11, 0.0  ;;  %v12060_v33 = vpack.c.bf16 %v13947_v32, %v13947_v32  ;;  %v10370_v60 = vsel %vm2035_vm4, %v13947_v32, 0.0  ;;  %v10575_v2 = vmul.f32 %v13947_v32, %v13947_v32 }
 0x532   : > { %v10760_v10 = vadd.f32 %v10759_v28, %v10758_v24  ;;  %v10369_v31 = vadd.f32 %v10368_v1, %v10367_v46  ;;  %10183 = vst.msk [vmem:[%s15281_s24 + $0xfc] sm:$0xf] %vm10119_vm9, %v12062_v9  ;;  %v10372_v59 = vsel %vm2035_vm4, %v13944_v26, 0.0  ;;  %v10577_v30 = vmul.f32 %v13946_v18, %v13946_v18 }
 0x533   : > { %v13820_v43 = vpop.f32.mrb[64].mxu0  ;;  %10181 = vst.msk [vmem:[%s15281_s24 + $0xf4] sm:$0xf] %vm10119_vm9, %v12060_v33  ;;  %v10763_v13 = vsel %vm2035_vm4, %v10575_v2, 0.0  ;;  %v10765_v7 = vsel %vm2035_vm4, %v10576_v19, 0.0  ;;  %v10374_v35 = vsel %vm2035_vm4, %v13946_v18, 0.0 }
 0x534   : > { %v10762_v4 = vadd.f32 %v10761_v38, %v10760_v10  ;;  %v10371_v51 = vadd.f32 %v10370_v60, %v10369_v31  ;;  %v13300_v5 = vpop.f32.mrb[64].mxu1  ;;  %v9224_v49 = vpop.f32.mrb[65].mxu0  ;;  %v10767_v27 = vsel %vm2035_vm4, %v10577_v30, 0.0 }
 0x535   : > { %v13948_v41 = vadd.f32 %v13820_v43, %v13300_v5  ;;  %v6392_v29 = vpop.f32.mrb[65].mxu1  ;;  %v13821_v14 = vpop.f32.mrb[66].mxu0 }
 0x536   : > { %v10373_v61 = vadd.f32 %v10372_v59, %v10371_v51  ;;  %v10764_v55 = vadd.f32 %v10763_v13, %v10762_v4  ;;  %v13949_v16 = vadd.f32 %v9224_v49, %v6392_v29  ;;  %v13301_v8 = vpop.f32.mrb[66].mxu1  ;;  %v9227_v53 = vpop.f32.mrb[67].mxu0 }
 0x537   : > { %v12065_v6 = vpack.c.bf16 %v13948_v41, %v13948_v41  ;;  %v13950_v52 = vadd.f32 %v13821_v14, %v13301_v8  ;;  %v6395_v36 = vpop.f32.mrb[67].mxu1  ;;  %v10580_v21 = vmul.f32 %v13948_v41, %v13948_v41  ;;  %v10380_v0 = vsel %vm2035_vm4, %v13948_v41, 0.0 }
 0x538   : > { %v10375_v50 = vadd.f32 %v10374_v35, %v10373_v61  ;;  %v10766_v12 = vadd.f32 %v10765_v7, %v10764_v55  ;;  %v12063_v42 = vpack.c.bf16 %v13949_v16, %v13949_v16  ;;  %v10376_v20 = vsel %vm2035_vm4, %v13949_v16, 0.0 }
 0x539   : > { %10186 = vst.msk [vmem:[%s15281_s24 + $0x108] sm:$0xf] %vm10119_vm9, %v12065_v6  ;;  %v10578_v62 = vmul.f32 %v13949_v16, %v13949_v16  ;;  %v12066_v48 = vpack.c.bf16 %v13950_v52, %v13950_v52  ;;  %v13951_v39 = vadd.f32 %v9227_v53, %v6395_v36  ;;  %v10773_v37 = vsel %vm2035_vm4, %v10580_v21, 0.0 }
 0x53a   : > { %v10768_v54 = vadd.f32 %v10767_v27, %v10766_v12  ;;  %10184 = vst.msk [vmem:[%s15281_s24 + $0x100] sm:$0xf] %vm10119_vm9, %v12063_v42  ;;  %v10377_v34 = vadd.f32 %v10376_v20, %v10375_v50  ;;  %v10581_v46 = vmul.f32 %v13950_v52, %v13950_v52  ;;  %v10382_v32 = vsel %vm2035_vm4, %v13950_v52, 0.0 }
 0x53b   : > { %v10769_v26 = vsel %vm2035_vm4, %v10578_v62, 0.0  ;;  %10187 = vst.msk [vmem:[%s15281_s24 + $0x10c] sm:$0xf] %vm10119_vm9, %v12066_v48  ;;  %v13824_v56 = vpop.f32.mrb[68].mxu0  ;;  %v12064_v23 = vpack.c.bf16 %v13951_v39, %v13951_v39  ;;  %v10378_v25 = vsel %vm2035_vm4, %v13951_v39, 0.0  ;;  %v10579_v45 = vmul.f32 %v13951_v39, %v13951_v39 }
 0x53c   : > { %v10770_v15 = vadd.f32 %v10769_v26, %v10768_v54  ;;  %v13304_v40 = vpop.f32.mrb[68].mxu1  ;;  %v9240_v47 = vpop.f32.mrb[69].mxu0  ;;  %v10379_v44 = vadd.f32 %v10378_v25, %v10377_v34  ;;  %v10775_v43 = vsel %vm2035_vm4, %v10581_v46, 0.0 }
 0x53d   : > { %v13952_v3 = vadd.f32 %v13824_v56, %v13304_v40  ;;  %v6408_v17 = vpop.f32.mrb[69].mxu1  ;;  %v13825_v57 = vpop.f32.mrb[70].mxu0  ;;  %10185 = vst.msk [vmem:[%s15281_s24 + $0x104] sm:$0xf] %vm10119_vm9, %v12064_v23  ;;  %v10771_v22 = vsel %vm2035_vm4, %v10579_v45, 0.0 }
 0x53e   : > { %v13953_v58 = vadd.f32 %v9240_v47, %v6408_v17  ;;  %v13305_v1 = vpop.f32.mrb[70].mxu1  ;;  %v9243_v11 = vpop.f32.mrb[71].mxu0  ;;  %v10381_v24 = vadd.f32 %v10380_v0, %v10379_v44  ;;  %v10772_v28 = vadd.f32 %v10771_v22, %v10770_v15 }
 0x53f   : > { %v12069_v18 = vpack.c.bf16 %v13952_v3, %v13952_v3  ;;  %v6411_v63 = vpop.f32.mrb[71].mxu1  ;;  %v13954_v19 = vadd.f32 %v13825_v57, %v13305_v1  ;;  %v10584_v2 = vmul.f32 %v13952_v3, %v13952_v3  ;;  %v10388_v53 = vsel %vm2035_vm4, %v13952_v3, 0.0 }
 0x540   : > { %v12067_v38 = vpack.c.bf16 %v13953_v58, %v13953_v58  ;;  %v10384_v10 = vsel %vm2035_vm4, %v13953_v58, 0.0  ;;  %v10383_v31 = vadd.f32 %v10382_v32, %v10381_v24  ;;  %v10582_v9 = vmul.f32 %v13953_v58, %v13953_v58 }
 0x541   : > { %10190 = vst.msk [vmem:[%s15281_s24 + $0x118] sm:$0xf] %vm10119_vm9, %v12069_v18  ;;  %v13955_v33 = vadd.f32 %v9243_v11, %v6411_v63  ;;  %v10774_v60 = vadd.f32 %v10773_v37, %v10772_v28  ;;  %v12070_v5 = vpack.c.bf16 %v13954_v19, %v13954_v19  ;;  %v10781_v7 = vsel %vm2035_vm4, %v10584_v2, 0.0 }
 0x542   : > { %10188 = vst.msk [vmem:[%s15281_s24 + $0x110] sm:$0xf] %vm10119_vm9, %v12067_v38  ;;  %v10385_v4 = vadd.f32 %v10384_v10, %v10383_v31  ;;  %v10777_v51 = vsel %vm2035_vm4, %v10582_v9, 0.0  ;;  %v10585_v50 = vmul.f32 %v13954_v19, %v13954_v19  ;;  %v10390_v62 = vsel %vm2035_vm4, %v13954_v19, 0.0 }
 0x543   : > { %v13828_v49 = vpop.f32.mrb[72].mxu0  ;;  %v10776_v59 = vadd.f32 %v10775_v43, %v10774_v60  ;;  %v12068_v30 = vpack.c.bf16 %v13955_v33, %v13955_v33  ;;  %v10386_v13 = vsel %vm2035_vm4, %v13955_v33, 0.0  ;;  %10191 = vst.msk [vmem:[%s15281_s24 + $0x11c] sm:$0xf] %vm10119_vm9, %v12070_v5  ;;  %v10583_v61 = vmul.f32 %v13955_v33, %v13955_v33 }
 0x544   : > { %v13308_v41 = vpop.f32.mrb[72].mxu1  ;;  %v9256_v29 = vpop.f32.mrb[73].mxu0  ;;  %v10387_v14 = vadd.f32 %v10386_v13, %v10385_v4  ;;  %v10783_v25 = vsel %vm2035_vm4, %v10585_v50, 0.0 }
 0x545   : > { %v13956_v55 = vadd.f32 %v13828_v49, %v13308_v41  ;;  %v6424_v16 = vpop.f32.mrb[73].mxu1  ;;  %v13829_v8 = vpop.f32.mrb[74].mxu0  ;;  %v10778_v35 = vadd.f32 %v10777_v51, %v10776_v59  ;;  %10189 = vst.msk [vmem:[%s15281_s24 + $0x114] sm:$0xf] %vm10119_vm9, %v12068_v30  ;;  %v10779_v42 = vsel %vm2035_vm4, %v10583_v61, 0.0 }
 0x546   : > { %v13957_v6 = vadd.f32 %v9256_v29, %v6424_v16  ;;  %v13309_v52 = vpop.f32.mrb[74].mxu1  ;;  %v9259_v36 = vpop.f32.mrb[75].mxu0  ;;  %v10389_v12 = vadd.f32 %v10388_v53, %v10387_v14 }
 0x547   : > { %v12073_v20 = vpack.c.bf16 %v13956_v55, %v13956_v55  ;;  %v6427_v27 = vpop.f32.mrb[75].mxu1  ;;  %v10780_v48 = vadd.f32 %v10779_v42, %v10778_v35  ;;  %v13958_v26 = vadd.f32 %v13829_v8, %v13309_v52  ;;  %v10588_v23 = vmul.f32 %v13956_v55, %v13956_v55 }
 0x548   : > { %v12071_v54 = vpack.c.bf16 %v13957_v6, %v13957_v6  ;;  %v10392_v21 = vsel %vm2035_vm4, %v13957_v6, 0.0  ;;  %v10391_v34 = vadd.f32 %v10390_v62, %v10389_v12  ;;  %v10586_v39 = vmul.f32 %v13957_v6, %v13957_v6 }
 0x549   : > { %10194 = vst.msk [vmem:[%s15281_s24 + $0x128] sm:$0xf] %vm10119_vm9, %v12073_v20  ;;  %v13959_v56 = vadd.f32 %v9259_v36, %v6427_v27  ;;  %v10782_v15 = vadd.f32 %v10781_v7, %v10780_v48  ;;  %v12074_v44 = vpack.c.bf16 %v13958_v26, %v13958_v26  ;;  %v10396_v22 = vsel %vm2035_vm4, %v13956_v55, 0.0 }
 0x54a   : > { %10192 = vst.msk [vmem:[%s15281_s24 + $0x120] sm:$0xf] %vm10119_vm9, %v12071_v54  ;;  %v10393_v40 = vadd.f32 %v10392_v21, %v10391_v34  ;;  %v10785_v47 = vsel %vm2035_vm4, %v10586_v39, 0.0  ;;  %v10789_v18 = vsel %vm2035_vm4, %v10588_v23, 0.0  ;;  %v10589_v10 = vmul.f32 %v13958_v26, %v13958_v26 }
 0x54b   : > { %v13832_v45 = vpop.f32.mrb[76].mxu0  ;;  %v10784_v3 = vadd.f32 %v10783_v25, %v10782_v15  ;;  %v12072_v17 = vpack.c.bf16 %v13959_v56, %v13959_v56  ;;  %v10394_v57 = vsel %vm2035_vm4, %v13959_v56, 0.0  ;;  %10195 = vst.msk [vmem:[%s15281_s24 + $0x12c] sm:$0xf] %vm10119_vm9, %v12074_v44  ;;  %v10587_v1 = vmul.f32 %v13959_v56, %v13959_v56 }
 0x54c   : > { %v13312_v0 = vpop.f32.mrb[76].mxu1  ;;  %v9272_v37 = vpop.f32.mrb[77].mxu0  ;;  %v10395_v58 = vadd.f32 %v10394_v57, %v10393_v40  ;;  %v10398_v60 = vsel %vm2035_vm4, %v13958_v26, 0.0  ;;  %v10791_v41 = vsel %vm2035_vm4, %v10589_v10, 0.0 }
 0x54d   : > { %v13960_v11 = vadd.f32 %v13832_v45, %v13312_v0  ;;  %v6440_v46 = vpop.f32.mrb[77].mxu1  ;;  %v13833_v24 = vpop.f32.mrb[78].mxu0  ;;  %v10786_v63 = vadd.f32 %v10785_v47, %v10784_v3  ;;  %10193 = vst.msk [vmem:[%s15281_s24 + $0x124] sm:$0xf] %vm10119_vm9, %v12072_v17  ;;  %v10787_v9 = vsel %vm2035_vm4, %v10587_v1, 0.0 }
 0x54e   : > { %v13961_v32 = vadd.f32 %v9272_v37, %v6440_v46  ;;  %v13313_v28 = vpop.f32.mrb[78].mxu1  ;;  %v9275_v38 = vpop.f32.mrb[79].mxu0  ;;  %v10397_v31 = vadd.f32 %v10396_v22, %v10395_v58 }
 0x54f   : > { %v12077_v19 = vpack.c.bf16 %v13960_v11, %v13960_v11  ;;  %v6443_v33 = vpop.f32.mrb[79].mxu1  ;;  %v10788_v2 = vadd.f32 %v10787_v9, %v10786_v63  ;;  %v13962_v49 = vadd.f32 %v13833_v24, %v13313_v28  ;;  %v10592_v13 = vmul.f32 %v13960_v11, %v13960_v11 }
 0x550   : > { %v12075_v43 = vpack.c.bf16 %v13961_v32, %v13961_v32  ;;  %v10400_v4 = vsel %vm2035_vm4, %v13961_v32, 0.0  ;;  %v10399_v51 = vadd.f32 %v10398_v60, %v10397_v31  ;;  %v10590_v5 = vmul.f32 %v13961_v32, %v13961_v32 }
 0x551   : > { %10198 = vst.msk [vmem:[%s15281_s24 + $0x138] sm:$0xf] %vm10119_vm9, %v12077_v19  ;;  %v13963_v59 = vadd.f32 %v9275_v38, %v6443_v33  ;;  %v10790_v30 = vadd.f32 %v10789_v18, %v10788_v2  ;;  %v12078_v61 = vpack.c.bf16 %v13962_v49, %v13962_v49  ;;  %v10404_v42 = vsel %vm2035_vm4, %v13960_v11, 0.0 }
 0x552   : > { %10196 = vst.msk [vmem:[%s15281_s24 + $0x130] sm:$0xf] %vm10119_vm9, %v12075_v43  ;;  %v10401_v29 = vadd.f32 %v10400_v4, %v10399_v51  ;;  %v10793_v14 = vsel %vm2035_vm4, %v10590_v5, 0.0  ;;  %v10797_v20 = vsel %vm2035_vm4, %v10592_v13, 0.0  ;;  %v10593_v21 = vmul.f32 %v13962_v49, %v13962_v49 }
 0x553   : > { %v13836_v55 = vpop.f32.mrb[80].mxu0  ;;  %v10792_v16 = vadd.f32 %v10791_v41, %v10790_v30  ;;  %v12076_v8 = vpack.c.bf16 %v13963_v59, %v13963_v59  ;;  %v10402_v53 = vsel %vm2035_vm4, %v13963_v59, 0.0  ;;  %10199 = vst.msk [vmem:[%s15281_s24 + $0x13c] sm:$0xf] %vm10119_vm9, %v12078_v61  ;;  %v10591_v52 = vmul.f32 %v13963_v59, %v13963_v59 }
 0x554   : > { %v13316_v7 = vpop.f32.mrb[80].mxu1  ;;  %v9288_v35 = vpop.f32.mrb[81].mxu0  ;;  %v10403_v6 = vadd.f32 %v10402_v53, %v10401_v29  ;;  %v10406_v15 = vsel %vm2035_vm4, %v13962_v49, 0.0  ;;  %v10799_v0 = vsel %vm2035_vm4, %v10593_v21, 0.0 }
 0x555   : > { %v13964_v36 = vadd.f32 %v13836_v55, %v13316_v7  ;;  %v6456_v50 = vpop.f32.mrb[81].mxu1  ;;  %v13837_v12 = vpop.f32.mrb[82].mxu0  ;;  %v10794_v27 = vadd.f32 %v10793_v14, %v10792_v16  ;;  %10197 = vst.msk [vmem:[%s15281_s24 + $0x134] sm:$0xf] %vm10119_vm9, %v12076_v8  ;;  %v10795_v39 = vsel %vm2035_vm4, %v10591_v52, 0.0 }
 0x556   : > { %v13965_v62 = vadd.f32 %v9288_v35, %v6456_v50  ;;  %v13317_v48 = vpop.f32.mrb[82].mxu1  ;;  %v9291_v54 = vpop.f32.mrb[83].mxu0  ;;  %v10405_v34 = vadd.f32 %v10404_v42, %v10403_v6 }
 0x557   : > { %v12081_v26 = vpack.c.bf16 %v13964_v36, %v13964_v36  ;;  %v6459_v56 = vpop.f32.mrb[83].mxu1  ;;  %v10796_v23 = vadd.f32 %v10795_v39, %v10794_v27  ;;  %v13966_v45 = vadd.f32 %v13837_v12, %v13317_v48  ;;  %v10596_v57 = vmul.f32 %v13964_v36, %v13964_v36 }
 0x558   : > { %v12079_v25 = vpack.c.bf16 %v13965_v62, %v13965_v62  ;;  %v10408_v40 = vsel %vm2035_vm4, %v13965_v62, 0.0  ;;  %v10407_v47 = vadd.f32 %v10406_v15, %v10405_v34  ;;  %v10594_v44 = vmul.f32 %v13965_v62, %v13965_v62 }
 0x559   : > { %10202 = vst.msk [vmem:[%s15281_s24 + $0x148] sm:$0xf] %vm10119_vm9, %v12081_v26  ;;  %v13967_v3 = vadd.f32 %v9291_v54, %v6459_v56  ;;  %v10798_v17 = vadd.f32 %v10797_v20, %v10796_v23  ;;  %v12082_v1 = vpack.c.bf16 %v13966_v45, %v13966_v45  ;;  %v10412_v9 = vsel %vm2035_vm4, %v13964_v36, 0.0 }
 0x55a   : > { %10200 = vst.msk [vmem:[%s15281_s24 + $0x140] sm:$0xf] %vm10119_vm9, %v12079_v25  ;;  %v10409_v37 = vadd.f32 %v10408_v40, %v10407_v47  ;;  %v10801_v58 = vsel %vm2035_vm4, %v10594_v44, 0.0  ;;  %v10805_v19 = vsel %vm2035_vm4, %v10596_v57, 0.0  ;;  %v10597_v4 = vmul.f32 %v13966_v45, %v13966_v45 }
 0x55b   : > { %v13840_v11 = vpop.f32.mrb[84].mxu0  ;;  %v10800_v46 = vadd.f32 %v10799_v0, %v10798_v17  ;;  %v12080_v24 = vpack.c.bf16 %v13967_v3, %v13967_v3  ;;  %v10410_v22 = vsel %vm2035_vm4, %v13967_v3, 0.0  ;;  %10203 = vst.msk [vmem:[%s15281_s24 + $0x14c] sm:$0xf] %vm10119_vm9, %v12082_v1  ;;  %v10595_v28 = vmul.f32 %v13967_v3, %v13967_v3 }
 0x55c   : > { %v13320_v18 = vpop.f32.mrb[84].mxu1  ;;  %v9304_v63 = vpop.f32.mrb[85].mxu0  ;;  %v10411_v32 = vadd.f32 %v10410_v22, %v10409_v37  ;;  %v10414_v30 = vsel %vm2035_vm4, %v13966_v45, 0.0  ;;  %v10807_v7 = vsel %vm2035_vm4, %v10597_v4, 0.0 }
 0x55d   : > { %v13968_v38 = vadd.f32 %v13840_v11, %v13320_v18  ;;  %v6472_v10 = vpop.f32.mrb[85].mxu1  ;;  %v13841_v31 = vpop.f32.mrb[86].mxu0  ;;  %v10802_v33 = vadd.f32 %v10801_v58, %v10800_v46  ;;  %10201 = vst.msk [vmem:[%s15281_s24 + $0x144] sm:$0xf] %vm10119_vm9, %v12080_v24  ;;  %v10803_v5 = vsel %vm2035_vm4, %v10595_v28, 0.0 }
 0x55e   : > { %v13969_v60 = vadd.f32 %v9304_v63, %v6472_v10  ;;  %v13321_v2 = vpop.f32.mrb[86].mxu1  ;;  %v9307_v43 = vpop.f32.mrb[87].mxu0  ;;  %v10413_v51 = vadd.f32 %v10412_v9, %v10411_v32 }
 0x55f   : > { %v12085_v49 = vpack.c.bf16 %v13968_v38, %v13968_v38  ;;  %v6475_v59 = vpop.f32.mrb[87].mxu1  ;;  %v10804_v13 = vadd.f32 %v10803_v5, %v10802_v33  ;;  %v13970_v55 = vadd.f32 %v13841_v31, %v13321_v2  ;;  %v10600_v53 = vmul.f32 %v13968_v38, %v13968_v38 }
 0x560   : > { %v12083_v41 = vpack.c.bf16 %v13969_v60, %v13969_v60  ;;  %v10416_v29 = vsel %vm2035_vm4, %v13969_v60, 0.0  ;;  %v10415_v14 = vadd.f32 %v10414_v30, %v10413_v51  ;;  %v10598_v61 = vmul.f32 %v13969_v60, %v13969_v60 }
 0x561   : > { %10206 = vst.msk [vmem:[%s15281_s24 + $0x158] sm:$0xf] %vm10119_vm9, %v12085_v49  ;;  %v13971_v16 = vadd.f32 %v9307_v43, %v6475_v59  ;;  %v10806_v8 = vadd.f32 %v10805_v19, %v10804_v13  ;;  %v12086_v52 = vpack.c.bf16 %v13970_v55, %v13970_v55  ;;  %v10420_v39 = vsel %vm2035_vm4, %v13968_v38, 0.0 }
 0x562   : > { %10204 = vst.msk [vmem:[%s15281_s24 + $0x150] sm:$0xf] %vm10119_vm9, %v12083_v41  ;;  %v10417_v35 = vadd.f32 %v10416_v29, %v10415_v14  ;;  %v10809_v6 = vsel %vm2035_vm4, %v10598_v61, 0.0  ;;  %v10813_v26 = vsel %vm2035_vm4, %v10600_v53, 0.0  ;;  %v10601_v40 = vmul.f32 %v13970_v55, %v13970_v55 }
 0x563   : > { %v13844_v36 = vpop.f32.mrb[88].mxu0  ;;  %v10808_v50 = vadd.f32 %v10807_v7, %v10806_v8  ;;  %v12084_v12 = vpack.c.bf16 %v13971_v16, %v13971_v16  ;;  %v10418_v42 = vsel %vm2035_vm4, %v13971_v16, 0.0  ;;  %10207 = vst.msk [vmem:[%s15281_s24 + $0x15c] sm:$0xf] %vm10119_vm9, %v12086_v52  ;;  %v10599_v48 = vmul.f32 %v13971_v16, %v13971_v16 }
 0x564   : > { %v13324_v20 = vpop.f32.mrb[88].mxu1  ;;  %v9320_v27 = vpop.f32.mrb[89].mxu0  ;;  %v10419_v62 = vadd.f32 %v10418_v42, %v10417_v35  ;;  %v10422_v17 = vsel %vm2035_vm4, %v13970_v55, 0.0  ;;  %v10815_v18 = vsel %vm2035_vm4, %v10601_v40, 0.0 }
 0x565   : > { %v13972_v54 = vadd.f32 %v13844_v36, %v13324_v20  ;;  %v6488_v21 = vpop.f32.mrb[89].mxu1  ;;  %v13845_v34 = vpop.f32.mrb[90].mxu0  ;;  %v10810_v56 = vadd.f32 %v10809_v6, %v10808_v50  ;;  %10205 = vst.msk [vmem:[%s15281_s24 + $0x154] sm:$0xf] %vm10119_vm9, %v12084_v12  ;;  %v10811_v44 = vsel %vm2035_vm4, %v10599_v48, 0.0 }
 0x566   : > { %v13973_v15 = vadd.f32 %v9320_v27, %v6488_v21  ;;  %v13325_v23 = vpop.f32.mrb[90].mxu1  ;;  %v9323_v25 = vpop.f32.mrb[91].mxu0  ;;  %v10421_v47 = vadd.f32 %v10420_v39, %v10419_v62 }
 0x567   : > { %v12089_v45 = vpack.c.bf16 %v13972_v54, %v13972_v54  ;;  %v6491_v3 = vpop.f32.mrb[91].mxu1  ;;  %v10812_v57 = vadd.f32 %v10811_v44, %v10810_v56  ;;  %v13974_v11 = vadd.f32 %v13845_v34, %v13325_v23  ;;  %v10604_v22 = vmul.f32 %v13972_v54, %v13972_v54 }
 0x568   : > { %v12087_v0 = vpack.c.bf16 %v13973_v15, %v13973_v15  ;;  %v10424_v37 = vsel %vm2035_vm4, %v13973_v15, 0.0  ;;  %v10423_v58 = vadd.f32 %v10422_v17, %v10421_v47  ;;  %v10602_v1 = vmul.f32 %v13973_v15, %v13973_v15 }
 0x569   : > { %10210 = vst.msk [vmem:[%s15281_s24 + $0x168] sm:$0xf] %vm10119_vm9, %v12089_v45  ;;  %v13975_v46 = vadd.f32 %v9323_v25, %v6491_v3  ;;  %v10814_v24 = vadd.f32 %v10813_v26, %v10812_v57  ;;  %v12090_v28 = vpack.c.bf16 %v13974_v11, %v13974_v11  ;;  %v10428_v5 = vsel %vm2035_vm4, %v13972_v54, 0.0 }
 0x56a   : > { %10208 = vst.msk [vmem:[%s15281_s24 + $0x160] sm:$0xf] %vm10119_vm9, %v12087_v0  ;;  %v10425_v63 = vadd.f32 %v10424_v37, %v10423_v58  ;;  %v10817_v32 = vsel %vm2035_vm4, %v10602_v1, 0.0  ;;  %v10821_v49 = vsel %vm2035_vm4, %v10604_v22, 0.0  ;;  %v10605_v29 = vmul.f32 %v13974_v11, %v13974_v11 }
 0x56b   : > { %v13848_v38 = vpop.f32.mrb[92].mxu0  ;;  %v10816_v10 = vadd.f32 %v10815_v18, %v10814_v24  ;;  %v12088_v31 = vpack.c.bf16 %v13975_v46, %v13975_v46  ;;  %v10426_v9 = vsel %vm2035_vm4, %v13975_v46, 0.0  ;;  %10211 = vst.msk [vmem:[%s15281_s24 + $0x16c] sm:$0xf] %vm10119_vm9, %v12090_v28  ;;  %v10603_v2 = vmul.f32 %v13975_v46, %v13975_v46 }
 0x56c   : > { %v13328_v19 = vpop.f32.mrb[92].mxu1  ;;  %v9336_v33 = vpop.f32.mrb[93].mxu0  ;;  %v10427_v60 = vadd.f32 %v10426_v9, %v10425_v63  ;;  %v10430_v8 = vsel %vm2035_vm4, %v13974_v11, 0.0  ;;  %v10823_v20 = vsel %vm2035_vm4, %v10605_v29, 0.0 }
 0x56d   : > { %v13976_v43 = vadd.f32 %v13848_v38, %v13328_v19  ;;  %v6504_v4 = vpop.f32.mrb[93].mxu1  ;;  %v13849_v51 = vpop.f32.mrb[94].mxu0  ;;  %v10818_v59 = vadd.f32 %v10817_v32, %v10816_v10  ;;  %10209 = vst.msk [vmem:[%s15281_s24 + $0x164] sm:$0xf] %vm10119_vm9, %v12088_v31  ;;  %v10819_v61 = vsel %vm2035_vm4, %v10603_v2, 0.0 }
 0x56e   : > { %v13977_v30 = vadd.f32 %v9336_v33, %v6504_v4  ;;  %v13329_v13 = vpop.f32.mrb[94].mxu1  ;;  %v9339_v41 = vpop.f32.mrb[95].mxu0  ;;  %v10429_v14 = vadd.f32 %v10428_v5, %v10427_v60 }
 0x56f   : > { %v12093_v55 = vpack.c.bf16 %v13976_v43, %v13976_v43  ;;  %v6507_v16 = vpop.f32.mrb[95].mxu1  ;;  %v10820_v53 = vadd.f32 %v10819_v61, %v10818_v59  ;;  %v13978_v36 = vadd.f32 %v13849_v51, %v13329_v13  ;;  %v10608_v42 = vmul.f32 %v13976_v43, %v13976_v43 }
 0x570   : > { %v12091_v7 = vpack.c.bf16 %v13977_v30, %v13977_v30  ;;  %v10432_v35 = vsel %vm2035_vm4, %v13977_v30, 0.0  ;;  %v10431_v6 = vadd.f32 %v10430_v8, %v10429_v14  ;;  %v10606_v52 = vmul.f32 %v13977_v30, %v13977_v30 }
 0x571   : > { %10214 = vst.msk [vmem:[%s15281_s24 + $0x178] sm:$0xf] %vm10119_vm9, %v12093_v55  ;;  %v13979_v50 = vadd.f32 %v9339_v41, %v6507_v16  ;;  %v10822_v12 = vadd.f32 %v10821_v49, %v10820_v53  ;;  %v12094_v48 = vpack.c.bf16 %v13978_v36, %v13978_v36  ;;  %v10436_v44 = vsel %vm2035_vm4, %v13976_v43, 0.0 }
 0x572   : > { %10212 = vst.msk [vmem:[%s15281_s24 + $0x170] sm:$0xf] %vm10119_vm9, %v12091_v7  ;;  %v10433_v27 = vadd.f32 %v10432_v35, %v10431_v6  ;;  %v10825_v62 = vsel %vm2035_vm4, %v10606_v52, 0.0  ;;  %v10829_v45 = vsel %vm2035_vm4, %v10608_v42, 0.0  ;;  %v10609_v37 = vmul.f32 %v13978_v36, %v13978_v36 }
 0x573   : > { %v13852_v54 = vpop.f32.mrb[96].mxu0  ;;  %v10824_v21 = vadd.f32 %v10823_v20, %v10822_v12  ;;  %v12092_v34 = vpack.c.bf16 %v13979_v50, %v13979_v50  ;;  %v10434_v39 = vsel %vm2035_vm4, %v13979_v50, 0.0  ;;  %10215 = vst.msk [vmem:[%s15281_s24 + $0x17c] sm:$0xf] %vm10119_vm9, %v12094_v48  ;;  %v10607_v23 = vmul.f32 %v13979_v50, %v13979_v50 }
 0x574   : > { %v13332_v26 = vpop.f32.mrb[96].mxu1  ;;  %v9352_v56 = vpop.f32.mrb[97].mxu0  ;;  %v10435_v15 = vadd.f32 %v10434_v39, %v10433_v27  ;;  %v10438_v24 = vsel %vm2035_vm4, %v13978_v36, 0.0  ;;  %v10831_v19 = vsel %vm2035_vm4, %v10609_v37, 0.0 }
 0x575   : > { %v13980_v25 = vadd.f32 %v13852_v54, %v13332_v26  ;;  %v6520_v40 = vpop.f32.mrb[97].mxu1  ;;  %v13853_v47 = vpop.f32.mrb[98].mxu0  ;;  %v10826_v3 = vadd.f32 %v10825_v62, %v10824_v21  ;;  %10213 = vst.msk [vmem:[%s15281_s24 + $0x174] sm:$0xf] %vm10119_vm9, %v12092_v34  ;;  %v10827_v1 = vsel %vm2035_vm4, %v10607_v23, 0.0 }
 0x576   : > { %v13981_v17 = vadd.f32 %v9352_v56, %v6520_v40  ;;  %v13333_v57 = vpop.f32.mrb[98].mxu1  ;;  %v9355_v0 = vpop.f32.mrb[99].mxu0  ;;  %v10437_v58 = vadd.f32 %v10436_v44, %v10435_v15 }
 0x577   : > { %v12097_v11 = vpack.c.bf16 %v13980_v25, %v13980_v25  ;;  %v6523_v46 = vpop.f32.mrb[99].mxu1  ;;  %v10828_v22 = vadd.f32 %v10827_v1, %v10826_v3  ;;  %v13982_v38 = vadd.f32 %v13853_v47, %v13333_v57  ;;  %v10612_v9 = vmul.f32 %v13980_v25, %v13980_v25 }
 0x578   : > { %v12095_v18 = vpack.c.bf16 %v13981_v17, %v13981_v17  ;;  %v10440_v63 = vsel %vm2035_vm4, %v13981_v17, 0.0  ;;  %v10439_v32 = vadd.f32 %v10438_v24, %v10437_v58  ;;  %v10610_v28 = vmul.f32 %v13981_v17, %v13981_v17 }
 0x579   : > { %10218 = vst.msk [vmem:[%s15281_s24 + $0x188] sm:$0xf] %vm10119_vm9, %v12097_v11  ;;  %v13983_v10 = vadd.f32 %v9355_v0, %v6523_v46  ;;  %v10830_v31 = vadd.f32 %v10829_v45, %v10828_v22  ;;  %v12098_v2 = vpack.c.bf16 %v13982_v38, %v13982_v38  ;;  %v10444_v61 = vsel %vm2035_vm4, %v13980_v25, 0.0 }
 0x57a   : > { %10216 = vst.msk [vmem:[%s15281_s24 + $0x180] sm:$0xf] %vm10119_vm9, %v12095_v18  ;;  %v10441_v33 = vadd.f32 %v10440_v63, %v10439_v32  ;;  %v10833_v60 = vsel %vm2035_vm4, %v10610_v28, 0.0  ;;  %v10837_v55 = vsel %vm2035_vm4, %v10612_v9, 0.0  ;;  %v10613_v35 = vmul.f32 %v13982_v38, %v13982_v38 }
 0x57b   : > { %v13856_v43 = vpop.f32.mrb[100].mxu0  ;;  %v10832_v4 = vadd.f32 %v10831_v19, %v10830_v31  ;;  %v12096_v51 = vpack.c.bf16 %v13983_v10, %v13983_v10  ;;  %v10442_v5 = vsel %vm2035_vm4, %v13983_v10, 0.0  ;;  %10219 = vst.msk [vmem:[%s15281_s24 + $0x18c] sm:$0xf] %vm10119_vm9, %v12098_v2  ;;  %v10611_v13 = vmul.f32 %v13983_v10, %v13983_v10 }
 0x57c   : > { %v13336_v49 = vpop.f32.mrb[100].mxu1  ;;  %v9368_v59 = vpop.f32.mrb[101].mxu0  ;;  %v10443_v30 = vadd.f32 %v10442_v5, %v10441_v33  ;;  %v10446_v12 = vsel %vm2035_vm4, %v13982_v38, 0.0  ;;  %v10839_v26 = vsel %vm2035_vm4, %v10613_v35, 0.0 }
 0x57d   : > { %v13984_v41 = vadd.f32 %v13856_v43, %v13336_v49  ;;  %v6536_v29 = vpop.f32.mrb[101].mxu1  ;;  %v13857_v14 = vpop.f32.mrb[102].mxu0  ;;  %v10834_v16 = vadd.f32 %v10833_v60, %v10832_v4  ;;  %10217 = vst.msk [vmem:[%s15281_s24 + $0x184] sm:$0xf] %vm10119_vm9, %v12096_v51  ;;  %v10835_v52 = vsel %vm2035_vm4, %v10611_v13, 0.0 }
 0x57e   : > { %v13985_v8 = vadd.f32 %v9368_v59, %v6536_v29  ;;  %v13337_v53 = vpop.f32.mrb[102].mxu1  ;;  %v9371_v7 = vpop.f32.mrb[103].mxu0  ;;  %v10445_v6 = vadd.f32 %v10444_v61, %v10443_v30 }
 0x57f   : > { %v12101_v36 = vpack.c.bf16 %v13984_v41, %v13984_v41  ;;  %v6539_v50 = vpop.f32.mrb[103].mxu1  ;;  %v10836_v42 = vadd.f32 %v10835_v52, %v10834_v16  ;;  %v13986_v54 = vadd.f32 %v13857_v14, %v13337_v53  ;;  %v10616_v39 = vmul.f32 %v13984_v41, %v13984_v41 }
 0x580   : > { %v12099_v20 = vpack.c.bf16 %v13985_v8, %v13985_v8  ;;  %v10448_v27 = vsel %vm2035_vm4, %v13985_v8, 0.0  ;;  %v10447_v62 = vadd.f32 %v10446_v12, %v10445_v6  ;;  %v10614_v48 = vmul.f32 %v13985_v8, %v13985_v8 }
 0x581   : > { %10222 = vst.msk [vmem:[%s15281_s24 + $0x198] sm:$0xf] %vm10119_vm9, %v12101_v36  ;;  %v13987_v21 = vadd.f32 %v9371_v7, %v6539_v50  ;;  %v10838_v34 = vadd.f32 %v10837_v55, %v10836_v42  ;;  %v12102_v23 = vpack.c.bf16 %v13986_v54, %v13986_v54  ;;  %v10452_v1 = vsel %vm2035_vm4, %v13984_v41, 0.0 }
 0x582   : > { %10220 = vst.msk [vmem:[%s15281_s24 + $0x190] sm:$0xf] %vm10119_vm9, %v12099_v20  ;;  %v10449_v56 = vadd.f32 %v10448_v27, %v10447_v62  ;;  %v10841_v15 = vsel %vm2035_vm4, %v10614_v48, 0.0  ;;  %v10845_v11 = vsel %vm2035_vm4, %v10616_v39, 0.0  ;;  %v10617_v63 = vmul.f32 %v13986_v54, %v13986_v54 }
 0x583   : > { %v13860_v25 = vpop.f32.mrb[104].mxu0  ;;  %v10840_v40 = vadd.f32 %v10839_v26, %v10838_v34  ;;  %v12100_v47 = vpack.c.bf16 %v13987_v21, %v13987_v21  ;;  %v10450_v44 = vsel %vm2035_vm4, %v13987_v21, 0.0  ;;  %10223 = vst.msk [vmem:[%s15281_s24 + $0x19c] sm:$0xf] %vm10119_vm9, %v12102_v23  ;;  %v10615_v57 = vmul.f32 %v13987_v21, %v13987_v21 }
 0x584   : > { %v13340_v45 = vpop.f32.mrb[104].mxu1  ;;  %v9384_v3 = vpop.f32.mrb[105].mxu0  ;;  %v10451_v17 = vadd.f32 %v10450_v44, %v10449_v56  ;;  %v10454_v31 = vsel %vm2035_vm4, %v13986_v54, 0.0  ;;  %v10847_v49 = vsel %vm2035_vm4, %v10617_v63, 0.0 }
 0x585   : > { %v13988_v0 = vadd.f32 %v13860_v25, %v13340_v45  ;;  %v6552_v37 = vpop.f32.mrb[105].mxu1  ;;  %v13861_v58 = vpop.f32.mrb[106].mxu0  ;;  %v10842_v46 = vadd.f32 %v10841_v15, %v10840_v40  ;;  %10221 = vst.msk [vmem:[%s15281_s24 + $0x194] sm:$0xf] %vm10119_vm9, %v12100_v47  ;;  %v10843_v28 = vsel %vm2035_vm4, %v10615_v57, 0.0 }
 0x586   : > { %v13989_v24 = vadd.f32 %v9384_v3, %v6552_v37  ;;  %v13341_v22 = vpop.f32.mrb[106].mxu1  ;;  %v9387_v18 = vpop.f32.mrb[107].mxu0  ;;  %v10453_v32 = vadd.f32 %v10452_v1, %v10451_v17 }
 0x587   : > { %v12105_v38 = vpack.c.bf16 %v13988_v0, %v13988_v0  ;;  %v6555_v10 = vpop.f32.mrb[107].mxu1  ;;  %v10844_v9 = vadd.f32 %v10843_v28, %v10842_v46  ;;  %v13990_v43 = vadd.f32 %v13861_v58, %v13341_v22  ;;  %v10620_v5 = vmul.f32 %v13988_v0, %v13988_v0 }
 0x588   : > { %v12103_v19 = vpack.c.bf16 %v13989_v24, %v13989_v24  ;;  %v10456_v33 = vsel %vm2035_vm4, %v13989_v24, 0.0  ;;  %v10455_v60 = vadd.f32 %v10454_v31, %v10453_v32  ;;  %v10618_v2 = vmul.f32 %v13989_v24, %v13989_v24 }
 0x589   : > { %10226 = vst.msk [vmem:[%s15281_s24 + $0x1a8] sm:$0xf] %vm10119_vm9, %v12105_v38  ;;  %v13991_v4 = vadd.f32 %v9387_v18, %v6555_v10  ;;  %v10846_v51 = vadd.f32 %v10845_v11, %v10844_v9  ;;  %v12106_v13 = vpack.c.bf16 %v13990_v43, %v13990_v43  ;;  %v10460_v52 = vsel %vm2035_vm4, %v13988_v0, 0.0 }
 0x58a   : > { %10224 = vst.msk [vmem:[%s15281_s24 + $0x1a0] sm:$0xf] %vm10119_vm9, %v12103_v19  ;;  %v10457_v59 = vadd.f32 %v10456_v33, %v10455_v60  ;;  %v10849_v30 = vsel %vm2035_vm4, %v10618_v2, 0.0  ;;  %v10853_v36 = vsel %vm2035_vm4, %v10620_v5, 0.0  ;;  %v10621_v27 = vmul.f32 %v13990_v43, %v13990_v43 }
 0x58b   : > { %v13864_v41 = vpop.f32.mrb[108].mxu0  ;;  %v10848_v29 = vadd.f32 %v10847_v49, %v10846_v51  ;;  %v12104_v14 = vpack.c.bf16 %v13991_v4, %v13991_v4  ;;  %v10458_v61 = vsel %vm2035_vm4, %v13991_v4, 0.0  ;;  %10227 = vst.msk [vmem:[%s15281_s24 + $0x1ac] sm:$0xf] %vm10119_vm9, %v12106_v13  ;;  %v10619_v53 = vmul.f32 %v13991_v4, %v13991_v4 }
 0x58c   : > { %v13344_v55 = vpop.f32.mrb[108].mxu1  ;;  %v9400_v16 = vpop.f32.mrb[109].mxu0  ;;  %v10459_v8 = vadd.f32 %v10458_v61, %v10457_v59  ;;  %v10462_v34 = vsel %vm2035_vm4, %v13990_v43, 0.0  ;;  %v10855_v45 = vsel %vm2035_vm4, %v10621_v27, 0.0 }
 0x58d   : > { %v13992_v7 = vadd.f32 %v13864_v41, %v13344_v55  ;;  %v6568_v35 = vpop.f32.mrb[109].mxu1  ;;  %v13865_v6 = vpop.f32.mrb[110].mxu0  ;;  %v10850_v50 = vadd.f32 %v10849_v30, %v10848_v29  ;;  %10225 = vst.msk [vmem:[%s15281_s24 + $0x1a4] sm:$0xf] %vm10119_vm9, %v12104_v14  ;;  %v10851_v48 = vsel %vm2035_vm4, %v10619_v53, 0.0 }
 0x58e   : > { %v13993_v12 = vadd.f32 %v9400_v16, %v6568_v35  ;;  %v13345_v42 = vpop.f32.mrb[110].mxu1  ;;  %v9403_v20 = vpop.f32.mrb[111].mxu0  ;;  %v10461_v62 = vadd.f32 %v10460_v52, %v10459_v8 }
 0x58f   : > { %v12109_v54 = vpack.c.bf16 %v13992_v7, %v13992_v7  ;;  %v6571_v21 = vpop.f32.mrb[111].mxu1  ;;  %v10852_v39 = vadd.f32 %v10851_v48, %v10850_v50  ;;  %v13994_v25 = vadd.f32 %v13865_v6, %v13345_v42  ;;  %v10624_v44 = vmul.f32 %v13992_v7, %v13992_v7 }
 0x590   : > { %v12107_v26 = vpack.c.bf16 %v13993_v12, %v13993_v12  ;;  %v10464_v56 = vsel %vm2035_vm4, %v13993_v12, 0.0  ;;  %v10463_v15 = vadd.f32 %v10462_v34, %v10461_v62  ;;  %v10622_v23 = vmul.f32 %v13993_v12, %v13993_v12 }
 0x591   : > { %10230 = vst.msk [vmem:[%s15281_s24 + $0x1b8] sm:$0xf] %vm10119_vm9, %v12109_v54  ;;  %v13995_v40 = vadd.f32 %v9403_v20, %v6571_v21  ;;  %v10854_v47 = vadd.f32 %v10853_v36, %v10852_v39  ;;  %v12110_v57 = vpack.c.bf16 %v13994_v25, %v13994_v25  ;;  %v10468_v28 = vsel %vm2035_vm4, %v13992_v7, 0.0 }
 0x592   : > { %10228 = vst.msk [vmem:[%s15281_s24 + $0x1b0] sm:$0xf] %vm10119_vm9, %v12107_v26  ;;  %v10465_v3 = vadd.f32 %v10464_v56, %v10463_v15  ;;  %v10857_v17 = vsel %vm2035_vm4, %v10622_v23, 0.0  ;;  %v10861_v38 = vsel %vm2035_vm4, %v10624_v44, 0.0  ;;  %v10625_v33 = vmul.f32 %v13994_v25, %v13994_v25 }
 0x593   : > { %v13868_v0 = vpop.f32.mrb[112].mxu0  ;;  %v10856_v37 = vadd.f32 %v10855_v45, %v10854_v47  ;;  %v12108_v58 = vpack.c.bf16 %v13995_v40, %v13995_v40  ;;  %v10466_v1 = vsel %vm2035_vm4, %v13995_v40, 0.0  ;;  %10231 = vst.msk [vmem:[%s15281_s24 + $0x1bc] sm:$0xf] %vm10119_vm9, %v12110_v57  ;;  %v10623_v22 = vmul.f32 %v13995_v40, %v13995_v40 }
 0x594   : > { %v13348_v11 = vpop.f32.mrb[112].mxu1  ;;  %v9416_v46 = vpop.f32.mrb[113].mxu0  ;;  %v10467_v24 = vadd.f32 %v10466_v1, %v10465_v3  ;;  %v10470_v51 = vsel %vm2035_vm4, %v13994_v25, 0.0  ;;  %v10863_v55 = vsel %vm2035_vm4, %v10625_v33, 0.0 }
 0x595   : > { %v13996_v18 = vadd.f32 %v13868_v0, %v13348_v11  ;;  %v6584_v63 = vpop.f32.mrb[113].mxu1  ;;  %v13869_v32 = vpop.f32.mrb[114].mxu0  ;;  %v10858_v10 = vadd.f32 %v10857_v17, %v10856_v37  ;;  %10229 = vst.msk [vmem:[%s15281_s24 + $0x1b4] sm:$0xf] %vm10119_vm9, %v12108_v58  ;;  %v10859_v2 = vsel %vm2035_vm4, %v10623_v22, 0.0 }
 0x596   : > { %v13997_v31 = vadd.f32 %v9416_v46, %v6584_v63  ;;  %v13349_v9 = vpop.f32.mrb[114].mxu1  ;;  %v9419_v19 = vpop.f32.mrb[115].mxu0  ;;  %v10469_v60 = vadd.f32 %v10468_v28, %v10467_v24 }
 0x597   : > { %v12113_v43 = vpack.c.bf16 %v13996_v18, %v13996_v18  ;;  %v6587_v4 = vpop.f32.mrb[115].mxu1  ;;  %v10860_v5 = vadd.f32 %v10859_v2, %v10858_v10  ;;  %v13998_v41 = vadd.f32 %v13869_v32, %v13349_v9  ;;  %v10628_v61 = vmul.f32 %v13996_v18, %v13996_v18 }
 0x598   : > { %v12111_v49 = vpack.c.bf16 %v13997_v31, %v13997_v31  ;;  %v10472_v59 = vsel %vm2035_vm4, %v13997_v31, 0.0  ;;  %v10471_v30 = vadd.f32 %v10470_v51, %v10469_v60  ;;  %v10626_v13 = vmul.f32 %v13997_v31, %v13997_v31 }
 0x599   : > { %10234 = vst.msk [vmem:[%s15281_s24 + $0x1c8] sm:$0xf] %vm10119_vm9, %v12113_v43  ;;  %v13999_v29 = vadd.f32 %v9419_v19, %v6587_v4  ;;  %v10862_v14 = vadd.f32 %v10861_v38, %v10860_v5  ;;  %v12114_v53 = vpack.c.bf16 %v13998_v41, %v13998_v41  ;;  %v10476_v48 = vsel %vm2035_vm4, %v13996_v18, 0.0 }
 0x59a   : > { %10232 = vst.msk [vmem:[%s15281_s24 + $0x1c0] sm:$0xf] %vm10119_vm9, %v12111_v49  ;;  %v10473_v16 = vadd.f32 %v10472_v59, %v10471_v30  ;;  %v10865_v8 = vsel %vm2035_vm4, %v10626_v13, 0.0  ;;  %v10869_v54 = vsel %vm2035_vm4, %v10628_v61, 0.0  ;;  %v10629_v56 = vmul.f32 %v13998_v41, %v13998_v41 }
 0x59b   : > { %v13872_v7 = vpop.f32.mrb[116].mxu0  ;;  %v10864_v35 = vadd.f32 %v10863_v55, %v10862_v14  ;;  %v12112_v6 = vpack.c.bf16 %v13999_v29, %v13999_v29  ;;  %v10474_v52 = vsel %vm2035_vm4, %v13999_v29, 0.0  ;;  %10235 = vst.msk [vmem:[%s15281_s24 + $0x1cc] sm:$0xf] %vm10119_vm9, %v12114_v53  ;;  %v10627_v42 = vmul.f32 %v13999_v29, %v13999_v29 }
 0x59c   : > { %v13352_v36 = vpop.f32.mrb[116].mxu1  ;;  %v9432_v50 = vpop.f32.mrb[117].mxu0  ;;  %v10475_v12 = vadd.f32 %v10474_v52, %v10473_v16  ;;  %v10478_v47 = vsel %vm2035_vm4, %v13998_v41, 0.0  ;;  %v10871_v11 = vsel %vm2035_vm4, %v10629_v56, 0.0 }
 0x59d   : > { %v14000_v20 = vadd.f32 %v13872_v7, %v13352_v36  ;;  %v6600_v27 = vpop.f32.mrb[117].mxu1  ;;  %v13873_v62 = vpop.f32.mrb[118].mxu0  ;;  %v10866_v21 = vadd.f32 %v10865_v8, %v10864_v35  ;;  %10233 = vst.msk [vmem:[%s15281_s24 + $0x1c4] sm:$0xf] %vm10119_vm9, %v12112_v6  ;;  %v10867_v23 = vsel %vm2035_vm4, %v10627_v42, 0.0 }
 0x59e   : > { %v14001_v34 = vadd.f32 %v9432_v50, %v6600_v27  ;;  %v13353_v39 = vpop.f32.mrb[118].mxu1  ;;  %v9435_v26 = vpop.f32.mrb[119].mxu0  ;;  %v10477_v15 = vadd.f32 %v10476_v48, %v10475_v12 }
 0x59f   : > { %v12117_v25 = vpack.c.bf16 %v14000_v20, %v14000_v20  ;;  %v6603_v40 = vpop.f32.mrb[119].mxu1  ;;  %v10868_v44 = vadd.f32 %v10867_v23, %v10866_v21  ;;  %v14002_v0 = vadd.f32 %v13873_v62, %v13353_v39  ;;  %v10632_v1 = vmul.f32 %v14000_v20, %v14000_v20 }
 0x5a0   : > { %v12115_v45 = vpack.c.bf16 %v14001_v34, %v14001_v34  ;;  %v10480_v3 = vsel %vm2035_vm4, %v14001_v34, 0.0  ;;  %v10479_v17 = vadd.f32 %v10478_v47, %v10477_v15  ;;  %v10630_v57 = vmul.f32 %v14001_v34, %v14001_v34 }
 0x5a1   : > { %10238 = vst.msk [vmem:[%s15281_s24 + $0x1d8] sm:$0xf] %vm10119_vm9, %v12117_v25  ;;  %v14003_v37 = vadd.f32 %v9435_v26, %v6603_v40  ;;  %v10870_v58 = vadd.f32 %v10869_v54, %v10868_v44  ;;  %v12118_v22 = vpack.c.bf16 %v14002_v0, %v14002_v0  ;;  %v10484_v2 = vsel %vm2035_vm4, %v14000_v20, 0.0 }
 0x5a2   : > { %10236 = vst.msk [vmem:[%s15281_s24 + $0x1d0] sm:$0xf] %vm10119_vm9, %v12115_v45  ;;  %v10481_v46 = vadd.f32 %v10480_v3, %v10479_v17  ;;  %v10873_v24 = vsel %vm2035_vm4, %v10630_v57, 0.0  ;;  %v10877_v43 = vsel %vm2035_vm4, %v10632_v1, 0.0  ;;  %v10633_v59 = vmul.f32 %v14002_v0, %v14002_v0 }
 0x5a3   : > { %v13876_v18 = vpop.f32.mrb[120].mxu0  ;;  %v10872_v63 = vadd.f32 %v10871_v11, %v10870_v58  ;;  %v12116_v32 = vpack.c.bf16 %v14003_v37, %v14003_v37  ;;  %v10482_v28 = vsel %vm2035_vm4, %v14003_v37, 0.0  ;;  %10239 = vst.msk [vmem:[%s15281_s24 + $0x1dc] sm:$0xf] %vm10119_vm9, %v12118_v22  ;;  %v10631_v9 = vmul.f32 %v14003_v37, %v14003_v37 }
 0x5a4   : > { %v13356_v38 = vpop.f32.mrb[120].mxu1  ;;  %v9448_v10 = vpop.f32.mrb[121].mxu0  ;;  %v10483_v31 = vadd.f32 %v10482_v28, %v10481_v46  ;;  %v10486_v14 = vsel %vm2035_vm4, %v14002_v0, 0.0  ;;  %v10879_v36 = vsel %vm2035_vm4, %v10633_v59, 0.0 }
 0x5a5   : > { %v14004_v19 = vadd.f32 %v13876_v18, %v13356_v38  ;;  %v6616_v33 = vpop.f32.mrb[121].mxu1  ;;  %v13877_v60 = vpop.f32.mrb[122].mxu0  ;;  %v10874_v4 = vadd.f32 %v10873_v24, %v10872_v63  ;;  %10237 = vst.msk [vmem:[%s15281_s24 + $0x1d4] sm:$0xf] %vm10119_vm9, %v12116_v32  ;;  %v10875_v13 = vsel %vm2035_vm4, %v10631_v9, 0.0 }
 0x5a6   : > { %v14005_v51 = vadd.f32 %v9448_v10, %v6616_v33  ;;  %v13357_v5 = vpop.f32.mrb[122].mxu1  ;;  %v9451_v49 = vpop.f32.mrb[123].mxu0  ;;  %v10485_v30 = vadd.f32 %v10484_v2, %v10483_v31 }
 0x5a7   : > { %v12121_v41 = vpack.c.bf16 %v14004_v19, %v14004_v19  ;;  %v6619_v29 = vpop.f32.mrb[123].mxu1  ;;  %v10876_v61 = vadd.f32 %v10875_v13, %v10874_v4  ;;  %v14006_v7 = vadd.f32 %v13877_v60, %v13357_v5  ;;  %v10636_v52 = vmul.f32 %v14004_v19, %v14004_v19 }
 0x5a8   : > { %v12119_v55 = vpack.c.bf16 %v14005_v51, %v14005_v51  ;;  %v10488_v16 = vsel %vm2035_vm4, %v14005_v51, 0.0  ;;  %v10487_v8 = vadd.f32 %v10486_v14, %v10485_v30  ;;  %v10634_v53 = vmul.f32 %v14005_v51, %v14005_v51 }
 0x5a9   : > { %10242 = vst.msk [vmem:[%s15281_s24 + $0x1e8] sm:$0xf] %vm10119_vm9, %v12121_v41  ;;  %v14007_v35 = vadd.f32 %v9451_v49, %v6619_v29  ;;  %v10878_v6 = vadd.f32 %v10877_v43, %v10876_v61  ;;  %v12122_v42 = vpack.c.bf16 %v14006_v7, %v14006_v7  ;;  %v10492_v23 = vsel %vm2035_vm4, %v14004_v19, 0.0 }
 0x5aa   : > { %10240 = vst.msk [vmem:[%s15281_s24 + $0x1e0] sm:$0xf] %vm10119_vm9, %v12119_v55  ;;  %v10489_v50 = vadd.f32 %v10488_v16, %v10487_v8  ;;  %v10881_v12 = vsel %vm2035_vm4, %v10634_v53, 0.0  ;;  %v10885_v25 = vsel %vm2035_vm4, %v10636_v52, 0.0  ;;  %v10637_v3 = vmul.f32 %v14006_v7, %v14006_v7 }
 0x5ab   : > { %v13880_v20 = vpop.f32.mrb[124].mxu0  ;;  %v10880_v27 = vadd.f32 %v10879_v36, %v10878_v6  ;;  %v12120_v62 = vpack.c.bf16 %v14007_v35, %v14007_v35  ;;  %v10490_v48 = vsel %vm2035_vm4, %v14007_v35, 0.0  ;;  %10243 = vst.msk [vmem:[%s15281_s24 + $0x1ec] sm:$0xf] %vm10119_vm9, %v12122_v42  ;;  %v10635_v39 = vmul.f32 %v14007_v35, %v14007_v35 }
 0x5ac   : > { %v13360_v54 = vpop.f32.mrb[124].mxu1  ;;  %v9464_v21 = vpop.f32.mrb[125].mxu0  ;;  %v10491_v34 = vadd.f32 %v10490_v48, %v10489_v50  ;;  %v10494_v58 = vsel %vm2035_vm4, %v14006_v7, 0.0  ;;  %v10887_v28 = vsel %vm2035_vm4, %v10637_v3, 0.0  ;;  %v10248_v50 = vld [vmem:[%s18991_s3] sm:$0x1] }
 0x5ad   : > { %v14008_v26 = vadd.f32 %v13880_v20, %v13360_v54  ;;  %v6632_v56 = vpop.f32.mrb[125].mxu1  ;;  %v13881_v15 = vpop.f32.mrb[126].mxu0  ;;  %v10882_v40 = vadd.f32 %v10881_v12, %v10880_v27  ;;  %10241 = vst.msk [vmem:[%s15281_s24 + $0x1e4] sm:$0xf] %vm10119_vm9, %v12120_v62  ;;  %v10883_v57 = vsel %vm2035_vm4, %v10635_v39, 0.0 }
 0x5ae   : > { %v14009_v47 = vadd.f32 %v9464_v21, %v6632_v56  ;;  %v13361_v44 = vpop.f32.mrb[126].mxu1  ;;  %v9467_v45 = vpop.f32.mrb[127].mxu0  ;;  %v10493_v17 = vadd.f32 %v10492_v23, %v10491_v34  ;;  %v10513_v62 = vld [vmem:[%s18992_s4] sm:$0x1] }
 0x5af   : > { %v12125_v0 = vpack.c.bf16 %v14008_v26, %v14008_v26  ;;  %v6635_v37 = vpop.f32.mrb[127].mxu1  ;;  %v10884_v1 = vadd.f32 %v10883_v57, %v10882_v40  ;;  %v14010_v18 = vadd.f32 %v13881_v15, %v13361_v44  ;;  %v10640_v60 = vmul.f32 %v14008_v26, %v14008_v26 }
 0x5b0   : > { %v12123_v11 = vpack.c.bf16 %v14009_v47, %v14009_v47  ;;  %v10496_v46 = vsel %vm2035_vm4, %v14009_v47, 0.0  ;;  %v10495_v24 = vadd.f32 %v10494_v58, %v10493_v17  ;;  %v10638_v22 = vmul.f32 %v14009_v47, %v14009_v47 }
 0x5b1   : > { %10246 = vst.msk [vmem:[%s15281_s24 + $0x1f8] sm:$0xf] %vm10119_vm9, %v12125_v0  ;;  %v14011_v63 = vadd.f32 %v9467_v45, %v6635_v37  ;;  %v10886_v32 = vadd.f32 %v10885_v25, %v10884_v1  ;;  %v12126_v31 = vpack.c.bf16 %v14010_v18, %v14010_v18  ;;  %v10500_v4 = vsel %vm2035_vm4, %v14008_v26, 0.0 }
 0x5b2   : > { %10244 = vst.msk [vmem:[%s15281_s24 + $0x1f0] sm:$0xf] %vm10119_vm9, %v12123_v11  ;;  %v10497_v38 = vadd.f32 %v10496_v46, %v10495_v24  ;;  %v10889_v10 = vsel %vm2035_vm4, %v10638_v22, 0.0  ;;  %v10641_v5 = vmul.f32 %v14010_v18, %v14010_v18  ;;  %v10502_v30 = vsel %vm2035_vm4, %v14010_v18, 0.0 }
 0x5b3   : > { %v10888_v9 = vadd.f32 %v10887_v28, %v10886_v32  ;;  %v12124_v19 = vpack.c.bf16 %v14011_v63, %v14011_v63  ;;  %v10498_v33 = vsel %vm2035_vm4, %v14011_v63, 0.0  ;;  %10247 = vst.msk [vmem:[%s15281_s24 + $0x1fc] sm:$0xf] %vm10119_vm9, %v12126_v31  ;;  %v10639_v43 = vmul.f32 %v14011_v63, %v14011_v63 }
 0x5b4   : > { %v10499_v2 = vadd.f32 %v10498_v33, %v10497_v38  ;;  %v10893_v41 = vsel %vm2035_vm4, %v10640_v60, 0.0  ;;  %v10895_v61 = vsel %vm2035_vm4, %v10641_v5, 0.0 }
 0x5b5   : > { %v10890_v51 = vadd.f32 %v10889_v10, %v10888_v9  ;;  %10245 = vst.msk [vmem:[%s15281_s24 + $0x1f4] sm:$0xf] %vm10119_vm9, %v12124_v19  ;;  %v10891_v59 = vsel %vm2035_vm4, %v10639_v43, 0.0 }
 0x5b6   : > { %v10501_v49 = vadd.f32 %v10500_v4, %v10499_v2 }
 0x5b7   : > { %v10892_v13 = vadd.f32 %v10891_v59, %v10890_v51 }
 0x5b8   : > { %v10503_v29 = vadd.f32 %v10502_v30, %v10501_v49 }
 0x5b9   : > { %v10894_v14 = vadd.f32 %v10893_v41, %v10892_v13 }
 0x5ba   : > { %v10504_v55 = vrot.slane %v10503_v29, 4 }
 0x5bb   : > { %v10896_v16 = vadd.f32 %v10895_v61, %v10894_v14 }
 0x5bc   : > { %v10505_v8 = vadd.f32 %v10504_v55, %v10503_v29 }
 0x5bd   : > { %v10897_v53 = vrot.slane %v10896_v16, 4 }
 0x5be   : > { %v10506_v7 = vrot.slane %v10505_v8, 2 }
 0x5bf   : > { %v10898_v35 = vadd.f32 %v10897_v53, %v10896_v16 }
 0x5c0   : > { %v10507_v6 = vadd.f32 %v10506_v7, %v10505_v8 }
 0x5c1   : > { %v10899_v52 = vrot.slane %v10898_v35, 2 }
 0x5c2   : > { %v10508_v36 = vrot.slane %v10507_v6, 1 }
 0x5c3   : > { %v10900_v12 = vadd.f32 %v10899_v52, %v10898_v35 }
 0x5c4   : > { %v10509_v42 = vadd.f32 %v10508_v36, %v10507_v6 }
 0x5c5   : > { %v10901_v20 = vrot.slane %v10900_v12, 1 }
 0x5c6   : > { %v10510_v27 = vadd.f32 %v10509_v42, %v10248_v50 }
 0x5c7   : > { %v10902_v48 = vadd.f32 %v10901_v20, %v10900_v12 }
 0x5c8   : > { %10512 = vst.msk [vmem:[%s18991_s3] sm:$0x1] %vm10511_vm10, %v10510_v27 }
 0x5c9   : > { %v10903_v54 = vadd.f32 %v10902_v48, %v10513_v62 }
 0x5cb   : > { %10904 = vst.msk [vmem:[%s18992_s4] sm:$0x1] %vm10511_vm10, %v10903_v54 }
 0x5cc PF: > { %s15_s17 = sadd.s32 1, %s15232_s17   ;;  %s19885_s15 = smov %s15228_s16 }
 0x5cd   : > { %p12_p6 = scmp.ge.s32.totalorder %s15_s17, 4   ;;  %s19886_s16 = smov %s19888_s18 }
 0x5cf   :  { %14 = sbr.rel (!%p12_p6) target bundleno = 2 (0x2), region = 89 }

</bundles_post_ra>
